<compile_context>
chip_gen: v6e
topology: v6e:2x2x1
jax: 0.10.0
libtpu: 0.0.40
codegen_flags: <defaults>
</compile_context>

<pallas_src>
import functools

import jax
import jax.numpy as jnp
from jax.experimental import pallas as pl
from jax.experimental.pallas import tpu as pltpu


def _round_up(x, m):
    return ((x + m - 1) // m) * m


def _vmem_spec():
    return pl.BlockSpec(memory_space=pltpu.MemorySpace.VMEM)


# ----------------------------- Pallas kernels -----------------------------

def _matmul_bn_kernel(a_ref, b_ref, s_ref, c_ref, o_ref, acc_ref, *, relu):
    # a: (tm, tk) bf16 im2col patches, b: (tk, tn) bf16 weights.
    # K is the innermost ("arbitrary") grid axis; accumulate in f32 scratch.
    k = pl.program_id(2)

    @pl.when(k == 0)
    def _():
        acc_ref[...] = jnp.zeros_like(acc_ref)

    acc_ref[...] += jnp.dot(a_ref[...], b_ref[...],
                            preferred_element_type=jnp.float32)

    @pl.when(k == pl.num_programs(2) - 1)
    def _():
        y = acc_ref[...] * s_ref[...] + c_ref[...]          # folded BN (f32)
        if relu:
            y = jnp.maximum(y, 0.0)
        o_ref[...] = y.astype(o_ref.dtype)


def _matmul_bn_res_kernel(a_ref, b_ref, s_ref, c_ref, r_ref, o_ref, acc_ref,
                          *, relu):
    k = pl.program_id(2)

    @pl.when(k == 0)
    def _():
        acc_ref[...] = jnp.zeros_like(acc_ref)

    acc_ref[...] += jnp.dot(a_ref[...], b_ref[...],
                            preferred_element_type=jnp.float32)

    @pl.when(k == pl.num_programs(2) - 1)
    def _():
        # BN + residual add (residual stored bf16, promoted to f32 here)
        y = (acc_ref[...] * s_ref[...] + c_ref[...]
             + r_ref[...].astype(jnp.float32))
        if relu:
            y = jnp.maximum(y, 0.0)
        o_ref[...] = y.astype(o_ref.dtype)


def _max9_kernel(p_ref, o_ref):
    # p: (9, tm, C) -> elementwise max over the 9 window taps (MaxPool 3x3)
    o_ref[...] = jnp.max(p_ref[...], axis=0)


def _gap_kernel(x_ref, o_ref):
    # x: (N, H*W, C) bf16 -> (N, C) f32  (AdaptiveAvgPool2d(1) + flatten)
    o_ref[...] = jnp.mean(x_ref[...].astype(jnp.float32), axis=1)


# ------------------------------ wrappers -----------------------------------

def matmul_bn(a, b, scale, bias, *, relu, residual=None):
    """a: (M, K), b: (K, O). Returns (M, O) bf16 with fused BN/residual/ReLU."""
    M, K = a.shape
    O = b.shape[1]

    # ---- tile selection (bf16 inputs => 16-sublane granule, 128 lanes) ----
    tm = 512 if M >= 512 else _round_up(M, 16)
    tn = min(256, _round_up(O, 128))
    kp0 = _round_up(K, 128)
    if kp0 <= 1024:
        tk = kp0
    elif kp0 % 512 == 0:
        tk = 512
    else:
        tk = 256

    Mp = _round_up(M, tm)
    Op = _round_up(O, tn)
    Kp = _round_up(K, tk)

    a_p = a.astype(jnp.bfloat16)
    if (Mp, Kp) != (M, K):
        a_p = jnp.pad(a_p, ((0, Mp - M), (0, Kp - K)))
    b_p = b.astype(jnp.bfloat16)
    if (Kp, Op) != (K, O):
        b_p = jnp.pad(b_p, ((0, Kp - K), (0, Op - O)))
    s_p = scale.reshape(1, O).astype(jnp.float32)
    c_p = bias.reshape(1, O).astype(jnp.float32)
    if Op != O:
        s_p = jnp.pad(s_p, ((0, 0), (0, Op - O)))
        c_p = jnp.pad(c_p, ((0, 0), (0, Op - O)))

    in_specs = [
        pl.BlockSpec((tm, tk), lambda i, j, k: (i, k)),
        pl.BlockSpec((tk, tn), lambda i, j, k: (k, j)),
        pl.BlockSpec((1, tn), lambda i, j, k: (0, j)),
        pl.BlockSpec((1, tn), lambda i, j, k: (0, j)),
    ]
    args = [a_p, b_p, s_p, c_p]
    if residual is None:
        kernel = functools.partial(_matmul_bn_kernel, relu=relu)
    else:
        r_p = residual.astype(jnp.bfloat16)
        if (Mp, Op) != (M, O):
            r_p = jnp.pad(r_p, ((0, Mp - M), (0, Op - O)))
        in_specs.append(pl.BlockSpec((tm, tn), lambda i, j, k: (i, j)))
        args.append(r_p)
        kernel = functools.partial(_matmul_bn_res_kernel, relu=relu)

    # VMEM budget: double-buffered input/output tiles + f32 accumulator.
    block_bytes = (tm * tk * 2 + tk * tn * 2 + 2 * tn * 4
                   + tm * tn * 2 * (1 if residual is None else 2)
                   + tm * tn * 4)
    vmem_bytes = int(min(64 * 1024 * 1024,
                         max(16 * 1024 * 1024, 2 * block_bytes + (1 << 20))))

    cost = pl.CostEstimate(
        flops=2 * Mp * Kp * Op,
        transcendentals=0,
        bytes_accessed=(a_p.size * 2 + b_p.size * 2 + Mp * Op * 2
                        + (Mp * Op * 2 if residual is not None else 0)),
    )

    out = pl.pallas_call(
        kernel,
        out_shape=jax.ShapeDtypeStruct((Mp, Op), jnp.bfloat16),
        grid_spec=pltpu.PrefetchScalarGridSpec(
            num_scalar_prefetch=0,
            grid=(Mp // tm, Op // tn, Kp // tk),
            in_specs=in_specs,
            out_specs=pl.BlockSpec((tm, tn), lambda i, j, k: (i, j)),
            scratch_shapes=[pltpu.VMEM((tm, tn), jnp.float32)],
        ),
        compiler_params=pltpu.CompilerParams(
            dimension_semantics=("parallel", "parallel", "arbitrary"),
            vmem_limit_bytes=vmem_bytes,
        ),
        cost_estimate=cost,
    )(*args)
    if (Mp, Op) != (M, O):
        out = out[:M, :O]
    return out


def conv_bn(x, w, scale, bias, *, stride, padding, relu, residual=None):
    """x: (N,H,W,Cin) NHWC ; w: (O,I,kh,kw) PyTorch OIHW. Returns (N,Ho,Wo,O)."""
    N, H, W, C = x.shape
    O, I, kh, kw = w.shape
    # Cast to bf16 before im2col materialization (halves HBM bytes of the
    # inflated patch tensor); all epilogue math stays in f32 inside the kernel.
    xp = jnp.pad(x.astype(jnp.bfloat16),
                 ((0, 0), (padding, padding), (padding, padding), (0, 0)))
    Ho = (H + 2 * padding - kh) // stride + 1
    Wo = (W + 2 * padding - kw) // stride + 1
    # TODO(synk): im2col still materializes kh*kw shifted copies in HBM; a
    # direct-conv kernel (halo DMA / tap grid axis) would remove this blowup.
    pats = [
        xp[:, di:di + stride * (Ho - 1) + 1:stride,
              dj:dj + stride * (Wo - 1) + 1:stride, :]
        for di in range(kh) for dj in range(kw)
    ]
    A = jnp.concatenate(pats, axis=-1).reshape(N * Ho * Wo, kh * kw * C)
    B = jnp.transpose(w, (2, 3, 1, 0)).reshape(kh * kw * I, O)
    res = None if residual is None else residual.reshape(N * Ho * Wo, O)
    out = matmul_bn(A, B, scale, bias, relu=relu, residual=res)
    return out.reshape(N, Ho, Wo, O)


def maxpool3x3s2p1(x):
    # TODO(synk): could be fused into the conv1 epilogue to save one HBM
    # round-trip of the stem activation.
    N, H, W, C = x.shape
    xp = jnp.pad(x, ((0, 0), (1, 1), (1, 1), (0, 0)),
                 constant_values=-jnp.inf)
    Ho = (H + 2 - 3) // 2 + 1
    Wo = (W + 2 - 3) // 2 + 1
    M = N * Ho * Wo
    pats = jnp.stack(
        [xp[:, di:di + 2 * (Ho - 1) + 1:2, dj:dj + 2 * (Wo - 1) + 1:2, :]
         for di in range(3) for dj in range(3)],
        axis=0,
    ).reshape(9, M, C)
    tm = 512 if M > 512 else _round_up(M, 16)
    Mp = _round_up(M, tm)
    if Mp != M:
        pats = jnp.pad(pats, ((0, 0), (0, Mp - M), (0, 0)))
    out = pl.pallas_call(
        _max9_kernel,
        out_shape=jax.ShapeDtypeStruct((Mp, C), x.dtype),
        grid_spec=pltpu.PrefetchScalarGridSpec(
            num_scalar_prefetch=0,
            grid=(Mp // tm,),
            in_specs=[pl.BlockSpec((9, tm, C), lambda i: (0, i, 0))],
            out_specs=pl.BlockSpec((tm, C), lambda i: (i, 0)),
        ),
        compiler_params=pltpu.CompilerParams(
            dimension_semantics=("parallel",),
        ),
    )(pats)
    return out[:M].reshape(N, Ho, Wo, C)


def global_avg_pool(x):
    N, H, W, C = x.shape
    return pl.pallas_call(
        _gap_kernel,
        out_shape=jax.ShapeDtypeStruct((N, C), jnp.float32),
        in_specs=[_vmem_spec()],
        out_specs=_vmem_spec(),
    )(x.reshape(N, H * W, C))


# ------------------------------ parameters ---------------------------------

def kaiming_conv(key, o, i, kh, kw):
    # nn.init.kaiming_normal_(mode='fan_out', nonlinearity='relu')
    fan_out = o * kh * kw
    std = (2.0 / fan_out) ** 0.5
    return jax.random.normal(key, (o, i, kh, kw), jnp.float32) * std


def bn_params(c, eps=1e-5):
    # eval-mode BN folded into scale/bias: gamma=1, beta=0, mean=0, var=1
    gamma = jnp.ones((c,), jnp.float32)
    beta = jnp.zeros((c,), jnp.float32)
    mean = jnp.zeros((c,), jnp.float32)
    var = jnp.ones((c,), jnp.float32)
    scale = gamma / jnp.sqrt(var + eps)
    bias = beta - mean * scale
    return scale, bias


def init_params(key, layers=(2, 2, 2, 2)):
    keys = iter(jax.random.split(key, 64))
    params = {
        "conv1": kaiming_conv(next(keys), 64, 3, 7, 7),
        "bn1": bn_params(64),
        "layers": [],
    }
    inplanes = 64
    cfg = [(64, layers[0], 1), (128, layers[1], 2),
           (256, layers[2], 2), (512, layers[3], 2)]
    for planes, blocks, stride in cfg:
        layer = []
        for b in range(blocks):
            s = stride if b == 0 else 1
            blk = {
                "conv1": kaiming_conv(next(keys), planes, inplanes, 3, 3),
                "bn1": bn_params(planes),
                "conv2": kaiming_conv(next(keys), planes, planes, 3, 3),
                "bn2": bn_params(planes),
                "stride": s,
            }
            if s != 1 or inplanes != planes:  # BasicBlock downsample
                blk["down_conv"] = kaiming_conv(next(keys), planes, inplanes, 1, 1)
                blk["down_bn"] = bn_params(planes)
            layer.append(blk)
            inplanes = planes
        params["layers"].append(layer)
    return params


# ------------------------------ forward ------------------------------------

def basic_block(x, p):
    # TODO(synk): conv1+conv2(+downsample) could be fused into one pallas_call
    # (emit_pipeline) to avoid HBM round-trips of small late-layer activations.
    identity = x
    s = p["stride"]
    out = conv_bn(x, p["conv1"], *p["bn1"], stride=s, padding=1, relu=True)
    if "down_conv" in p:
        identity = conv_bn(x, p["down_conv"], *p["down_bn"],
                           stride=s, padding=0, relu=False)
    # conv2 + bn2 + residual add + relu, fused in one Pallas kernel epilogue
    out = conv_bn(out, p["conv2"], *p["bn2"], stride=1, padding=1,
                  relu=True, residual=identity)
    return out


def uresnet_forward(params, x_nchw):
    x = jnp.transpose(x_nchw, (0, 2, 3, 1))  # NCHW -> NHWC
    # conv1 + pertubration0(Identity) + bn1 + relu
    x = conv_bn(x, params["conv1"], *params["bn1"],
                stride=2, padding=3, relu=True)
    x = maxpool3x3s2p1(x)
    # pertubration1..5 are Identity; layer1..layer4
    for layer in params["layers"]:
        for blk in layer:
            x = basic_block(x, blk)
    v = global_avg_pool(x)  # AdaptiveAvgPool2d(1) + flatten
    return v                # fc is Identity


if __name__ == "__main__":
    key = jax.random.PRNGKey(0)
    pkey, xkey = jax.random.split(key)
    params = init_params(pkey)
    x = jax.random.normal(xkey, (2, 3, 16, 16), jnp.float32)  # NCHW input
    fwd = jax.jit(functools.partial(uresnet_forward, params))
    out = jax.block_until_ready(fwd(x))
    assert out.shape == (2, 512), out.shape
    assert bool(jnp.all(jnp.isfinite(out)))
    print("KERNEL_OK")
</pallas_src>

<mosaic_0001>
module attributes {stable_mosaic.version = 11 : i64} {
  func.func @_matmul_bn_kernel(%arg0: i32, %arg1: i32, %arg2: i32, %arg3: memref<128x256xbf16, #tpu.memory_space<vmem>>, %arg4: memref<256x128xbf16, #tpu.memory_space<vmem>>, %arg5: memref<1x128xf32, #tpu.memory_space<vmem>>, %arg6: memref<1x128xf32, #tpu.memory_space<vmem>>, %arg7: memref<128x128xbf16, #tpu.memory_space<vmem>>, %arg8: memref<128x128xf32, #tpu.memory_space<vmem>>) attributes {dimension_semantics = [#tpu.dimension_semantics<parallel>, #tpu.dimension_semantics<parallel>, #tpu.dimension_semantics<arbitrary>], iteration_bounds = array<i64: 1, 1, 1>, scalar_prefetch = 0 : i64, scratch_operands = 1 : i64, tpu.core_type = #tpu.core_type<tc>, window_params = [{transform_indices = @transform_0, window_bounds = array<i64: 128, 256>}, {transform_indices = @transform_1, window_bounds = array<i64: 256, 128>}, {transform_indices = @transform_2, window_bounds = array<i64: 1, 128>}, {transform_indices = @transform_3, window_bounds = array<i64: 1, 128>}, {transform_indices = @transform_4, window_bounds = array<i64: 128, 128>}]} {
    %c0_i32 = arith.constant 0 : i32
    %0 = arith.cmpi eq, %arg2, %c0_i32 : i32
    %1 = arith.extui %0 : i1 to i32
    %c0_i32_0 = arith.constant 0 : i32
    %2 = arith.cmpi ne, %1, %c0_i32_0 : i32
    scf.if %2 {
      %cst_10 = arith.constant 0.000000e+00 : f32
      %12 = vector.broadcast %cst_10 : f32 to vector<128x128xf32>
      %c0_11 = arith.constant 0 : index
      %c0_12 = arith.constant 0 : index
      %13 = vector.load %arg8[%c0_11, %c0_12] : memref<128x128xf32, #tpu.memory_space<vmem>>, vector<128x128xf32>
      tpu.vector_store %arg8[%c0_11, %c0_12], %12 {strides = array<i32>} : memref<128x128xf32, #tpu.memory_space<vmem>>, vector<128x128xf32>,
    } else {
    }
    %c0 = arith.constant 0 : index
    %c0_1 = arith.constant 0 : index
    %3 = vector.load %arg8[%c0, %c0_1] : memref<128x128xf32, #tpu.memory_space<vmem>>, vector<128x128xf32>
    %c0_2 = arith.constant 0 : index
    %c0_3 = arith.constant 0 : index
    %4 = vector.load %arg3[%c0_2, %c0_3] : memref<128x256xbf16, #tpu.memory_space<vmem>>, vector<128x256xbf16>
    %c0_4 = arith.constant 0 : index
    %c0_5 = arith.constant 0 : index
    %5 = vector.load %arg4[%c0_4, %c0_5] : memref<256x128xbf16, #tpu.memory_space<vmem>>, vector<256x128xbf16>
    %cst = arith.constant dense<0.000000e+00> : vector<128x128xf32>
    %6 = tpu.matmul %4, %5, %cst {dimension_numbers = #tpu.dot_dimension_numbers<[1], [0], [0], [1], [0, 0, 1, 1], [], []>} : vector<128x256xbf16>, vector<256x128xbf16>, vector<128x128xf32> -> vector<128x128xf32>
    %7 = arith.addf %3, %6 : vector<128x128xf32>
    %c0_6 = arith.constant 0 : index
    %c0_7 = arith.constant 0 : index
    %8 = vector.load %arg8[%c0_6, %c0_7] : memref<128x128xf32, #tpu.memory_space<vmem>>, vector<128x128xf32>
    tpu.vector_store %arg8[%c0_6, %c0_7], %7 {strides = array<i32>} : memref<128x128xf32, #tpu.memory_space<vmem>>, vector<128x128xf32>,
    %c0_i32_8 = arith.constant 0 : i32
    %9 = arith.cmpi eq, %arg2, %c0_i32_8 : i32
    %10 = arith.extui %9 : i1 to i32
    %c0_i32_9 = arith.constant 0 : i32
    %11 = arith.cmpi ne, %10, %c0_i32_9 : i32
    scf.if %11 {
      %c0_10 = arith.constant 0 : index
      %c0_11 = arith.constant 0 : index
      %12 = vector.load %arg8[%c0_10, %c0_11] : memref<128x128xf32, #tpu.memory_space<vmem>>, vector<128x128xf32>
      %c0_12 = arith.constant 0 : index
      %c0_13 = arith.constant 0 : index
      %13 = vector.load %arg5[%c0_12, %c0_13] : memref<1x128xf32, #tpu.memory_space<vmem>>, vector<1x128xf32>
      %14 = vector.broadcast %13 : vector<1x128xf32> to vector<128x128xf32>
      %15 = arith.mulf %12, %14 : vector<128x128xf32>
      %c0_14 = arith.constant 0 : index
      %c0_15 = arith.constant 0 : index
      %16 = vector.load %arg6[%c0_14, %c0_15] : memref<1x128xf32, #tpu.memory_space<vmem>>, vector<1x128xf32>
      %17 = vector.broadcast %16 : vector<1x128xf32> to vector<128x128xf32>
      %18 = arith.addf %15, %17 : vector<128x128xf32>
      %cst_16 = arith.constant 0.000000e+00 : f32
      %19 = vector.broadcast %cst_16 : f32 to vector<128x128xf32>
      %20 = arith.maximumf %18, %19 : vector<128x128xf32>
      %21 = arith.truncf %20 : vector<128x128xf32> to vector<128x128xbf16>
      %c0_17 = arith.constant 0 : index
      %c0_18 = arith.constant 0 : index
      %22 = vector.load %arg7[%c0_17, %c0_18] : memref<128x128xbf16, #tpu.memory_space<vmem>>, vector<128x128xbf16>
      tpu.vector_store %arg7[%c0_17, %c0_18], %21 {strides = array<i32>} : memref<128x128xbf16, #tpu.memory_space<vmem>>, vector<128x128xbf16>,
    } else {
    }
    return
  }
  func.func @transform_0(%arg0: i32, %arg1: i32, %arg2: i32) -> (i32, i32) {
    %c0_i32 = arith.constant 0 : i32
    return %arg0, %arg2 : i32, i32
  }
  func.func @transform_1(%arg0: i32, %arg1: i32, %arg2: i32) -> (i32, i32) {
    %c0_i32 = arith.constant 0 : i32
    return %arg2, %arg1 : i32, i32
  }
  func.func @transform_2(%arg0: i32, %arg1: i32, %arg2: i32) -> (i32, i32) {
    %c0_i32 = arith.constant 0 : i32
    %c0_i32_0 = arith.constant 0 : i32
    return %c0_i32, %arg1 : i32, i32
  }
  func.func @transform_3(%arg0: i32, %arg1: i32, %arg2: i32) -> (i32, i32) {
    %c0_i32 = arith.constant 0 : i32
    %c0_i32_0 = arith.constant 0 : i32
    return %c0_i32, %arg1 : i32, i32
  }
  func.func @transform_4(%arg0: i32, %arg1: i32, %arg2: i32) -> (i32, i32) {
    %c0_i32 = arith.constant 0 : i32
    return %arg0, %arg1 : i32, i32
  }
}

module attributes {stable_mosaic.version = 11 : i64} {
  func.func @_max9_kernel(%arg0: i32, %arg1: memref<9x32x64xbf16, #tpu.memory_space<vmem>>, %arg2: memref<32x64xbf16, #tpu.memory_space<vmem>>) attributes {dimension_semantics = [#tpu.dimension_semantics<parallel>], iteration_bounds = array<i64: 1>, scalar_prefetch = 0 : i64, scratch_operands = 0 : i64, tpu.core_type = #tpu.core_type<tc>, window_params = [{transform_indices = @transform_0, window_bounds = array<i64: 9, 32, 64>}, {transform_indices = @transform_1, window_bounds = array<i64: 32, 64>}]} {
    %c0 = arith.constant 0 : index
    %c0_0 = arith.constant 0 : index
    %c0_1 = arith.constant 0 : index
    %0 = vector.load %arg1[%c0, %c0_0, %c0_1] : memref<9x32x64xbf16, #tpu.memory_space<vmem>>, vector<9x32x64xbf16>
    %cst = arith.constant dense<0xFF80> : vector<32x64xbf16>
    %1 = vector.multi_reduction <maximumf>, %0, %cst [0] : vector<9x32x64xbf16> to vector<32x64xbf16>
    %c0_2 = arith.constant 0 : index
    %c0_3 = arith.constant 0 : index
    %2 = vector.load %arg2[%c0_2, %c0_3] : memref<32x64xbf16, #tpu.memory_space<vmem>>, vector<32x64xbf16>
    tpu.vector_store %arg2[%c0_2, %c0_3], %1 {strides = array<i32>} : memref<32x64xbf16, #tpu.memory_space<vmem>>, vector<32x64xbf16>,
    return
  }
  func.func @transform_0(%arg0: i32) -> (i32, i32, i32) {
    %c0_i32 = arith.constant 0 : i32
    %c0_i32_0 = arith.constant 0 : i32
    %c0_i32_1 = arith.constant 0 : i32
    return %c0_i32, %arg0, %c0_i32_0 : i32, i32, i32
  }
  func.func @transform_1(%arg0: i32) -> (i32, i32) {
    %c0_i32 = arith.constant 0 : i32
    %c0_i32_0 = arith.constant 0 : i32
    return %arg0, %c0_i32 : i32, i32
  }
}

module attributes {stable_mosaic.version = 11 : i64} {
  func.func @_matmul_bn_kernel(%arg0: i32, %arg1: i32, %arg2: i32, %arg3: memref<32x640xbf16, #tpu.memory_space<vmem>>, %arg4: memref<640x128xbf16, #tpu.memory_space<vmem>>, %arg5: memref<1x128xf32, #tpu.memory_space<vmem>>, %arg6: memref<1x128xf32, #tpu.memory_space<vmem>>, %arg7: memref<32x128xbf16, #tpu.memory_space<vmem>>, %arg8: memref<32x128xf32, #tpu.memory_space<vmem>>) attributes {dimension_semantics = [#tpu.dimension_semantics<parallel>, #tpu.dimension_semantics<parallel>, #tpu.dimension_semantics<arbitrary>], iteration_bounds = array<i64: 1, 1, 1>, scalar_prefetch = 0 : i64, scratch_operands = 1 : i64, tpu.core_type = #tpu.core_type<tc>, window_params = [{transform_indices = @transform_0, window_bounds = array<i64: 32, 640>}, {transform_indices = @transform_1, window_bounds = array<i64: 640, 128>}, {transform_indices = @transform_2, window_bounds = array<i64: 1, 128>}, {transform_indices = @transform_3, window_bounds = array<i64: 1, 128>}, {transform_indices = @transform_4, window_bounds = array<i64: 32, 128>}]} {
    %c0_i32 = arith.constant 0 : i32
    %0 = arith.cmpi eq, %arg2, %c0_i32 : i32
    %1 = arith.extui %0 : i1 to i32
    %c0_i32_0 = arith.constant 0 : i32
    %2 = arith.cmpi ne, %1, %c0_i32_0 : i32
    scf.if %2 {
      %cst_10 = arith.constant 0.000000e+00 : f32
      %12 = vector.broadcast %cst_10 : f32 to vector<32x128xf32>
      %c0_11 = arith.constant 0 : index
      %c0_12 = arith.constant 0 : index
      %13 = vector.load %arg8[%c0_11, %c0_12] : memref<32x128xf32, #tpu.memory_space<vmem>>, vector<32x128xf32>
      tpu.vector_store %arg8[%c0_11, %c0_12], %12 {strides = array<i32>} : memref<32x128xf32, #tpu.memory_space<vmem>>, vector<32x128xf32>,
    } else {
    }
    %c0 = arith.constant 0 : index
    %c0_1 = arith.constant 0 : index
    %3 = vector.load %arg8[%c0, %c0_1] : memref<32x128xf32, #tpu.memory_space<vmem>>, vector<32x128xf32>
    %c0_2 = arith.constant 0 : index
    %c0_3 = arith.constant 0 : index
    %4 = vector.load %arg3[%c0_2, %c0_3] : memref<32x640xbf16, #tpu.memory_space<vmem>>, vector<32x640xbf16>
    %c0_4 = arith.constant 0 : index
    %c0_5 = arith.constant 0 : index
    %5 = vector.load %arg4[%c0_4, %c0_5] : memref<640x128xbf16, #tpu.memory_space<vmem>>, vector<640x128xbf16>
    %cst = arith.constant dense<0.000000e+00> : vector<32x128xf32>
    %6 = tpu.matmul %4, %5, %cst {dimension_numbers = #tpu.dot_dimension_numbers<[1], [0], [0], [1], [0, 0, 1, 1], [], []>} : vector<32x640xbf16>, vector<640x128xbf16>, vector<32x128xf32> -> vector<32x128xf32>
    %7 = arith.addf %3, %6 : vector<32x128xf32>
    %c0_6 = arith.constant 0 : index
    %c0_7 = arith.constant 0 : index
    %8 = vector.load %arg8[%c0_6, %c0_7] : memref<32x128xf32, #tpu.memory_space<vmem>>, vector<32x128xf32>
    tpu.vector_store %arg8[%c0_6, %c0_7], %7 {strides = array<i32>} : memref<32x128xf32, #tpu.memory_space<vmem>>, vector<32x128xf32>,
    %c0_i32_8 = arith.constant 0 : i32
    %9 = arith.cmpi eq, %arg2, %c0_i32_8 : i32
    %10 = arith.extui %9 : i1 to i32
    %c0_i32_9 = arith.constant 0 : i32
    %11 = arith.cmpi ne, %10, %c0_i32_9 : i32
    scf.if %11 {
      %c0_10 = arith.constant 0 : index
      %c0_11 = arith.constant 0 : index
      %12 = vector.load %arg8[%c0_10, %c0_11] : memref<32x128xf32, #tpu.memory_space<vmem>>, vector<32x128xf32>
      %c0_12 = arith.constant 0 : index
      %c0_13 = arith.constant 0 : index
      %13 = vector.load %arg5[%c0_12, %c0_13] : memref<1x128xf32, #tpu.memory_space<vmem>>, vector<1x128xf32>
      %14 = vector.broadcast %13 : vector<1x128xf32> to vector<32x128xf32>
      %15 = arith.mulf %12, %14 : vector<32x128xf32>
      %c0_14 = arith.constant 0 : index
      %c0_15 = arith.constant 0 : index
      %16 = vector.load %arg6[%c0_14, %c0_15] : memref<1x128xf32, #tpu.memory_space<vmem>>, vector<1x128xf32>
      %17 = vector.broadcast %16 : vector<1x128xf32> to vector<32x128xf32>
      %18 = arith.addf %15, %17 : vector<32x128xf32>
      %cst_16 = arith.constant 0.000000e+00 : f32
      %19 = vector.broadcast %cst_16 : f32 to vector<32x128xf32>
      %20 = arith.maximumf %18, %19 : vector<32x128xf32>
      %21 = arith.truncf %20 : vector<32x128xf32> to vector<32x128xbf16>
      %c0_17 = arith.constant 0 : index
      %c0_18 = arith.constant 0 : index
      %22 = vector.load %arg7[%c0_17, %c0_18] : memref<32x128xbf16, #tpu.memory_space<vmem>>, vector<32x128xbf16>
      tpu.vector_store %arg7[%c0_17, %c0_18], %21 {strides = array<i32>} : memref<32x128xbf16, #tpu.memory_space<vmem>>, vector<32x128xbf16>,
    } else {
    }
    return
  }
  func.func @transform_0(%arg0: i32, %arg1: i32, %arg2: i32) -> (i32, i32) {
    %c0_i32 = arith.constant 0 : i32
    return %arg0, %arg2 : i32, i32
  }
  func.func @transform_1(%arg0: i32, %arg1: i32, %arg2: i32) -> (i32, i32) {
    %c0_i32 = arith.constant 0 : i32
    return %arg2, %arg1 : i32, i32
  }
  func.func @transform_2(%arg0: i32, %arg1: i32, %arg2: i32) -> (i32, i32) {
    %c0_i32 = arith.constant 0 : i32
    %c0_i32_0 = arith.constant 0 : i32
    return %c0_i32, %arg1 : i32, i32
  }
  func.func @transform_3(%arg0: i32, %arg1: i32, %arg2: i32) -> (i32, i32) {
    %c0_i32 = arith.constant 0 : i32
    %c0_i32_0 = arith.constant 0 : i32
    return %c0_i32, %arg1 : i32, i32
  }
  func.func @transform_4(%arg0: i32, %arg1: i32, %arg2: i32) -> (i32, i32) {
    %c0_i32 = arith.constant 0 : i32
    return %arg0, %arg1 : i32, i32
  }
}

module attributes {stable_mosaic.version = 11 : i64} {
  func.func @_matmul_bn_res_kernel(%arg0: i32, %arg1: i32, %arg2: i32, %arg3: memref<32x640xbf16, #tpu.memory_space<vmem>>, %arg4: memref<640x128xbf16, #tpu.memory_space<vmem>>, %arg5: memref<1x128xf32, #tpu.memory_space<vmem>>, %arg6: memref<1x128xf32, #tpu.memory_space<vmem>>, %arg7: memref<32x128xbf16, #tpu.memory_space<vmem>>, %arg8: memref<32x128xbf16, #tpu.memory_space<vmem>>, %arg9: memref<32x128xf32, #tpu.memory_space<vmem>>) attributes {dimension_semantics = [#tpu.dimension_semantics<parallel>, #tpu.dimension_semantics<parallel>, #tpu.dimension_semantics<arbitrary>], iteration_bounds = array<i64: 1, 1, 1>, scalar_prefetch = 0 : i64, scratch_operands = 1 : i64, tpu.core_type = #tpu.core_type<tc>, window_params = [{transform_indices = @transform_0, window_bounds = array<i64: 32, 640>}, {transform_indices = @transform_1, window_bounds = array<i64: 640, 128>}, {transform_indices = @transform_2, window_bounds = array<i64: 1, 128>}, {transform_indices = @transform_3, window_bounds = array<i64: 1, 128>}, {transform_indices = @transform_4, window_bounds = array<i64: 32, 128>}, {transform_indices = @transform_5, window_bounds = array<i64: 32, 128>}]} {
    %c0_i32 = arith.constant 0 : i32
    %0 = arith.cmpi eq, %arg2, %c0_i32 : i32
    %1 = arith.extui %0 : i1 to i32
    %c0_i32_0 = arith.constant 0 : i32
    %2 = arith.cmpi ne, %1, %c0_i32_0 : i32
    scf.if %2 {
      %cst_10 = arith.constant 0.000000e+00 : f32
      %12 = vector.broadcast %cst_10 : f32 to vector<32x128xf32>
      %c0_11 = arith.constant 0 : index
      %c0_12 = arith.constant 0 : index
      %13 = vector.load %arg9[%c0_11, %c0_12] : memref<32x128xf32, #tpu.memory_space<vmem>>, vector<32x128xf32>
      tpu.vector_store %arg9[%c0_11, %c0_12], %12 {strides = array<i32>} : memref<32x128xf32, #tpu.memory_space<vmem>>, vector<32x128xf32>,
    } else {
    }
    %c0 = arith.constant 0 : index
    %c0_1 = arith.constant 0 : index
    %3 = vector.load %arg9[%c0, %c0_1] : memref<32x128xf32, #tpu.memory_space<vmem>>, vector<32x128xf32>
    %c0_2 = arith.constant 0 : index
    %c0_3 = arith.constant 0 : index
    %4 = vector.load %arg3[%c0_2, %c0_3] : memref<32x640xbf16, #tpu.memory_space<vmem>>, vector<32x640xbf16>
    %c0_4 = arith.constant 0 : index
    %c0_5 = arith.constant 0 : index
    %5 = vector.load %arg4[%c0_4, %c0_5] : memref<640x128xbf16, #tpu.memory_space<vmem>>, vector<640x128xbf16>
    %cst = arith.constant dense<0.000000e+00> : vector<32x128xf32>
    %6 = tpu.matmul %4, %5, %cst {dimension_numbers = #tpu.dot_dimension_numbers<[1], [0], [0], [1], [0, 0, 1, 1], [], []>} : vector<32x640xbf16>, vector<640x128xbf16>, vector<32x128xf32> -> vector<32x128xf32>
    %7 = arith.addf %3, %6 : vector<32x128xf32>
    %c0_6 = arith.constant 0 : index
    %c0_7 = arith.constant 0 : index
    %8 = vector.load %arg9[%c0_6, %c0_7] : memref<32x128xf32, #tpu.memory_space<vmem>>, vector<32x128xf32>
    tpu.vector_store %arg9[%c0_6, %c0_7], %7 {strides = array<i32>} : memref<32x128xf32, #tpu.memory_space<vmem>>, vector<32x128xf32>,
    %c0_i32_8 = arith.constant 0 : i32
    %9 = arith.cmpi eq, %arg2, %c0_i32_8 : i32
    %10 = arith.extui %9 : i1 to i32
    %c0_i32_9 = arith.constant 0 : i32
    %11 = arith.cmpi ne, %10, %c0_i32_9 : i32
    scf.if %11 {
      %c0_10 = arith.constant 0 : index
      %c0_11 = arith.constant 0 : index
      %12 = vector.load %arg9[%c0_10, %c0_11] : memref<32x128xf32, #tpu.memory_space<vmem>>, vector<32x128xf32>
      %c0_12 = arith.constant 0 : index
      %c0_13 = arith.constant 0 : index
      %13 = vector.load %arg5[%c0_12, %c0_13] : memref<1x128xf32, #tpu.memory_space<vmem>>, vector<1x128xf32>
      %14 = vector.broadcast %13 : vector<1x128xf32> to vector<32x128xf32>
      %15 = arith.mulf %12, %14 : vector<32x128xf32>
      %c0_14 = arith.constant 0 : index
      %c0_15 = arith.constant 0 : index
      %16 = vector.load %arg6[%c0_14, %c0_15] : memref<1x128xf32, #tpu.memory_space<vmem>>, vector<1x128xf32>
      %17 = vector.broadcast %16 : vector<1x128xf32> to vector<32x128xf32>
      %18 = arith.addf %15, %17 : vector<32x128xf32>
      %c0_16 = arith.constant 0 : index
      %c0_17 = arith.constant 0 : index
      %19 = vector.load %arg7[%c0_16, %c0_17] : memref<32x128xbf16, #tpu.memory_space<vmem>>, vector<32x128xbf16>
      %20 = arith.extf %19 : vector<32x128xbf16> to vector<32x128xf32>
      %21 = arith.addf %18, %20 : vector<32x128xf32>
      %cst_18 = arith.constant 0.000000e+00 : f32
      %22 = vector.broadcast %cst_18 : f32 to vector<32x128xf32>
      %23 = arith.maximumf %21, %22 : vector<32x128xf32>
      %24 = arith.truncf %23 : vector<32x128xf32> to vector<32x128xbf16>
      %c0_19 = arith.constant 0 : index
      %c0_20 = arith.constant 0 : index
      %25 = vector.load %arg8[%c0_19, %c0_20] : memref<32x128xbf16, #tpu.memory_space<vmem>>, vector<32x128xbf16>
      tpu.vector_store %arg8[%c0_19, %c0_20], %24 {strides = array<i32>} : memref<32x128xbf16, #tpu.memory_space<vmem>>, vector<32x128xbf16>,
    } else {
    }
    return
  }
  func.func @transform_0(%arg0: i32, %arg1: i32, %arg2: i32) -> (i32, i32) {
    %c0_i32 = arith.constant 0 : i32
    return %arg0, %arg2 : i32, i32
  }
  func.func @transform_1(%arg0: i32, %arg1: i32, %arg2: i32) -> (i32, i32) {
    %c0_i32 = arith.constant 0 : i32
    return %arg2, %arg1 : i32, i32
  }
  func.func @transform_2(%arg0: i32, %arg1: i32, %arg2: i32) -> (i32, i32) {
    %c0_i32 = arith.constant 0 : i32
    %c0_i32_0 = arith.constant 0 : i32
    return %c0_i32, %arg1 : i32, i32
  }
  func.func @transform_3(%arg0: i32, %arg1: i32, %arg2: i32) -> (i32, i32) {
    %c0_i32 = arith.constant 0 : i32
    %c0_i32_0 = arith.constant 0 : i32
    return %c0_i32, %arg1 : i32, i32
  }
  func.func @transform_4(%arg0: i32, %arg1: i32, %arg2: i32) -> (i32, i32) {
    %c0_i32 = arith.constant 0 : i32
    return %arg0, %arg1 : i32, i32
  }
  func.func @transform_5(%arg0: i32, %arg1: i32, %arg2: i32) -> (i32, i32) {
    %c0_i32 = arith.constant 0 : i32
    return %arg0, %arg1 : i32, i32
  }
}

module attributes {stable_mosaic.version = 11 : i64} {
  func.func @_matmul_bn_kernel(%arg0: i32, %arg1: i32, %arg2: i32, %arg3: memref<16x640xbf16, #tpu.memory_space<vmem>>, %arg4: memref<640x128xbf16, #tpu.memory_space<vmem>>, %arg5: memref<1x128xf32, #tpu.memory_space<vmem>>, %arg6: memref<1x128xf32, #tpu.memory_space<vmem>>, %arg7: memref<16x128xbf16, #tpu.memory_space<vmem>>, %arg8: memref<16x128xf32, #tpu.memory_space<vmem>>) attributes {dimension_semantics = [#tpu.dimension_semantics<parallel>, #tpu.dimension_semantics<parallel>, #tpu.dimension_semantics<arbitrary>], iteration_bounds = array<i64: 1, 1, 1>, scalar_prefetch = 0 : i64, scratch_operands = 1 : i64, tpu.core_type = #tpu.core_type<tc>, window_params = [{transform_indices = @transform_0, window_bounds = array<i64: 16, 640>}, {transform_indices = @transform_1, window_bounds = array<i64: 640, 128>}, {transform_indices = @transform_2, window_bounds = array<i64: 1, 128>}, {transform_indices = @transform_3, window_bounds = array<i64: 1, 128>}, {transform_indices = @transform_4, window_bounds = array<i64: 16, 128>}]} {
    %c0_i32 = arith.constant 0 : i32
    %0 = arith.cmpi eq, %arg2, %c0_i32 : i32
    %1 = arith.extui %0 : i1 to i32
    %c0_i32_0 = arith.constant 0 : i32
    %2 = arith.cmpi ne, %1, %c0_i32_0 : i32
    scf.if %2 {
      %cst_10 = arith.constant 0.000000e+00 : f32
      %12 = vector.broadcast %cst_10 : f32 to vector<16x128xf32>
      %c0_11 = arith.constant 0 : index
      %c0_12 = arith.constant 0 : index
      %13 = vector.load %arg8[%c0_11, %c0_12] : memref<16x128xf32, #tpu.memory_space<vmem>>, vector<16x128xf32>
      tpu.vector_store %arg8[%c0_11, %c0_12], %12 {strides = array<i32>} : memref<16x128xf32, #tpu.memory_space<vmem>>, vector<16x128xf32>,
    } else {
    }
    %c0 = arith.constant 0 : index
    %c0_1 = arith.constant 0 : index
    %3 = vector.load %arg8[%c0, %c0_1] : memref<16x128xf32, #tpu.memory_space<vmem>>, vector<16x128xf32>
    %c0_2 = arith.constant 0 : index
    %c0_3 = arith.constant 0 : index
    %4 = vector.load %arg3[%c0_2, %c0_3] : memref<16x640xbf16, #tpu.memory_space<vmem>>, vector<16x640xbf16>
    %c0_4 = arith.constant 0 : index
    %c0_5 = arith.constant 0 : index
    %5 = vector.load %arg4[%c0_4, %c0_5] : memref<640x128xbf16, #tpu.memory_space<vmem>>, vector<640x128xbf16>
    %cst = arith.constant dense<0.000000e+00> : vector<16x128xf32>
    %6 = tpu.matmul %4, %5, %cst {dimension_numbers = #tpu.dot_dimension_numbers<[1], [0], [0], [1], [0, 0, 1, 1], [], []>} : vector<16x640xbf16>, vector<640x128xbf16>, vector<16x128xf32> -> vector<16x128xf32>
    %7 = arith.addf %3, %6 : vector<16x128xf32>
    %c0_6 = arith.constant 0 : index
    %c0_7 = arith.constant 0 : index
    %8 = vector.load %arg8[%c0_6, %c0_7] : memref<16x128xf32, #tpu.memory_space<vmem>>, vector<16x128xf32>
    tpu.vector_store %arg8[%c0_6, %c0_7], %7 {strides = array<i32>} : memref<16x128xf32, #tpu.memory_space<vmem>>, vector<16x128xf32>,
    %c0_i32_8 = arith.constant 0 : i32
    %9 = arith.cmpi eq, %arg2, %c0_i32_8 : i32
    %10 = arith.extui %9 : i1 to i32
    %c0_i32_9 = arith.constant 0 : i32
    %11 = arith.cmpi ne, %10, %c0_i32_9 : i32
    scf.if %11 {
      %c0_10 = arith.constant 0 : index
      %c0_11 = arith.constant 0 : index
      %12 = vector.load %arg8[%c0_10, %c0_11] : memref<16x128xf32, #tpu.memory_space<vmem>>, vector<16x128xf32>
      %c0_12 = arith.constant 0 : index
      %c0_13 = arith.constant 0 : index
      %13 = vector.load %arg5[%c0_12, %c0_13] : memref<1x128xf32, #tpu.memory_space<vmem>>, vector<1x128xf32>
      %14 = vector.broadcast %13 : vector<1x128xf32> to vector<16x128xf32>
      %15 = arith.mulf %12, %14 : vector<16x128xf32>
      %c0_14 = arith.constant 0 : index
      %c0_15 = arith.constant 0 : index
      %16 = vector.load %arg6[%c0_14, %c0_15] : memref<1x128xf32, #tpu.memory_space<vmem>>, vector<1x128xf32>
      %17 = vector.broadcast %16 : vector<1x128xf32> to vector<16x128xf32>
      %18 = arith.addf %15, %17 : vector<16x128xf32>
      %cst_16 = arith.constant 0.000000e+00 : f32
      %19 = vector.broadcast %cst_16 : f32 to vector<16x128xf32>
      %20 = arith.maximumf %18, %19 : vector<16x128xf32>
      %21 = arith.truncf %20 : vector<16x128xf32> to vector<16x128xbf16>
      %c0_17 = arith.constant 0 : index
      %c0_18 = arith.constant 0 : index
      %22 = vector.load %arg7[%c0_17, %c0_18] : memref<16x128xbf16, #tpu.memory_space<vmem>>, vector<16x128xbf16>
      tpu.vector_store %arg7[%c0_17, %c0_18], %21 {strides = array<i32>} : memref<16x128xbf16, #tpu.memory_space<vmem>>, vector<16x128xbf16>,
    } else {
    }
    return
  }
  func.func @transform_0(%arg0: i32, %arg1: i32, %arg2: i32) -> (i32, i32) {
    %c0_i32 = arith.constant 0 : i32
    return %arg0, %arg2 : i32, i32
  }
  func.func @transform_1(%arg0: i32, %arg1: i32, %arg2: i32) -> (i32, i32) {
    %c0_i32 = arith.constant 0 : i32
    return %arg2, %arg1 : i32, i32
  }
  func.func @transform_2(%arg0: i32, %arg1: i32, %arg2: i32) -> (i32, i32) {
    %c0_i32 = arith.constant 0 : i32
    %c0_i32_0 = arith.constant 0 : i32
    return %c0_i32, %arg1 : i32, i32
  }
  func.func @transform_3(%arg0: i32, %arg1: i32, %arg2: i32) -> (i32, i32) {
    %c0_i32 = arith.constant 0 : i32
    %c0_i32_0 = arith.constant 0 : i32
    return %c0_i32, %arg1 : i32, i32
  }
  func.func @transform_4(%arg0: i32, %arg1: i32, %arg2: i32) -> (i32, i32) {
    %c0_i32 = arith.constant 0 : i32
    return %arg0, %arg1 : i32, i32
  }
}

module attributes {stable_mosaic.version = 11 : i64} {
  func.func @_matmul_bn_kernel(%arg0: i32, %arg1: i32, %arg2: i32, %arg3: memref<16x128xbf16, #tpu.memory_space<vmem>>, %arg4: memref<128x128xbf16, #tpu.memory_space<vmem>>, %arg5: memref<1x128xf32, #tpu.memory_space<vmem>>, %arg6: memref<1x128xf32, #tpu.memory_space<vmem>>, %arg7: memref<16x128xbf16, #tpu.memory_space<vmem>>, %arg8: memref<16x128xf32, #tpu.memory_space<vmem>>) attributes {dimension_semantics = [#tpu.dimension_semantics<parallel>, #tpu.dimension_semantics<parallel>, #tpu.dimension_semantics<arbitrary>], iteration_bounds = array<i64: 1, 1, 1>, scalar_prefetch = 0 : i64, scratch_operands = 1 : i64, tpu.core_type = #tpu.core_type<tc>, window_params = [{transform_indices = @transform_0, window_bounds = array<i64: 16, 128>}, {transform_indices = @transform_1, window_bounds = array<i64: 128, 128>}, {transform_indices = @transform_2, window_bounds = array<i64: 1, 128>}, {transform_indices = @transform_3, window_bounds = array<i64: 1, 128>}, {transform_indices = @transform_4, window_bounds = array<i64: 16, 128>}]} {
    %c0_i32 = arith.constant 0 : i32
    %0 = arith.cmpi eq, %arg2, %c0_i32 : i32
    %1 = arith.extui %0 : i1 to i32
    %c0_i32_0 = arith.constant 0 : i32
    %2 = arith.cmpi ne, %1, %c0_i32_0 : i32
    scf.if %2 {
      %cst_10 = arith.constant 0.000000e+00 : f32
      %12 = vector.broadcast %cst_10 : f32 to vector<16x128xf32>
      %c0_11 = arith.constant 0 : index
      %c0_12 = arith.constant 0 : index
      %13 = vector.load %arg8[%c0_11, %c0_12] : memref<16x128xf32, #tpu.memory_space<vmem>>, vector<16x128xf32>
      tpu.vector_store %arg8[%c0_11, %c0_12], %12 {strides = array<i32>} : memref<16x128xf32, #tpu.memory_space<vmem>>, vector<16x128xf32>,
    } else {
    }
    %c0 = arith.constant 0 : index
    %c0_1 = arith.constant 0 : index
    %3 = vector.load %arg8[%c0, %c0_1] : memref<16x128xf32, #tpu.memory_space<vmem>>, vector<16x128xf32>
    %c0_2 = arith.constant 0 : index
    %c0_3 = arith.constant 0 : index
    %4 = vector.load %arg3[%c0_2, %c0_3] : memref<16x128xbf16, #tpu.memory_space<vmem>>, vector<16x128xbf16>
    %c0_4 = arith.constant 0 : index
    %c0_5 = arith.constant 0 : index
    %5 = vector.load %arg4[%c0_4, %c0_5] : memref<128x128xbf16, #tpu.memory_space<vmem>>, vector<128x128xbf16>
    %cst = arith.constant dense<0.000000e+00> : vector<16x128xf32>
    %6 = tpu.matmul %4, %5, %cst {dimension_numbers = #tpu.dot_dimension_numbers<[1], [0], [0], [1], [0, 0, 1, 1], [], []>} : vector<16x128xbf16>, vector<128x128xbf16>, vector<16x128xf32> -> vector<16x128xf32>
    %7 = arith.addf %3, %6 : vector<16x128xf32>
    %c0_6 = arith.constant 0 : index
    %c0_7 = arith.constant 0 : index
    %8 = vector.load %arg8[%c0_6, %c0_7] : memref<16x128xf32, #tpu.memory_space<vmem>>, vector<16x128xf32>
    tpu.vector_store %arg8[%c0_6, %c0_7], %7 {strides = array<i32>} : memref<16x128xf32, #tpu.memory_space<vmem>>, vector<16x128xf32>,
    %c0_i32_8 = arith.constant 0 : i32
    %9 = arith.cmpi eq, %arg2, %c0_i32_8 : i32
    %10 = arith.extui %9 : i1 to i32
    %c0_i32_9 = arith.constant 0 : i32
    %11 = arith.cmpi ne, %10, %c0_i32_9 : i32
    scf.if %11 {
      %c0_10 = arith.constant 0 : index
      %c0_11 = arith.constant 0 : index
      %12 = vector.load %arg8[%c0_10, %c0_11] : memref<16x128xf32, #tpu.memory_space<vmem>>, vector<16x128xf32>
      %c0_12 = arith.constant 0 : index
      %c0_13 = arith.constant 0 : index
      %13 = vector.load %arg5[%c0_12, %c0_13] : memref<1x128xf32, #tpu.memory_space<vmem>>, vector<1x128xf32>
      %14 = vector.broadcast %13 : vector<1x128xf32> to vector<16x128xf32>
      %15 = arith.mulf %12, %14 : vector<16x128xf32>
      %c0_14 = arith.constant 0 : index
      %c0_15 = arith.constant 0 : index
      %16 = vector.load %arg6[%c0_14, %c0_15] : memref<1x128xf32, #tpu.memory_space<vmem>>, vector<1x128xf32>
      %17 = vector.broadcast %16 : vector<1x128xf32> to vector<16x128xf32>
      %18 = arith.addf %15, %17 : vector<16x128xf32>
      %19 = arith.truncf %18 : vector<16x128xf32> to vector<16x128xbf16>
      %c0_16 = arith.constant 0 : index
      %c0_17 = arith.constant 0 : index
      %20 = vector.load %arg7[%c0_16, %c0_17] : memref<16x128xbf16, #tpu.memory_space<vmem>>, vector<16x128xbf16>
      tpu.vector_store %arg7[%c0_16, %c0_17], %19 {strides = array<i32>} : memref<16x128xbf16, #tpu.memory_space<vmem>>, vector<16x128xbf16>,
    } else {
    }
    return
  }
  func.func @transform_0(%arg0: i32, %arg1: i32, %arg2: i32) -> (i32, i32) {
    %c0_i32 = arith.constant 0 : i32
    return %arg0, %arg2 : i32, i32
  }
  func.func @transform_1(%arg0: i32, %arg1: i32, %arg2: i32) -> (i32, i32) {
    %c0_i32 = arith.constant 0 : i32
    return %arg2, %arg1 : i32, i32
  }
  func.func @transform_2(%arg0: i32, %arg1: i32, %arg2: i32) -> (i32, i32) {
    %c0_i32 = arith.constant 0 : i32
    %c0_i32_0 = arith.constant 0 : i32
    return %c0_i32, %arg1 : i32, i32
  }
  func.func @transform_3(%arg0: i32, %arg1: i32, %arg2: i32) -> (i32, i32) {
    %c0_i32 = arith.constant 0 : i32
    %c0_i32_0 = arith.constant 0 : i32
    return %c0_i32, %arg1 : i32, i32
  }
  func.func @transform_4(%arg0: i32, %arg1: i32, %arg2: i32) -> (i32, i32) {
    %c0_i32 = arith.constant 0 : i32
    return %arg0, %arg1 : i32, i32
  }
}

module attributes {stable_mosaic.version = 11 : i64} {
  func.func @_matmul_bn_kernel(%arg0: i32, %arg1: i32, %arg2: i32, %arg3: memref<16x256xbf16, #tpu.memory_space<vmem>>, %arg4: memref<256x128xbf16, #tpu.memory_space<vmem>>, %arg5: memref<1x128xf32, #tpu.memory_space<vmem>>, %arg6: memref<1x128xf32, #tpu.memory_space<vmem>>, %arg7: memref<16x128xbf16, #tpu.memory_space<vmem>>, %arg8: memref<16x128xf32, #tpu.memory_space<vmem>>) attributes {dimension_semantics = [#tpu.dimension_semantics<parallel>, #tpu.dimension_semantics<parallel>, #tpu.dimension_semantics<arbitrary>], iteration_bounds = array<i64: 1, 1, 5>, scalar_prefetch = 0 : i64, scratch_operands = 1 : i64, tpu.core_type = #tpu.core_type<tc>, window_params = [{transform_indices = @transform_0, window_bounds = array<i64: 16, 256>}, {transform_indices = @transform_1, window_bounds = array<i64: 256, 128>}, {transform_indices = @transform_2, window_bounds = array<i64: 1, 128>}, {transform_indices = @transform_3, window_bounds = array<i64: 1, 128>}, {transform_indices = @transform_4, window_bounds = array<i64: 16, 128>}]} {
    %c0_i32 = arith.constant 0 : i32
    %0 = arith.cmpi eq, %arg2, %c0_i32 : i32
    %1 = arith.extui %0 : i1 to i32
    %c0_i32_0 = arith.constant 0 : i32
    %2 = arith.cmpi ne, %1, %c0_i32_0 : i32
    scf.if %2 {
      %cst_9 = arith.constant 0.000000e+00 : f32
      %12 = vector.broadcast %cst_9 : f32 to vector<16x128xf32>
      %c0_10 = arith.constant 0 : index
      %c0_11 = arith.constant 0 : index
      %13 = vector.load %arg8[%c0_10, %c0_11] : memref<16x128xf32, #tpu.memory_space<vmem>>, vector<16x128xf32>
      tpu.vector_store %arg8[%c0_10, %c0_11], %12 {strides = array<i32>} : memref<16x128xf32, #tpu.memory_space<vmem>>, vector<16x128xf32>,
    } else {
    }
    %c0 = arith.constant 0 : index
    %c0_1 = arith.constant 0 : index
    %3 = vector.load %arg8[%c0, %c0_1] : memref<16x128xf32, #tpu.memory_space<vmem>>, vector<16x128xf32>
    %c0_2 = arith.constant 0 : index
    %c0_3 = arith.constant 0 : index
    %4 = vector.load %arg3[%c0_2, %c0_3] : memref<16x256xbf16, #tpu.memory_space<vmem>>, vector<16x256xbf16>
    %c0_4 = arith.constant 0 : index
    %c0_5 = arith.constant 0 : index
    %5 = vector.load %arg4[%c0_4, %c0_5] : memref<256x128xbf16, #tpu.memory_space<vmem>>, vector<256x128xbf16>
    %cst = arith.constant dense<0.000000e+00> : vector<16x128xf32>
    %6 = tpu.matmul %4, %5, %cst {dimension_numbers = #tpu.dot_dimension_numbers<[1], [0], [0], [1], [0, 0, 1, 1], [], []>} : vector<16x256xbf16>, vector<256x128xbf16>, vector<16x128xf32> -> vector<16x128xf32>
    %7 = arith.addf %3, %6 : vector<16x128xf32>
    %c0_6 = arith.constant 0 : index
    %c0_7 = arith.constant 0 : index
    %8 = vector.load %arg8[%c0_6, %c0_7] : memref<16x128xf32, #tpu.memory_space<vmem>>, vector<16x128xf32>
    tpu.vector_store %arg8[%c0_6, %c0_7], %7 {strides = array<i32>} : memref<16x128xf32, #tpu.memory_space<vmem>>, vector<16x128xf32>,
    %c4_i32 = arith.constant 4 : i32
    %9 = arith.cmpi eq, %arg2, %c4_i32 : i32
    %10 = arith.extui %9 : i1 to i32
    %c0_i32_8 = arith.constant 0 : i32
    %11 = arith.cmpi ne, %10, %c0_i32_8 : i32
    scf.if %11 {
      %c0_9 = arith.constant 0 : index
      %c0_10 = arith.constant 0 : index
      %12 = vector.load %arg8[%c0_9, %c0_10] : memref<16x128xf32, #tpu.memory_space<vmem>>, vector<16x128xf32>
      %c0_11 = arith.constant 0 : index
      %c0_12 = arith.constant 0 : index
      %13 = vector.load %arg5[%c0_11, %c0_12] : memref<1x128xf32, #tpu.memory_space<vmem>>, vector<1x128xf32>
      %14 = vector.broadcast %13 : vector<1x128xf32> to vector<16x128xf32>
      %15 = arith.mulf %12, %14 : vector<16x128xf32>
      %c0_13 = arith.constant 0 : index
      %c0_14 = arith.constant 0 : index
      %16 = vector.load %arg6[%c0_13, %c0_14] : memref<1x128xf32, #tpu.memory_space<vmem>>, vector<1x128xf32>
      %17 = vector.broadcast %16 : vector<1x128xf32> to vector<16x128xf32>
      %18 = arith.addf %15, %17 : vector<16x128xf32>
      %cst_15 = arith.constant 0.000000e+00 : f32
      %19 = vector.broadcast %cst_15 : f32 to vector<16x128xf32>
      %20 = arith.maximumf %18, %19 : vector<16x128xf32>
      %21 = arith.truncf %20 : vector<16x128xf32> to vector<16x128xbf16>
      %c0_16 = arith.constant 0 : index
      %c0_17 = arith.constant 0 : index
      %22 = vector.load %arg7[%c0_16, %c0_17] : memref<16x128xbf16, #tpu.memory_space<vmem>>, vector<16x128xbf16>
      tpu.vector_store %arg7[%c0_16, %c0_17], %21 {strides = array<i32>} : memref<16x128xbf16, #tpu.memory_space<vmem>>, vector<16x128xbf16>,
    } else {
    }
    return
  }
  func.func @transform_0(%arg0: i32, %arg1: i32, %arg2: i32) -> (i32, i32) {
    %c0_i32 = arith.constant 0 : i32
    return %arg0, %arg2 : i32, i32
  }
  func.func @transform_1(%arg0: i32, %arg1: i32, %arg2: i32) -> (i32, i32) {
    %c0_i32 = arith.constant 0 : i32
    return %arg2, %arg1 : i32, i32
  }
  func.func @transform_2(%arg0: i32, %arg1: i32, %arg2: i32) -> (i32, i32) {
    %c0_i32 = arith.constant 0 : i32
    %c0_i32_0 = arith.constant 0 : i32
    return %c0_i32, %arg1 : i32, i32
  }
  func.func @transform_3(%arg0: i32, %arg1: i32, %arg2: i32) -> (i32, i32) {
    %c0_i32 = arith.constant 0 : i32
    %c0_i32_0 = arith.constant 0 : i32
    return %c0_i32, %arg1 : i32, i32
  }
  func.func @transform_4(%arg0: i32, %arg1: i32, %arg2: i32) -> (i32, i32) {
    %c0_i32 = arith.constant 0 : i32
    return %arg0, %arg1 : i32, i32
  }
}

module attributes {stable_mosaic.version = 11 : i64} {
  func.func @_matmul_bn_res_kernel(%arg0: i32, %arg1: i32, %arg2: i32, %arg3: memref<16x256xbf16, #tpu.memory_space<vmem>>, %arg4: memref<256x128xbf16, #tpu.memory_space<vmem>>, %arg5: memref<1x128xf32, #tpu.memory_space<vmem>>, %arg6: memref<1x128xf32, #tpu.memory_space<vmem>>, %arg7: memref<16x128xbf16, #tpu.memory_space<vmem>>, %arg8: memref<16x128xbf16, #tpu.memory_space<vmem>>, %arg9: memref<16x128xf32, #tpu.memory_space<vmem>>) attributes {dimension_semantics = [#tpu.dimension_semantics<parallel>, #tpu.dimension_semantics<parallel>, #tpu.dimension_semantics<arbitrary>], iteration_bounds = array<i64: 1, 1, 5>, scalar_prefetch = 0 : i64, scratch_operands = 1 : i64, tpu.core_type = #tpu.core_type<tc>, window_params = [{transform_indices = @transform_0, window_bounds = array<i64: 16, 256>}, {transform_indices = @transform_1, window_bounds = array<i64: 256, 128>}, {transform_indices = @transform_2, window_bounds = array<i64: 1, 128>}, {transform_indices = @transform_3, window_bounds = array<i64: 1, 128>}, {transform_indices = @transform_4, window_bounds = array<i64: 16, 128>}, {transform_indices = @transform_5, window_bounds = array<i64: 16, 128>}]} {
    %c0_i32 = arith.constant 0 : i32
    %0 = arith.cmpi eq, %arg2, %c0_i32 : i32
    %1 = arith.extui %0 : i1 to i32
    %c0_i32_0 = arith.constant 0 : i32
    %2 = arith.cmpi ne, %1, %c0_i32_0 : i32
    scf.if %2 {
      %cst_9 = arith.constant 0.000000e+00 : f32
      %12 = vector.broadcast %cst_9 : f32 to vector<16x128xf32>
      %c0_10 = arith.constant 0 : index
      %c0_11 = arith.constant 0 : index
      %13 = vector.load %arg9[%c0_10, %c0_11] : memref<16x128xf32, #tpu.memory_space<vmem>>, vector<16x128xf32>
      tpu.vector_store %arg9[%c0_10, %c0_11], %12 {strides = array<i32>} : memref<16x128xf32, #tpu.memory_space<vmem>>, vector<16x128xf32>,
    } else {
    }
    %c0 = arith.constant 0 : index
    %c0_1 = arith.constant 0 : index
    %3 = vector.load %arg9[%c0, %c0_1] : memref<16x128xf32, #tpu.memory_space<vmem>>, vector<16x128xf32>
    %c0_2 = arith.constant 0 : index
    %c0_3 = arith.constant 0 : index
    %4 = vector.load %arg3[%c0_2, %c0_3] : memref<16x256xbf16, #tpu.memory_space<vmem>>, vector<16x256xbf16>
    %c0_4 = arith.constant 0 : index
    %c0_5 = arith.constant 0 : index
    %5 = vector.load %arg4[%c0_4, %c0_5] : memref<256x128xbf16, #tpu.memory_space<vmem>>, vector<256x128xbf16>
    %cst = arith.constant dense<0.000000e+00> : vector<16x128xf32>
    %6 = tpu.matmul %4, %5, %cst {dimension_numbers = #tpu.dot_dimension_numbers<[1], [0], [0], [1], [0, 0, 1, 1], [], []>} : vector<16x256xbf16>, vector<256x128xbf16>, vector<16x128xf32> -> vector<16x128xf32>
    %7 = arith.addf %3, %6 : vector<16x128xf32>
    %c0_6 = arith.constant 0 : index
    %c0_7 = arith.constant 0 : index
    %8 = vector.load %arg9[%c0_6, %c0_7] : memref<16x128xf32, #tpu.memory_space<vmem>>, vector<16x128xf32>
    tpu.vector_store %arg9[%c0_6, %c0_7], %7 {strides = array<i32>} : memref<16x128xf32, #tpu.memory_space<vmem>>, vector<16x128xf32>,
    %c4_i32 = arith.constant 4 : i32
    %9 = arith.cmpi eq, %arg2, %c4_i32 : i32
    %10 = arith.extui %9 : i1 to i32
    %c0_i32_8 = arith.constant 0 : i32
    %11 = arith.cmpi ne, %10, %c0_i32_8 : i32
    scf.if %11 {
      %c0_9 = arith.constant 0 : index
      %c0_10 = arith.constant 0 : index
      %12 = vector.load %arg9[%c0_9, %c0_10] : memref<16x128xf32, #tpu.memory_space<vmem>>, vector<16x128xf32>
      %c0_11 = arith.constant 0 : index
      %c0_12 = arith.constant 0 : index
      %13 = vector.load %arg5[%c0_11, %c0_12] : memref<1x128xf32, #tpu.memory_space<vmem>>, vector<1x128xf32>
      %14 = vector.broadcast %13 : vector<1x128xf32> to vector<16x128xf32>
      %15 = arith.mulf %12, %14 : vector<16x128xf32>
      %c0_13 = arith.constant 0 : index
      %c0_14 = arith.constant 0 : index
      %16 = vector.load %arg6[%c0_13, %c0_14] : memref<1x128xf32, #tpu.memory_space<vmem>>, vector<1x128xf32>
      %17 = vector.broadcast %16 : vector<1x128xf32> to vector<16x128xf32>
      %18 = arith.addf %15, %17 : vector<16x128xf32>
      %c0_15 = arith.constant 0 : index
      %c0_16 = arith.constant 0 : index
      %19 = vector.load %arg7[%c0_15, %c0_16] : memref<16x128xbf16, #tpu.memory_space<vmem>>, vector<16x128xbf16>
      %20 = arith.extf %19 : vector<16x128xbf16> to vector<16x128xf32>
      %21 = arith.addf %18, %20 : vector<16x128xf32>
      %cst_17 = arith.constant 0.000000e+00 : f32
      %22 = vector.broadcast %cst_17 : f32 to vector<16x128xf32>
      %23 = arith.maximumf %21, %22 : vector<16x128xf32>
      %24 = arith.truncf %23 : vector<16x128xf32> to vector<16x128xbf16>
      %c0_18 = arith.constant 0 : index
      %c0_19 = arith.constant 0 : index
      %25 = vector.load %arg8[%c0_18, %c0_19] : memref<16x128xbf16, #tpu.memory_space<vmem>>, vector<16x128xbf16>
      tpu.vector_store %arg8[%c0_18, %c0_19], %24 {strides = array<i32>} : memref<16x128xbf16, #tpu.memory_space<vmem>>, vector<16x128xbf16>,
    } else {
    }
    return
  }
  func.func @transform_0(%arg0: i32, %arg1: i32, %arg2: i32) -> (i32, i32) {
    %c0_i32 = arith.constant 0 : i32
    return %arg0, %arg2 : i32, i32
  }
  func.func @transform_1(%arg0: i32, %arg1: i32, %arg2: i32) -> (i32, i32) {
    %c0_i32 = arith.constant 0 : i32
    return %arg2, %arg1 : i32, i32
  }
  func.func @transform_2(%arg0: i32, %arg1: i32, %arg2: i32) -> (i32, i32) {
    %c0_i32 = arith.constant 0 : i32
    %c0_i32_0 = arith.constant 0 : i32
    return %c0_i32, %arg1 : i32, i32
  }
  func.func @transform_3(%arg0: i32, %arg1: i32, %arg2: i32) -> (i32, i32) {
    %c0_i32 = arith.constant 0 : i32
    %c0_i32_0 = arith.constant 0 : i32
    return %c0_i32, %arg1 : i32, i32
  }
  func.func @transform_4(%arg0: i32, %arg1: i32, %arg2: i32) -> (i32, i32) {
    %c0_i32 = arith.constant 0 : i32
    return %arg0, %arg1 : i32, i32
  }
  func.func @transform_5(%arg0: i32, %arg1: i32, %arg2: i32) -> (i32, i32) {
    %c0_i32 = arith.constant 0 : i32
    return %arg0, %arg1 : i32, i32
  }
}

module attributes {stable_mosaic.version = 11 : i64} {
  func.func @_matmul_bn_kernel(%arg0: i32, %arg1: i32, %arg2: i32, %arg3: memref<16x256xbf16, #tpu.memory_space<vmem>>, %arg4: memref<256x256xbf16, #tpu.memory_space<vmem>>, %arg5: memref<1x256xf32, #tpu.memory_space<vmem>>, %arg6: memref<1x256xf32, #tpu.memory_space<vmem>>, %arg7: memref<16x256xbf16, #tpu.memory_space<vmem>>, %arg8: memref<16x256xf32, #tpu.memory_space<vmem>>) attributes {dimension_semantics = [#tpu.dimension_semantics<parallel>, #tpu.dimension_semantics<parallel>, #tpu.dimension_semantics<arbitrary>], iteration_bounds = array<i64: 1, 1, 5>, scalar_prefetch = 0 : i64, scratch_operands = 1 : i64, tpu.core_type = #tpu.core_type<tc>, window_params = [{transform_indices = @transform_0, window_bounds = array<i64: 16, 256>}, {transform_indices = @transform_1, window_bounds = array<i64: 256, 256>}, {transform_indices = @transform_2, window_bounds = array<i64: 1, 256>}, {transform_indices = @transform_3, window_bounds = array<i64: 1, 256>}, {transform_indices = @transform_4, window_bounds = array<i64: 16, 256>}]} {
    %c0_i32 = arith.constant 0 : i32
    %0 = arith.cmpi eq, %arg2, %c0_i32 : i32
    %1 = arith.extui %0 : i1 to i32
    %c0_i32_0 = arith.constant 0 : i32
    %2 = arith.cmpi ne, %1, %c0_i32_0 : i32
    scf.if %2 {
      %cst_9 = arith.constant 0.000000e+00 : f32
      %12 = vector.broadcast %cst_9 : f32 to vector<16x256xf32>
      %c0_10 = arith.constant 0 : index
      %c0_11 = arith.constant 0 : index
      %13 = vector.load %arg8[%c0_10, %c0_11] : memref<16x256xf32, #tpu.memory_space<vmem>>, vector<16x256xf32>
      tpu.vector_store %arg8[%c0_10, %c0_11], %12 {strides = array<i32>} : memref<16x256xf32, #tpu.memory_space<vmem>>, vector<16x256xf32>,
    } else {
    }
    %c0 = arith.constant 0 : index
    %c0_1 = arith.constant 0 : index
    %3 = vector.load %arg8[%c0, %c0_1] : memref<16x256xf32, #tpu.memory_space<vmem>>, vector<16x256xf32>
    %c0_2 = arith.constant 0 : index
    %c0_3 = arith.constant 0 : index
    %4 = vector.load %arg3[%c0_2, %c0_3] : memref<16x256xbf16, #tpu.memory_space<vmem>>, vector<16x256xbf16>
    %c0_4 = arith.constant 0 : index
    %c0_5 = arith.constant 0 : index
    %5 = vector.load %arg4[%c0_4, %c0_5] : memref<256x256xbf16, #tpu.memory_space<vmem>>, vector<256x256xbf16>
    %cst = arith.constant dense<0.000000e+00> : vector<16x256xf32>
    %6 = tpu.matmul %4, %5, %cst {dimension_numbers = #tpu.dot_dimension_numbers<[1], [0], [0], [1], [0, 0, 1, 1], [], []>} : vector<16x256xbf16>, vector<256x256xbf16>, vector<16x256xf32> -> vector<16x256xf32>
    %7 = arith.addf %3, %6 : vector<16x256xf32>
    %c0_6 = arith.constant 0 : index
    %c0_7 = arith.constant 0 : index
    %8 = vector.load %arg8[%c0_6, %c0_7] : memref<16x256xf32, #tpu.memory_space<vmem>>, vector<16x256xf32>
    tpu.vector_store %arg8[%c0_6, %c0_7], %7 {strides = array<i32>} : memref<16x256xf32, #tpu.memory_space<vmem>>, vector<16x256xf32>,
    %c4_i32 = arith.constant 4 : i32
    %9 = arith.cmpi eq, %arg2, %c4_i32 : i32
    %10 = arith.extui %9 : i1 to i32
    %c0_i32_8 = arith.constant 0 : i32
    %11 = arith.cmpi ne, %10, %c0_i32_8 : i32
    scf.if %11 {
      %c0_9 = arith.constant 0 : index
      %c0_10 = arith.constant 0 : index
      %12 = vector.load %arg8[%c0_9, %c0_10] : memref<16x256xf32, #tpu.memory_space<vmem>>, vector<16x256xf32>
      %c0_11 = arith.constant 0 : index
      %c0_12 = arith.constant 0 : index
      %13 = vector.load %arg5[%c0_11, %c0_12] : memref<1x256xf32, #tpu.memory_space<vmem>>, vector<1x256xf32>
      %14 = vector.broadcast %13 : vector<1x256xf32> to vector<16x256xf32>
      %15 = arith.mulf %12, %14 : vector<16x256xf32>
      %c0_13 = arith.constant 0 : index
      %c0_14 = arith.constant 0 : index
      %16 = vector.load %arg6[%c0_13, %c0_14] : memref<1x256xf32, #tpu.memory_space<vmem>>, vector<1x256xf32>
      %17 = vector.broadcast %16 : vector<1x256xf32> to vector<16x256xf32>
      %18 = arith.addf %15, %17 : vector<16x256xf32>
      %cst_15 = arith.constant 0.000000e+00 : f32
      %19 = vector.broadcast %cst_15 : f32 to vector<16x256xf32>
      %20 = arith.maximumf %18, %19 : vector<16x256xf32>
      %21 = arith.truncf %20 : vector<16x256xf32> to vector<16x256xbf16>
      %c0_16 = arith.constant 0 : index
      %c0_17 = arith.constant 0 : index
      %22 = vector.load %arg7[%c0_16, %c0_17] : memref<16x256xbf16, #tpu.memory_space<vmem>>, vector<16x256xbf16>
      tpu.vector_store %arg7[%c0_16, %c0_17], %21 {strides = array<i32>} : memref<16x256xbf16, #tpu.memory_space<vmem>>, vector<16x256xbf16>,
    } else {
    }
    return
  }
  func.func @transform_0(%arg0: i32, %arg1: i32, %arg2: i32) -> (i32, i32) {
    %c0_i32 = arith.constant 0 : i32
    return %arg0, %arg2 : i32, i32
  }
  func.func @transform_1(%arg0: i32, %arg1: i32, %arg2: i32) -> (i32, i32) {
    %c0_i32 = arith.constant 0 : i32
    return %arg2, %arg1 : i32, i32
  }
  func.func @transform_2(%arg0: i32, %arg1: i32, %arg2: i32) -> (i32, i32) {
    %c0_i32 = arith.constant 0 : i32
    %c0_i32_0 = arith.constant 0 : i32
    return %c0_i32, %arg1 : i32, i32
  }
  func.func @transform_3(%arg0: i32, %arg1: i32, %arg2: i32) -> (i32, i32) {
    %c0_i32 = arith.constant 0 : i32
    %c0_i32_0 = arith.constant 0 : i32
    return %c0_i32, %arg1 : i32, i32
  }
  func.func @transform_4(%arg0: i32, %arg1: i32, %arg2: i32) -> (i32, i32) {
    %c0_i32 = arith.constant 0 : i32
    return %arg0, %arg1 : i32, i32
  }
}

module attributes {stable_mosaic.version = 11 : i64} {
  func.func @_matmul_bn_kernel(%arg0: i32, %arg1: i32, %arg2: i32, %arg3: memref<16x128xbf16, #tpu.memory_space<vmem>>, %arg4: memref<128x256xbf16, #tpu.memory_space<vmem>>, %arg5: memref<1x256xf32, #tpu.memory_space<vmem>>, %arg6: memref<1x256xf32, #tpu.memory_space<vmem>>, %arg7: memref<16x256xbf16, #tpu.memory_space<vmem>>, %arg8: memref<16x256xf32, #tpu.memory_space<vmem>>) attributes {dimension_semantics = [#tpu.dimension_semantics<parallel>, #tpu.dimension_semantics<parallel>, #tpu.dimension_semantics<arbitrary>], iteration_bounds = array<i64: 1, 1, 1>, scalar_prefetch = 0 : i64, scratch_operands = 1 : i64, tpu.core_type = #tpu.core_type<tc>, window_params = [{transform_indices = @transform_0, window_bounds = array<i64: 16, 128>}, {transform_indices = @transform_1, window_bounds = array<i64: 128, 256>}, {transform_indices = @transform_2, window_bounds = array<i64: 1, 256>}, {transform_indices = @transform_3, window_bounds = array<i64: 1, 256>}, {transform_indices = @transform_4, window_bounds = array<i64: 16, 256>}]} {
    %c0_i32 = arith.constant 0 : i32
    %0 = arith.cmpi eq, %arg2, %c0_i32 : i32
    %1 = arith.extui %0 : i1 to i32
    %c0_i32_0 = arith.constant 0 : i32
    %2 = arith.cmpi ne, %1, %c0_i32_0 : i32
    scf.if %2 {
      %cst_10 = arith.constant 0.000000e+00 : f32
      %12 = vector.broadcast %cst_10 : f32 to vector<16x256xf32>
      %c0_11 = arith.constant 0 : index
      %c0_12 = arith.constant 0 : index
      %13 = vector.load %arg8[%c0_11, %c0_12] : memref<16x256xf32, #tpu.memory_space<vmem>>, vector<16x256xf32>
      tpu.vector_store %arg8[%c0_11, %c0_12], %12 {strides = array<i32>} : memref<16x256xf32, #tpu.memory_space<vmem>>, vector<16x256xf32>,
    } else {
    }
    %c0 = arith.constant 0 : index
    %c0_1 = arith.constant 0 : index
    %3 = vector.load %arg8[%c0, %c0_1] : memref<16x256xf32, #tpu.memory_space<vmem>>, vector<16x256xf32>
    %c0_2 = arith.constant 0 : index
    %c0_3 = arith.constant 0 : index
    %4 = vector.load %arg3[%c0_2, %c0_3] : memref<16x128xbf16, #tpu.memory_space<vmem>>, vector<16x128xbf16>
    %c0_4 = arith.constant 0 : index
    %c0_5 = arith.constant 0 : index
    %5 = vector.load %arg4[%c0_4, %c0_5] : memref<128x256xbf16, #tpu.memory_space<vmem>>, vector<128x256xbf16>
    %cst = arith.constant dense<0.000000e+00> : vector<16x256xf32>
    %6 = tpu.matmul %4, %5, %cst {dimension_numbers = #tpu.dot_dimension_numbers<[1], [0], [0], [1], [0, 0, 1, 1], [], []>} : vector<16x128xbf16>, vector<128x256xbf16>, vector<16x256xf32> -> vector<16x256xf32>
    %7 = arith.addf %3, %6 : vector<16x256xf32>
    %c0_6 = arith.constant 0 : index
    %c0_7 = arith.constant 0 : index
    %8 = vector.load %arg8[%c0_6, %c0_7] : memref<16x256xf32, #tpu.memory_space<vmem>>, vector<16x256xf32>
    tpu.vector_store %arg8[%c0_6, %c0_7], %7 {strides = array<i32>} : memref<16x256xf32, #tpu.memory_space<vmem>>, vector<16x256xf32>,
    %c0_i32_8 = arith.constant 0 : i32
    %9 = arith.cmpi eq, %arg2, %c0_i32_8 : i32
    %10 = arith.extui %9 : i1 to i32
    %c0_i32_9 = arith.constant 0 : i32
    %11 = arith.cmpi ne, %10, %c0_i32_9 : i32
    scf.if %11 {
      %c0_10 = arith.constant 0 : index
      %c0_11 = arith.constant 0 : index
      %12 = vector.load %arg8[%c0_10, %c0_11] : memref<16x256xf32, #tpu.memory_space<vmem>>, vector<16x256xf32>
      %c0_12 = arith.constant 0 : index
      %c0_13 = arith.constant 0 : index
      %13 = vector.load %arg5[%c0_12, %c0_13] : memref<1x256xf32, #tpu.memory_space<vmem>>, vector<1x256xf32>
      %14 = vector.broadcast %13 : vector<1x256xf32> to vector<16x256xf32>
      %15 = arith.mulf %12, %14 : vector<16x256xf32>
      %c0_14 = arith.constant 0 : index
      %c0_15 = arith.constant 0 : index
      %16 = vector.load %arg6[%c0_14, %c0_15] : memref<1x256xf32, #tpu.memory_space<vmem>>, vector<1x256xf32>
      %17 = vector.broadcast %16 : vector<1x256xf32> to vector<16x256xf32>
      %18 = arith.addf %15, %17 : vector<16x256xf32>
      %19 = arith.truncf %18 : vector<16x256xf32> to vector<16x256xbf16>
      %c0_16 = arith.constant 0 : index
      %c0_17 = arith.constant 0 : index
      %20 = vector.load %arg7[%c0_16, %c0_17] : memref<16x256xbf16, #tpu.memory_space<vmem>>, vector<16x256xbf16>
      tpu.vector_store %arg7[%c0_16, %c0_17], %19 {strides = array<i32>} : memref<16x256xbf16, #tpu.memory_space<vmem>>, vector<16x256xbf16>,
    } else {
    }
    return
  }
  func.func @transform_0(%arg0: i32, %arg1: i32, %arg2: i32) -> (i32, i32) {
    %c0_i32 = arith.constant 0 : i32
    return %arg0, %arg2 : i32, i32
  }
  func.func @transform_1(%arg0: i32, %arg1: i32, %arg2: i32) -> (i32, i32) {
    %c0_i32 = arith.constant 0 : i32
    return %arg2, %arg1 : i32, i32
  }
  func.func @transform_2(%arg0: i32, %arg1: i32, %arg2: i32) -> (i32, i32) {
    %c0_i32 = arith.constant 0 : i32
    %c0_i32_0 = arith.constant 0 : i32
    return %c0_i32, %arg1 : i32, i32
  }
  func.func @transform_3(%arg0: i32, %arg1: i32, %arg2: i32) -> (i32, i32) {
    %c0_i32 = arith.constant 0 : i32
    %c0_i32_0 = arith.constant 0 : i32
    return %c0_i32, %arg1 : i32, i32
  }
  func.func @transform_4(%arg0: i32, %arg1: i32, %arg2: i32) -> (i32, i32) {
    %c0_i32 = arith.constant 0 : i32
    return %arg0, %arg1 : i32, i32
  }
}

module attributes {stable_mosaic.version = 11 : i64} {
  func.func @_matmul_bn_res_kernel(%arg0: i32, %arg1: i32, %arg2: i32, %arg3: memref<16x256xbf16, #tpu.memory_space<vmem>>, %arg4: memref<256x256xbf16, #tpu.memory_space<vmem>>, %arg5: memref<1x256xf32, #tpu.memory_space<vmem>>, %arg6: memref<1x256xf32, #tpu.memory_space<vmem>>, %arg7: memref<16x256xbf16, #tpu.memory_space<vmem>>, %arg8: memref<16x256xbf16, #tpu.memory_space<vmem>>, %arg9: memref<16x256xf32, #tpu.memory_space<vmem>>) attributes {dimension_semantics = [#tpu.dimension_semantics<parallel>, #tpu.dimension_semantics<parallel>, #tpu.dimension_semantics<arbitrary>], iteration_bounds = array<i64: 1, 1, 9>, scalar_prefetch = 0 : i64, scratch_operands = 1 : i64, tpu.core_type = #tpu.core_type<tc>, window_params = [{transform_indices = @transform_0, window_bounds = array<i64: 16, 256>}, {transform_indices = @transform_1, window_bounds = array<i64: 256, 256>}, {transform_indices = @transform_2, window_bounds = array<i64: 1, 256>}, {transform_indices = @transform_3, window_bounds = array<i64: 1, 256>}, {transform_indices = @transform_4, window_bounds = array<i64: 16, 256>}, {transform_indices = @transform_5, window_bounds = array<i64: 16, 256>}]} {
    %c0_i32 = arith.constant 0 : i32
    %0 = arith.cmpi eq, %arg2, %c0_i32 : i32
    %1 = arith.extui %0 : i1 to i32
    %c0_i32_0 = arith.constant 0 : i32
    %2 = arith.cmpi ne, %1, %c0_i32_0 : i32
    scf.if %2 {
      %cst_9 = arith.constant 0.000000e+00 : f32
      %12 = vector.broadcast %cst_9 : f32 to vector<16x256xf32>
      %c0_10 = arith.constant 0 : index
      %c0_11 = arith.constant 0 : index
      %13 = vector.load %arg9[%c0_10, %c0_11] : memref<16x256xf32, #tpu.memory_space<vmem>>, vector<16x256xf32>
      tpu.vector_store %arg9[%c0_10, %c0_11], %12 {strides = array<i32>} : memref<16x256xf32, #tpu.memory_space<vmem>>, vector<16x256xf32>,
    } else {
    }
    %c0 = arith.constant 0 : index
    %c0_1 = arith.constant 0 : index
    %3 = vector.load %arg9[%c0, %c0_1] : memref<16x256xf32, #tpu.memory_space<vmem>>, vector<16x256xf32>
    %c0_2 = arith.constant 0 : index
    %c0_3 = arith.constant 0 : index
    %4 = vector.load %arg3[%c0_2, %c0_3] : memref<16x256xbf16, #tpu.memory_space<vmem>>, vector<16x256xbf16>
    %c0_4 = arith.constant 0 : index
    %c0_5 = arith.constant 0 : index
    %5 = vector.load %arg4[%c0_4, %c0_5] : memref<256x256xbf16, #tpu.memory_space<vmem>>, vector<256x256xbf16>
    %cst = arith.constant dense<0.000000e+00> : vector<16x256xf32>
    %6 = tpu.matmul %4, %5, %cst {dimension_numbers = #tpu.dot_dimension_numbers<[1], [0], [0], [1], [0, 0, 1, 1], [], []>} : vector<16x256xbf16>, vector<256x256xbf16>, vector<16x256xf32> -> vector<16x256xf32>
    %7 = arith.addf %3, %6 : vector<16x256xf32>
    %c0_6 = arith.constant 0 : index
    %c0_7 = arith.constant 0 : index
    %8 = vector.load %arg9[%c0_6, %c0_7] : memref<16x256xf32, #tpu.memory_space<vmem>>, vector<16x256xf32>
    tpu.vector_store %arg9[%c0_6, %c0_7], %7 {strides = array<i32>} : memref<16x256xf32, #tpu.memory_space<vmem>>, vector<16x256xf32>,
    %c8_i32 = arith.constant 8 : i32
    %9 = arith.cmpi eq, %arg2, %c8_i32 : i32
    %10 = arith.extui %9 : i1 to i32
    %c0_i32_8 = arith.constant 0 : i32
    %11 = arith.cmpi ne, %10, %c0_i32_8 : i32
    scf.if %11 {
      %c0_9 = arith.constant 0 : index
      %c0_10 = arith.constant 0 : index
      %12 = vector.load %arg9[%c0_9, %c0_10] : memref<16x256xf32, #tpu.memory_space<vmem>>, vector<16x256xf32>
      %c0_11 = arith.constant 0 : index
      %c0_12 = arith.constant 0 : index
      %13 = vector.load %arg5[%c0_11, %c0_12] : memref<1x256xf32, #tpu.memory_space<vmem>>, vector<1x256xf32>
      %14 = vector.broadcast %13 : vector<1x256xf32> to vector<16x256xf32>
      %15 = arith.mulf %12, %14 : vector<16x256xf32>
      %c0_13 = arith.constant 0 : index
      %c0_14 = arith.constant 0 : index
      %16 = vector.load %arg6[%c0_13, %c0_14] : memref<1x256xf32, #tpu.memory_space<vmem>>, vector<1x256xf32>
      %17 = vector.broadcast %16 : vector<1x256xf32> to vector<16x256xf32>
      %18 = arith.addf %15, %17 : vector<16x256xf32>
      %c0_15 = arith.constant 0 : index
      %c0_16 = arith.constant 0 : index
      %19 = vector.load %arg7[%c0_15, %c0_16] : memref<16x256xbf16, #tpu.memory_space<vmem>>, vector<16x256xbf16>
      %20 = arith.extf %19 : vector<16x256xbf16> to vector<16x256xf32>
      %21 = arith.addf %18, %20 : vector<16x256xf32>
      %cst_17 = arith.constant 0.000000e+00 : f32
      %22 = vector.broadcast %cst_17 : f32 to vector<16x256xf32>
      %23 = arith.maximumf %21, %22 : vector<16x256xf32>
      %24 = arith.truncf %23 : vector<16x256xf32> to vector<16x256xbf16>
      %c0_18 = arith.constant 0 : index
      %c0_19 = arith.constant 0 : index
      %25 = vector.load %arg8[%c0_18, %c0_19] : memref<16x256xbf16, #tpu.memory_space<vmem>>, vector<16x256xbf16>
      tpu.vector_store %arg8[%c0_18, %c0_19], %24 {strides = array<i32>} : memref<16x256xbf16, #tpu.memory_space<vmem>>, vector<16x256xbf16>,
    } else {
    }
    return
  }
  func.func @transform_0(%arg0: i32, %arg1: i32, %arg2: i32) -> (i32, i32) {
    %c0_i32 = arith.constant 0 : i32
    return %arg0, %arg2 : i32, i32
  }
  func.func @transform_1(%arg0: i32, %arg1: i32, %arg2: i32) -> (i32, i32) {
    %c0_i32 = arith.constant 0 : i32
    return %arg2, %arg1 : i32, i32
  }
  func.func @transform_2(%arg0: i32, %arg1: i32, %arg2: i32) -> (i32, i32) {
    %c0_i32 = arith.constant 0 : i32
    %c0_i32_0 = arith.constant 0 : i32
    return %c0_i32, %arg1 : i32, i32
  }
  func.func @transform_3(%arg0: i32, %arg1: i32, %arg2: i32) -> (i32, i32) {
    %c0_i32 = arith.constant 0 : i32
    %c0_i32_0 = arith.constant 0 : i32
    return %c0_i32, %arg1 : i32, i32
  }
  func.func @transform_4(%arg0: i32, %arg1: i32, %arg2: i32) -> (i32, i32) {
    %c0_i32 = arith.constant 0 : i32
    return %arg0, %arg1 : i32, i32
  }
  func.func @transform_5(%arg0: i32, %arg1: i32, %arg2: i32) -> (i32, i32) {
    %c0_i32 = arith.constant 0 : i32
    return %arg0, %arg1 : i32, i32
  }
}

module attributes {stable_mosaic.version = 11 : i64} {
  func.func @_matmul_bn_kernel(%arg0: i32, %arg1: i32, %arg2: i32, %arg3: memref<16x256xbf16, #tpu.memory_space<vmem>>, %arg4: memref<256x256xbf16, #tpu.memory_space<vmem>>, %arg5: memref<1x256xf32, #tpu.memory_space<vmem>>, %arg6: memref<1x256xf32, #tpu.memory_space<vmem>>, %arg7: memref<16x256xbf16, #tpu.memory_space<vmem>>, %arg8: memref<16x256xf32, #tpu.memory_space<vmem>>) attributes {dimension_semantics = [#tpu.dimension_semantics<parallel>, #tpu.dimension_semantics<parallel>, #tpu.dimension_semantics<arbitrary>], iteration_bounds = array<i64: 1, 1, 9>, scalar_prefetch = 0 : i64, scratch_operands = 1 : i64, tpu.core_type = #tpu.core_type<tc>, window_params = [{transform_indices = @transform_0, window_bounds = array<i64: 16, 256>}, {transform_indices = @transform_1, window_bounds = array<i64: 256, 256>}, {transform_indices = @transform_2, window_bounds = array<i64: 1, 256>}, {transform_indices = @transform_3, window_bounds = array<i64: 1, 256>}, {transform_indices = @transform_4, window_bounds = array<i64: 16, 256>}]} {
    %c0_i32 = arith.constant 0 : i32
    %0 = arith.cmpi eq, %arg2, %c0_i32 : i32
    %1 = arith.extui %0 : i1 to i32
    %c0_i32_0 = arith.constant 0 : i32
    %2 = arith.cmpi ne, %1, %c0_i32_0 : i32
    scf.if %2 {
      %cst_9 = arith.constant 0.000000e+00 : f32
      %12 = vector.broadcast %cst_9 : f32 to vector<16x256xf32>
      %c0_10 = arith.constant 0 : index
      %c0_11 = arith.constant 0 : index
      %13 = vector.load %arg8[%c0_10, %c0_11] : memref<16x256xf32, #tpu.memory_space<vmem>>, vector<16x256xf32>
      tpu.vector_store %arg8[%c0_10, %c0_11], %12 {strides = array<i32>} : memref<16x256xf32, #tpu.memory_space<vmem>>, vector<16x256xf32>,
    } else {
    }
    %c0 = arith.constant 0 : index
    %c0_1 = arith.constant 0 : index
    %3 = vector.load %arg8[%c0, %c0_1] : memref<16x256xf32, #tpu.memory_space<vmem>>, vector<16x256xf32>
    %c0_2 = arith.constant 0 : index
    %c0_3 = arith.constant 0 : index
    %4 = vector.load %arg3[%c0_2, %c0_3] : memref<16x256xbf16, #tpu.memory_space<vmem>>, vector<16x256xbf16>
    %c0_4 = arith.constant 0 : index
    %c0_5 = arith.constant 0 : index
    %5 = vector.load %arg4[%c0_4, %c0_5] : memref<256x256xbf16, #tpu.memory_space<vmem>>, vector<256x256xbf16>
    %cst = arith.constant dense<0.000000e+00> : vector<16x256xf32>
    %6 = tpu.matmul %4, %5, %cst {dimension_numbers = #tpu.dot_dimension_numbers<[1], [0], [0], [1], [0, 0, 1, 1], [], []>} : vector<16x256xbf16>, vector<256x256xbf16>, vector<16x256xf32> -> vector<16x256xf32>
    %7 = arith.addf %3, %6 : vector<16x256xf32>
    %c0_6 = arith.constant 0 : index
    %c0_7 = arith.constant 0 : index
    %8 = vector.load %arg8[%c0_6, %c0_7] : memref<16x256xf32, #tpu.memory_space<vmem>>, vector<16x256xf32>
    tpu.vector_store %arg8[%c0_6, %c0_7], %7 {strides = array<i32>} : memref<16x256xf32, #tpu.memory_space<vmem>>, vector<16x256xf32>,
    %c8_i32 = arith.constant 8 : i32
    %9 = arith.cmpi eq, %arg2, %c8_i32 : i32
    %10 = arith.extui %9 : i1 to i32
    %c0_i32_8 = arith.constant 0 : i32
    %11 = arith.cmpi ne, %10, %c0_i32_8 : i32
    scf.if %11 {
      %c0_9 = arith.constant 0 : index
      %c0_10 = arith.constant 0 : index
      %12 = vector.load %arg8[%c0_9, %c0_10] : memref<16x256xf32, #tpu.memory_space<vmem>>, vector<16x256xf32>
      %c0_11 = arith.constant 0 : index
      %c0_12 = arith.constant 0 : index
      %13 = vector.load %arg5[%c0_11, %c0_12] : memref<1x256xf32, #tpu.memory_space<vmem>>, vector<1x256xf32>
      %14 = vector.broadcast %13 : vector<1x256xf32> to vector<16x256xf32>
      %15 = arith.mulf %12, %14 : vector<16x256xf32>
      %c0_13 = arith.constant 0 : index
      %c0_14 = arith.constant 0 : index
      %16 = vector.load %arg6[%c0_13, %c0_14] : memref<1x256xf32, #tpu.memory_space<vmem>>, vector<1x256xf32>
      %17 = vector.broadcast %16 : vector<1x256xf32> to vector<16x256xf32>
      %18 = arith.addf %15, %17 : vector<16x256xf32>
      %cst_15 = arith.constant 0.000000e+00 : f32
      %19 = vector.broadcast %cst_15 : f32 to vector<16x256xf32>
      %20 = arith.maximumf %18, %19 : vector<16x256xf32>
      %21 = arith.truncf %20 : vector<16x256xf32> to vector<16x256xbf16>
      %c0_16 = arith.constant 0 : index
      %c0_17 = arith.constant 0 : index
      %22 = vector.load %arg7[%c0_16, %c0_17] : memref<16x256xbf16, #tpu.memory_space<vmem>>, vector<16x256xbf16>
      tpu.vector_store %arg7[%c0_16, %c0_17], %21 {strides = array<i32>} : memref<16x256xbf16, #tpu.memory_space<vmem>>, vector<16x256xbf16>,
    } else {
    }
    return
  }
  func.func @transform_0(%arg0: i32, %arg1: i32, %arg2: i32) -> (i32, i32) {
    %c0_i32 = arith.constant 0 : i32
    return %arg0, %arg2 : i32, i32
  }
  func.func @transform_1(%arg0: i32, %arg1: i32, %arg2: i32) -> (i32, i32) {
    %c0_i32 = arith.constant 0 : i32
    return %arg2, %arg1 : i32, i32
  }
  func.func @transform_2(%arg0: i32, %arg1: i32, %arg2: i32) -> (i32, i32) {
    %c0_i32 = arith.constant 0 : i32
    %c0_i32_0 = arith.constant 0 : i32
    return %c0_i32, %arg1 : i32, i32
  }
  func.func @transform_3(%arg0: i32, %arg1: i32, %arg2: i32) -> (i32, i32) {
    %c0_i32 = arith.constant 0 : i32
    %c0_i32_0 = arith.constant 0 : i32
    return %c0_i32, %arg1 : i32, i32
  }
  func.func @transform_4(%arg0: i32, %arg1: i32, %arg2: i32) -> (i32, i32) {
    %c0_i32 = arith.constant 0 : i32
    return %arg0, %arg1 : i32, i32
  }
}

module attributes {stable_mosaic.version = 11 : i64} {
  func.func @_matmul_bn_kernel(%arg0: i32, %arg1: i32, %arg2: i32, %arg3: memref<16x256xbf16, #tpu.memory_space<vmem>>, %arg4: memref<256x256xbf16, #tpu.memory_space<vmem>>, %arg5: memref<1x256xf32, #tpu.memory_space<vmem>>, %arg6: memref<1x256xf32, #tpu.memory_space<vmem>>, %arg7: memref<16x256xbf16, #tpu.memory_space<vmem>>, %arg8: memref<16x256xf32, #tpu.memory_space<vmem>>) attributes {dimension_semantics = [#tpu.dimension_semantics<parallel>, #tpu.dimension_semantics<parallel>, #tpu.dimension_semantics<arbitrary>], iteration_bounds = array<i64: 1, 2, 9>, scalar_prefetch = 0 : i64, scratch_operands = 1 : i64, tpu.core_type = #tpu.core_type<tc>, window_params = [{transform_indices = @transform_0, window_bounds = array<i64: 16, 256>}, {transform_indices = @transform_1, window_bounds = array<i64: 256, 256>}, {transform_indices = @transform_2, window_bounds = array<i64: 1, 256>}, {transform_indices = @transform_3, window_bounds = array<i64: 1, 256>}, {transform_indices = @transform_4, window_bounds = array<i64: 16, 256>}]} {
    %c0_i32 = arith.constant 0 : i32
    %0 = arith.cmpi eq, %arg2, %c0_i32 : i32
    %1 = arith.extui %0 : i1 to i32
    %c0_i32_0 = arith.constant 0 : i32
    %2 = arith.cmpi ne, %1, %c0_i32_0 : i32
    scf.if %2 {
      %cst_9 = arith.constant 0.000000e+00 : f32
      %12 = vector.broadcast %cst_9 : f32 to vector<16x256xf32>
      %c0_10 = arith.constant 0 : index
      %c0_11 = arith.constant 0 : index
      %13 = vector.load %arg8[%c0_10, %c0_11] : memref<16x256xf32, #tpu.memory_space<vmem>>, vector<16x256xf32>
      tpu.vector_store %arg8[%c0_10, %c0_11], %12 {strides = array<i32>} : memref<16x256xf32, #tpu.memory_space<vmem>>, vector<16x256xf32>,
    } else {
    }
    %c0 = arith.constant 0 : index
    %c0_1 = arith.constant 0 : index
    %3 = vector.load %arg8[%c0, %c0_1] : memref<16x256xf32, #tpu.memory_space<vmem>>, vector<16x256xf32>
    %c0_2 = arith.constant 0 : index
    %c0_3 = arith.constant 0 : index
    %4 = vector.load %arg3[%c0_2, %c0_3] : memref<16x256xbf16, #tpu.memory_space<vmem>>, vector<16x256xbf16>
    %c0_4 = arith.constant 0 : index
    %c0_5 = arith.constant 0 : index
    %5 = vector.load %arg4[%c0_4, %c0_5] : memref<256x256xbf16, #tpu.memory_space<vmem>>, vector<256x256xbf16>
    %cst = arith.constant dense<0.000000e+00> : vector<16x256xf32>
    %6 = tpu.matmul %4, %5, %cst {dimension_numbers = #tpu.dot_dimension_numbers<[1], [0], [0], [1], [0, 0, 1, 1], [], []>} : vector<16x256xbf16>, vector<256x256xbf16>, vector<16x256xf32> -> vector<16x256xf32>
    %7 = arith.addf %3, %6 : vector<16x256xf32>
    %c0_6 = arith.constant 0 : index
    %c0_7 = arith.constant 0 : index
    %8 = vector.load %arg8[%c0_6, %c0_7] : memref<16x256xf32, #tpu.memory_space<vmem>>, vector<16x256xf32>
    tpu.vector_store %arg8[%c0_6, %c0_7], %7 {strides = array<i32>} : memref<16x256xf32, #tpu.memory_space<vmem>>, vector<16x256xf32>,
    %c8_i32 = arith.constant 8 : i32
    %9 = arith.cmpi eq, %arg2, %c8_i32 : i32
    %10 = arith.extui %9 : i1 to i32
    %c0_i32_8 = arith.constant 0 : i32
    %11 = arith.cmpi ne, %10, %c0_i32_8 : i32
    scf.if %11 {
      %c0_9 = arith.constant 0 : index
      %c0_10 = arith.constant 0 : index
      %12 = vector.load %arg8[%c0_9, %c0_10] : memref<16x256xf32, #tpu.memory_space<vmem>>, vector<16x256xf32>
      %c0_11 = arith.constant 0 : index
      %c0_12 = arith.constant 0 : index
      %13 = vector.load %arg5[%c0_11, %c0_12] : memref<1x256xf32, #tpu.memory_space<vmem>>, vector<1x256xf32>
      %14 = vector.broadcast %13 : vector<1x256xf32> to vector<16x256xf32>
      %15 = arith.mulf %12, %14 : vector<16x256xf32>
      %c0_13 = arith.constant 0 : index
      %c0_14 = arith.constant 0 : index
      %16 = vector.load %arg6[%c0_13, %c0_14] : memref<1x256xf32, #tpu.memory_space<vmem>>, vector<1x256xf32>
      %17 = vector.broadcast %16 : vector<1x256xf32> to vector<16x256xf32>
      %18 = arith.addf %15, %17 : vector<16x256xf32>
      %cst_15 = arith.constant 0.000000e+00 : f32
      %19 = vector.broadcast %cst_15 : f32 to vector<16x256xf32>
      %20 = arith.maximumf %18, %19 : vector<16x256xf32>
      %21 = arith.truncf %20 : vector<16x256xf32> to vector<16x256xbf16>
      %c0_16 = arith.constant 0 : index
      %c0_17 = arith.constant 0 : index
      %22 = vector.load %arg7[%c0_16, %c0_17] : memref<16x256xbf16, #tpu.memory_space<vmem>>, vector<16x256xbf16>
      tpu.vector_store %arg7[%c0_16, %c0_17], %21 {strides = array<i32>} : memref<16x256xbf16, #tpu.memory_space<vmem>>, vector<16x256xbf16>,
    } else {
    }
    return
  }
  func.func @transform_0(%arg0: i32, %arg1: i32, %arg2: i32) -> (i32, i32) {
    %c0_i32 = arith.constant 0 : i32
    return %arg0, %arg2 : i32, i32
  }
  func.func @transform_1(%arg0: i32, %arg1: i32, %arg2: i32) -> (i32, i32) {
    %c0_i32 = arith.constant 0 : i32
    return %arg2, %arg1 : i32, i32
  }
  func.func @transform_2(%arg0: i32, %arg1: i32, %arg2: i32) -> (i32, i32) {
    %c0_i32 = arith.constant 0 : i32
    %c0_i32_0 = arith.constant 0 : i32
    return %c0_i32, %arg1 : i32, i32
  }
  func.func @transform_3(%arg0: i32, %arg1: i32, %arg2: i32) -> (i32, i32) {
    %c0_i32 = arith.constant 0 : i32
    %c0_i32_0 = arith.constant 0 : i32
    return %c0_i32, %arg1 : i32, i32
  }
  func.func @transform_4(%arg0: i32, %arg1: i32, %arg2: i32) -> (i32, i32) {
    %c0_i32 = arith.constant 0 : i32
    return %arg0, %arg1 : i32, i32
  }
}

module attributes {stable_mosaic.version = 11 : i64} {
  func.func @_matmul_bn_kernel(%arg0: i32, %arg1: i32, %arg2: i32, %arg3: memref<16x256xbf16, #tpu.memory_space<vmem>>, %arg4: memref<256x256xbf16, #tpu.memory_space<vmem>>, %arg5: memref<1x256xf32, #tpu.memory_space<vmem>>, %arg6: memref<1x256xf32, #tpu.memory_space<vmem>>, %arg7: memref<16x256xbf16, #tpu.memory_space<vmem>>, %arg8: memref<16x256xf32, #tpu.memory_space<vmem>>) attributes {dimension_semantics = [#tpu.dimension_semantics<parallel>, #tpu.dimension_semantics<parallel>, #tpu.dimension_semantics<arbitrary>], iteration_bounds = array<i64: 1, 2, 1>, scalar_prefetch = 0 : i64, scratch_operands = 1 : i64, tpu.core_type = #tpu.core_type<tc>, window_params = [{transform_indices = @transform_0, window_bounds = array<i64: 16, 256>}, {transform_indices = @transform_1, window_bounds = array<i64: 256, 256>}, {transform_indices = @transform_2, window_bounds = array<i64: 1, 256>}, {transform_indices = @transform_3, window_bounds = array<i64: 1, 256>}, {transform_indices = @transform_4, window_bounds = array<i64: 16, 256>}]} {
    %c0_i32 = arith.constant 0 : i32
    %0 = arith.cmpi eq, %arg2, %c0_i32 : i32
    %1 = arith.extui %0 : i1 to i32
    %c0_i32_0 = arith.constant 0 : i32
    %2 = arith.cmpi ne, %1, %c0_i32_0 : i32
    scf.if %2 {
      %cst_10 = arith.constant 0.000000e+00 : f32
      %12 = vector.broadcast %cst_10 : f32 to vector<16x256xf32>
      %c0_11 = arith.constant 0 : index
      %c0_12 = arith.constant 0 : index
      %13 = vector.load %arg8[%c0_11, %c0_12] : memref<16x256xf32, #tpu.memory_space<vmem>>, vector<16x256xf32>
      tpu.vector_store %arg8[%c0_11, %c0_12], %12 {strides = array<i32>} : memref<16x256xf32, #tpu.memory_space<vmem>>, vector<16x256xf32>,
    } else {
    }
    %c0 = arith.constant 0 : index
    %c0_1 = arith.constant 0 : index
    %3 = vector.load %arg8[%c0, %c0_1] : memref<16x256xf32, #tpu.memory_space<vmem>>, vector<16x256xf32>
    %c0_2 = arith.constant 0 : index
    %c0_3 = arith.constant 0 : index
    %4 = vector.load %arg3[%c0_2, %c0_3] : memref<16x256xbf16, #tpu.memory_space<vmem>>, vector<16x256xbf16>
    %c0_4 = arith.constant 0 : index
    %c0_5 = arith.constant 0 : index
    %5 = vector.load %arg4[%c0_4, %c0_5] : memref<256x256xbf16, #tpu.memory_space<vmem>>, vector<256x256xbf16>
    %cst = arith.constant dense<0.000000e+00> : vector<16x256xf32>
    %6 = tpu.matmul %4, %5, %cst {dimension_numbers = #tpu.dot_dimension_numbers<[1], [0], [0], [1], [0, 0, 1, 1], [], []>} : vector<16x256xbf16>, vector<256x256xbf16>, vector<16x256xf32> -> vector<16x256xf32>
    %7 = arith.addf %3, %6 : vector<16x256xf32>
    %c0_6 = arith.constant 0 : index
    %c0_7 = arith.constant 0 : index
    %8 = vector.load %arg8[%c0_6, %c0_7] : memref<16x256xf32, #tpu.memory_space<vmem>>, vector<16x256xf32>
    tpu.vector_store %arg8[%c0_6, %c0_7], %7 {strides = array<i32>} : memref<16x256xf32, #tpu.memory_space<vmem>>, vector<16x256xf32>,
    %c0_i32_8 = arith.constant 0 : i32
    %9 = arith.cmpi eq, %arg2, %c0_i32_8 : i32
    %10 = arith.extui %9 : i1 to i32
    %c0_i32_9 = arith.constant 0 : i32
    %11 = arith.cmpi ne, %10, %c0_i32_9 : i32
    scf.if %11 {
      %c0_10 = arith.constant 0 : index
      %c0_11 = arith.constant 0 : index
      %12 = vector.load %arg8[%c0_10, %c0_11] : memref<16x256xf32, #tpu.memory_space<vmem>>, vector<16x256xf32>
      %c0_12 = arith.constant 0 : index
      %c0_13 = arith.constant 0 : index
      %13 = vector.load %arg5[%c0_12, %c0_13] : memref<1x256xf32, #tpu.memory_space<vmem>>, vector<1x256xf32>
      %14 = vector.broadcast %13 : vector<1x256xf32> to vector<16x256xf32>
      %15 = arith.mulf %12, %14 : vector<16x256xf32>
      %c0_14 = arith.constant 0 : index
      %c0_15 = arith.constant 0 : index
      %16 = vector.load %arg6[%c0_14, %c0_15] : memref<1x256xf32, #tpu.memory_space<vmem>>, vector<1x256xf32>
      %17 = vector.broadcast %16 : vector<1x256xf32> to vector<16x256xf32>
      %18 = arith.addf %15, %17 : vector<16x256xf32>
      %19 = arith.truncf %18 : vector<16x256xf32> to vector<16x256xbf16>
      %c0_16 = arith.constant 0 : index
      %c0_17 = arith.constant 0 : index
      %20 = vector.load %arg7[%c0_16, %c0_17] : memref<16x256xbf16, #tpu.memory_space<vmem>>, vector<16x256xbf16>
      tpu.vector_store %arg7[%c0_16, %c0_17], %19 {strides = array<i32>} : memref<16x256xbf16, #tpu.memory_space<vmem>>, vector<16x256xbf16>,
    } else {
    }
    return
  }
  func.func @transform_0(%arg0: i32, %arg1: i32, %arg2: i32) -> (i32, i32) {
    %c0_i32 = arith.constant 0 : i32
    return %arg0, %arg2 : i32, i32
  }
  func.func @transform_1(%arg0: i32, %arg1: i32, %arg2: i32) -> (i32, i32) {
    %c0_i32 = arith.constant 0 : i32
    return %arg2, %arg1 : i32, i32
  }
  func.func @transform_2(%arg0: i32, %arg1: i32, %arg2: i32) -> (i32, i32) {
    %c0_i32 = arith.constant 0 : i32
    %c0_i32_0 = arith.constant 0 : i32
    return %c0_i32, %arg1 : i32, i32
  }
  func.func @transform_3(%arg0: i32, %arg1: i32, %arg2: i32) -> (i32, i32) {
    %c0_i32 = arith.constant 0 : i32
    %c0_i32_0 = arith.constant 0 : i32
    return %c0_i32, %arg1 : i32, i32
  }
  func.func @transform_4(%arg0: i32, %arg1: i32, %arg2: i32) -> (i32, i32) {
    %c0_i32 = arith.constant 0 : i32
    return %arg0, %arg1 : i32, i32
  }
}

module attributes {stable_mosaic.version = 11 : i64} {
  func.func @_matmul_bn_res_kernel(%arg0: i32, %arg1: i32, %arg2: i32, %arg3: memref<16x512xbf16, #tpu.memory_space<vmem>>, %arg4: memref<512x256xbf16, #tpu.memory_space<vmem>>, %arg5: memref<1x256xf32, #tpu.memory_space<vmem>>, %arg6: memref<1x256xf32, #tpu.memory_space<vmem>>, %arg7: memref<16x256xbf16, #tpu.memory_space<vmem>>, %arg8: memref<16x256xbf16, #tpu.memory_space<vmem>>, %arg9: memref<16x256xf32, #tpu.memory_space<vmem>>) attributes {dimension_semantics = [#tpu.dimension_semantics<parallel>, #tpu.dimension_semantics<parallel>, #tpu.dimension_semantics<arbitrary>], iteration_bounds = array<i64: 1, 2, 9>, scalar_prefetch = 0 : i64, scratch_operands = 1 : i64, tpu.core_type = #tpu.core_type<tc>, window_params = [{transform_indices = @transform_0, window_bounds = array<i64: 16, 512>}, {transform_indices = @transform_1, window_bounds = array<i64: 512, 256>}, {transform_indices = @transform_2, window_bounds = array<i64: 1, 256>}, {transform_indices = @transform_3, window_bounds = array<i64: 1, 256>}, {transform_indices = @transform_4, window_bounds = array<i64: 16, 256>}, {transform_indices = @transform_5, window_bounds = array<i64: 16, 256>}]} {
    %c0_i32 = arith.constant 0 : i32
    %0 = arith.cmpi eq, %arg2, %c0_i32 : i32
    %1 = arith.extui %0 : i1 to i32
    %c0_i32_0 = arith.constant 0 : i32
    %2 = arith.cmpi ne, %1, %c0_i32_0 : i32
    scf.if %2 {
      %cst_9 = arith.constant 0.000000e+00 : f32
      %12 = vector.broadcast %cst_9 : f32 to vector<16x256xf32>
      %c0_10 = arith.constant 0 : index
      %c0_11 = arith.constant 0 : index
      %13 = vector.load %arg9[%c0_10, %c0_11] : memref<16x256xf32, #tpu.memory_space<vmem>>, vector<16x256xf32>
      tpu.vector_store %arg9[%c0_10, %c0_11], %12 {strides = array<i32>} : memref<16x256xf32, #tpu.memory_space<vmem>>, vector<16x256xf32>,
    } else {
    }
    %c0 = arith.constant 0 : index
    %c0_1 = arith.constant 0 : index
    %3 = vector.load %arg9[%c0, %c0_1] : memref<16x256xf32, #tpu.memory_space<vmem>>, vector<16x256xf32>
    %c0_2 = arith.constant 0 : index
    %c0_3 = arith.constant 0 : index
    %4 = vector.load %arg3[%c0_2, %c0_3] : memref<16x512xbf16, #tpu.memory_space<vmem>>, vector<16x512xbf16>
    %c0_4 = arith.constant 0 : index
    %c0_5 = arith.constant 0 : index
    %5 = vector.load %arg4[%c0_4, %c0_5] : memref<512x256xbf16, #tpu.memory_space<vmem>>, vector<512x256xbf16>
    %cst = arith.constant dense<0.000000e+00> : vector<16x256xf32>
    %6 = tpu.matmul %4, %5, %cst {dimension_numbers = #tpu.dot_dimension_numbers<[1], [0], [0], [1], [0, 0, 1, 1], [], []>} : vector<16x512xbf16>, vector<512x256xbf16>, vector<16x256xf32> -> vector<16x256xf32>
    %7 = arith.addf %3, %6 : vector<16x256xf32>
    %c0_6 = arith.constant 0 : index
    %c0_7 = arith.constant 0 : index
    %8 = vector.load %arg9[%c0_6, %c0_7] : memref<16x256xf32, #tpu.memory_space<vmem>>, vector<16x256xf32>
    tpu.vector_store %arg9[%c0_6, %c0_7], %7 {strides = array<i32>} : memref<16x256xf32, #tpu.memory_space<vmem>>, vector<16x256xf32>,
    %c8_i32 = arith.constant 8 : i32
    %9 = arith.cmpi eq, %arg2, %c8_i32 : i32
    %10 = arith.extui %9 : i1 to i32
    %c0_i32_8 = arith.constant 0 : i32
    %11 = arith.cmpi ne, %10, %c0_i32_8 : i32
    scf.if %11 {
      %c0_9 = arith.constant 0 : index
      %c0_10 = arith.constant 0 : index
      %12 = vector.load %arg9[%c0_9, %c0_10] : memref<16x256xf32, #tpu.memory_space<vmem>>, vector<16x256xf32>
      %c0_11 = arith.constant 0 : index
      %c0_12 = arith.constant 0 : index
      %13 = vector.load %arg5[%c0_11, %c0_12] : memref<1x256xf32, #tpu.memory_space<vmem>>, vector<1x256xf32>
      %14 = vector.broadcast %13 : vector<1x256xf32> to vector<16x256xf32>
      %15 = arith.mulf %12, %14 : vector<16x256xf32>
      %c0_13 = arith.constant 0 : index
      %c0_14 = arith.constant 0 : index
      %16 = vector.load %arg6[%c0_13, %c0_14] : memref<1x256xf32, #tpu.memory_space<vmem>>, vector<1x256xf32>
      %17 = vector.broadcast %16 : vector<1x256xf32> to vector<16x256xf32>
      %18 = arith.addf %15, %17 : vector<16x256xf32>
      %c0_15 = arith.constant 0 : index
      %c0_16 = arith.constant 0 : index
      %19 = vector.load %arg7[%c0_15, %c0_16] : memref<16x256xbf16, #tpu.memory_space<vmem>>, vector<16x256xbf16>
      %20 = arith.extf %19 : vector<16x256xbf16> to vector<16x256xf32>
      %21 = arith.addf %18, %20 : vector<16x256xf32>
      %cst_17 = arith.constant 0.000000e+00 : f32
      %22 = vector.broadcast %cst_17 : f32 to vector<16x256xf32>
      %23 = arith.maximumf %21, %22 : vector<16x256xf32>
      %24 = arith.truncf %23 : vector<16x256xf32> to vector<16x256xbf16>
      %c0_18 = arith.constant 0 : index
      %c0_19 = arith.constant 0 : index
      %25 = vector.load %arg8[%c0_18, %c0_19] : memref<16x256xbf16, #tpu.memory_space<vmem>>, vector<16x256xbf16>
      tpu.vector_store %arg8[%c0_18, %c0_19], %24 {strides = array<i32>} : memref<16x256xbf16, #tpu.memory_space<vmem>>, vector<16x256xbf16>,
    } else {
    }
    return
  }
  func.func @transform_0(%arg0: i32, %arg1: i32, %arg2: i32) -> (i32, i32) {
    %c0_i32 = arith.constant 0 : i32
    return %arg0, %arg2 : i32, i32
  }
  func.func @transform_1(%arg0: i32, %arg1: i32, %arg2: i32) -> (i32, i32) {
    %c0_i32 = arith.constant 0 : i32
    return %arg2, %arg1 : i32, i32
  }
  func.func @transform_2(%arg0: i32, %arg1: i32, %arg2: i32) -> (i32, i32) {
    %c0_i32 = arith.constant 0 : i32
    %c0_i32_0 = arith.constant 0 : i32
    return %c0_i32, %arg1 : i32, i32
  }
  func.func @transform_3(%arg0: i32, %arg1: i32, %arg2: i32) -> (i32, i32) {
    %c0_i32 = arith.constant 0 : i32
    %c0_i32_0 = arith.constant 0 : i32
    return %c0_i32, %arg1 : i32, i32
  }
  func.func @transform_4(%arg0: i32, %arg1: i32, %arg2: i32) -> (i32, i32) {
    %c0_i32 = arith.constant 0 : i32
    return %arg0, %arg1 : i32, i32
  }
  func.func @transform_5(%arg0: i32, %arg1: i32, %arg2: i32) -> (i32, i32) {
    %c0_i32 = arith.constant 0 : i32
    return %arg0, %arg1 : i32, i32
  }
}

module attributes {stable_mosaic.version = 11 : i64} {
  func.func @_matmul_bn_kernel(%arg0: i32, %arg1: i32, %arg2: i32, %arg3: memref<16x512xbf16, #tpu.memory_space<vmem>>, %arg4: memref<512x256xbf16, #tpu.memory_space<vmem>>, %arg5: memref<1x256xf32, #tpu.memory_space<vmem>>, %arg6: memref<1x256xf32, #tpu.memory_space<vmem>>, %arg7: memref<16x256xbf16, #tpu.memory_space<vmem>>, %arg8: memref<16x256xf32, #tpu.memory_space<vmem>>) attributes {dimension_semantics = [#tpu.dimension_semantics<parallel>, #tpu.dimension_semantics<parallel>, #tpu.dimension_semantics<arbitrary>], iteration_bounds = array<i64: 1, 2, 9>, scalar_prefetch = 0 : i64, scratch_operands = 1 : i64, tpu.core_type = #tpu.core_type<tc>, window_params = [{transform_indices = @transform_0, window_bounds = array<i64: 16, 512>}, {transform_indices = @transform_1, window_bounds = array<i64: 512, 256>}, {transform_indices = @transform_2, window_bounds = array<i64: 1, 256>}, {transform_indices = @transform_3, window_bounds = array<i64: 1, 256>}, {transform_indices = @transform_4, window_bounds = array<i64: 16, 256>}]} {
    %c0_i32 = arith.constant 0 : i32
    %0 = arith.cmpi eq, %arg2, %c0_i32 : i32
    %1 = arith.extui %0 : i1 to i32
    %c0_i32_0 = arith.constant 0 : i32
    %2 = arith.cmpi ne, %1, %c0_i32_0 : i32
    scf.if %2 {
      %cst_9 = arith.constant 0.000000e+00 : f32
      %12 = vector.broadcast %cst_9 : f32 to vector<16x256xf32>
      %c0_10 = arith.constant 0 : index
      %c0_11 = arith.constant 0 : index
      %13 = vector.load %arg8[%c0_10, %c0_11] : memref<16x256xf32, #tpu.memory_space<vmem>>, vector<16x256xf32>
      tpu.vector_store %arg8[%c0_10, %c0_11], %12 {strides = array<i32>} : memref<16x256xf32, #tpu.memory_space<vmem>>, vector<16x256xf32>,
    } else {
    }
    %c0 = arith.constant 0 : index
    %c0_1 = arith.constant 0 : index
    %3 = vector.load %arg8[%c0, %c0_1] : memref<16x256xf32, #tpu.memory_space<vmem>>, vector<16x256xf32>
    %c0_2 = arith.constant 0 : index
    %c0_3 = arith.constant 0 : index
    %4 = vector.load %arg3[%c0_2, %c0_3] : memref<16x512xbf16, #tpu.memory_space<vmem>>, vector<16x512xbf16>
    %c0_4 = arith.constant 0 : index
    %c0_5 = arith.constant 0 : index
    %5 = vector.load %arg4[%c0_4, %c0_5] : memref<512x256xbf16, #tpu.memory_space<vmem>>, vector<512x256xbf16>
    %cst = arith.constant dense<0.000000e+00> : vector<16x256xf32>
    %6 = tpu.matmul %4, %5, %cst {dimension_numbers = #tpu.dot_dimension_numbers<[1], [0], [0], [1], [0, 0, 1, 1], [], []>} : vector<16x512xbf16>, vector<512x256xbf16>, vector<16x256xf32> -> vector<16x256xf32>
    %7 = arith.addf %3, %6 : vector<16x256xf32>
    %c0_6 = arith.constant 0 : index
    %c0_7 = arith.constant 0 : index
    %8 = vector.load %arg8[%c0_6, %c0_7] : memref<16x256xf32, #tpu.memory_space<vmem>>, vector<16x256xf32>
    tpu.vector_store %arg8[%c0_6, %c0_7], %7 {strides = array<i32>} : memref<16x256xf32, #tpu.memory_space<vmem>>, vector<16x256xf32>,
    %c8_i32 = arith.constant 8 : i32
    %9 = arith.cmpi eq, %arg2, %c8_i32 : i32
    %10 = arith.extui %9 : i1 to i32
    %c0_i32_8 = arith.constant 0 : i32
    %11 = arith.cmpi ne, %10, %c0_i32_8 : i32
    scf.if %11 {
      %c0_9 = arith.constant 0 : index
      %c0_10 = arith.constant 0 : index
      %12 = vector.load %arg8[%c0_9, %c0_10] : memref<16x256xf32, #tpu.memory_space<vmem>>, vector<16x256xf32>
      %c0_11 = arith.constant 0 : index
      %c0_12 = arith.constant 0 : index
      %13 = vector.load %arg5[%c0_11, %c0_12] : memref<1x256xf32, #tpu.memory_space<vmem>>, vector<1x256xf32>
      %14 = vector.broadcast %13 : vector<1x256xf32> to vector<16x256xf32>
      %15 = arith.mulf %12, %14 : vector<16x256xf32>
      %c0_13 = arith.constant 0 : index
      %c0_14 = arith.constant 0 : index
      %16 = vector.load %arg6[%c0_13, %c0_14] : memref<1x256xf32, #tpu.memory_space<vmem>>, vector<1x256xf32>
      %17 = vector.broadcast %16 : vector<1x256xf32> to vector<16x256xf32>
      %18 = arith.addf %15, %17 : vector<16x256xf32>
      %cst_15 = arith.constant 0.000000e+00 : f32
      %19 = vector.broadcast %cst_15 : f32 to vector<16x256xf32>
      %20 = arith.maximumf %18, %19 : vector<16x256xf32>
      %21 = arith.truncf %20 : vector<16x256xf32> to vector<16x256xbf16>
      %c0_16 = arith.constant 0 : index
      %c0_17 = arith.constant 0 : index
      %22 = vector.load %arg7[%c0_16, %c0_17] : memref<16x256xbf16, #tpu.memory_space<vmem>>, vector<16x256xbf16>
      tpu.vector_store %arg7[%c0_16, %c0_17], %21 {strides = array<i32>} : memref<16x256xbf16, #tpu.memory_space<vmem>>, vector<16x256xbf16>,
    } else {
    }
    return
  }
  func.func @transform_0(%arg0: i32, %arg1: i32, %arg2: i32) -> (i32, i32) {
    %c0_i32 = arith.constant 0 : i32
    return %arg0, %arg2 : i32, i32
  }
  func.func @transform_1(%arg0: i32, %arg1: i32, %arg2: i32) -> (i32, i32) {
    %c0_i32 = arith.constant 0 : i32
    return %arg2, %arg1 : i32, i32
  }
  func.func @transform_2(%arg0: i32, %arg1: i32, %arg2: i32) -> (i32, i32) {
    %c0_i32 = arith.constant 0 : i32
    %c0_i32_0 = arith.constant 0 : i32
    return %c0_i32, %arg1 : i32, i32
  }
  func.func @transform_3(%arg0: i32, %arg1: i32, %arg2: i32) -> (i32, i32) {
    %c0_i32 = arith.constant 0 : i32
    %c0_i32_0 = arith.constant 0 : i32
    return %c0_i32, %arg1 : i32, i32
  }
  func.func @transform_4(%arg0: i32, %arg1: i32, %arg2: i32) -> (i32, i32) {
    %c0_i32 = arith.constant 0 : i32
    return %arg0, %arg1 : i32, i32
  }
}

module attributes {stable_mosaic.version = 11 : i64} {
  func.func @_gap_kernel(%arg0: memref<2x1x512xbf16, #tpu.memory_space<vmem>>, %arg1: memref<2x512xf32, #tpu.memory_space<vmem>>) attributes {dimension_semantics = [], scalar_prefetch = 0 : i64, scratch_operands = 0 : i64, tpu.core_type = #tpu.core_type<tc>} {
    %c0 = arith.constant 0 : index
    %c0_0 = arith.constant 0 : index
    %c0_1 = arith.constant 0 : index
    %0 = vector.load %arg0[%c0, %c0_0, %c0_1] : memref<2x1x512xbf16, #tpu.memory_space<vmem>>, vector<2x1x512xbf16>
    %1 = arith.extf %0 : vector<2x1x512xbf16> to vector<2x1x512xf32>
    %cst = arith.constant dense<0.000000e+00> : vector<2x512xf32>
    %2 = vector.multi_reduction <add>, %1, %cst [1] : vector<2x1x512xf32> to vector<2x512xf32>
    %cst_2 = arith.constant 1.000000e+00 : f32
    %3 = vector.broadcast %cst_2 : f32 to vector<2x512xf32>
    %4 = arith.divf %2, %3 : vector<2x512xf32>
    %c0_3 = arith.constant 0 : index
    %c0_4 = arith.constant 0 : index
    %5 = vector.load %arg1[%c0_3, %c0_4] : memref<2x512xf32, #tpu.memory_space<vmem>>, vector<2x512xf32>
    tpu.vector_store %arg1[%c0_3, %c0_4], %4 {strides = array<i32>} : memref<2x512xf32, #tpu.memory_space<vmem>>, vector<2x512xf32>,
    return
  }
}

</mosaic_0001>

<bundles_post_ra>
// kernel: uresnet_forward.23
= control target key start
LH: loop header
LB: loop body
LE: loop exit
PB: predicated region body
PF: predicated region fallthrough
CT: control target
= control target key end

     0   :  { %vm45_vm0 = vcmask 519168   ;;  %s365_s0 = inlined_call_operand.vmem [shape: bf16[9,32,64], index: 0, kind: input, shape index: {}]   ;;  %s366_s1 = inlined_call_operand.vmem [shape: bf16[32,64], index: 1, kind: output, shape index: {}]  }
   0x1   :  { %v9_v0 = vld [vmem:[%s365_s0] sm:$0xf]  ;;  %v13_v1 = vld [vmem:[%s365_s0 + $0x10] sm:$0xf]  ;;  %v10_v12 = vld [vmem:[%s365_s0 + $0x4] sm:$0xf] }
   0x2   :  { %v17_v2 = vld [vmem:[%s365_s0 + $0x20] sm:$0xf]  ;;  %v21_v3 = vld [vmem:[%s365_s0 + $0x30] sm:$0xf]  ;;  %v48_v4 = vsel %vm45_vm0, %v9_v0, 4286644096 }
   0x3   :  { %v51_v5 = vsel %vm45_vm0, %v13_v1, 4286644096  ;;  %v55_v6 = vsel %vm45_vm0, %v17_v2, 4286644096  ;;  %v25_v7 = vld [vmem:[%s365_s0 + $0x40] sm:$0xf] }
   0x4   :  { %v53_v8 = vmax.bf16 %v51_v5, %v48_v4  ;;  %v29_v9 = vld [vmem:[%s365_s0 + $0x50] sm:$0xf]  ;;  %v59_v10 = vsel %vm45_vm0, %v21_v3, 4286644096  ;;  %v14_v13 = vld [vmem:[%s365_s0 + $0x14] sm:$0xf] }
   0x5   :  { %v18_v14 = vld [vmem:[%s365_s0 + $0x24] sm:$0xf]  ;;  %v63_v15 = vsel %vm45_vm0, %v25_v7, 4286644096  ;;  %v33_v16 = vld [vmem:[%s365_s0 + $0x60] sm:$0xf] }
   0x6   :  { %v57_v11 = vmax.bf16 %v55_v6, %v53_v8  ;;  %v67_v18 = vsel %vm45_vm0, %v29_v9, 4286644096  ;;  %v22_v19 = vld [vmem:[%s365_s0 + $0x34] sm:$0xf]  ;;  %v83_v20 = vsel %vm45_vm0, %v10_v12, 4286644096 }
   0x7   :  { %v86_v21 = vsel %vm45_vm0, %v14_v13, 4286644096  ;;  %v90_v22 = vsel %vm45_vm0, %v18_v14, 4286644096  ;;  %v37_v23 = vld [vmem:[%s365_s0 + $0x70] sm:$0xf] }
   0x8   :  { %v61_v17 = vmax.bf16 %v59_v10, %v57_v11  ;;  %v41_v24 = vld [vmem:[%s365_s0 + $0x80] sm:$0xf]  ;;  %v26_v26 = vld [vmem:[%s365_s0 + $0x44] sm:$0xf]  ;;  %v88_v27 = vmax.bf16 %v86_v21, %v83_v20  ;;  %v71_v28 = vsel %vm45_vm0, %v33_v16, 4286644096 }
   0x9   :  { %v30_v29 = vld [vmem:[%s365_s0 + $0x54] sm:$0xf]  ;;  %v94_v30 = vsel %vm45_vm0, %v22_v19, 4286644096  ;;  %v11_v33 = vld [vmem:[%s365_s0 + $0x8] sm:$0xf] }
   0xa   :  { %v65_v25 = vmax.bf16 %v63_v15, %v61_v17  ;;  %v92_v32 = vmax.bf16 %v90_v22, %v88_v27  ;;  %v15_v34 = vld [vmem:[%s365_s0 + $0x18] sm:$0xf]  ;;  %v19_v35 = vld [vmem:[%s365_s0 + $0x28] sm:$0xf]  ;;  %v75_v36 = vsel %vm45_vm0, %v37_v23, 4286644096 }
   0xb   :  { %v79_v37 = vsel %vm45_vm0, %v41_v24, 4286644096  ;;  %v98_v38 = vsel %vm45_vm0, %v26_v26, 4286644096  ;;  %v34_v40 = vld [vmem:[%s365_s0 + $0x64] sm:$0xf] }
   0xc   :  { %v69_v31 = vmax.bf16 %v67_v18, %v65_v25  ;;  %v96_v41 = vmax.bf16 %v94_v30, %v92_v32  ;;  %v102_v42 = vsel %vm45_vm0, %v30_v29, 4286644096  ;;  %v23_v43 = vld [vmem:[%s365_s0 + $0x38] sm:$0xf]  ;;  %v118_v44 = vsel %vm45_vm0, %v11_v33, 4286644096 }
   0xd   :  { %v121_v45 = vsel %vm45_vm0, %v15_v34, 4286644096  ;;  %v125_v46 = vsel %vm45_vm0, %v19_v35, 4286644096  ;;  %v38_v48 = vld [vmem:[%s365_s0 + $0x74] sm:$0xf] }
   0xe   :  { %v73_v39 = vmax.bf16 %v71_v28, %v69_v31  ;;  %v42_v49 = vld [vmem:[%s365_s0 + $0x84] sm:$0xf]  ;;  %v100_v50 = vmax.bf16 %v98_v38, %v96_v41  ;;  %v27_v51 = vld [vmem:[%s365_s0 + $0x48] sm:$0xf]  ;;  %v123_v52 = vmax.bf16 %v121_v45, %v118_v44  ;;  %v106_v53 = vsel %vm45_vm0, %v34_v40, 4286644096 }
   0xf   :  { %v31_v54 = vld [vmem:[%s365_s0 + $0x58] sm:$0xf]  ;;  %v129_v55 = vsel %vm45_vm0, %v23_v43, 4286644096  ;;  %v12_v59 = vld [vmem:[%s365_s0 + $0xc] sm:$0xf] }
  0x10   :  { %v77_v47 = vmax.bf16 %v75_v36, %v73_v39  ;;  %v104_v57 = vmax.bf16 %v102_v42, %v100_v50  ;;  %v127_v58 = vmax.bf16 %v125_v46, %v123_v52  ;;  %v16_v60 = vld [vmem:[%s365_s0 + $0x1c] sm:$0xf]  ;;  %v20_v61 = vld [vmem:[%s365_s0 + $0x2c] sm:$0xf]  ;;  %v110_v62 = vsel %vm45_vm0, %v38_v48, 4286644096 }
  0x11   :  { %v114_v63 = vsel %vm45_vm0, %v42_v49, 4286644096  ;;  %v133_v0 = vsel %vm45_vm0, %v27_v51, 4286644096  ;;  %v35_v2 = vld [vmem:[%s365_s0 + $0x68] sm:$0xf] }
  0x12   :  { %v81_v56 = vmax.bf16 %v79_v37, %v77_v47  ;;  %v108_v1 = vmax.bf16 %v106_v53, %v104_v57  ;;  %v131_v3 = vmax.bf16 %v129_v55, %v127_v58  ;;  %v137_v4 = vsel %vm45_vm0, %v31_v54, 4286644096  ;;  %v24_v5 = vld [vmem:[%s365_s0 + $0x3c] sm:$0xf]  ;;  %v39_v10 = vld [vmem:[%s365_s0 + $0x78] sm:$0xf] }
  0x13   :  { %v153_v6 = vsel %vm45_vm0, %v12_v59, 4286644096  ;;  %v156_v7 = vsel %vm45_vm0, %v16_v60, 4286644096  ;;  %v160_v8 = vsel %vm45_vm0, %v20_v61, 4286644096 }
  0x14   :  { %187 = vst.msk [vmem:[%s366_s1] sm:$0xf] %vm45_vm0, %v81_v56  ;;  %v112_v9 = vmax.bf16 %v110_v62, %v108_v1  ;;  %v135_v11 = vmax.bf16 %v133_v0, %v131_v3  ;;  %v28_v12 = vld [vmem:[%s365_s0 + $0x4c] sm:$0xf]  ;;  %v158_v13 = vmax.bf16 %v156_v7, %v153_v6  ;;  %v141_v14 = vsel %vm45_vm0, %v35_v2, 4286644096 }
  0x15   :  { %v164_v15 = vsel %vm45_vm0, %v24_v5, 4286644096  ;;  %v43_v17 = vld [vmem:[%s365_s0 + $0x88] sm:$0xf]  ;;  %v32_v19 = vld [vmem:[%s365_s0 + $0x5c] sm:$0xf] }
  0x16   :  { %v116_v16 = vmax.bf16 %v114_v63, %v112_v9  ;;  %v139_v18 = vmax.bf16 %v137_v4, %v135_v11  ;;  %v162_v20 = vmax.bf16 %v160_v8, %v158_v13  ;;  %v145_v21 = vsel %vm45_vm0, %v39_v10, 4286644096  ;;  %v36_v24 = vld [vmem:[%s365_s0 + $0x6c] sm:$0xf]  ;;  %v40_v29 = vld [vmem:[%s365_s0 + $0x7c] sm:$0xf] }
  0x17   :  { %v168_v22 = vsel %vm45_vm0, %v28_v12, 4286644096  ;;  %v149_v26 = vsel %vm45_vm0, %v43_v17, 4286644096  ;;  %v172_v27 = vsel %vm45_vm0, %v32_v19, 4286644096 }
  0x18   :  { %188 = vst.msk [vmem:[%s366_s1 + $0x4] sm:$0xf] %vm45_vm0, %v116_v16  ;;  %v143_v23 = vmax.bf16 %v141_v14, %v139_v18  ;;  %v166_v25 = vmax.bf16 %v164_v15, %v162_v20  ;;  %v176_v31 = vsel %vm45_vm0, %v36_v24, 4286644096  ;;  %v44_v33 = vld [vmem:[%s365_s0 + $0x8c] sm:$0xf] }
  0x19   :  { %v180_v35 = vsel %vm45_vm0, %v40_v29, 4286644096  ;;  %v184_v37 = vsel %vm45_vm0, %v44_v33, 4286644096 }
  0x1a   :  { %v147_v28 = vmax.bf16 %v145_v21, %v143_v23  ;;  %v170_v30 = vmax.bf16 %v168_v22, %v166_v25 }
  0x1c   :  { %v151_v32 = vmax.bf16 %v149_v26, %v147_v28  ;;  %v174_v34 = vmax.bf16 %v172_v27, %v170_v30 }
  0x1e   :  { %189 = vst.msk [vmem:[%s366_s1 + $0x8] sm:$0xf] %vm45_vm0, %v151_v32  ;;  %v178_v36 = vmax.bf16 %v176_v31, %v174_v34 }
  0x20   :  { %v182_v38 = vmax.bf16 %v180_v35, %v178_v36 }
  0x22   :  { %v186_v39 = vmax.bf16 %v184_v37, %v182_v38 }
  0x24   :  { %190 = vst.msk [vmem:[%s366_s1 + $0xc] sm:$0xf] %vm45_vm0, %v186_v39 }

// kernel: uresnet_forward.22
= control target key start
LH: loop header
LB: loop body
LE: loop exit
PB: predicated region body
PF: predicated region fallthrough
CT: control target
= control target key end

     0   :  { %s992_s1 = inlined_call_operand.vmem [shape: bf16[256,128], index: 1, kind: input, shape index: {}]   ;;  %s993_s0 = inlined_call_operand.vmem [shape: bf16[128,256], index: 0, kind: input, shape index: {}]   ;;  %s994_s2 = inlined_call_operand.vmem [shape: f32[1,128], index: 2, kind: input, shape index: {}]   ;;  %s995_s3 = inlined_call_operand.vmem [shape: f32[1,128], index: 3, kind: input, shape index: {}]   ;;  %s996_s4 = inlined_call_operand.vmem [shape: bf16[128,128], index: 4, kind: output, shape index: {}]  }
   0x1   :  { %v765_v0 = vld [vmem:[%s992_s1 + $0x78] sm:$0xff]   ;;  %v767_v2 = vld [vmem:[%s992_s1 + $0x70] sm:$0xff]   ;;  %v769_v4 = vld [vmem:[%s992_s1 + $0x68] sm:$0xff]  }
   0x2   :  { %v766_v1 = vld [vmem:[%s992_s1 + $0x38] sm:$0xff]   ;;  %685 = vmatprep.subr.bf16.mxu0 %v765_v0  ;;  %749 = vmatprep.subr.bf16.mxu1 %v765_v0  ;;  %v768_v3 = vld [vmem:[%s992_s1 + $0x30] sm:$0xff]   ;;  %v770_v5 = vld [vmem:[%s992_s1 + $0x28] sm:$0xff]  }
   0x3   :  { %686 = vmatpush3.bf16.msra.mxu0 %v766_v1  ;;  %757 = vmatpush3.bf16.msra.mxu1 %v766_v1  ;;  %v771_v6 = vld [vmem:[%s992_s1 + $0x60] sm:$0xff]   ;;  %v773_v8 = vld [vmem:[%s992_s1 + $0x58] sm:$0xff]   ;;  %v775_v10 = vld [vmem:[%s992_s1 + $0x50] sm:$0xff]  }
   0x4   :  { %687 = vmatprep.subr.bf16.mxu0 %v767_v2  ;;  %750 = vmatprep.subr.bf16.mxu1 %v767_v2  ;;  %v772_v7 = vld [vmem:[%s992_s1 + $0x20] sm:$0xff]   ;;  %v774_v9 = vld [vmem:[%s992_s1 + $0x18] sm:$0xff]   ;;  %v776_v13 = vld [vmem:[%s992_s1 + $0x10] sm:$0xff]  }
   0x5   :  { %v783_v11 = vld [vmem:[%s993_s0 + $0x4] ss:$8 sps:$4 sm:$0xff]   ;;  %v781_v18 = vld [vmem:[%s993_s0] ss:$8 sps:$4 sm:$0xff]   ;;  %v787_v20 = vld [vmem:[%s993_s0 + $0x14] ss:$8 sps:$4 sm:$0xff]  }
   0x6   :  { %v786_v12 = vld [vmem:[%s993_s0 + $0x44] ss:$8 sps:$4 sm:$0xff]   ;;  %310 = vmatprep.mubr.bf16.mxu0 %v783_v11  ;;  %v784_v19 = vld [vmem:[%s993_s0 + $0x40] ss:$8 sps:$4 sm:$0xff]   ;;  %v789_v21 = vld [vmem:[%s993_s0 + $0x54] ss:$8 sps:$4 sm:$0xff]  }
   0x7   :  { %688 = vmatpush3.bf16.msra.mxu0 %v768_v3  ;;  %758 = vmatpush3.bf16.msra.mxu1 %v768_v3  ;;  %v777_v14 = vld [vmem:[%s992_s1 + $0x48] sm:$0xff]   ;;  %v779_v16 = vld [vmem:[%s992_s1 + $0x40] sm:$0xff]   ;;  %v791_v22 = vld [vmem:[%s993_s0 + $0x10] ss:$8 sps:$4 sm:$0xff]  }
   0x8   :  { %689 = vmatprep.subr.bf16.mxu0 %v769_v4  ;;  %751 = vmatprep.subr.bf16.mxu1 %v769_v4  ;;  %v778_v15 = vld [vmem:[%s992_s1 + $0x8] sm:$0xff]   ;;  %v780_v17 = vld [vmem:[%s992_s1] sm:$0xff]   ;;  %v792_v23 = vld [vmem:[%s993_s0 + $0x50] ss:$8 sps:$4 sm:$0xff]  }
   0x9   :  { %342 = vmatprep.mubr.bf16.mxu1 %v786_v12  ;;  %v793_v24 = vld [vmem:[%s993_s0 + $0x24] ss:$8 sps:$4 sm:$0xff]   ;;  %v797_v26 = vld [vmem:[%s993_s0 + $0x20] ss:$8 sps:$4 sm:$0xff]   ;;  %v799_v28 = vld [vmem:[%s993_s0 + $0x34] ss:$8 sps:$4 sm:$0xff]  }
   0xa   :  { %v795_v25 = vld [vmem:[%s993_s0 + $0x64] ss:$8 sps:$4 sm:$0xff]   ;;  %v798_v27 = vld [vmem:[%s993_s0 + $0x60] ss:$8 sps:$4 sm:$0xff]   ;;  %v801_v29 = vld [vmem:[%s993_s0 + $0x74] ss:$8 sps:$4 sm:$0xff]  }
   0xb   :  { %690 = vmatpush3.bf16.msra.mxu0 %v770_v5  ;;  %759 = vmatpush3.bf16.msra.mxu1 %v770_v5  ;;  %v803_v30 = vld [vmem:[%s993_s0 + $0x30] ss:$8 sps:$4 sm:$0xff]   ;;  %v929_v35 = vld [vmem:[%s994_s2] ss:$0 sm:$0xff] }
   0xc   :  { %691 = vmatprep.subr.bf16.mxu0 %v771_v6  ;;  %752 = vmatprep.subr.bf16.mxu1 %v771_v6  ;;  %v804_v31 = vld [vmem:[%s993_s0 + $0x70] ss:$8 sps:$4 sm:$0xff]   ;;  %v936_v43 = vld [vmem:[%s995_s3] ss:$0 sm:$0xff] }
   0xf   :  { %692 = vmatpush3.bf16.msra.mxu0 %v772_v7  ;;  %760 = vmatpush3.bf16.msra.mxu1 %v772_v7 }
  0x10   :  { %693 = vmatprep.subr.bf16.mxu0 %v773_v8  ;;  %753 = vmatprep.subr.bf16.mxu1 %v773_v8 }
  0x13   :  { %694 = vmatpush3.bf16.msra.mxu0 %v774_v9  ;;  %761 = vmatpush3.bf16.msra.mxu1 %v774_v9 }
  0x14   :  { %695 = vmatprep.subr.bf16.mxu0 %v775_v10  ;;  %754 = vmatprep.subr.bf16.mxu1 %v775_v10 }
  0x17   :  { %696 = vmatpush3.bf16.msra.mxu0 %v776_v13  ;;  %762 = vmatpush3.bf16.msra.mxu1 %v776_v13 }
  0x18   :  { %697 = vmatprep.subr.bf16.mxu0 %v777_v14  ;;  %755 = vmatprep.subr.bf16.mxu1 %v777_v14 }
  0x1b   :  { %698 = vmatpush3.bf16.msra.mxu0 %v778_v15  ;;  %763 = vmatpush3.bf16.msra.mxu1 %v778_v15 }
  0x1c   :  { %699 = vmatprep.subr.bf16.mxu0 %v779_v16  ;;  %756 = vmatprep.subr.bf16.mxu1 %v779_v16 }
  0x1f   :  { %700 = vmatpush3.bf16.msra.mxu0 %v780_v17  ;;  %764 = vmatpush3.bf16.msra.mxu1 %v780_v17 }
  0x22   :  { %311 = vmatmul.mubr.bf16.vlgmr.msra.gmra.mxu0 %v781_v18  ;;  %343 = vmatmul.mubr.bf16.vlgmr.msra.gmra.mxu1 %v784_v19 }
  0x23   :  { %318 = vmatprep.mubr.bf16.mxu0 %v787_v20  ;;  %350 = vmatprep.mubr.bf16.mxu1 %v789_v21 }
  0x2a   :  { %319 = vmatmul.mubr.bf16.gmra.mxu0 %v791_v22  ;;  %351 = vmatmul.mubr.bf16.gmra.mxu1 %v792_v23 }
  0x2b   :  { %326 = vmatprep.mubr.bf16.mxu0 %v793_v24  ;;  %358 = vmatprep.mubr.bf16.mxu1 %v795_v25 }
  0x32   :  { %327 = vmatmul.mubr.bf16.gmra.mxu0 %v797_v26  ;;  %359 = vmatmul.mubr.bf16.gmra.mxu1 %v798_v27 }
  0x33   :  { %334 = vmatprep.mubr.bf16.mxu0 %v799_v28  ;;  %366 = vmatprep.mubr.bf16.mxu1 %v801_v29 }
  0x3a   :  { %335 = vmatmul.mubr.bf16.gmra.mxu0 %v803_v30  ;;  %367 = vmatmul.mubr.bf16.gmra.mxu1 %v804_v31 }
  0xe2   :  { %v701_v32 = vpop.f32.mrf.mxu0  ;;  %v725_v33 = vpop.f32.mrf.mxu1 }
  0xe4   :  { %v702_v34 = vpop.f32.mrf.mxu0  ;;  %v726_v36 = vpop.f32.mrf.mxu1 }
  0xe5   :  { %v703_v37 = vadd.f32 %v702_v34, %v701_v32  ;;  %v727_v38 = vadd.f32 %v726_v36, %v725_v33 }
  0xe6   :  { %v704_v39 = vpop.f32.mrf.mxu0  ;;  %v728_v40 = vpop.f32.mrf.mxu1 }
  0xe7   :  { %v433_v41 = vmul.f32 %v703_v37, %v929_v35  ;;  %v441_v42 = vmul.f32 %v727_v38, %v929_v35 }
  0xe8   :  { %v705_v44 = vpop.f32.mrf.mxu0  ;;  %v729_v45 = vpop.f32.mrf.mxu1 }
  0xe9   :  { %v706_v46 = vadd.f32 %v705_v44, %v704_v39  ;;  %v730_v47 = vadd.f32 %v729_v45, %v728_v40  ;;  %v456_v50 = vadd.f32 %v936_v43, %v433_v41  ;;  %v464_v51 = vadd.f32 %v936_v43, %v441_v42 }
  0xea   :  { %v707_v48 = vpop.f32.mrf.mxu0  ;;  %v731_v49 = vpop.f32.mrf.mxu1 }
  0xeb   :  { %v434_v52 = vmul.f32 %v706_v46, %v929_v35  ;;  %v442_v53 = vmul.f32 %v730_v47, %v929_v35  ;;  %v472_v62 = vmax.f32 %v456_v50, 0.0  ;;  %v480_v63 = vmax.f32 %v464_v51, 0.0 }
  0xec   :  { %v708_v54 = vpop.f32.mrf.mxu0  ;;  %v732_v55 = vpop.f32.mrf.mxu1 }
  0xed   :  { %v457_v56 = vadd.f32 %v936_v43, %v434_v52  ;;  %v465_v57 = vadd.f32 %v936_v43, %v442_v53  ;;  %v709_v58 = vadd.f32 %v708_v54, %v707_v48  ;;  %v733_v59 = vadd.f32 %v732_v55, %v731_v49 }
  0xee   :  { %v710_v60 = vpop.f32.mrf.mxu0  ;;  %v734_v61 = vpop.f32.mrf.mxu1 }
  0xef   :  { %v473_v0 = vmax.f32 %v457_v56, 0.0  ;;  %v481_v1 = vmax.f32 %v465_v57, 0.0  ;;  %v435_v2 = vmul.f32 %v709_v58, %v929_v35  ;;  %v443_v3 = vmul.f32 %v733_v59, %v929_v35 }
  0xf0   :  { %v711_v4 = vpop.f32.mrf.mxu0  ;;  %v735_v5 = vpop.f32.mrf.mxu1 }
  0xf1   :  { %v641_v6 = vpack.c.bf16 %v473_v0, %v472_v62  ;;  %v661_v7 = vpack.c.bf16 %v481_v1, %v480_v63  ;;  %v712_v8 = vadd.f32 %v711_v4, %v710_v60  ;;  %v736_v9 = vadd.f32 %v735_v5, %v734_v61 }
  0xf2   :  { %v713_v10 = vpop.f32.mrf.mxu0  ;;  %v737_v11 = vpop.f32.mrf.mxu1  ;;  %v458_v12 = vadd.f32 %v936_v43, %v435_v2  ;;  %v466_v13 = vadd.f32 %v936_v43, %v443_v3 }
  0xf3   :  { %642 = vst [vmem:[%s996_s4] sm:$0xff] %v641_v6   ;;  %681 = vst [vmem:[%s996_s4 + $0x20] sm:$0xff] %v661_v7   ;;  %v436_v14 = vmul.f32 %v712_v8, %v929_v35  ;;  %v444_v15 = vmul.f32 %v736_v9, %v929_v35 }
  0xf4   :  { %v714_v16 = vpop.f32.mrf.mxu0  ;;  %v738_v17 = vpop.f32.mrf.mxu1  ;;  %v474_v26 = vmax.f32 %v458_v12, 0.0  ;;  %v482_v27 = vmax.f32 %v466_v13, 0.0 }
  0xf5   :  { %v715_v18 = vadd.f32 %v714_v16, %v713_v10  ;;  %v739_v19 = vadd.f32 %v738_v17, %v737_v11  ;;  %v459_v20 = vadd.f32 %v936_v43, %v436_v14  ;;  %v467_v21 = vadd.f32 %v936_v43, %v444_v15 }
  0xf6   :  { %v716_v22 = vpop.f32.mrf.mxu0  ;;  %v740_v23 = vpop.f32.mrf.mxu1 }
  0xf7   :  { %v437_v24 = vmul.f32 %v715_v18, %v929_v35  ;;  %v445_v25 = vmul.f32 %v739_v19, %v929_v35  ;;  %v475_v28 = vmax.f32 %v459_v20, 0.0  ;;  %v483_v29 = vmax.f32 %v467_v21, 0.0 }
  0xf8   :  { %v717_v30 = vpop.f32.mrf.mxu0  ;;  %v741_v31 = vpop.f32.mrf.mxu1 }
  0xf9   :  { %v718_v32 = vadd.f32 %v717_v30, %v716_v22  ;;  %v742_v33 = vadd.f32 %v741_v31, %v740_v23  ;;  %v646_v34 = vpack.c.bf16 %v475_v28, %v474_v26  ;;  %v666_v36 = vpack.c.bf16 %v483_v29, %v482_v27 }
  0xfa   :  { %v719_v37 = vpop.f32.mrf.mxu0  ;;  %v743_v38 = vpop.f32.mrf.mxu1  ;;  %v460_v39 = vadd.f32 %v936_v43, %v437_v24  ;;  %v468_v40 = vadd.f32 %v936_v43, %v445_v25 }
  0xfb   :  { %v438_v41 = vmul.f32 %v718_v32, %v929_v35  ;;  %v446_v42 = vmul.f32 %v742_v33, %v929_v35  ;;  %678 = vst [vmem:[%s996_s4 + $0x8] sm:$0xff] %v646_v34   ;;  %682 = vst [vmem:[%s996_s4 + $0x28] sm:$0xff] %v666_v36  }
  0xfc   :  { %v720_v44 = vpop.f32.mrf.mxu0  ;;  %v744_v45 = vpop.f32.mrf.mxu1  ;;  %v476_v52 = vmax.f32 %v460_v39, 0.0  ;;  %v484_v53 = vmax.f32 %v468_v40, 0.0 }
  0xfd   :  { %v461_v46 = vadd.f32 %v936_v43, %v438_v41  ;;  %v469_v47 = vadd.f32 %v936_v43, %v446_v42  ;;  %v721_v48 = vadd.f32 %v720_v44, %v719_v37  ;;  %v745_v49 = vadd.f32 %v744_v45, %v743_v38 }
  0xfe   :  { %v722_v50 = vpop.f32.mrf.mxu0  ;;  %v746_v51 = vpop.f32.mrf.mxu1 }
  0xff   :  { %v477_v54 = vmax.f32 %v461_v46, 0.0  ;;  %v485_v55 = vmax.f32 %v469_v47, 0.0  ;;  %v439_v56 = vmul.f32 %v721_v48, %v929_v35  ;;  %v447_v57 = vmul.f32 %v745_v49, %v929_v35 }
 0x100   :  { %v723_v58 = vpop.f32.mrf.mxu0  ;;  %v747_v59 = vpop.f32.mrf.mxu1 }
 0x101   :  { %v651_v60 = vpack.c.bf16 %v477_v54, %v476_v52  ;;  %v671_v61 = vpack.c.bf16 %v485_v55, %v484_v53  ;;  %v724_v62 = vadd.f32 %v723_v58, %v722_v50  ;;  %v748_v63 = vadd.f32 %v747_v59, %v746_v51 }
 0x102   :  { %v462_v0 = vadd.f32 %v936_v43, %v439_v56  ;;  %v470_v1 = vadd.f32 %v936_v43, %v447_v57 }
 0x103   :  { %679 = vst [vmem:[%s996_s4 + $0x10] sm:$0xff] %v651_v60   ;;  %683 = vst [vmem:[%s996_s4 + $0x30] sm:$0xff] %v671_v61   ;;  %v440_v2 = vmul.f32 %v724_v62, %v929_v35  ;;  %v448_v3 = vmul.f32 %v748_v63, %v929_v35 }
 0x104   :  { %v478_v6 = vmax.f32 %v462_v0, 0.0  ;;  %v486_v7 = vmax.f32 %v470_v1, 0.0 }
 0x105   :  { %v463_v4 = vadd.f32 %v936_v43, %v440_v2  ;;  %v471_v5 = vadd.f32 %v936_v43, %v448_v3 }
 0x107   :  { %v479_v8 = vmax.f32 %v463_v4, 0.0  ;;  %v487_v9 = vmax.f32 %v471_v5, 0.0 }
 0x109   :  { %v656_v10 = vpack.c.bf16 %v479_v8, %v478_v6  ;;  %v676_v11 = vpack.c.bf16 %v487_v9, %v486_v7 }
 0x10b   :  { %680 = vst [vmem:[%s996_s4 + $0x18] sm:$0xff] %v656_v10   ;;  %684 = vst [vmem:[%s996_s4 + $0x38] sm:$0xff] %v676_v11  }

// kernel: uresnet_forward.24
= control target key start
LH: loop header
LB: loop body
LE: loop exit
PB: predicated region body
PF: predicated region fallthrough
CT: control target
= control target key end

     0   :  { %s1024_s1 = inlined_call_operand.vmem [shape: bf16[640,128], index: 1, kind: input, shape index: {}]   ;;  %s1025_s0 = inlined_call_operand.vmem [shape: bf16[32,640], index: 0, kind: input, shape index: {}]   ;;  %s1026_s2 = inlined_call_operand.vmem [shape: f32[1,128], index: 2, kind: input, shape index: {}]   ;;  %s1027_s3 = inlined_call_operand.vmem [shape: f32[1,128], index: 3, kind: input, shape index: {}]   ;;  %s1028_s4 = inlined_call_operand.vmem [shape: bf16[32,128], index: 4, kind: output, shape index: {}]  }
   0x1   :  { %v783_v0 = vld [vmem:[%s1024_s1 + $0x78] sm:$0xff]   ;;  %v787_v4 = vld [vmem:[%s1024_s1 + $0x70] sm:$0xff]   ;;  %v791_v8 = vld [vmem:[%s1024_s1 + $0x68] sm:$0xff]  }
   0x2   :  { %v784_v1 = vld [vmem:[%s1024_s1 + $0xf8] sm:$0xff]   ;;  %697 = vmatprep.subr.bf16.mxu0 %v783_v0  ;;  %v788_v5 = vld [vmem:[%s1024_s1 + $0xf0] sm:$0xff]   ;;  %v792_v9 = vld [vmem:[%s1024_s1 + $0xe8] sm:$0xff]  }
   0x3   :  { %v785_v2 = vld [vmem:[%s1024_s1 + $0x38] sm:$0xff]   ;;  %725 = vmatprep.subr.bf16.mxu1 %v784_v1  ;;  %v789_v6 = vld [vmem:[%s1024_s1 + $0x30] sm:$0xff]   ;;  %v793_v10 = vld [vmem:[%s1024_s1 + $0x28] sm:$0xff]  }
   0x4   :  { %v786_v3 = vld [vmem:[%s1024_s1 + $0xb8] sm:$0xff]   ;;  %698 = vmatpush3.bf16.msra.mxu0 %v785_v2  ;;  %v790_v7 = vld [vmem:[%s1024_s1 + $0xb0] sm:$0xff]   ;;  %v794_v11 = vld [vmem:[%s1024_s1 + $0xa8] sm:$0xff]  }
   0x5   :  { %726 = vmatpush3.bf16.msra.mxu1 %v786_v3  ;;  %699 = vmatprep.subr.bf16.mxu0 %v787_v4  ;;  %v795_v12 = vld [vmem:[%s1024_s1 + $0x60] sm:$0xff]   ;;  %v799_v16 = vld [vmem:[%s1024_s1 + $0x58] sm:$0xff]   ;;  %v803_v20 = vld [vmem:[%s1024_s1 + $0x50] sm:$0xff]  }
   0x6   :  { %727 = vmatprep.subr.bf16.mxu1 %v788_v5  ;;  %v796_v13 = vld [vmem:[%s1024_s1 + $0xe0] sm:$0xff]   ;;  %v800_v17 = vld [vmem:[%s1024_s1 + $0xd8] sm:$0xff]   ;;  %v804_v21 = vld [vmem:[%s1024_s1 + $0xd0] sm:$0xff]  }
   0x7   :  { %v797_v14 = vld [vmem:[%s1024_s1 + $0x20] sm:$0xff]   ;;  %v801_v18 = vld [vmem:[%s1024_s1 + $0x18] sm:$0xff]   ;;  %v805_v22 = vld [vmem:[%s1024_s1 + $0x10] sm:$0xff]  }
   0x8   :  { %700 = vmatpush3.bf16.msra.mxu0 %v789_v6  ;;  %v798_v15 = vld [vmem:[%s1024_s1 + $0xa0] sm:$0xff]   ;;  %v802_v19 = vld [vmem:[%s1024_s1 + $0x98] sm:$0xff]   ;;  %v806_v23 = vld [vmem:[%s1024_s1 + $0x90] sm:$0xff]  }
   0x9   :  { %728 = vmatpush3.bf16.msra.mxu1 %v790_v7  ;;  %701 = vmatprep.subr.bf16.mxu0 %v791_v8  ;;  %v807_v24 = vld [vmem:[%s1024_s1 + $0x48] sm:$0xff]   ;;  %v811_v28 = vld [vmem:[%s1024_s1 + $0x40] sm:$0xff]   ;;  %v821_v36 = vld [vmem:[%s1024_s1 + $0x138] sm:$0xff]  }
   0xa   :  { %729 = vmatprep.subr.bf16.mxu1 %v792_v9  ;;  %v808_v25 = vld [vmem:[%s1024_s1 + $0xc8] sm:$0xff]   ;;  %v812_v29 = vld [vmem:[%s1024_s1 + $0xc0] sm:$0xff]   ;;  %v822_v37 = vld [vmem:[%s1024_s1 + $0x130] sm:$0xff]  }
   0xb   :  { %v809_v26 = vld [vmem:[%s1024_s1 + $0x8] sm:$0xff]   ;;  %v813_v30 = vld [vmem:[%s1024_s1] sm:$0xff]   ;;  %v825_v45 = vld [vmem:[%s1024_s1 + $0x118] sm:$0xff]  }
   0xc   :  { %702 = vmatpush3.bf16.msra.mxu0 %v793_v10  ;;  %v810_v27 = vld [vmem:[%s1024_s1 + $0x88] sm:$0xff]   ;;  %v814_v31 = vld [vmem:[%s1024_s1 + $0x80] sm:$0xff]   ;;  %v832_v46 = vld [vmem:[%s1024_s1 + $0x110] sm:$0xff]  }
   0xd   :  { %730 = vmatpush3.bf16.msra.mxu1 %v794_v11  ;;  %703 = vmatprep.subr.bf16.mxu0 %v795_v12  ;;  %v815_v32 = vld [vmem:[%s1025_s0] ss:$20 sps:$4 sm:$0xff]   ;;  %v817_v33 = vld [vmem:[%s1025_s0 + $0x4] ss:$20 sps:$4 sm:$0xff]   ;;  %v818_v34 = vld [vmem:[%s1025_s0 + $0x8] ss:$20 sps:$4 sm:$0xff]  }
   0xe   :  { %731 = vmatprep.subr.bf16.mxu1 %v796_v13  ;;  %v820_v35 = vld [vmem:[%s1025_s0 + $0xc] ss:$20 sps:$4 sm:$0xff]   ;;  %446 = vmatprep.mubr.bf16.mxu0 %v817_v33  ;;  %v828_v40 = vld [vmem:[%s1025_s0 + $0x34] ss:$20 sps:$4 sm:$0xff]   ;;  %v831_v42 = vld [vmem:[%s1025_s0 + $0x30] ss:$20 sps:$4 sm:$0xff]  }
   0xf   :  { %495 = vmatprep.mubr.bf16.mxu1 %v820_v35  ;;  %v823_v38 = vld [vmem:[%s1024_s1 + $0x128] sm:$0xff]   ;;  %v824_v43 = vld [vmem:[%s1024_s1 + $0x120] sm:$0xff]  }
  0x10   :  { %704 = vmatpush3.bf16.msra.mxu0 %v797_v14  ;;  %v826_v39 = vld [vmem:[%s1025_s0 + $0x2c] ss:$20 sps:$4 sm:$0xff]   ;;  %v830_v41 = vld [vmem:[%s1025_s0 + $0x28] ss:$20 sps:$4 sm:$0xff]   ;;  %v835_v44 = vld [vmem:[%s1025_s0 + $0x10] ss:$20 sps:$4 sm:$0xff]  }
  0x11   :  { %732 = vmatpush3.bf16.msra.mxu1 %v798_v15  ;;  %705 = vmatprep.subr.bf16.mxu0 %v799_v16  ;;  %v833_v47 = vld [vmem:[%s1024_s1 + $0x108] sm:$0xff]   ;;  %v834_v48 = vld [vmem:[%s1024_s1 + $0x100] sm:$0xff]  }
  0x12   :  { %733 = vmatprep.subr.bf16.mxu1 %v800_v17  ;;  %v836_v49 = vld [vmem:[%s1025_s0 + $0x38] ss:$20 sps:$4 sm:$0xff]   ;;  %v676_v10 = vld [vmem:[%s1026_s2] ss:$0 sm:$0xff] }
  0x14   :  { %706 = vmatpush3.bf16.msra.mxu0 %v801_v18 }
  0x15   :  { %734 = vmatpush3.bf16.msra.mxu1 %v802_v19  ;;  %707 = vmatprep.subr.bf16.mxu0 %v803_v20  ;;  %v677_v19 = vld [vmem:[%s1027_s3] ss:$0 sm:$0xff] }
  0x16   :  { %735 = vmatprep.subr.bf16.mxu1 %v804_v21 }
  0x18   :  { %708 = vmatpush3.bf16.msra.mxu0 %v805_v22 }
  0x19   :  { %736 = vmatpush3.bf16.msra.mxu1 %v806_v23  ;;  %709 = vmatprep.subr.bf16.mxu0 %v807_v24 }
  0x1a   :  { %737 = vmatprep.subr.bf16.mxu1 %v808_v25 }
  0x1c   :  { %710 = vmatpush3.bf16.msra.mxu0 %v809_v26 }
  0x1d   :  { %738 = vmatpush3.bf16.msra.mxu1 %v810_v27  ;;  %711 = vmatprep.subr.bf16.mxu0 %v811_v28 }
  0x1e   :  { %739 = vmatprep.subr.bf16.mxu1 %v812_v29 }
  0x20   :  { %712 = vmatpush3.bf16.msra.mxu0 %v813_v30 }
  0x21   :  { %740 = vmatpush3.bf16.msra.mxu1 %v814_v31  ;;  %763 = vmatprep.subr.bf16.mxu0 %v821_v36 }
  0x23   :  { %447 = vmatmul.mubr.bf16.vlgmr.msra.gmra.mxu0 %v815_v32 }
  0x24   :  { %496 = vmatmul.mubr.bf16.vlgmr.msra.gmra.mxu1 %v818_v34  ;;  %764 = vmatpush3.bf16.msra.mxu0 %v821_v36 }
  0x25   :  { %765 = vmatprep.subr.bf16.mxu0 %v822_v37  ;;  %454 = vmatprep.mubr.bf16.mxu0 %v826_v39 }
  0x26   :  { %503 = vmatprep.mubr.bf16.mxu1 %v828_v40 }
  0x28   :  { %766 = vmatpush3.bf16.msra.mxu0 %v822_v37 }
  0x29   :  { %767 = vmatprep.subr.bf16.mxu0 %v823_v38 }
  0x2b   :  { %455 = vmatmul.mubr.bf16.gmra.mxu0 %v830_v41 }
  0x2c   :  { %504 = vmatmul.mubr.bf16.gmra.mxu1 %v831_v42  ;;  %768 = vmatpush3.bf16.msra.mxu0 %v823_v38 }
  0x2d   :  { %769 = vmatprep.subr.bf16.mxu0 %v824_v43  ;;  %779 = vmatprep.mubr.bf16.mxu0 %v835_v44 }
  0x30   :  { %770 = vmatpush3.bf16.msra.mxu0 %v824_v43 }
  0x31   :  { %771 = vmatprep.subr.bf16.mxu0 %v825_v45 }
  0x34   :  { %772 = vmatpush3.bf16.msra.mxu0 %v825_v45 }
  0x35   :  { %773 = vmatprep.subr.bf16.mxu0 %v832_v46 }
  0x38   :  { %774 = vmatpush3.bf16.msra.mxu0 %v832_v46 }
  0x39   :  { %775 = vmatprep.subr.bf16.mxu0 %v833_v47 }
  0x3c   :  { %776 = vmatpush3.bf16.msra.mxu0 %v833_v47 }
  0x3d   :  { %777 = vmatprep.subr.bf16.mxu0 %v834_v48 }
  0x40   :  { %778 = vmatpush3.bf16.msra.mxu0 %v834_v48 }
  0x43   :  { %780 = vmatmul.mubr.bf16.vlgmr.msra.gmra.mxu0 %v836_v49 }
  0xe3   :  { %v713_v50 = vpop.f32.mrf.mxu0 }
  0xe4   :  { %v741_v51 = vpop.f32.mrf.mxu1 }
  0xe5   :  { %v714_v52 = vpop.f32.mrf.mxu0 }
  0xe6   :  { %v742_v53 = vpop.f32.mrf.mxu1  ;;  %v715_v4 = vadd.f32 %v714_v52, %v713_v50 }
  0xe7   :  { %v716_v54 = vpop.f32.mrf.mxu0  ;;  %v743_v5 = vadd.f32 %v742_v53, %v741_v51 }
  0xe8   :  { %v744_v55 = vpop.f32.mrf.mxu1 }
  0xe9   :  { %v717_v56 = vpop.f32.mrf.mxu0  ;;  %v498_v14 = vadd.f32 %v743_v5, %v715_v4 }
  0xea   :  { %v745_v57 = vpop.f32.mrf.mxu1  ;;  %v718_v11 = vadd.f32 %v717_v56, %v716_v54 }
  0xeb   :  { %v719_v58 = vpop.f32.mrf.mxu0  ;;  %v746_v12 = vadd.f32 %v745_v57, %v744_v55 }
  0xec   :  { %v747_v59 = vpop.f32.mrf.mxu1 }
  0xed   :  { %v720_v60 = vpop.f32.mrf.mxu0  ;;  %v501_v23 = vadd.f32 %v746_v12, %v718_v11 }
  0xee   :  { %v748_v61 = vpop.f32.mrf.mxu1  ;;  %v721_v0 = vadd.f32 %v720_v60, %v719_v58 }
  0xef   :  { %v722_v62 = vpop.f32.mrf.mxu0  ;;  %v749_v1 = vadd.f32 %v748_v61, %v747_v59 }
  0xf0   :  { %v750_v63 = vpop.f32.mrf.mxu1 }
  0xf1   :  { %v723_v2 = vpop.f32.mrf.mxu0  ;;  %v506_v8 = vadd.f32 %v749_v1, %v721_v0 }
  0xf2   :  { %v751_v3 = vpop.f32.mrf.mxu1  ;;  %v724_v6 = vadd.f32 %v723_v2, %v722_v62 }
  0xf3   :  { %v752_v7 = vadd.f32 %v751_v3, %v750_v63 }
  0xf5   :  { %v509_v18 = vadd.f32 %v752_v7, %v724_v6 }
 0x103   :  { %v781_v9 = vpop.f32.mrf.mxu0 }
 0x104   :  { %v555_v13 = vadd.f32 %v781_v9, %v506_v8 }
 0x105   :  { %v546_v15 = vpop.f32.mrf.mxu0 }
 0x106   :  { %v585_v16 = vmul.f32 %v676_v10, %v555_v13  ;;  %v547_v17 = vadd.f32 %v546_v15, %v498_v14 }
 0x107   :  { %v782_v20 = vpop.f32.mrf.mxu0 }
 0x108   :  { %v583_v21 = vmul.f32 %v676_v10, %v547_v17  ;;  %v558_v22 = vadd.f32 %v782_v20, %v509_v18  ;;  %v596_v25 = vadd.f32 %v677_v19, %v585_v16 }
 0x109   :  { %v549_v24 = vpop.f32.mrf.mxu0 }
 0x10a   :  { %v586_v26 = vmul.f32 %v676_v10, %v558_v22  ;;  %v550_v27 = vadd.f32 %v549_v24, %v501_v23  ;;  %v594_v28 = vadd.f32 %v677_v19, %v583_v21  ;;  %v600_v31 = vmax.f32 %v596_v25, 0.0 }
 0x10c   :  { %v597_v29 = vadd.f32 %v677_v19, %v586_v26  ;;  %v584_v30 = vmul.f32 %v676_v10, %v550_v27  ;;  %v598_v34 = vmax.f32 %v594_v28, 0.0 }
 0x10e   :  { %v601_v32 = vmax.f32 %v597_v29, 0.0  ;;  %v595_v33 = vadd.f32 %v677_v19, %v584_v30 }
 0x110   :  { %v694_v35 = vpack.c.bf16 %v601_v32, %v600_v31  ;;  %v599_v36 = vmax.f32 %v595_v33, 0.0 }
 0x112   :  { %696 = vst [vmem:[%s1028_s4 + $0x8] sm:$0xff] %v694_v35   ;;  %v689_v37 = vpack.c.bf16 %v599_v36, %v598_v34 }
 0x114   :  { %690 = vst [vmem:[%s1028_s4] sm:$0xff] %v689_v37  }

// kernel: uresnet_forward.25
= control target key start
LH: loop header
LB: loop body
LE: loop exit
PB: predicated region body
PF: predicated region fallthrough
CT: control target
= control target key end

     0   :  { %s1059_s1 = inlined_call_operand.vmem [shape: bf16[640,128], index: 1, kind: input, shape index: {}]   ;;  %s1060_s0 = inlined_call_operand.vmem [shape: bf16[32,640], index: 0, kind: input, shape index: {}]   ;;  %s1061_s2 = inlined_call_operand.vmem [shape: f32[1,128], index: 2, kind: input, shape index: {}]   ;;  %s1062_s4 = inlined_call_operand.vmem [shape: bf16[32,128], index: 4, kind: input, shape index: {}]   ;;  %s1063_s3 = inlined_call_operand.vmem [shape: f32[1,128], index: 3, kind: input, shape index: {}]   ;;  %s1064_s5 = inlined_call_operand.vmem [shape: bf16[32,128], index: 5, kind: output, shape index: {}]  }
   0x1   :  { %v807_v0 = vld [vmem:[%s1059_s1 + $0x78] sm:$0xff]   ;;  %v811_v4 = vld [vmem:[%s1059_s1 + $0x70] sm:$0xff]   ;;  %v815_v8 = vld [vmem:[%s1059_s1 + $0x68] sm:$0xff]  }
   0x2   :  { %v808_v1 = vld [vmem:[%s1059_s1 + $0xf8] sm:$0xff]   ;;  %721 = vmatprep.subr.bf16.mxu0 %v807_v0  ;;  %v812_v5 = vld [vmem:[%s1059_s1 + $0xf0] sm:$0xff]   ;;  %v816_v9 = vld [vmem:[%s1059_s1 + $0xe8] sm:$0xff]  }
   0x3   :  { %v809_v2 = vld [vmem:[%s1059_s1 + $0x38] sm:$0xff]   ;;  %749 = vmatprep.subr.bf16.mxu1 %v808_v1  ;;  %v813_v6 = vld [vmem:[%s1059_s1 + $0x30] sm:$0xff]   ;;  %v817_v10 = vld [vmem:[%s1059_s1 + $0x28] sm:$0xff]  }
   0x4   :  { %v810_v3 = vld [vmem:[%s1059_s1 + $0xb8] sm:$0xff]   ;;  %722 = vmatpush3.bf16.msra.mxu0 %v809_v2  ;;  %v814_v7 = vld [vmem:[%s1059_s1 + $0xb0] sm:$0xff]   ;;  %v818_v11 = vld [vmem:[%s1059_s1 + $0xa8] sm:$0xff]  }
   0x5   :  { %750 = vmatpush3.bf16.msra.mxu1 %v810_v3  ;;  %723 = vmatprep.subr.bf16.mxu0 %v811_v4  ;;  %v819_v12 = vld [vmem:[%s1059_s1 + $0x60] sm:$0xff]   ;;  %v823_v16 = vld [vmem:[%s1059_s1 + $0x58] sm:$0xff]   ;;  %v827_v20 = vld [vmem:[%s1059_s1 + $0x50] sm:$0xff]  }
   0x6   :  { %751 = vmatprep.subr.bf16.mxu1 %v812_v5  ;;  %v820_v13 = vld [vmem:[%s1059_s1 + $0xe0] sm:$0xff]   ;;  %v824_v17 = vld [vmem:[%s1059_s1 + $0xd8] sm:$0xff]   ;;  %v828_v21 = vld [vmem:[%s1059_s1 + $0xd0] sm:$0xff]  }
   0x7   :  { %v821_v14 = vld [vmem:[%s1059_s1 + $0x20] sm:$0xff]   ;;  %v825_v18 = vld [vmem:[%s1059_s1 + $0x18] sm:$0xff]   ;;  %v829_v22 = vld [vmem:[%s1059_s1 + $0x10] sm:$0xff]  }
   0x8   :  { %724 = vmatpush3.bf16.msra.mxu0 %v813_v6  ;;  %v822_v15 = vld [vmem:[%s1059_s1 + $0xa0] sm:$0xff]   ;;  %v826_v19 = vld [vmem:[%s1059_s1 + $0x98] sm:$0xff]   ;;  %v830_v23 = vld [vmem:[%s1059_s1 + $0x90] sm:$0xff]  }
   0x9   :  { %752 = vmatpush3.bf16.msra.mxu1 %v814_v7  ;;  %725 = vmatprep.subr.bf16.mxu0 %v815_v8  ;;  %v831_v24 = vld [vmem:[%s1059_s1 + $0x48] sm:$0xff]   ;;  %v835_v28 = vld [vmem:[%s1059_s1 + $0x40] sm:$0xff]   ;;  %v845_v36 = vld [vmem:[%s1059_s1 + $0x138] sm:$0xff]  }
   0xa   :  { %753 = vmatprep.subr.bf16.mxu1 %v816_v9  ;;  %v832_v25 = vld [vmem:[%s1059_s1 + $0xc8] sm:$0xff]   ;;  %v836_v29 = vld [vmem:[%s1059_s1 + $0xc0] sm:$0xff]   ;;  %v846_v37 = vld [vmem:[%s1059_s1 + $0x130] sm:$0xff]  }
   0xb   :  { %v833_v26 = vld [vmem:[%s1059_s1 + $0x8] sm:$0xff]   ;;  %v837_v30 = vld [vmem:[%s1059_s1] sm:$0xff]   ;;  %v849_v45 = vld [vmem:[%s1059_s1 + $0x118] sm:$0xff]  }
   0xc   :  { %726 = vmatpush3.bf16.msra.mxu0 %v817_v10  ;;  %v834_v27 = vld [vmem:[%s1059_s1 + $0x88] sm:$0xff]   ;;  %v838_v31 = vld [vmem:[%s1059_s1 + $0x80] sm:$0xff]   ;;  %v856_v46 = vld [vmem:[%s1059_s1 + $0x110] sm:$0xff]  }
   0xd   :  { %754 = vmatpush3.bf16.msra.mxu1 %v818_v11  ;;  %727 = vmatprep.subr.bf16.mxu0 %v819_v12  ;;  %v839_v32 = vld [vmem:[%s1060_s0] ss:$20 sps:$4 sm:$0xff]   ;;  %v841_v33 = vld [vmem:[%s1060_s0 + $0x4] ss:$20 sps:$4 sm:$0xff]   ;;  %v842_v34 = vld [vmem:[%s1060_s0 + $0x8] ss:$20 sps:$4 sm:$0xff]  }
   0xe   :  { %755 = vmatprep.subr.bf16.mxu1 %v820_v13  ;;  %v844_v35 = vld [vmem:[%s1060_s0 + $0xc] ss:$20 sps:$4 sm:$0xff]   ;;  %449 = vmatprep.mubr.bf16.mxu0 %v841_v33  ;;  %v852_v40 = vld [vmem:[%s1060_s0 + $0x34] ss:$20 sps:$4 sm:$0xff]   ;;  %v855_v42 = vld [vmem:[%s1060_s0 + $0x30] ss:$20 sps:$4 sm:$0xff]  }
   0xf   :  { %498 = vmatprep.mubr.bf16.mxu1 %v844_v35  ;;  %v847_v38 = vld [vmem:[%s1059_s1 + $0x128] sm:$0xff]   ;;  %v848_v43 = vld [vmem:[%s1059_s1 + $0x120] sm:$0xff]  }
  0x10   :  { %728 = vmatpush3.bf16.msra.mxu0 %v821_v14  ;;  %v850_v39 = vld [vmem:[%s1060_s0 + $0x2c] ss:$20 sps:$4 sm:$0xff]   ;;  %v854_v41 = vld [vmem:[%s1060_s0 + $0x28] ss:$20 sps:$4 sm:$0xff]   ;;  %v859_v44 = vld [vmem:[%s1060_s0 + $0x10] ss:$20 sps:$4 sm:$0xff]  }
  0x11   :  { %756 = vmatpush3.bf16.msra.mxu1 %v822_v15  ;;  %729 = vmatprep.subr.bf16.mxu0 %v823_v16  ;;  %v857_v47 = vld [vmem:[%s1059_s1 + $0x108] sm:$0xff]   ;;  %v858_v48 = vld [vmem:[%s1059_s1 + $0x100] sm:$0xff]  }
  0x12   :  { %757 = vmatprep.subr.bf16.mxu1 %v824_v17  ;;  %v860_v49 = vld [vmem:[%s1060_s0 + $0x38] ss:$20 sps:$4 sm:$0xff]   ;;  %v691_v10 = vld [vmem:[%s1061_s2] ss:$0 sm:$0xff] }
  0x13   :  { %v719_v14 = vld [vmem:[%s1062_s4 + $0x8] sm:$0xff]   ;;  %v692_v16 = vld [vmem:[%s1063_s3] ss:$0 sm:$0xff] }
  0x14   :  { %730 = vmatpush3.bf16.msra.mxu0 %v825_v18 }
  0x15   :  { %758 = vmatpush3.bf16.msra.mxu1 %v826_v19  ;;  %731 = vmatprep.subr.bf16.mxu0 %v827_v20  ;;  %v702_v20 = vld [vmem:[%s1062_s4] sm:$0xff]  }
  0x16   :  { %759 = vmatprep.subr.bf16.mxu1 %v828_v21 }
  0x18   :  { %732 = vmatpush3.bf16.msra.mxu0 %v829_v22  ;;  %v707_v22 = vunpack.c.l.bf16 %v719_v14 }
  0x19   :  { %760 = vmatpush3.bf16.msra.mxu1 %v830_v23  ;;  %733 = vmatprep.subr.bf16.mxu0 %v831_v24 }
  0x1a   :  { %761 = vmatprep.subr.bf16.mxu1 %v832_v25 }
  0x1c   :  { %734 = vmatpush3.bf16.msra.mxu0 %v833_v26 }
  0x1d   :  { %762 = vmatpush3.bf16.msra.mxu1 %v834_v27  ;;  %735 = vmatprep.subr.bf16.mxu0 %v835_v28  ;;  %v703_v28 = vunpack.c.l.bf16 %v702_v20 }
  0x1e   :  { %763 = vmatprep.subr.bf16.mxu1 %v836_v29 }
  0x20   :  { %736 = vmatpush3.bf16.msra.mxu0 %v837_v30 }
  0x21   :  { %764 = vmatpush3.bf16.msra.mxu1 %v838_v31  ;;  %787 = vmatprep.subr.bf16.mxu0 %v845_v36 }
  0x23   :  { %450 = vmatmul.mubr.bf16.vlgmr.msra.gmra.mxu0 %v839_v32  ;;  %v708_v32 = vunpack.c.h.bf16 %v719_v14 }
  0x24   :  { %499 = vmatmul.mubr.bf16.vlgmr.msra.gmra.mxu1 %v842_v34  ;;  %788 = vmatpush3.bf16.msra.mxu0 %v845_v36 }
  0x25   :  { %789 = vmatprep.subr.bf16.mxu0 %v846_v37  ;;  %457 = vmatprep.mubr.bf16.mxu0 %v850_v39 }
  0x26   :  { %506 = vmatprep.mubr.bf16.mxu1 %v852_v40 }
  0x28   :  { %790 = vmatpush3.bf16.msra.mxu0 %v846_v37  ;;  %v704_v37 = vunpack.c.h.bf16 %v702_v20 }
  0x29   :  { %791 = vmatprep.subr.bf16.mxu0 %v847_v38 }
  0x2b   :  { %458 = vmatmul.mubr.bf16.gmra.mxu0 %v854_v41 }
  0x2c   :  { %507 = vmatmul.mubr.bf16.gmra.mxu1 %v855_v42  ;;  %792 = vmatpush3.bf16.msra.mxu0 %v847_v38 }
  0x2d   :  { %793 = vmatprep.subr.bf16.mxu0 %v848_v43  ;;  %803 = vmatprep.mubr.bf16.mxu0 %v859_v44 }
  0x30   :  { %794 = vmatpush3.bf16.msra.mxu0 %v848_v43 }
  0x31   :  { %795 = vmatprep.subr.bf16.mxu0 %v849_v45 }
  0x34   :  { %796 = vmatpush3.bf16.msra.mxu0 %v849_v45 }
  0x35   :  { %797 = vmatprep.subr.bf16.mxu0 %v856_v46 }
  0x38   :  { %798 = vmatpush3.bf16.msra.mxu0 %v856_v46 }
  0x39   :  { %799 = vmatprep.subr.bf16.mxu0 %v857_v47 }
  0x3c   :  { %800 = vmatpush3.bf16.msra.mxu0 %v857_v47 }
  0x3d   :  { %801 = vmatprep.subr.bf16.mxu0 %v858_v48 }
  0x40   :  { %802 = vmatpush3.bf16.msra.mxu0 %v858_v48 }
  0x43   :  { %804 = vmatmul.mubr.bf16.vlgmr.msra.gmra.mxu0 %v860_v49 }
  0xe3   :  { %v737_v50 = vpop.f32.mrf.mxu0 }
  0xe4   :  { %v765_v51 = vpop.f32.mrf.mxu1 }
  0xe5   :  { %v738_v52 = vpop.f32.mrf.mxu0 }
  0xe6   :  { %v766_v53 = vpop.f32.mrf.mxu1  ;;  %v739_v4 = vadd.f32 %v738_v52, %v737_v50 }
  0xe7   :  { %v740_v54 = vpop.f32.mrf.mxu0  ;;  %v767_v5 = vadd.f32 %v766_v53, %v765_v51 }
  0xe8   :  { %v768_v55 = vpop.f32.mrf.mxu1 }
  0xe9   :  { %v741_v56 = vpop.f32.mrf.mxu0  ;;  %v501_v15 = vadd.f32 %v767_v5, %v739_v4 }
  0xea   :  { %v769_v57 = vpop.f32.mrf.mxu1  ;;  %v742_v11 = vadd.f32 %v741_v56, %v740_v54 }
  0xeb   :  { %v743_v58 = vpop.f32.mrf.mxu0  ;;  %v770_v12 = vadd.f32 %v769_v57, %v768_v55 }
  0xec   :  { %v771_v59 = vpop.f32.mrf.mxu1 }
  0xed   :  { %v744_v60 = vpop.f32.mrf.mxu0  ;;  %v504_v27 = vadd.f32 %v770_v12, %v742_v11 }
  0xee   :  { %v772_v61 = vpop.f32.mrf.mxu1  ;;  %v745_v0 = vadd.f32 %v744_v60, %v743_v58 }
  0xef   :  { %v746_v62 = vpop.f32.mrf.mxu0  ;;  %v773_v1 = vadd.f32 %v772_v61, %v771_v59 }
  0xf0   :  { %v774_v63 = vpop.f32.mrf.mxu1 }
  0xf1   :  { %v747_v2 = vpop.f32.mrf.mxu0  ;;  %v509_v8 = vadd.f32 %v773_v1, %v745_v0 }
  0xf2   :  { %v775_v3 = vpop.f32.mrf.mxu1  ;;  %v748_v6 = vadd.f32 %v747_v2, %v746_v62 }
  0xf3   :  { %v776_v7 = vadd.f32 %v775_v3, %v774_v63 }
  0xf5   :  { %v512_v21 = vadd.f32 %v776_v7, %v748_v6 }
 0x103   :  { %v805_v9 = vpop.f32.mrf.mxu0 }
 0x104   :  { %v558_v13 = vadd.f32 %v805_v9, %v509_v8 }
 0x105   :  { %v549_v17 = vpop.f32.mrf.mxu0 }
 0x106   :  { %v588_v18 = vmul.f32 %v691_v10, %v558_v13  ;;  %v550_v19 = vadd.f32 %v549_v17, %v501_v15 }
 0x107   :  { %v806_v23 = vpop.f32.mrf.mxu0 }
 0x108   :  { %v599_v24 = vadd.f32 %v692_v16, %v588_v18  ;;  %v586_v25 = vmul.f32 %v691_v10, %v550_v19  ;;  %v561_v26 = vadd.f32 %v806_v23, %v512_v21 }
 0x109   :  { %v552_v29 = vpop.f32.mrf.mxu0 }
 0x10a   :  { %v597_v30 = vadd.f32 %v692_v16, %v586_v25  ;;  %v589_v31 = vmul.f32 %v691_v10, %v561_v26  ;;  %v553_v33 = vadd.f32 %v552_v29, %v504_v27  ;;  %v611_v34 = vadd.f32 %v707_v22, %v599_v24 }
 0x10c   :  { %v600_v35 = vadd.f32 %v692_v16, %v589_v31  ;;  %v587_v36 = vmul.f32 %v691_v10, %v553_v33  ;;  %v609_v38 = vadd.f32 %v703_v28, %v597_v30  ;;  %v615_v41 = vmax.f32 %v611_v34, 0.0 }
 0x10e   :  { %v612_v39 = vadd.f32 %v708_v32, %v600_v35  ;;  %v598_v40 = vadd.f32 %v692_v16, %v587_v36  ;;  %v613_v44 = vmax.f32 %v609_v38, 0.0 }
 0x110   :  { %v616_v42 = vmax.f32 %v612_v39, 0.0  ;;  %v610_v43 = vadd.f32 %v704_v37, %v598_v40 }
 0x112   :  { %v717_v45 = vpack.c.bf16 %v616_v42, %v615_v41  ;;  %v614_v46 = vmax.f32 %v610_v43, 0.0 }
 0x114   :  { %720 = vst [vmem:[%s1064_s5 + $0x8] sm:$0xff] %v717_v45   ;;  %v712_v47 = vpack.c.bf16 %v614_v46, %v613_v44 }
 0x116   :  { %713 = vst [vmem:[%s1064_s5] sm:$0xff] %v712_v47  }

// kernel: uresnet_forward.28
= control target key start
LH: loop header
LB: loop body
LE: loop exit
PB: predicated region body
PF: predicated region fallthrough
CT: control target
= control target key end

     0   :  { %v722_v34 = vmov 0.0   ;;  %vm723_vm0 = vmmov 0   ;;  %s893_s1 = inlined_call_operand.vmem [shape: bf16[640,128], index: 1, kind: input, shape index: {}]   ;;  %s894_s0 = inlined_call_operand.vmem [shape: bf16[16,640], index: 0, kind: input, shape index: {}]   ;;  %s895_s2 = inlined_call_operand.vmem [shape: f32[1,128], index: 2, kind: input, shape index: {}]   ;;  %s896_s3 = inlined_call_operand.vmem [shape: f32[1,128], index: 3, kind: input, shape index: {}]   ;;  %s897_s4 = inlined_call_operand.vmem [shape: bf16[16,128], index: 4, kind: output, shape index: {}]  }
   0x1   :  { %v675_v0 = vld [vmem:[%s893_s1 + $0x78] sm:$0xff]   ;;  %v679_v4 = vld [vmem:[%s893_s1 + $0x70] sm:$0xff]   ;;  %v683_v8 = vld [vmem:[%s893_s1 + $0x68] sm:$0xff]  }
   0x2   :  { %v676_v1 = vld [vmem:[%s893_s1 + $0xf8] sm:$0xff]   ;;  %600 = vmatprep.subr.bf16.mxu0 %v675_v0  ;;  %v680_v5 = vld [vmem:[%s893_s1 + $0xf0] sm:$0xff]   ;;  %v684_v9 = vld [vmem:[%s893_s1 + $0xe8] sm:$0xff]  }
   0x3   :  { %v677_v2 = vld [vmem:[%s893_s1 + $0x38] sm:$0xff]   ;;  %622 = vmatprep.subr.bf16.mxu1 %v676_v1  ;;  %v681_v6 = vld [vmem:[%s893_s1 + $0x30] sm:$0xff]   ;;  %v685_v10 = vld [vmem:[%s893_s1 + $0x28] sm:$0xff]  }
   0x4   :  { %v678_v3 = vld [vmem:[%s893_s1 + $0xb8] sm:$0xff]   ;;  %601 = vmatpush3.bf16.msra.mxu0 %v677_v2  ;;  %v682_v7 = vld [vmem:[%s893_s1 + $0xb0] sm:$0xff]   ;;  %v686_v11 = vld [vmem:[%s893_s1 + $0xa8] sm:$0xff]  }
   0x5   :  { %623 = vmatpush3.bf16.msra.mxu1 %v678_v3  ;;  %602 = vmatprep.subr.bf16.mxu0 %v679_v4  ;;  %v687_v12 = vld [vmem:[%s893_s1 + $0x60] sm:$0xff]   ;;  %v691_v16 = vld [vmem:[%s893_s1 + $0x58] sm:$0xff]   ;;  %v695_v20 = vld [vmem:[%s893_s1 + $0x50] sm:$0xff]  }
   0x6   :  { %624 = vmatprep.subr.bf16.mxu1 %v680_v5  ;;  %v688_v13 = vld [vmem:[%s893_s1 + $0xe0] sm:$0xff]   ;;  %v692_v17 = vld [vmem:[%s893_s1 + $0xd8] sm:$0xff]   ;;  %v696_v21 = vld [vmem:[%s893_s1 + $0xd0] sm:$0xff]  }
   0x7   :  { %v689_v14 = vld [vmem:[%s893_s1 + $0x20] sm:$0xff]   ;;  %v693_v18 = vld [vmem:[%s893_s1 + $0x18] sm:$0xff]   ;;  %v697_v22 = vld [vmem:[%s893_s1 + $0x10] sm:$0xff]  }
   0x8   :  { %603 = vmatpush3.bf16.msra.mxu0 %v681_v6  ;;  %v690_v15 = vld [vmem:[%s893_s1 + $0xa0] sm:$0xff]   ;;  %v694_v19 = vld [vmem:[%s893_s1 + $0x98] sm:$0xff]   ;;  %v698_v23 = vld [vmem:[%s893_s1 + $0x90] sm:$0xff]  }
   0x9   :  { %625 = vmatpush3.bf16.msra.mxu1 %v682_v7  ;;  %604 = vmatprep.subr.bf16.mxu0 %v683_v8  ;;  %v699_v24 = vld [vmem:[%s893_s1 + $0x48] sm:$0xff]   ;;  %v703_v28 = vld [vmem:[%s893_s1 + $0x40] sm:$0xff]   ;;  %v713_v37 = vld [vmem:[%s893_s1 + $0x138] sm:$0xff]  }
   0xa   :  { %626 = vmatprep.subr.bf16.mxu1 %v684_v9  ;;  %v700_v25 = vld [vmem:[%s893_s1 + $0xc8] sm:$0xff]   ;;  %v704_v29 = vld [vmem:[%s893_s1 + $0xc0] sm:$0xff]   ;;  %v714_v38 = vld [vmem:[%s893_s1 + $0x130] sm:$0xff]  }
   0xb   :  { %v701_v26 = vld [vmem:[%s893_s1 + $0x8] sm:$0xff]   ;;  %v705_v30 = vld [vmem:[%s893_s1] sm:$0xff]   ;;  %v717_v41 = vld [vmem:[%s893_s1 + $0x118] sm:$0xff]  }
   0xc   :  { %605 = vmatpush3.bf16.msra.mxu0 %v685_v10  ;;  %v702_v27 = vld [vmem:[%s893_s1 + $0x88] sm:$0xff]   ;;  %v706_v31 = vld [vmem:[%s893_s1 + $0x80] sm:$0xff]   ;;  %v718_v42 = vld [vmem:[%s893_s1 + $0x110] sm:$0xff]  }
   0xd   :  { %627 = vmatpush3.bf16.msra.mxu1 %v686_v11  ;;  %606 = vmatprep.subr.bf16.mxu0 %v687_v12  ;;  %v707_v32 = vld [vmem:[%s894_s0] ss:$20 sps:$4 sm:$0xff]   ;;  %v709_v33 = vld [vmem:[%s894_s0 + $0x4] ss:$20 sps:$4 sm:$0xff]   ;;  %v710_v35 = vld [vmem:[%s894_s0 + $0x8] ss:$20 sps:$4 sm:$0xff]  }
   0xe   :  { %628 = vmatprep.subr.bf16.mxu1 %v688_v13  ;;  %v712_v36 = vld [vmem:[%s894_s0 + $0xc] ss:$20 sps:$4 sm:$0xff]   ;;  %410 = vmatprep.mubr.bf16.mxu0 %v709_v33  ;;  %v721_v45 = vld [vmem:[%s894_s0 + $0x10] ss:$20 sps:$4 sm:$0xff]  }
   0xf   :  { %451 = vmatprep.mubr.bf16.mxu1 %v712_v36  ;;  %v715_v39 = vld [vmem:[%s893_s1 + $0x128] sm:$0xff]   ;;  %v716_v40 = vld [vmem:[%s893_s1 + $0x120] sm:$0xff]  }
  0x10   :  { %607 = vmatpush3.bf16.msra.mxu0 %v689_v14  ;;  %v719_v43 = vld [vmem:[%s893_s1 + $0x108] sm:$0xff]   ;;  %v720_v44 = vld [vmem:[%s893_s1 + $0x100] sm:$0xff]  }
  0x11   :  { %629 = vmatpush3.bf16.msra.mxu1 %v690_v15  ;;  %608 = vmatprep.subr.bf16.mxu0 %v691_v16  ;;  %v589_v60 = vld [vmem:[%s895_s2] ss:$0 sm:$0xff] }
  0x12   :  { %630 = vmatprep.subr.bf16.mxu1 %v692_v17  ;;  %v590_v1 = vld [vmem:[%s896_s3] ss:$0 sm:$0xff] }
  0x14   :  { %609 = vmatpush3.bf16.msra.mxu0 %v693_v18 }
  0x15   :  { %631 = vmatpush3.bf16.msra.mxu1 %v694_v19  ;;  %610 = vmatprep.subr.bf16.mxu0 %v695_v20 }
  0x16   :  { %632 = vmatprep.subr.bf16.mxu1 %v696_v21 }
  0x18   :  { %611 = vmatpush3.bf16.msra.mxu0 %v697_v22 }
  0x19   :  { %633 = vmatpush3.bf16.msra.mxu1 %v698_v23  ;;  %612 = vmatprep.subr.bf16.mxu0 %v699_v24 }
  0x1a   :  { %634 = vmatprep.subr.bf16.mxu1 %v700_v25 }
  0x1c   :  { %613 = vmatpush3.bf16.msra.mxu0 %v701_v26 }
  0x1d   :  { %635 = vmatpush3.bf16.msra.mxu1 %v702_v27  ;;  %614 = vmatprep.subr.bf16.mxu0 %v703_v28 }
  0x1e   :  { %636 = vmatprep.subr.bf16.mxu1 %v704_v29 }
  0x20   :  { %615 = vmatpush3.bf16.msra.mxu0 %v705_v30 }
  0x21   :  { %637 = vmatpush3.bf16.msra.mxu1 %v706_v31  ;;  %653 = vmatprep.subr.bf16.mxu0 %v722_v34 }
  0x23   :  { %411 = vmatmul.mubr.bf16.vlgmr.msra.gmra.mxu0 %v707_v32 }
  0x24   :  { %452 = vmatmul.mubr.bf16.vlgmr.msra.gmra.mxu1 %v710_v35  ;;  %654 = vmatpush3.bf16.msra.mxu0 %v713_v37 }
  0x25   :  { %655 = vmatprep.subr.bf16.mxu0 %v722_v34  ;;  %669 = vmatprep.mubr.msk.bf16.mxu0 %vm723_vm0, %v722_v34 }
  0x28   :  { %656 = vmatpush3.bf16.msra.mxu0 %v714_v38 }
  0x29   :  { %657 = vmatprep.subr.bf16.mxu0 %v722_v34 }
  0x2c   :  { %658 = vmatpush3.bf16.msra.mxu0 %v715_v39 }
  0x2d   :  { %659 = vmatprep.subr.bf16.mxu0 %v722_v34 }
  0x30   :  { %660 = vmatpush3.bf16.msra.mxu0 %v716_v40 }
  0x31   :  { %661 = vmatprep.subr.bf16.mxu0 %v722_v34 }
  0x34   :  { %662 = vmatpush3.bf16.msra.mxu0 %v717_v41 }
  0x35   :  { %663 = vmatprep.subr.bf16.mxu0 %v722_v34 }
  0x38   :  { %664 = vmatpush3.bf16.msra.mxu0 %v718_v42 }
  0x39   :  { %665 = vmatprep.subr.bf16.mxu0 %v722_v34 }
  0x3c   :  { %666 = vmatpush3.bf16.msra.mxu0 %v719_v43 }
  0x3d   :  { %667 = vmatprep.subr.bf16.mxu0 %v722_v34 }
  0x40   :  { %668 = vmatpush3.bf16.msra.mxu0 %v720_v44 }
  0x43   :  { %670 = vmatmul.mubr.bf16.vlgmr.msra.gmra.mxu0 %v721_v45 }
  0xe3   :  { %v616_v46 = vpop.f32.mrf.mxu0 }
  0xe4   :  { %v638_v47 = vpop.f32.mrf.mxu1 }
  0xe5   :  { %v617_v48 = vpop.f32.mrf.mxu0 }
  0xe6   :  { %v639_v49 = vpop.f32.mrf.mxu1  ;;  %v618_v52 = vadd.f32 %v617_v48, %v616_v46 }
  0xe7   :  { %v619_v50 = vpop.f32.mrf.mxu0  ;;  %v640_v53 = vadd.f32 %v639_v49, %v638_v47 }
  0xe8   :  { %v641_v51 = vpop.f32.mrf.mxu1 }
  0xe9   :  { %v620_v54 = vpop.f32.mrf.mxu0  ;;  %v454_v58 = vadd.f32 %v640_v53, %v618_v52 }
  0xea   :  { %v642_v55 = vpop.f32.mrf.mxu1  ;;  %v621_v56 = vadd.f32 %v620_v54, %v619_v50 }
  0xeb   :  { %v643_v57 = vadd.f32 %v642_v55, %v641_v51 }
  0xed   :  { %v457_v0 = vadd.f32 %v643_v57, %v621_v56 }
 0x103   :  { %v494_v59 = vpop.f32.mrf.mxu0 }
 0x104   :  { %v495_v61 = vadd.f32 %v494_v59, %v454_v58 }
 0x105   :  { %v671_v62 = vpop.f32.mrf.mxu0 }
 0x106   :  { %v517_v63 = vmul.f32 %v589_v60, %v495_v61 }
 0x107   :  { %v497_v2 = vpop.f32.mrf.mxu0 }
 0x108   :  { %v498_v3 = vadd.f32 %v497_v2, %v457_v0  ;;  %v526_v5 = vadd.f32 %v590_v1, %v517_v63 }
 0x109   :  { %v672_v4 = vpop.f32.mrf.mxu0 }
 0x10a   :  { %v518_v6 = vmul.f32 %v589_v60, %v498_v3  ;;  %v528_v8 = vmax.f32 %v526_v5, 0.0 }
 0x10c   :  { %v527_v7 = vadd.f32 %v590_v1, %v518_v6 }
 0x10e   :  { %v529_v9 = vmax.f32 %v527_v7, 0.0 }
 0x110   :  { %v598_v10 = vpack.c.bf16 %v529_v9, %v528_v8 }
 0x112   :  { %599 = vst [vmem:[%s897_s4] sm:$0xff] %v598_v10  }

// kernel: uresnet_forward.29
= control target key start
LH: loop header
LB: loop body
LE: loop exit
PB: predicated region body
PF: predicated region fallthrough
CT: control target
= control target key end

     0   :  { %v240_v0 = vmov 0.0   ;;  %vm241_vm0 = vmmov 0   ;;  %s303_s1 = inlined_call_operand.vmem [shape: bf16[128,128], index: 1, kind: input, shape index: {}]   ;;  %s304_s0 = inlined_call_operand.vmem [shape: bf16[16,128], index: 0, kind: input, shape index: {}]   ;;  %s305_s2 = inlined_call_operand.vmem [shape: f32[1,128], index: 2, kind: input, shape index: {}]   ;;  %s306_s3 = inlined_call_operand.vmem [shape: f32[1,128], index: 3, kind: input, shape index: {}]   ;;  %s307_s4 = inlined_call_operand.vmem [shape: bf16[16,128], index: 4, kind: output, shape index: {}]  }
   0x1   :  { %209 = vmatprep.subr.bf16.mxu0 %v240_v0  ;;  %v231_v1 = vld [vmem:[%s303_s1 + $0x38] sm:$0xff]   ;;  %225 = vmatprep.mubr.msk.bf16.mxu0 %vm241_vm0, %v240_v0  ;;  %v232_v2 = vld [vmem:[%s303_s1 + $0x30] sm:$0xff]   ;;  %v233_v3 = vld [vmem:[%s303_s1 + $0x28] sm:$0xff]  }
   0x2   :  { %210 = vmatpush3.bf16.msra.mxu0 %v231_v1  ;;  %v234_v4 = vld [vmem:[%s303_s1 + $0x20] sm:$0xff]   ;;  %v235_v5 = vld [vmem:[%s303_s1 + $0x18] sm:$0xff]   ;;  %v236_v6 = vld [vmem:[%s303_s1 + $0x10] sm:$0xff]  }
   0x3   :  { %211 = vmatprep.subr.bf16.mxu0 %v240_v0  ;;  %v237_v7 = vld [vmem:[%s303_s1 + $0x8] sm:$0xff]   ;;  %v238_v8 = vld [vmem:[%s303_s1] sm:$0xff]  }
   0x4   :  { %v239_v9 = vld [vmem:[%s304_s0] sm:$0xff]  }
   0x5   :  { %v189_v11 = vld [vmem:[%s305_s2] ss:$0 sm:$0xff] }
   0x6   :  { %212 = vmatpush3.bf16.msra.mxu0 %v232_v2  ;;  %v190_v14 = vld [vmem:[%s306_s3] ss:$0 sm:$0xff] }
   0x7   :  { %213 = vmatprep.subr.bf16.mxu0 %v240_v0 }
   0xa   :  { %214 = vmatpush3.bf16.msra.mxu0 %v233_v3 }
   0xb   :  { %215 = vmatprep.subr.bf16.mxu0 %v240_v0 }
   0xe   :  { %216 = vmatpush3.bf16.msra.mxu0 %v234_v4 }
   0xf   :  { %217 = vmatprep.subr.bf16.mxu0 %v240_v0 }
  0x12   :  { %218 = vmatpush3.bf16.msra.mxu0 %v235_v5 }
  0x13   :  { %219 = vmatprep.subr.bf16.mxu0 %v240_v0 }
  0x16   :  { %220 = vmatpush3.bf16.msra.mxu0 %v236_v6 }
  0x17   :  { %221 = vmatprep.subr.bf16.mxu0 %v240_v0 }
  0x1a   :  { %222 = vmatpush3.bf16.msra.mxu0 %v237_v7 }
  0x1b   :  { %223 = vmatprep.subr.bf16.mxu0 %v240_v0 }
  0x1e   :  { %224 = vmatpush3.bf16.msra.mxu0 %v238_v8 }
  0x21   :  { %226 = vmatmul.mubr.bf16.vlgmr.msra.gmra.mxu0 %v239_v9 }
  0xe1   :  { %v132_v10 = vpop.f32.mrf.mxu0 }
  0xe2   :  { %v155_v13 = vmul.f32 %v189_v11, %v132_v10 }
  0xe3   :  { %v227_v12 = vpop.f32.mrf.mxu0 }
  0xe4   :  { %v164_v18 = vadd.f32 %v190_v14, %v155_v13 }
  0xe5   :  { %v135_v15 = vpop.f32.mrf.mxu0 }
  0xe6   :  { %v156_v16 = vmul.f32 %v189_v11, %v135_v15 }
  0xe7   :  { %v228_v17 = vpop.f32.mrf.mxu0 }
  0xe8   :  { %v165_v19 = vadd.f32 %v190_v14, %v156_v16 }
  0xea   :  { %v198_v20 = vpack.c.bf16 %v165_v19, %v164_v18 }
  0xec   :  { %199 = vst [vmem:[%s307_s4] sm:$0xff] %v198_v20  }

// kernel: uresnet_forward.31
= control target key start
LH: loop header
LB: loop body
LE: loop exit
PB: predicated region body
PF: predicated region fallthrough
CT: control target
= control target key end

     0   :  { %s883_s15 = smov 0   ;;  %s885_s16 = smov 0   ;;  %s984_s0 = inlined_call_operand.vmem [shape: bf16[16,1280], index: 0, kind: input, shape index: {}]   ;;  %s985_s1 = inlined_call_operand.vmem [shape: bf16[1280,128], index: 1, kind: input, shape index: {}]   ;;  %s986_s2 = inlined_call_operand.vmem [shape: f32[1,128], index: 2, kind: input, shape index: {}]   ;;  %s987_s3 = inlined_call_operand.vmem [shape: f32[1,128], index: 3, kind: input, shape index: {}]   ;;  %s988_s4 = inlined_call_operand.vmem [shape: bf16[16,128], index: 4, kind: output, shape index: {}]  }
   0x1   :  { %s887_s17 = smov 0   ;;  %s889_s18 = smov 0  }
   0x2   :  { %s891_s19 = smov 0  }
   0x3 LB: > { %s26_s20 = sadd.s32 1, %s851_s18  ;;  %p49_p1 = scmp.ne.s32.totalorder %s843_s16, %s839_s15  ;;  %s855_s19 = sphi %s891_s19, %s14_s19   ;;  %s851_s18 = sphi %s889_s18, %s992_s18   ;;  %s847_s17 = sphi %s887_s17, %s991_s17   ;;  %s843_s16 = sphi %s885_s16, %s990_s16   ;;  %s839_s15 = sphi %s883_s15, %s989_s15  }
   0x4   : > { %p27_p0 = scmp.ge.s32.totalorder %s26_s20, 5  ;;  %p50_p2 = scmp.eq.s32.totalorder %s855_s19, 0 }
   0x5   : > { %s42_s22 = sadd.s32 1, %s843_s16  ;;  %p691_p5 = scmp.ge.s32.totalorder %s855_s19, 5 }
   0x6   : > { %s994_s20 = smov (%p27_p0, %s26_s20), 0  ;;  %p51_p3 = por %p50_p2, %p49_p1 }
   0x7   : > { %s38_s21 = ssub.s32 %s851_s18, %s994_s20  ;;  %195 = sbr.rel (%p691_p5) target bundleno = 17 (0x11), region = 24 }
   0x8   : > { %p40_p4 = scmp.eq.s32.totalorder %s38_s21, 0 }
   0xa   : > { %s918_s23 = scalar_select %p40_p4, %s843_s16, %s42_s22  }
   0xc   : > { %198 = sbr.rel (!%p51_p3) target bundleno = 17 (0x11), region = 28  ;;  %s200_s24 = sand.u32 (%p51_p3), 1, %s843_s16  }
   0xd   : > { %s727_s25 = sshll.u32 (%p51_p3), %s851_s18, 3  ;;  %s692_s26 = sshll.u32 (%p51_p3), %s200_s24, 4 }
   0xe   : > { %s208_s29 = scalar_lea.vmem (%p51_p3), %s984_s0, %s727_s25  ;;  %s202_s30 = scalar_lea.vmem (%p51_p3), [#allocation3], %s692_s26 }
   0xf   : > { %v239_v0 = vld [vmem:[%s208_s29] sm:$0xff] (%p51_p3)  ;;  %v241_v1 = vld [vmem:[%s208_s29 + $0x28] sm:$0xff] (%p51_p3) }
  0x10   : > { %240 = vst [vmem:[%s202_s30] sm:$0xff] (%p51_p3), %v239_v0  ;;  %242 = vst [vmem:[%s202_s30 + $0x8] sm:$0xff] (%p51_p3), %v241_v1 }
  0x11 PF: > { %p695_p6 = scmp.ge.s32.totalorder %s855_s19, 1  ;;  %p259_p7 = scmp.lt.s32.totalorder %s855_s19, 6 }
  0x13   : > { %p260_p8 = pnand %p695_p6, %p259_p7 }
  0x14   : > { %s266_s5 = sand.u32 (!%p260_p8), 1, %s839_s15   ;;  %s697_s6 = sshll.u32 (!%p260_p8), %s847_s17, 5 }
  0x15   : > { %263 = sbr.rel (%p260_p8) target bundleno = 286 (0x11e), region = 70  ;;  %s930_s7 = sshll.u32 (!%p260_p8), %s266_s5, 4 }
  0x16   : > { %p311_p9 = scmp.lt.s32.totalorder (!%p260_p8), %s697_s6, 159  ;;  %s268_s12 = scalar_lea.vmem (!%p260_p8), [#allocation3], %s930_s7 }
  0x17   : > { %p699_p10 = scmp.ne.s32.totalorder (!%p260_p8), %s847_s17, 0 }
  0x1a   : > { %s996_s6 = smov (!%p311_p9, %s697_s6), 159  ;;  %338 = sbr.rel (%p699_p10) target bundleno = 33 (0x21), region = 78 }
  0x1b   : > { %s698_s8 = sshll.u32 %s996_s6, 2 }
  0x1c   : > { %s935_s11 = scalar_lea.vmem %s985_s1, %s698_s8 }
  0x1f   : > { %v857_v2 = vmov 0.0  }
  0x20   : > { %339 = vst [vmem:[#allocation2] sm:$0xff] %v857_v2  ;;  %340 = vst [vmem:[#allocation2 + $0x8] sm:$0xff] %v857_v2 }
  0x21 PF: > { %v798_v3 = vld [vmem:[%s935_s11 + $0x78] sm:$0xff]   ;;  %v800_v5 = vld [vmem:[%s935_s11 + $0x70] sm:$0xff]   ;;  %v802_v7 = vld [vmem:[%s935_s11 + $0x68] sm:$0xff]   ;;  %p718_p11 = scmp.ne.s32.totalorder %s847_s17, 4 }
  0x22   : > { %v799_v4 = vld [vmem:[%s935_s11 + $0x38] sm:$0xff]   ;;  %735 = vmatprep.subr.bf16.mxu0 %v798_v3  ;;  %v801_v6 = vld [vmem:[%s935_s11 + $0x30] sm:$0xff]   ;;  %v803_v8 = vld [vmem:[%s935_s11 + $0x28] sm:$0xff]  }
  0x23   : > { %736 = vmatpush3.bf16.msra.mxu0 %v799_v4  ;;  %v804_v9 = vld [vmem:[%s935_s11 + $0x60] sm:$0xff]   ;;  %v806_v11 = vld [vmem:[%s935_s11 + $0x58] sm:$0xff]   ;;  %v808_v13 = vld [vmem:[%s935_s11 + $0x50] sm:$0xff]  }
  0x24   : > { %737 = vmatprep.subr.bf16.mxu0 %v800_v5  ;;  %v805_v10 = vld [vmem:[%s935_s11 + $0x20] sm:$0xff]   ;;  %v807_v12 = vld [vmem:[%s935_s11 + $0x18] sm:$0xff]   ;;  %v809_v15 = vld [vmem:[%s935_s11 + $0x10] sm:$0xff]  }
  0x25   : > { %v816_v14 = vld [vmem:[%s268_s12 + $0x4] ss:$8 sps:$4 sm:$0xff]   ;;  %v814_v20 = vld [vmem:[%s268_s12] ss:$8 sps:$4 sm:$0xff]  }
  0x26   : > { %515 = vmatprep.mubr.bf16.mxu0 %v816_v14  ;;  %v810_v16 = vld [vmem:[%s935_s11 + $0x48] sm:$0xff]   ;;  %v812_v18 = vld [vmem:[%s935_s11 + $0x40] sm:$0xff]  }
  0x27   : > { %738 = vmatpush3.bf16.msra.mxu0 %v801_v6  ;;  %v811_v17 = vld [vmem:[%s935_s11 + $0x8] sm:$0xff]   ;;  %v813_v19 = vld [vmem:[%s935_s11] sm:$0xff]  }
  0x28   : > { %739 = vmatprep.subr.bf16.mxu0 %v802_v7  ;;  %v341_v22 = vld [vmem:[#allocation2] sm:$0xff]  ;;  %v342_v27 = vld [vmem:[#allocation2 + $0x8] sm:$0xff] }
  0x2b   : > { %740 = vmatpush3.bf16.msra.mxu0 %v803_v8 }
  0x2c   : > { %741 = vmatprep.subr.bf16.mxu0 %v804_v9 }
  0x2f   : > { %742 = vmatpush3.bf16.msra.mxu0 %v805_v10 }
  0x30   : > { %743 = vmatprep.subr.bf16.mxu0 %v806_v11 }
  0x33   : > { %744 = vmatpush3.bf16.msra.mxu0 %v807_v12 }
  0x34   : > { %745 = vmatprep.subr.bf16.mxu0 %v808_v13 }
  0x37   : > { %746 = vmatpush3.bf16.msra.mxu0 %v809_v15 }
  0x38   : > { %747 = vmatprep.subr.bf16.mxu0 %v810_v16 }
  0x3b   : > { %748 = vmatpush3.bf16.msra.mxu0 %v811_v17 }
  0x3c   : > { %749 = vmatprep.subr.bf16.mxu0 %v812_v18 }
  0x3f   : > { %750 = vmatpush3.bf16.msra.mxu0 %v813_v19 }
  0x42   : > { %516 = vmatmul.mubr.bf16.vlgmr.msra.gmra.mxu0 %v814_v20 }
 0x102   : > { %v751_v21 = vpop.f32.mrf.mxu0 }
 0x104   : > { %v752_v23 = vpop.f32.mrf.mxu0 }
 0x105   : > { %v753_v24 = vadd.f32 %v752_v23, %v751_v21 }
 0x106   : > { %v754_v25 = vpop.f32.mrf.mxu0 }
 0x107   : > { %v524_v26 = vadd.f32 %v753_v24, %v341_v22 }
 0x108   : > { %v755_v28 = vpop.f32.mrf.mxu0 }
 0x109   : > { %526 = vst [vmem:[#allocation2] sm:$0xff] %v524_v26  ;;  %v756_v29 = vadd.f32 %v755_v28, %v754_v25  ;;  %531 = sbr.rel (%p718_p11) target bundleno = 286 (0x11e), region = 82 }
 0x10b   : > { %v525_v30 = vadd.f32 %v756_v29, %v342_v27 }
 0x10d   : > { %527 = vst [vmem:[#allocation2 + $0x8] sm:$0xff] %v525_v30 }
 0x10e   : > { %v719_v33 = vld [vmem:[%s986_s2] ss:$0 sm:$0xff] }
 0x10f   : > { %v720_v36 = vld [vmem:[%s987_s3] ss:$0 sm:$0xff] }
 0x110   : > { %v532_v31 = vld [vmem:[#allocation2] sm:$0xff] }
 0x111   : > { %v541_v34 = vmul.f32 %v719_v33, %v532_v31 }
 0x113   : > { %v550_v37 = vadd.f32 %v720_v36, %v541_v34 }
 0x114   : > { %v533_v32 = vld [vmem:[#allocation2 + $0x8] sm:$0xff] }
 0x115   : > { %v542_v35 = vmul.f32 %v719_v33, %v533_v32  ;;  %v552_v39 = vmax.f32 %v550_v37, 0.0 }
 0x117   : > { %v551_v38 = vadd.f32 %v720_v36, %v542_v35 }
 0x119   : > { %v553_v40 = vmax.f32 %v551_v38, 0.0 }
 0x11b   : > { %v733_v41 = vpack.c.bf16 %v553_v40, %v552_v39 }
 0x11d   : > { %734 = vst [vmem:[%s988_s4] sm:$0xff] %v733_v41  }
 0x11e PF: > { %s14_s19 = sadd.s32 1, %s855_s19   ;;  %s989_s15 = smov %s843_s16 }
 0x11f   : > { %p11_p12 = scmp.ge.s32.totalorder %s14_s19, 7   ;;  %s990_s16 = smov %s918_s23 }
 0x120   : > { %s991_s17 = smov %s851_s18  ;;  %s992_s18 = smov %s994_s20 }
 0x121   :  { %13 = sbr.rel (!%p11_p12) target bundleno = 3 (0x3), region = 126 }

// kernel: uresnet_forward.30
= control target key start
LH: loop header
LB: loop body
LE: loop exit
PB: predicated region body
PF: predicated region fallthrough
CT: control target
= control target key end

     0   :  { %s977_s18 = smov 0   ;;  %s979_s19 = smov 0   ;;  %s1081_s0 = inlined_call_operand.vmem [shape: bf16[16,1280], index: 0, kind: input, shape index: {}]   ;;  %s1082_s1 = inlined_call_operand.vmem [shape: bf16[1280,128], index: 1, kind: input, shape index: {}]   ;;  %s1083_s2 = inlined_call_operand.vmem [shape: f32[1,128], index: 2, kind: input, shape index: {}]   ;;  %s1084_s3 = inlined_call_operand.vmem [shape: f32[1,128], index: 3, kind: input, shape index: {}]   ;;  %s1085_s4 = inlined_call_operand.vmem [shape: bf16[16,128], index: 4, kind: input, shape index: {}]   ;;  %s1086_s5 = inlined_call_operand.vmem [shape: bf16[16,128], index: 5, kind: output, shape index: {}]  }
   0x1   :  { %s981_s20 = smov 0   ;;  %s983_s21 = smov 0  }
   0x2   :  { %s985_s22 = smov 0  }
   0x3 LB: > { %s27_s23 = sadd.s32 1, %s940_s21  ;;  %p50_p1 = scmp.ne.s32.totalorder %s932_s19, %s928_s18  ;;  %s944_s22 = sphi %s985_s22, %s15_s22   ;;  %s940_s21 = sphi %s983_s21, %s1090_s21   ;;  %s936_s20 = sphi %s981_s20, %s1089_s20   ;;  %s932_s19 = sphi %s979_s19, %s1088_s19   ;;  %s928_s18 = sphi %s977_s18, %s1087_s18  }
   0x4   : > { %p28_p0 = scmp.ge.s32.totalorder %s27_s23, 5  ;;  %p51_p2 = scmp.eq.s32.totalorder %s944_s22, 0 }
   0x5   : > { %s43_s25 = sadd.s32 1, %s932_s19  ;;  %p776_p5 = scmp.ge.s32.totalorder %s944_s22, 5 }
   0x6   : > { %s1092_s23 = smov (%p28_p0, %s27_s23), 0  ;;  %p52_p3 = por %p51_p2, %p50_p1 }
   0x7   : > { %s39_s24 = ssub.s32 %s940_s21, %s1092_s23  ;;  %236 = sbr.rel (%p776_p5) target bundleno = 17 (0x11), region = 28 }
   0x8   : > { %p41_p4 = scmp.eq.s32.totalorder %s39_s24, 0 }
   0xa   : > { %s1012_s26 = scalar_select %p41_p4, %s932_s19, %s43_s25  }
   0xc   : > { %239 = sbr.rel (!%p52_p3) target bundleno = 17 (0x11), region = 32  ;;  %s241_s27 = sand.u32 (%p52_p3), 1, %s932_s19  }
   0xd   : > { %s812_s28 = sshll.u32 (%p52_p3), %s940_s21, 3  ;;  %s777_s29 = sshll.u32 (%p52_p3), %s241_s27, 4 }
   0xe   : > { %s249_s7 = scalar_lea.vmem (%p52_p3), %s1081_s0, %s812_s28  ;;  %s243_s8 = scalar_lea.vmem (%p52_p3), [#allocation3], %s777_s29 }
   0xf   : > { %v280_v0 = vld [vmem:[%s249_s7] sm:$0xff] (%p52_p3)  ;;  %v282_v1 = vld [vmem:[%s249_s7 + $0x28] sm:$0xff] (%p52_p3) }
  0x10   : > { %281 = vst [vmem:[%s243_s8] sm:$0xff] (%p52_p3), %v280_v0  ;;  %283 = vst [vmem:[%s243_s8 + $0x8] sm:$0xff] (%p52_p3), %v282_v1 }
  0x11 PF: > { %p780_p6 = scmp.ge.s32.totalorder %s944_s22, 1  ;;  %p300_p7 = scmp.lt.s32.totalorder %s944_s22, 6 }
  0x13   : > { %p301_p8 = pnand %p780_p6, %p300_p7 }
  0x14   : > { %s307_s9 = sand.u32 (!%p301_p8), 1, %s928_s18   ;;  %s782_s10 = sshll.u32 (!%p301_p8), %s936_s20, 5 }
  0x15   : > { %304 = sbr.rel (%p301_p8) target bundleno = 288 (0x120), region = 74  ;;  %s1024_s11 = sshll.u32 (!%p301_p8), %s307_s9, 4 }
  0x16   : > { %p362_p9 = scmp.lt.s32.totalorder (!%p301_p8), %s782_s10, 159  ;;  %s309_s16 = scalar_lea.vmem (!%p301_p8), [#allocation3], %s1024_s11 }
  0x17   : > { %p784_p10 = scmp.ne.s32.totalorder (!%p301_p8), %s936_s20, 0 }
  0x1a   : > { %s1094_s10 = smov (!%p362_p9, %s782_s10), 159  ;;  %398 = sbr.rel (%p784_p10) target bundleno = 33 (0x21), region = 82 }
  0x1b   : > { %s783_s12 = sshll.u32 %s1094_s10, 2 }
  0x1c   : > { %s1029_s15 = scalar_lea.vmem %s1082_s1, %s783_s12 }
  0x1f   : > { %v946_v2 = vmov 0.0  }
  0x20   : > { %399 = vst [vmem:[#allocation2] sm:$0xff] %v946_v2  ;;  %400 = vst [vmem:[#allocation2 + $0x8] sm:$0xff] %v946_v2 }
  0x21 PF: > { %v887_v3 = vld [vmem:[%s1029_s15 + $0x78] sm:$0xff]   ;;  %v889_v5 = vld [vmem:[%s1029_s15 + $0x70] sm:$0xff]   ;;  %v891_v7 = vld [vmem:[%s1029_s15 + $0x68] sm:$0xff]   ;;  %p803_p11 = scmp.ne.s32.totalorder %s936_s20, 4 }
  0x22   : > { %v888_v4 = vld [vmem:[%s1029_s15 + $0x38] sm:$0xff]   ;;  %824 = vmatprep.subr.bf16.mxu0 %v887_v3  ;;  %v890_v6 = vld [vmem:[%s1029_s15 + $0x30] sm:$0xff]   ;;  %v892_v8 = vld [vmem:[%s1029_s15 + $0x28] sm:$0xff]  }
  0x23   : > { %825 = vmatpush3.bf16.msra.mxu0 %v888_v4  ;;  %v893_v9 = vld [vmem:[%s1029_s15 + $0x60] sm:$0xff]   ;;  %v895_v11 = vld [vmem:[%s1029_s15 + $0x58] sm:$0xff]   ;;  %v897_v13 = vld [vmem:[%s1029_s15 + $0x50] sm:$0xff]  }
  0x24   : > { %826 = vmatprep.subr.bf16.mxu0 %v889_v5  ;;  %v894_v10 = vld [vmem:[%s1029_s15 + $0x20] sm:$0xff]   ;;  %v896_v12 = vld [vmem:[%s1029_s15 + $0x18] sm:$0xff]   ;;  %v898_v15 = vld [vmem:[%s1029_s15 + $0x10] sm:$0xff]  }
  0x25   : > { %v905_v14 = vld [vmem:[%s309_s16 + $0x4] ss:$8 sps:$4 sm:$0xff]   ;;  %v903_v20 = vld [vmem:[%s309_s16] ss:$8 sps:$4 sm:$0xff]  }
  0x26   : > { %575 = vmatprep.mubr.bf16.mxu0 %v905_v14  ;;  %v899_v16 = vld [vmem:[%s1029_s15 + $0x48] sm:$0xff]   ;;  %v901_v18 = vld [vmem:[%s1029_s15 + $0x40] sm:$0xff]  }
  0x27   : > { %827 = vmatpush3.bf16.msra.mxu0 %v890_v6  ;;  %v900_v17 = vld [vmem:[%s1029_s15 + $0x8] sm:$0xff]   ;;  %v902_v19 = vld [vmem:[%s1029_s15] sm:$0xff]  }
  0x28   : > { %828 = vmatprep.subr.bf16.mxu0 %v891_v7  ;;  %v401_v22 = vld [vmem:[#allocation2] sm:$0xff]  ;;  %v402_v27 = vld [vmem:[#allocation2 + $0x8] sm:$0xff] }
  0x2b   : > { %829 = vmatpush3.bf16.msra.mxu0 %v892_v8 }
  0x2c   : > { %830 = vmatprep.subr.bf16.mxu0 %v893_v9 }
  0x2f   : > { %831 = vmatpush3.bf16.msra.mxu0 %v894_v10 }
  0x30   : > { %832 = vmatprep.subr.bf16.mxu0 %v895_v11 }
  0x33   : > { %833 = vmatpush3.bf16.msra.mxu0 %v896_v12 }
  0x34   : > { %834 = vmatprep.subr.bf16.mxu0 %v897_v13 }
  0x37   : > { %835 = vmatpush3.bf16.msra.mxu0 %v898_v15 }
  0x38   : > { %836 = vmatprep.subr.bf16.mxu0 %v899_v16 }
  0x3b   : > { %837 = vmatpush3.bf16.msra.mxu0 %v900_v17 }
  0x3c   : > { %838 = vmatprep.subr.bf16.mxu0 %v901_v18 }
  0x3f   : > { %839 = vmatpush3.bf16.msra.mxu0 %v902_v19 }
  0x42   : > { %576 = vmatmul.mubr.bf16.vlgmr.msra.gmra.mxu0 %v903_v20 }
 0x102   : > { %v840_v21 = vpop.f32.mrf.mxu0 }
 0x104   : > { %v841_v23 = vpop.f32.mrf.mxu0 }
 0x105   : > { %v842_v24 = vadd.f32 %v841_v23, %v840_v21 }
 0x106   : > { %v843_v25 = vpop.f32.mrf.mxu0 }
 0x107   : > { %v584_v26 = vadd.f32 %v842_v24, %v401_v22 }
 0x108   : > { %v844_v28 = vpop.f32.mrf.mxu0 }
 0x109   : > { %586 = vst [vmem:[#allocation2] sm:$0xff] %v584_v26  ;;  %v845_v29 = vadd.f32 %v844_v28, %v843_v25  ;;  %591 = sbr.rel (%p803_p11) target bundleno = 288 (0x120), region = 86 }
 0x10b   : > { %v585_v30 = vadd.f32 %v845_v29, %v402_v27 }
 0x10d   : > { %587 = vst [vmem:[#allocation2 + $0x8] sm:$0xff] %v585_v30 }
 0x10e   : > { %v804_v33 = vld [vmem:[%s1083_s2] ss:$0 sm:$0xff] }
 0x10f   : > { %v805_v36 = vld [vmem:[%s1084_s3] ss:$0 sm:$0xff] }
 0x110   : > { %v592_v31 = vld [vmem:[#allocation2] sm:$0xff] }
 0x111   : > { %v601_v34 = vmul.f32 %v804_v33, %v592_v31  ;;  %v816_v37 = vld [vmem:[%s1085_s4] sm:$0xff]  }
 0x112   : > { %v817_v38 = vunpack.c.l.bf16 %v816_v37  ;;  %v818_v39 = vunpack.c.h.bf16 %v816_v37 }
 0x113   : > { %v610_v40 = vadd.f32 %v805_v36, %v601_v34 }
 0x114   : > { %v593_v32 = vld [vmem:[#allocation2 + $0x8] sm:$0xff] }
 0x115   : > { %v602_v35 = vmul.f32 %v804_v33, %v593_v32  ;;  %v616_v42 = vadd.f32 %v817_v38, %v610_v40 }
 0x117   : > { %v611_v41 = vadd.f32 %v805_v36, %v602_v35  ;;  %v618_v44 = vmax.f32 %v616_v42, 0.0 }
 0x119   : > { %v617_v43 = vadd.f32 %v818_v39, %v611_v41 }
 0x11b   : > { %v619_v45 = vmax.f32 %v617_v43, 0.0 }
 0x11d   : > { %v822_v46 = vpack.c.bf16 %v619_v45, %v618_v44 }
 0x11f   : > { %823 = vst [vmem:[%s1086_s5] sm:$0xff] %v822_v46  }
 0x120 PF: > { %s15_s22 = sadd.s32 1, %s944_s22   ;;  %s1087_s18 = smov %s932_s19 }
 0x121   : > { %p12_p12 = scmp.ge.s32.totalorder %s15_s22, 7   ;;  %s1088_s19 = smov %s1012_s26 }
 0x122   : > { %s1089_s20 = smov %s940_s21  ;;  %s1090_s21 = smov %s1092_s23 }
 0x123   :  { %14 = sbr.rel (!%p12_p12) target bundleno = 3 (0x3), region = 133 }

// kernel: uresnet_forward.33
= control target key start
LH: loop header
LB: loop body
LE: loop exit
PB: predicated region body
PF: predicated region fallthrough
CT: control target
= control target key end

     0   :  { %s1034_s15 = smov 0   ;;  %s1036_s16 = smov 0   ;;  %s1154_s0 = inlined_call_operand.vmem [shape: bf16[16,1280], index: 0, kind: input, shape index: {}]   ;;  %s1155_s1 = inlined_call_operand.vmem [shape: bf16[1280,256], index: 1, kind: input, shape index: {}]   ;;  %s1156_s2 = inlined_call_operand.vmem [shape: f32[1,256], index: 2, kind: input, shape index: {}]   ;;  %s1157_s3 = inlined_call_operand.vmem [shape: f32[1,256], index: 3, kind: input, shape index: {}]   ;;  %s1158_s4 = inlined_call_operand.vmem [shape: bf16[16,256], index: 4, kind: output, shape index: {}]  }
   0x1   :  { %s1038_s17 = smov 0   ;;  %s1040_s18 = smov 0  }
   0x2   :  { %s1042_s19 = smov 0  }
   0x3 LB: > { %s26_s20 = sadd.s32 1, %s1002_s18  ;;  %p49_p1 = scmp.ne.s32.totalorder %s994_s16, %s990_s15  ;;  %s1006_s19 = sphi %s1042_s19, %s14_s19   ;;  %s1002_s18 = sphi %s1040_s18, %s1162_s18   ;;  %s998_s17 = sphi %s1038_s17, %s1161_s17   ;;  %s994_s16 = sphi %s1036_s16, %s1160_s16   ;;  %s990_s15 = sphi %s1034_s15, %s1159_s15  }
   0x4   : > { %p27_p0 = scmp.ge.s32.totalorder %s26_s20, 5  ;;  %p50_p2 = scmp.eq.s32.totalorder %s1006_s19, 0 }
   0x5   : > { %s42_s22 = sadd.s32 1, %s994_s16  ;;  %p821_p5 = scmp.ge.s32.totalorder %s1006_s19, 5 }
   0x6   : > { %s1164_s20 = smov (%p27_p0, %s26_s20), 0  ;;  %p51_p3 = por %p50_p2, %p49_p1 }
   0x7   : > { %s38_s21 = ssub.s32 %s1002_s18, %s1164_s20  ;;  %199 = sbr.rel (%p821_p5) target bundleno = 17 (0x11), region = 24 }
   0x8   : > { %p40_p4 = scmp.eq.s32.totalorder %s38_s21, 0 }
   0xa   : > { %s1069_s23 = scalar_select %p40_p4, %s994_s16, %s42_s22  }
   0xc   : > { %202 = sbr.rel (!%p51_p3) target bundleno = 17 (0x11), region = 28  ;;  %s204_s24 = sand.u32 (%p51_p3), 1, %s994_s16  }
   0xd   : > { %s872_s25 = sshll.u32 (%p51_p3), %s1002_s18, 3  ;;  %s822_s26 = sshll.u32 (%p51_p3), %s204_s24, 4 }
   0xe   : > { %s212_s29 = scalar_lea.vmem (%p51_p3), %s1154_s0, %s872_s25  ;;  %s206_s30 = scalar_lea.vmem (%p51_p3), [#allocation3], %s822_s26 }
   0xf   : > { %v243_v0 = vld [vmem:[%s212_s29] sm:$0xff] (%p51_p3)  ;;  %v245_v1 = vld [vmem:[%s212_s29 + $0x28] sm:$0xff] (%p51_p3) }
  0x10   : > { %244 = vst [vmem:[%s206_s30] sm:$0xff] (%p51_p3), %v243_v0  ;;  %246 = vst [vmem:[%s206_s30 + $0x8] sm:$0xff] (%p51_p3), %v245_v1 }
  0x11 PF: > { %p825_p6 = scmp.ge.s32.totalorder %s1006_s19, 1  ;;  %p266_p7 = scmp.lt.s32.totalorder %s1006_s19, 6 }
  0x13   : > { %p267_p8 = pnand %p825_p6, %p266_p7 }
  0x14   : > { %s273_s5 = sand.u32 (!%p267_p8), 1, %s990_s15   ;;  %s827_s6 = sshll.u32 (!%p267_p8), %s998_s17, 5 }
  0x15   : > { %270 = sbr.rel (%p267_p8) target bundleno = 318 (0x13e), region = 70  ;;  %s1081_s7 = sshll.u32 (!%p267_p8), %s273_s5, 4 }
  0x16   : > { %p325_p9 = scmp.lt.s32.totalorder (!%p267_p8), %s827_s6, 159  ;;  %s275_s12 = scalar_lea.vmem (!%p267_p8), [#allocation3], %s1081_s7 }
  0x17   : > { %p830_p10 = scmp.ne.s32.totalorder (!%p267_p8), %s998_s17, 0 }
  0x1a   : > { %s1166_s6 = smov (!%p325_p9, %s827_s6), 159  ;;  %360 = sbr.rel (%p830_p10) target bundleno = 34 (0x22), region = 78 }
  0x1b   : > { %s873_s8 = sshll.u32 %s1166_s6, 3 }
  0x1c   : > { %s1086_s11 = scalar_lea.vmem %s1155_s1, %s873_s8 }
  0x1f   : > { %v1008_v2 = vmov 0.0  }
  0x20   : > { %361 = vst [vmem:[#allocation2 + $0x10] sm:$0xff] %v1008_v2  ;;  %362 = vst [vmem:[#allocation2] sm:$0xff] %v1008_v2 }
  0x21   : > { %363 = vst [vmem:[#allocation2 + $0x18] sm:$0xff] %v1008_v2  ;;  %364 = vst [vmem:[#allocation2 + $0x8] sm:$0xff] %v1008_v2 }
  0x22 PF: > { %v917_v3 = vld [vmem:[%s1086_s11 + $0x74] ss:$8 sps:$4 sm:$0xff]   ;;  %v919_v4 = vld [vmem:[%s1086_s11 + $0x70] ss:$8 sps:$4 sm:$0xff]   ;;  %v920_v5 = vld [vmem:[%s1086_s11 + $0x64] ss:$8 sps:$4 sm:$0xff]  }
  0x23   : > { %573 = vmatprep.subr.bf16.mxu0 %v917_v3  ;;  %v922_v6 = vld [vmem:[%s1086_s11 + $0x60] ss:$8 sps:$4 sm:$0xff]   ;;  %v923_v7 = vld [vmem:[%s1086_s11 + $0x54] ss:$8 sps:$4 sm:$0xff]   ;;  %v925_v8 = vld [vmem:[%s1086_s11 + $0x50] ss:$8 sps:$4 sm:$0xff]  }
  0x24   : > { %574 = vmatpush1.bf16.msra.mxu0 %v919_v4  ;;  %v926_v9 = vld [vmem:[%s1086_s11 + $0x44] ss:$8 sps:$4 sm:$0xff]   ;;  %v928_v10 = vld [vmem:[%s1086_s11 + $0x40] ss:$8 sps:$4 sm:$0xff]   ;;  %v929_v11 = vld [vmem:[%s1086_s11 + $0x34] ss:$8 sps:$4 sm:$0xff]  }
  0x25   : > { %575 = vmatprep.subr.bf16.mxu0 %v920_v5  ;;  %v931_v12 = vld [vmem:[%s1086_s11 + $0x30] ss:$8 sps:$4 sm:$0xff]   ;;  %v932_v13 = vld [vmem:[%s1086_s11 + $0x24] ss:$8 sps:$4 sm:$0xff]   ;;  %v934_v14 = vld [vmem:[%s1086_s11 + $0x20] ss:$8 sps:$4 sm:$0xff]  }
  0x26   : > { %v935_v15 = vld [vmem:[%s1086_s11 + $0x14] ss:$8 sps:$4 sm:$0xff]   ;;  %v937_v17 = vld [vmem:[%s1086_s11 + $0x10] ss:$8 sps:$4 sm:$0xff]   ;;  %v938_v18 = vld [vmem:[%s1086_s11 + $0x4] ss:$8 sps:$4 sm:$0xff]  }
  0x27   : > { %v967_v16 = vld [vmem:[%s275_s12 + $0x4] ss:$8 sps:$4 sm:$0xff]   ;;  %v940_v19 = vld [vmem:[%s1086_s11] ss:$8 sps:$4 sm:$0xff]   ;;  %v943_v21 = vld [vmem:[%s1086_s11 + $0xf0] ss:$8 sps:$4 sm:$0xff]  }
  0x28   : > { %576 = vmatpush1.bf16.msra.mxu0 %v922_v6  ;;  %605 = vmatprep.mubr.bf16.mxu0 %v967_v16  ;;  %v941_v20 = vld [vmem:[%s1086_s11 + $0xf4] ss:$8 sps:$4 sm:$0xff]   ;;  %v944_v22 = vld [vmem:[%s1086_s11 + $0xe4] ss:$8 sps:$4 sm:$0xff]   ;;  %v946_v23 = vld [vmem:[%s1086_s11 + $0xe0] ss:$8 sps:$4 sm:$0xff]  }
  0x29   : > { %577 = vmatprep.subr.bf16.mxu0 %v923_v7  ;;  %v947_v24 = vld [vmem:[%s1086_s11 + $0xd4] ss:$8 sps:$4 sm:$0xff]   ;;  %v949_v25 = vld [vmem:[%s1086_s11 + $0xd0] ss:$8 sps:$4 sm:$0xff]   ;;  %v950_v26 = vld [vmem:[%s1086_s11 + $0xc4] ss:$8 sps:$4 sm:$0xff]  }
  0x2a   : > { %v952_v27 = vld [vmem:[%s1086_s11 + $0xc0] ss:$8 sps:$4 sm:$0xff]   ;;  %v953_v28 = vld [vmem:[%s1086_s11 + $0xb4] ss:$8 sps:$4 sm:$0xff]   ;;  %v955_v29 = vld [vmem:[%s1086_s11 + $0xb0] ss:$8 sps:$4 sm:$0xff]  }
  0x2b   : > { %v956_v30 = vld [vmem:[%s1086_s11 + $0xa4] ss:$8 sps:$4 sm:$0xff]   ;;  %v958_v31 = vld [vmem:[%s1086_s11 + $0xa0] ss:$8 sps:$4 sm:$0xff]   ;;  %v959_v32 = vld [vmem:[%s1086_s11 + $0x94] ss:$8 sps:$4 sm:$0xff]  }
  0x2c   : > { %578 = vmatpush1.bf16.msra.mxu0 %v925_v8  ;;  %v961_v33 = vld [vmem:[%s1086_s11 + $0x90] ss:$8 sps:$4 sm:$0xff]   ;;  %v962_v34 = vld [vmem:[%s1086_s11 + $0x84] ss:$8 sps:$4 sm:$0xff]   ;;  %v964_v35 = vld [vmem:[%s1086_s11 + $0x80] ss:$8 sps:$4 sm:$0xff]  }
  0x2d   : > { %579 = vmatprep.subr.bf16.mxu0 %v926_v9  ;;  %v965_v36 = vld [vmem:[%s275_s12] ss:$8 sps:$4 sm:$0xff]   ;;  %p865_p11 = scmp.ne.s32.totalorder %s998_s17, 4 }
  0x2e   : > { %v365_v37 = vld [vmem:[#allocation2 + $0x10] sm:$0xff]  ;;  %v366_v39 = vld [vmem:[#allocation2] sm:$0xff]  ;;  %v367_v42 = vld [vmem:[#allocation2 + $0x18] sm:$0xff] }
  0x2f   : > { %v368_v45 = vld [vmem:[#allocation2 + $0x8] sm:$0xff] }
  0x30   : > { %580 = vmatpush1.bf16.msra.mxu0 %v928_v10 }
  0x31   : > { %581 = vmatprep.subr.bf16.mxu0 %v929_v11 }
  0x34   : > { %582 = vmatpush1.bf16.msra.mxu0 %v931_v12 }
  0x35   : > { %583 = vmatprep.subr.bf16.mxu0 %v932_v13 }
  0x38   : > { %584 = vmatpush1.bf16.msra.mxu0 %v934_v14 }
  0x39   : > { %585 = vmatprep.subr.bf16.mxu0 %v935_v15 }
  0x3c   : > { %586 = vmatpush1.bf16.msra.mxu0 %v937_v17 }
  0x3d   : > { %587 = vmatprep.subr.bf16.mxu0 %v938_v18 }
  0x40   : > { %588 = vmatpush1.bf16.msra.mxu0 %v940_v19 }
  0x41   : > { %589 = vmatprep.subr.bf16.mxu0 %v941_v20 }
  0x44   : > { %590 = vmatpush2.bf16.msra.mxu0 %v943_v21 }
  0x45   : > { %591 = vmatprep.subr.bf16.mxu0 %v944_v22 }
  0x48   : > { %592 = vmatpush2.bf16.msra.mxu0 %v946_v23 }
  0x49   : > { %593 = vmatprep.subr.bf16.mxu0 %v947_v24 }
  0x4c   : > { %594 = vmatpush2.bf16.msra.mxu0 %v949_v25 }
  0x4d   : > { %595 = vmatprep.subr.bf16.mxu0 %v950_v26 }
  0x50   : > { %596 = vmatpush2.bf16.msra.mxu0 %v952_v27 }
  0x51   : > { %597 = vmatprep.subr.bf16.mxu0 %v953_v28 }
  0x54   : > { %598 = vmatpush2.bf16.msra.mxu0 %v955_v29 }
  0x55   : > { %599 = vmatprep.subr.bf16.mxu0 %v956_v30 }
  0x58   : > { %600 = vmatpush2.bf16.msra.mxu0 %v958_v31 }
  0x59   : > { %601 = vmatprep.subr.bf16.mxu0 %v959_v32 }
  0x5c   : > { %602 = vmatpush2.bf16.msra.mxu0 %v961_v33 }
  0x5d   : > { %603 = vmatprep.subr.bf16.mxu0 %v962_v34 }
  0x60   : > { %604 = vmatpush2.bf16.msra.mxu0 %v964_v35 }
  0x63   : > { %606 = vmatmul.mubr.bf16.vlgmr.msra.gmra.mxu0 %v965_v36 }
 0x123   : > { %v607_v38 = vpop.f32.mrf.mxu0 }
 0x124   : > { %v616_v40 = vadd.f32 %v607_v38, %v365_v37 }
 0x125   : > { %v609_v41 = vpop.f32.mrf.mxu0 }
 0x126   : > { %620 = vst [vmem:[#allocation2 + $0x10] sm:$0xff] %v616_v40  ;;  %v617_v43 = vadd.f32 %v609_v41, %v366_v39 }
 0x127   : > { %v611_v44 = vpop.f32.mrf.mxu0 }
 0x128   : > { %621 = vst [vmem:[#allocation2] sm:$0xff] %v617_v43  ;;  %v618_v46 = vadd.f32 %v611_v44, %v367_v42  ;;  %627 = sbr.rel (%p865_p11) target bundleno = 318 (0x13e), region = 82 }
 0x129   : > { %v613_v47 = vpop.f32.mrf.mxu0 }
 0x12a   : > { %622 = vst [vmem:[#allocation2 + $0x18] sm:$0xff] %v618_v46  ;;  %v619_v48 = vadd.f32 %v613_v47, %v368_v45 }
 0x12c   : > { %623 = vst [vmem:[#allocation2 + $0x8] sm:$0xff] %v619_v48 }
 0x12d   : > { %v634_v49 = vlaneseq  ;;  %v632_v51 = vld [vmem:[%s1156_s2] sm:$0x3]  ;;  %v628_v53 = vld [vmem:[#allocation2 + $0x10] sm:$0xff] }
 0x12e   : > { %v648_v52 = vld [vmem:[%s1157_s3] sm:$0x3] }
 0x12f   : > { %v635_v50 = vshrl.u32 %v634_v49, 7  ;;  %v629_v56 = vld [vmem:[#allocation2] sm:$0xff] }
 0x131   : > { %v636_v54 = vsub.s32 0, %v635_v50  ;;  %v640_v55 = vsub.s32 1, %v635_v50  ;;  %v630_v57 = vld [vmem:[#allocation2 + $0x18] sm:$0xff] }
 0x133   : > { %v631_v58 = vld [vmem:[#allocation2 + $0x8] sm:$0xff]  ;;  %v637_v59 = vrot.slane %v632_v51, %v636_v54  ;;  %v641_v60 = vrot.slane %v632_v51, %v640_v55  ;;  %v653_v61 = vrot.slane %v648_v52, %v636_v54  ;;  %v657_v62 = vrot.slane %v648_v52, %v640_v55 }
 0x135   : > { %v644_v63 = vmul.f32 %v637_v59, %v628_v53  ;;  %v645_v0 = vmul.f32 %v641_v60, %v629_v56  ;;  %v646_v1 = vmul.f32 %v637_v59, %v630_v57  ;;  %v647_v2 = vmul.f32 %v641_v60, %v631_v58 }
 0x137   : > { %v660_v3 = vadd.f32 %v653_v61, %v644_v63  ;;  %v661_v4 = vadd.f32 %v657_v62, %v645_v0  ;;  %v662_v5 = vadd.f32 %v653_v61, %v646_v1  ;;  %v663_v6 = vadd.f32 %v657_v62, %v647_v2 }
 0x139   : > { %v664_v7 = vmax.f32 %v660_v3, 0.0  ;;  %v665_v8 = vmax.f32 %v661_v4, 0.0  ;;  %v666_v9 = vmax.f32 %v662_v5, 0.0  ;;  %v667_v10 = vmax.f32 %v663_v6, 0.0 }
 0x13b   : > { %v874_v11 = vpack.c.bf16 %v665_v8, %v664_v7  ;;  %v875_v12 = vpack.c.bf16 %v667_v10, %v666_v9 }
 0x13d   : > { %680 = vst [vmem:[%s1158_s4] sm:$0xff] %v874_v11  ;;  %681 = vst [vmem:[%s1158_s4 + $0x8] sm:$0xff] %v875_v12 }
 0x13e PF: > { %s14_s19 = sadd.s32 1, %s1006_s19   ;;  %s1159_s15 = smov %s994_s16 }
 0x13f   : > { %p11_p12 = scmp.ge.s32.totalorder %s14_s19, 7   ;;  %s1160_s16 = smov %s1069_s23 }
 0x140   : > { %s1161_s17 = smov %s1002_s18  ;;  %s1162_s18 = smov %s1164_s20 }
 0x141   :  { %13 = sbr.rel (!%p11_p12) target bundleno = 3 (0x3), region = 126 }

// kernel: uresnet_forward.34
= control target key start
LH: loop header
LB: loop body
LE: loop exit
PB: predicated region body
PF: predicated region fallthrough
CT: control target
= control target key end

     0   :  { %v289_v1 = vmov 0   ;;  %v194_v18 = vlaneseq  ;;  %s378_s1 = inlined_call_operand.vmem [shape: bf16[128,256], index: 1, kind: input, shape index: {}]   ;;  %s379_s0 = inlined_call_operand.vmem [shape: bf16[16,128], index: 0, kind: input, shape index: {}]   ;;  %s380_s2 = inlined_call_operand.vmem [shape: f32[1,256], index: 2, kind: input, shape index: {}]   ;;  %s381_s3 = inlined_call_operand.vmem [shape: f32[1,256], index: 3, kind: input, shape index: {}]   ;;  %s382_s4 = inlined_call_operand.vmem [shape: bf16[16,256], index: 4, kind: output, shape index: {}]  }
   0x1   :  { %v264_v0 = vld [vmem:[%s378_s1 + $0x74] ss:$8 sps:$4 sm:$0xff]   ;;  %166 = vmatprep.mubr.bf16.mxu0 %v289_v1  ;;  %v266_v2 = vld [vmem:[%s378_s1 + $0x70] ss:$8 sps:$4 sm:$0xff]   ;;  %v267_v3 = vld [vmem:[%s378_s1 + $0x64] ss:$8 sps:$4 sm:$0xff]  }
   0x2   :  { %134 = vmatprep.subr.bf16.mxu0 %v264_v0  ;;  %v269_v4 = vld [vmem:[%s378_s1 + $0x60] ss:$8 sps:$4 sm:$0xff]   ;;  %v270_v5 = vld [vmem:[%s378_s1 + $0x54] ss:$8 sps:$4 sm:$0xff]   ;;  %v272_v6 = vld [vmem:[%s378_s1 + $0x50] ss:$8 sps:$4 sm:$0xff]  }
   0x3   :  { %135 = vmatpush1.bf16.msra.mxu0 %v266_v2  ;;  %v273_v7 = vld [vmem:[%s378_s1 + $0x44] ss:$8 sps:$4 sm:$0xff]   ;;  %v275_v8 = vld [vmem:[%s378_s1 + $0x40] ss:$8 sps:$4 sm:$0xff]   ;;  %v276_v9 = vld [vmem:[%s378_s1 + $0x34] ss:$8 sps:$4 sm:$0xff]  }
   0x4   :  { %136 = vmatprep.subr.bf16.mxu0 %v267_v3  ;;  %v278_v10 = vld [vmem:[%s378_s1 + $0x30] ss:$8 sps:$4 sm:$0xff]   ;;  %v279_v11 = vld [vmem:[%s378_s1 + $0x24] ss:$8 sps:$4 sm:$0xff]   ;;  %v281_v12 = vld [vmem:[%s378_s1 + $0x20] ss:$8 sps:$4 sm:$0xff]  }
   0x5   :  { %v282_v13 = vld [vmem:[%s378_s1 + $0x14] ss:$8 sps:$4 sm:$0xff]   ;;  %v284_v14 = vld [vmem:[%s378_s1 + $0x10] ss:$8 sps:$4 sm:$0xff]   ;;  %v285_v15 = vld [vmem:[%s378_s1 + $0x4] ss:$8 sps:$4 sm:$0xff]  }
   0x6   :  { %v287_v16 = vld [vmem:[%s378_s1] ss:$8 sps:$4 sm:$0xff]   ;;  %v195_v19 = vshrl.u32 %v194_v18, 7 }
   0x7   :  { %137 = vmatpush1.bf16.msra.mxu0 %v269_v4  ;;  %v288_v17 = vld [vmem:[%s379_s0] sm:$0xff]  }
   0x8   :  { %138 = vmatprep.subr.bf16.mxu0 %v270_v5  ;;  %v196_v20 = vsub.s32 0, %v195_v19  ;;  %v192_v21 = vld [vmem:[%s380_s2] sm:$0x3]  ;;  %v200_v22 = vsub.s32 1, %v195_v19 }
   0x9   :  { %v208_v24 = vld [vmem:[%s381_s3] sm:$0x3] }
   0xa   :  { %v197_v23 = vrot.slane %v192_v21, %v196_v20  ;;  %v201_v25 = vrot.slane %v192_v21, %v200_v22  ;;  %v213_v28 = vrot.slane %v208_v24, %v196_v20  ;;  %v217_v29 = vrot.slane %v208_v24, %v200_v22 }
   0xb   :  { %139 = vmatpush1.bf16.msra.mxu0 %v272_v6 }
   0xc   :  { %140 = vmatprep.subr.bf16.mxu0 %v273_v7 }
   0xf   :  { %141 = vmatpush1.bf16.msra.mxu0 %v275_v8 }
  0x10   :  { %142 = vmatprep.subr.bf16.mxu0 %v276_v9 }
  0x13   :  { %143 = vmatpush1.bf16.msra.mxu0 %v278_v10 }
  0x14   :  { %144 = vmatprep.subr.bf16.mxu0 %v279_v11 }
  0x17   :  { %145 = vmatpush1.bf16.msra.mxu0 %v281_v12 }
  0x18   :  { %146 = vmatprep.subr.bf16.mxu0 %v282_v13 }
  0x1b   :  { %147 = vmatpush1.bf16.msra.mxu0 %v284_v14 }
  0x1c   :  { %148 = vmatprep.subr.bf16.mxu0 %v285_v15 }
  0x1f   :  { %149 = vmatpush1.bf16.msra.mxu0 %v287_v16 }
  0x22   :  { %167 = vmatmul.mubr.bf16.vlgmr.msra.gmra.mxu0 %v288_v17 }
  0xe2   :  { %v168_v26 = vpop.f32.mrf.mxu0 }
  0xe3   :  { %v204_v27 = vmul.f32 %v197_v23, %v168_v26 }
  0xe4   :  { %v170_v30 = vpop.f32.mrf.mxu0 }
  0xe5   :  { %v205_v31 = vmul.f32 %v201_v25, %v170_v30  ;;  %v220_v33 = vadd.f32 %v213_v28, %v204_v27 }
  0xe6   :  { %v172_v32 = vpop.f32.mrf.mxu0 }
  0xe7   :  { %v221_v34 = vadd.f32 %v217_v29, %v205_v31  ;;  %v206_v35 = vmul.f32 %v197_v23, %v172_v32 }
  0xe8   :  { %v174_v36 = vpop.f32.mrf.mxu0 }
  0xe9   :  { %v261_v37 = vpack.c.bf16 %v221_v34, %v220_v33  ;;  %v207_v38 = vmul.f32 %v201_v25, %v174_v36  ;;  %v222_v39 = vadd.f32 %v213_v28, %v206_v35 }
  0xeb   :  { %236 = vst [vmem:[%s382_s4] sm:$0xff] %v261_v37  ;;  %v223_v40 = vadd.f32 %v217_v29, %v207_v38 }
  0xed   :  { %v262_v41 = vpack.c.bf16 %v223_v40, %v222_v39 }
  0xef   :  { %237 = vst [vmem:[%s382_s4 + $0x8] sm:$0xff] %v262_v41 }

// kernel: uresnet_forward.35
= control target key start
LH: loop header
LB: loop body
LE: loop exit
PB: predicated region body
PF: predicated region fallthrough
CT: control target
= control target key end

     0   :  { %s1139_s18 = smov 0   ;;  %s1141_s19 = smov 0   ;;  %s1265_s0 = inlined_call_operand.vmem [shape: bf16[16,2304], index: 0, kind: input, shape index: {}]   ;;  %s1266_s1 = inlined_call_operand.vmem [shape: bf16[2304,256], index: 1, kind: input, shape index: {}]   ;;  %s1267_s2 = inlined_call_operand.vmem [shape: f32[1,256], index: 2, kind: input, shape index: {}]   ;;  %s1268_s3 = inlined_call_operand.vmem [shape: f32[1,256], index: 3, kind: input, shape index: {}]   ;;  %s1269_s4 = inlined_call_operand.vmem [shape: bf16[16,256], index: 4, kind: input, shape index: {}]   ;;  %s1270_s5 = inlined_call_operand.vmem [shape: bf16[16,256], index: 5, kind: output, shape index: {}]  }
   0x1   :  { %s1143_s20 = smov 0   ;;  %s1145_s21 = smov 0  }
   0x2   :  { %s1147_s22 = smov 0  }
   0x3 LB: > { %s27_s23 = sadd.s32 1, %s1102_s21  ;;  %p50_p1 = scmp.ne.s32.totalorder %s1094_s19, %s1090_s18  ;;  %s1106_s22 = sphi %s1147_s22, %s15_s22   ;;  %s1102_s21 = sphi %s1145_s21, %s1274_s21   ;;  %s1098_s20 = sphi %s1143_s20, %s1273_s20   ;;  %s1094_s19 = sphi %s1141_s19, %s1272_s19   ;;  %s1090_s18 = sphi %s1139_s18, %s1271_s18  }
   0x4   : > { %p28_p0 = scmp.ge.s32.totalorder %s27_s23, 9  ;;  %p51_p2 = scmp.eq.s32.totalorder %s1106_s22, 0 }
   0x5   : > { %s43_s25 = sadd.s32 1, %s1094_s19  ;;  %p921_p5 = scmp.ge.s32.totalorder %s1106_s22, 9 }
   0x6   : > { %s1276_s23 = smov (%p28_p0, %s27_s23), 0  ;;  %p52_p3 = por %p51_p2, %p50_p1 }
   0x7   : > { %s39_s24 = ssub.s32 %s1102_s21, %s1276_s23  ;;  %243 = sbr.rel (%p921_p5) target bundleno = 17 (0x11), region = 28 }
   0x8   : > { %p41_p4 = scmp.eq.s32.totalorder %s39_s24, 0 }
   0xa   : > { %s1174_s26 = scalar_select %p41_p4, %s1094_s19, %s43_s25  }
   0xc   : > { %246 = sbr.rel (!%p52_p3) target bundleno = 17 (0x11), region = 32  ;;  %s248_s27 = sand.u32 (%p52_p3), 1, %s1094_s19  }
   0xd   : > { %s972_s28 = sshll.u32 (%p52_p3), %s1102_s21, 3  ;;  %s922_s29 = sshll.u32 (%p52_p3), %s248_s27, 4 }
   0xe   : > { %s256_s7 = scalar_lea.vmem (%p52_p3), %s1265_s0, %s972_s28  ;;  %s250_s8 = scalar_lea.vmem (%p52_p3), [#allocation3], %s922_s29 }
   0xf   : > { %v287_v0 = vld [vmem:[%s256_s7] sm:$0xff] (%p52_p3)  ;;  %v289_v1 = vld [vmem:[%s256_s7 + $0x48] sm:$0xff] (%p52_p3) }
  0x10   : > { %288 = vst [vmem:[%s250_s8] sm:$0xff] (%p52_p3), %v287_v0  ;;  %290 = vst [vmem:[%s250_s8 + $0x8] sm:$0xff] (%p52_p3), %v289_v1 }
  0x11 PF: > { %p925_p6 = scmp.ge.s32.totalorder %s1106_s22, 1  ;;  %p310_p7 = scmp.lt.s32.totalorder %s1106_s22, 10 }
  0x13   : > { %p311_p8 = pnand %p925_p6, %p310_p7 }
  0x14   : > { %s317_s9 = sand.u32 (!%p311_p8), 1, %s1090_s18   ;;  %s927_s10 = sshll.u32 (!%p311_p8), %s1098_s20, 5 }
  0x15   : > { %314 = sbr.rel (%p311_p8) target bundleno = 320 (0x140), region = 74  ;;  %s1186_s11 = sshll.u32 (!%p311_p8), %s317_s9, 4 }
  0x16   : > { %p381_p9 = scmp.lt.s32.totalorder (!%p311_p8), %s927_s10, 287  ;;  %s319_s16 = scalar_lea.vmem (!%p311_p8), [#allocation3], %s1186_s11 }
  0x17   : > { %p930_p10 = scmp.ne.s32.totalorder (!%p311_p8), %s1098_s20, 0 }
  0x1a   : > { %s1278_s10 = smov (!%p381_p9, %s927_s10), 287  ;;  %428 = sbr.rel (%p930_p10) target bundleno = 34 (0x22), region = 82 }
  0x1b   : > { %s973_s12 = sshll.u32 %s1278_s10, 3 }
  0x1c   : > { %s1191_s15 = scalar_lea.vmem %s1266_s1, %s973_s12 }
  0x1f   : > { %v1108_v2 = vmov 0.0  }
  0x20   : > { %429 = vst [vmem:[#allocation2 + $0x10] sm:$0xff] %v1108_v2  ;;  %430 = vst [vmem:[#allocation2] sm:$0xff] %v1108_v2 }
  0x21   : > { %431 = vst [vmem:[#allocation2 + $0x18] sm:$0xff] %v1108_v2  ;;  %432 = vst [vmem:[#allocation2 + $0x8] sm:$0xff] %v1108_v2 }
  0x22 PF: > { %v1017_v3 = vld [vmem:[%s1191_s15 + $0x74] ss:$8 sps:$4 sm:$0xff]   ;;  %v1019_v4 = vld [vmem:[%s1191_s15 + $0x70] ss:$8 sps:$4 sm:$0xff]   ;;  %v1020_v5 = vld [vmem:[%s1191_s15 + $0x64] ss:$8 sps:$4 sm:$0xff]  }
  0x23   : > { %641 = vmatprep.subr.bf16.mxu0 %v1017_v3  ;;  %v1022_v6 = vld [vmem:[%s1191_s15 + $0x60] ss:$8 sps:$4 sm:$0xff]   ;;  %v1023_v7 = vld [vmem:[%s1191_s15 + $0x54] ss:$8 sps:$4 sm:$0xff]   ;;  %v1025_v8 = vld [vmem:[%s1191_s15 + $0x50] ss:$8 sps:$4 sm:$0xff]  }
  0x24   : > { %642 = vmatpush1.bf16.msra.mxu0 %v1019_v4  ;;  %v1026_v9 = vld [vmem:[%s1191_s15 + $0x44] ss:$8 sps:$4 sm:$0xff]   ;;  %v1028_v10 = vld [vmem:[%s1191_s15 + $0x40] ss:$8 sps:$4 sm:$0xff]   ;;  %v1029_v11 = vld [vmem:[%s1191_s15 + $0x34] ss:$8 sps:$4 sm:$0xff]  }
  0x25   : > { %643 = vmatprep.subr.bf16.mxu0 %v1020_v5  ;;  %v1031_v12 = vld [vmem:[%s1191_s15 + $0x30] ss:$8 sps:$4 sm:$0xff]   ;;  %v1032_v13 = vld [vmem:[%s1191_s15 + $0x24] ss:$8 sps:$4 sm:$0xff]   ;;  %v1034_v14 = vld [vmem:[%s1191_s15 + $0x20] ss:$8 sps:$4 sm:$0xff]  }
  0x26   : > { %v1035_v15 = vld [vmem:[%s1191_s15 + $0x14] ss:$8 sps:$4 sm:$0xff]   ;;  %v1037_v17 = vld [vmem:[%s1191_s15 + $0x10] ss:$8 sps:$4 sm:$0xff]   ;;  %v1038_v18 = vld [vmem:[%s1191_s15 + $0x4] ss:$8 sps:$4 sm:$0xff]  }
  0x27   : > { %v1067_v16 = vld [vmem:[%s319_s16 + $0x4] ss:$8 sps:$4 sm:$0xff]   ;;  %v1040_v19 = vld [vmem:[%s1191_s15] ss:$8 sps:$4 sm:$0xff]   ;;  %v1043_v21 = vld [vmem:[%s1191_s15 + $0xf0] ss:$8 sps:$4 sm:$0xff]  }
  0x28   : > { %644 = vmatpush1.bf16.msra.mxu0 %v1022_v6  ;;  %673 = vmatprep.mubr.bf16.mxu0 %v1067_v16  ;;  %v1041_v20 = vld [vmem:[%s1191_s15 + $0xf4] ss:$8 sps:$4 sm:$0xff]   ;;  %v1044_v22 = vld [vmem:[%s1191_s15 + $0xe4] ss:$8 sps:$4 sm:$0xff]   ;;  %v1046_v23 = vld [vmem:[%s1191_s15 + $0xe0] ss:$8 sps:$4 sm:$0xff]  }
  0x29   : > { %645 = vmatprep.subr.bf16.mxu0 %v1023_v7  ;;  %v1047_v24 = vld [vmem:[%s1191_s15 + $0xd4] ss:$8 sps:$4 sm:$0xff]   ;;  %v1049_v25 = vld [vmem:[%s1191_s15 + $0xd0] ss:$8 sps:$4 sm:$0xff]   ;;  %v1050_v26 = vld [vmem:[%s1191_s15 + $0xc4] ss:$8 sps:$4 sm:$0xff]  }
  0x2a   : > { %v1052_v27 = vld [vmem:[%s1191_s15 + $0xc0] ss:$8 sps:$4 sm:$0xff]   ;;  %v1053_v28 = vld [vmem:[%s1191_s15 + $0xb4] ss:$8 sps:$4 sm:$0xff]   ;;  %v1055_v29 = vld [vmem:[%s1191_s15 + $0xb0] ss:$8 sps:$4 sm:$0xff]  }
  0x2b   : > { %v1056_v30 = vld [vmem:[%s1191_s15 + $0xa4] ss:$8 sps:$4 sm:$0xff]   ;;  %v1058_v31 = vld [vmem:[%s1191_s15 + $0xa0] ss:$8 sps:$4 sm:$0xff]   ;;  %v1059_v32 = vld [vmem:[%s1191_s15 + $0x94] ss:$8 sps:$4 sm:$0xff]  }
  0x2c   : > { %646 = vmatpush1.bf16.msra.mxu0 %v1025_v8  ;;  %v1061_v33 = vld [vmem:[%s1191_s15 + $0x90] ss:$8 sps:$4 sm:$0xff]   ;;  %v1062_v34 = vld [vmem:[%s1191_s15 + $0x84] ss:$8 sps:$4 sm:$0xff]   ;;  %v1064_v35 = vld [vmem:[%s1191_s15 + $0x80] ss:$8 sps:$4 sm:$0xff]  }
  0x2d   : > { %647 = vmatprep.subr.bf16.mxu0 %v1026_v9  ;;  %v1065_v36 = vld [vmem:[%s319_s16] ss:$8 sps:$4 sm:$0xff]   ;;  %p965_p11 = scmp.ne.s32.totalorder %s1098_s20, 8 }
  0x2e   : > { %v433_v37 = vld [vmem:[#allocation2 + $0x10] sm:$0xff]  ;;  %v434_v39 = vld [vmem:[#allocation2] sm:$0xff]  ;;  %v435_v42 = vld [vmem:[#allocation2 + $0x18] sm:$0xff] }
  0x2f   : > { %v436_v45 = vld [vmem:[#allocation2 + $0x8] sm:$0xff] }
  0x30   : > { %648 = vmatpush1.bf16.msra.mxu0 %v1028_v10 }
  0x31   : > { %649 = vmatprep.subr.bf16.mxu0 %v1029_v11 }
  0x34   : > { %650 = vmatpush1.bf16.msra.mxu0 %v1031_v12 }
  0x35   : > { %651 = vmatprep.subr.bf16.mxu0 %v1032_v13 }
  0x38   : > { %652 = vmatpush1.bf16.msra.mxu0 %v1034_v14 }
  0x39   : > { %653 = vmatprep.subr.bf16.mxu0 %v1035_v15 }
  0x3c   : > { %654 = vmatpush1.bf16.msra.mxu0 %v1037_v17 }
  0x3d   : > { %655 = vmatprep.subr.bf16.mxu0 %v1038_v18 }
  0x40   : > { %656 = vmatpush1.bf16.msra.mxu0 %v1040_v19 }
  0x41   : > { %657 = vmatprep.subr.bf16.mxu0 %v1041_v20 }
  0x44   : > { %658 = vmatpush2.bf16.msra.mxu0 %v1043_v21 }
  0x45   : > { %659 = vmatprep.subr.bf16.mxu0 %v1044_v22 }
  0x48   : > { %660 = vmatpush2.bf16.msra.mxu0 %v1046_v23 }
  0x49   : > { %661 = vmatprep.subr.bf16.mxu0 %v1047_v24 }
  0x4c   : > { %662 = vmatpush2.bf16.msra.mxu0 %v1049_v25 }
  0x4d   : > { %663 = vmatprep.subr.bf16.mxu0 %v1050_v26 }
  0x50   : > { %664 = vmatpush2.bf16.msra.mxu0 %v1052_v27 }
  0x51   : > { %665 = vmatprep.subr.bf16.mxu0 %v1053_v28 }
  0x54   : > { %666 = vmatpush2.bf16.msra.mxu0 %v1055_v29 }
  0x55   : > { %667 = vmatprep.subr.bf16.mxu0 %v1056_v30 }
  0x58   : > { %668 = vmatpush2.bf16.msra.mxu0 %v1058_v31 }
  0x59   : > { %669 = vmatprep.subr.bf16.mxu0 %v1059_v32 }
  0x5c   : > { %670 = vmatpush2.bf16.msra.mxu0 %v1061_v33 }
  0x5d   : > { %671 = vmatprep.subr.bf16.mxu0 %v1062_v34 }
  0x60   : > { %672 = vmatpush2.bf16.msra.mxu0 %v1064_v35 }
  0x63   : > { %674 = vmatmul.mubr.bf16.vlgmr.msra.gmra.mxu0 %v1065_v36 }
 0x123   : > { %v675_v38 = vpop.f32.mrf.mxu0 }
 0x124   : > { %v684_v40 = vadd.f32 %v675_v38, %v433_v37 }
 0x125   : > { %v677_v41 = vpop.f32.mrf.mxu0 }
 0x126   : > { %688 = vst [vmem:[#allocation2 + $0x10] sm:$0xff] %v684_v40  ;;  %v685_v43 = vadd.f32 %v677_v41, %v434_v39 }
 0x127   : > { %v679_v44 = vpop.f32.mrf.mxu0 }
 0x128   : > { %689 = vst [vmem:[#allocation2] sm:$0xff] %v685_v43  ;;  %v686_v46 = vadd.f32 %v679_v44, %v435_v42  ;;  %695 = sbr.rel (%p965_p11) target bundleno = 320 (0x140), region = 86 }
 0x129   : > { %v681_v47 = vpop.f32.mrf.mxu0 }
 0x12a   : > { %690 = vst [vmem:[#allocation2 + $0x18] sm:$0xff] %v686_v46  ;;  %v687_v48 = vadd.f32 %v681_v47, %v436_v45 }
 0x12c   : > { %691 = vst [vmem:[#allocation2 + $0x8] sm:$0xff] %v687_v48 }
 0x12d   : > { %v702_v49 = vlaneseq  ;;  %v700_v51 = vld [vmem:[%s1267_s2] sm:$0x3]  ;;  %v696_v53 = vld [vmem:[#allocation2 + $0x10] sm:$0xff]  ;;  %v733_v57 = vld [vmem:[%s1269_s4 + $0x8] sm:$0xff] }
 0x12e   : > { %v716_v52 = vld [vmem:[%s1268_s3] sm:$0x3]  ;;  %v736_v3 = vunpack.c.l.bf16 %v733_v57  ;;  %v737_v4 = vunpack.c.h.bf16 %v733_v57 }
 0x12f   : > { %v703_v50 = vshrl.u32 %v702_v49, 7  ;;  %v732_v56 = vld [vmem:[%s1269_s4] sm:$0xff] }
 0x130   : > { %v697_v58 = vld [vmem:[#allocation2] sm:$0xff]  ;;  %v734_v1 = vunpack.c.l.bf16 %v732_v56  ;;  %v735_v2 = vunpack.c.h.bf16 %v732_v56 }
 0x131   : > { %v704_v54 = vsub.s32 0, %v703_v50  ;;  %v708_v55 = vsub.s32 1, %v703_v50  ;;  %v698_v59 = vld [vmem:[#allocation2 + $0x18] sm:$0xff] }
 0x133   : > { %v699_v60 = vld [vmem:[#allocation2 + $0x8] sm:$0xff]  ;;  %v705_v61 = vrot.slane %v700_v51, %v704_v54  ;;  %v709_v62 = vrot.slane %v700_v51, %v708_v55  ;;  %v721_v63 = vrot.slane %v716_v52, %v704_v54  ;;  %v725_v0 = vrot.slane %v716_v52, %v708_v55 }
 0x135   : > { %v712_v5 = vmul.f32 %v705_v61, %v696_v53  ;;  %v713_v6 = vmul.f32 %v709_v62, %v697_v58  ;;  %v714_v7 = vmul.f32 %v705_v61, %v698_v59  ;;  %v715_v8 = vmul.f32 %v709_v62, %v699_v60 }
 0x137   : > { %v728_v9 = vadd.f32 %v721_v63, %v712_v5  ;;  %v729_v10 = vadd.f32 %v725_v0, %v713_v6  ;;  %v730_v11 = vadd.f32 %v721_v63, %v714_v7  ;;  %v731_v12 = vadd.f32 %v725_v0, %v715_v8 }
 0x139   : > { %v738_v13 = vadd.f32 %v734_v1, %v728_v9  ;;  %v739_v14 = vadd.f32 %v735_v2, %v729_v10  ;;  %v740_v15 = vadd.f32 %v736_v3, %v730_v11  ;;  %v741_v16 = vadd.f32 %v737_v4, %v731_v12 }
 0x13b   : > { %v742_v17 = vmax.f32 %v738_v13, 0.0  ;;  %v743_v18 = vmax.f32 %v739_v14, 0.0  ;;  %v744_v19 = vmax.f32 %v740_v15, 0.0  ;;  %v745_v20 = vmax.f32 %v741_v16, 0.0 }
 0x13d   : > { %v974_v21 = vpack.c.bf16 %v743_v18, %v742_v17  ;;  %v975_v22 = vpack.c.bf16 %v745_v20, %v744_v19 }
 0x13f   : > { %758 = vst [vmem:[%s1270_s5] sm:$0xff] %v974_v21  ;;  %759 = vst [vmem:[%s1270_s5 + $0x8] sm:$0xff] %v975_v22 }
 0x140 PF: > { %s15_s22 = sadd.s32 1, %s1106_s22   ;;  %s1271_s18 = smov %s1094_s19 }
 0x141   : > { %p12_p12 = scmp.ge.s32.totalorder %s15_s22, 11   ;;  %s1272_s19 = smov %s1174_s26 }
 0x142   : > { %s1273_s20 = smov %s1102_s21  ;;  %s1274_s21 = smov %s1276_s23 }
 0x143   :  { %14 = sbr.rel (!%p12_p12) target bundleno = 3 (0x3), region = 133 }

// kernel: uresnet_forward.36
= control target key start
LH: loop header
LB: loop body
LE: loop exit
PB: predicated region body
PF: predicated region fallthrough
CT: control target
= control target key end

     0   :  { %s1034_s15 = smov 0   ;;  %s1036_s16 = smov 0   ;;  %s1154_s0 = inlined_call_operand.vmem [shape: bf16[16,2304], index: 0, kind: input, shape index: {}]   ;;  %s1155_s1 = inlined_call_operand.vmem [shape: bf16[2304,256], index: 1, kind: input, shape index: {}]   ;;  %s1156_s2 = inlined_call_operand.vmem [shape: f32[1,256], index: 2, kind: input, shape index: {}]   ;;  %s1157_s3 = inlined_call_operand.vmem [shape: f32[1,256], index: 3, kind: input, shape index: {}]   ;;  %s1158_s4 = inlined_call_operand.vmem [shape: bf16[16,256], index: 4, kind: output, shape index: {}]  }
   0x1   :  { %s1038_s17 = smov 0   ;;  %s1040_s18 = smov 0  }
   0x2   :  { %s1042_s19 = smov 0  }
   0x3 LB: > { %s26_s20 = sadd.s32 1, %s1002_s18  ;;  %p49_p1 = scmp.ne.s32.totalorder %s994_s16, %s990_s15  ;;  %s1006_s19 = sphi %s1042_s19, %s14_s19   ;;  %s1002_s18 = sphi %s1040_s18, %s1162_s18   ;;  %s998_s17 = sphi %s1038_s17, %s1161_s17   ;;  %s994_s16 = sphi %s1036_s16, %s1160_s16   ;;  %s990_s15 = sphi %s1034_s15, %s1159_s15  }
   0x4   : > { %p27_p0 = scmp.ge.s32.totalorder %s26_s20, 9  ;;  %p50_p2 = scmp.eq.s32.totalorder %s1006_s19, 0 }
   0x5   : > { %s42_s22 = sadd.s32 1, %s994_s16  ;;  %p821_p5 = scmp.ge.s32.totalorder %s1006_s19, 9 }
   0x6   : > { %s1164_s20 = smov (%p27_p0, %s26_s20), 0  ;;  %p51_p3 = por %p50_p2, %p49_p1 }
   0x7   : > { %s38_s21 = ssub.s32 %s1002_s18, %s1164_s20  ;;  %199 = sbr.rel (%p821_p5) target bundleno = 17 (0x11), region = 24 }
   0x8   : > { %p40_p4 = scmp.eq.s32.totalorder %s38_s21, 0 }
   0xa   : > { %s1069_s23 = scalar_select %p40_p4, %s994_s16, %s42_s22  }
   0xc   : > { %202 = sbr.rel (!%p51_p3) target bundleno = 17 (0x11), region = 28  ;;  %s204_s24 = sand.u32 (%p51_p3), 1, %s994_s16  }
   0xd   : > { %s872_s25 = sshll.u32 (%p51_p3), %s1002_s18, 3  ;;  %s822_s26 = sshll.u32 (%p51_p3), %s204_s24, 4 }
   0xe   : > { %s212_s29 = scalar_lea.vmem (%p51_p3), %s1154_s0, %s872_s25  ;;  %s206_s30 = scalar_lea.vmem (%p51_p3), [#allocation3], %s822_s26 }
   0xf   : > { %v243_v0 = vld [vmem:[%s212_s29] sm:$0xff] (%p51_p3)  ;;  %v245_v1 = vld [vmem:[%s212_s29 + $0x48] sm:$0xff] (%p51_p3) }
  0x10   : > { %244 = vst [vmem:[%s206_s30] sm:$0xff] (%p51_p3), %v243_v0  ;;  %246 = vst [vmem:[%s206_s30 + $0x8] sm:$0xff] (%p51_p3), %v245_v1 }
  0x11 PF: > { %p825_p6 = scmp.ge.s32.totalorder %s1006_s19, 1  ;;  %p266_p7 = scmp.lt.s32.totalorder %s1006_s19, 10 }
  0x13   : > { %p267_p8 = pnand %p825_p6, %p266_p7 }
  0x14   : > { %s273_s5 = sand.u32 (!%p267_p8), 1, %s990_s15   ;;  %s827_s6 = sshll.u32 (!%p267_p8), %s998_s17, 5 }
  0x15   : > { %270 = sbr.rel (%p267_p8) target bundleno = 318 (0x13e), region = 70  ;;  %s1081_s7 = sshll.u32 (!%p267_p8), %s273_s5, 4 }
  0x16   : > { %p325_p9 = scmp.lt.s32.totalorder (!%p267_p8), %s827_s6, 287  ;;  %s275_s12 = scalar_lea.vmem (!%p267_p8), [#allocation3], %s1081_s7 }
  0x17   : > { %p830_p10 = scmp.ne.s32.totalorder (!%p267_p8), %s998_s17, 0 }
  0x1a   : > { %s1166_s6 = smov (!%p325_p9, %s827_s6), 287  ;;  %360 = sbr.rel (%p830_p10) target bundleno = 34 (0x22), region = 78 }
  0x1b   : > { %s873_s8 = sshll.u32 %s1166_s6, 3 }
  0x1c   : > { %s1086_s11 = scalar_lea.vmem %s1155_s1, %s873_s8 }
  0x1f   : > { %v1008_v2 = vmov 0.0  }
  0x20   : > { %361 = vst [vmem:[#allocation2 + $0x10] sm:$0xff] %v1008_v2  ;;  %362 = vst [vmem:[#allocation2] sm:$0xff] %v1008_v2 }
  0x21   : > { %363 = vst [vmem:[#allocation2 + $0x18] sm:$0xff] %v1008_v2  ;;  %364 = vst [vmem:[#allocation2 + $0x8] sm:$0xff] %v1008_v2 }
  0x22 PF: > { %v917_v3 = vld [vmem:[%s1086_s11 + $0x74] ss:$8 sps:$4 sm:$0xff]   ;;  %v919_v4 = vld [vmem:[%s1086_s11 + $0x70] ss:$8 sps:$4 sm:$0xff]   ;;  %v920_v5 = vld [vmem:[%s1086_s11 + $0x64] ss:$8 sps:$4 sm:$0xff]  }
  0x23   : > { %573 = vmatprep.subr.bf16.mxu0 %v917_v3  ;;  %v922_v6 = vld [vmem:[%s1086_s11 + $0x60] ss:$8 sps:$4 sm:$0xff]   ;;  %v923_v7 = vld [vmem:[%s1086_s11 + $0x54] ss:$8 sps:$4 sm:$0xff]   ;;  %v925_v8 = vld [vmem:[%s1086_s11 + $0x50] ss:$8 sps:$4 sm:$0xff]  }
  0x24   : > { %574 = vmatpush1.bf16.msra.mxu0 %v919_v4  ;;  %v926_v9 = vld [vmem:[%s1086_s11 + $0x44] ss:$8 sps:$4 sm:$0xff]   ;;  %v928_v10 = vld [vmem:[%s1086_s11 + $0x40] ss:$8 sps:$4 sm:$0xff]   ;;  %v929_v11 = vld [vmem:[%s1086_s11 + $0x34] ss:$8 sps:$4 sm:$0xff]  }
  0x25   : > { %575 = vmatprep.subr.bf16.mxu0 %v920_v5  ;;  %v931_v12 = vld [vmem:[%s1086_s11 + $0x30] ss:$8 sps:$4 sm:$0xff]   ;;  %v932_v13 = vld [vmem:[%s1086_s11 + $0x24] ss:$8 sps:$4 sm:$0xff]   ;;  %v934_v14 = vld [vmem:[%s1086_s11 + $0x20] ss:$8 sps:$4 sm:$0xff]  }
  0x26   : > { %v935_v15 = vld [vmem:[%s1086_s11 + $0x14] ss:$8 sps:$4 sm:$0xff]   ;;  %v937_v17 = vld [vmem:[%s1086_s11 + $0x10] ss:$8 sps:$4 sm:$0xff]   ;;  %v938_v18 = vld [vmem:[%s1086_s11 + $0x4] ss:$8 sps:$4 sm:$0xff]  }
  0x27   : > { %v967_v16 = vld [vmem:[%s275_s12 + $0x4] ss:$8 sps:$4 sm:$0xff]   ;;  %v940_v19 = vld [vmem:[%s1086_s11] ss:$8 sps:$4 sm:$0xff]   ;;  %v943_v21 = vld [vmem:[%s1086_s11 + $0xf0] ss:$8 sps:$4 sm:$0xff]  }
  0x28   : > { %576 = vmatpush1.bf16.msra.mxu0 %v922_v6  ;;  %605 = vmatprep.mubr.bf16.mxu0 %v967_v16  ;;  %v941_v20 = vld [vmem:[%s1086_s11 + $0xf4] ss:$8 sps:$4 sm:$0xff]   ;;  %v944_v22 = vld [vmem:[%s1086_s11 + $0xe4] ss:$8 sps:$4 sm:$0xff]   ;;  %v946_v23 = vld [vmem:[%s1086_s11 + $0xe0] ss:$8 sps:$4 sm:$0xff]  }
  0x29   : > { %577 = vmatprep.subr.bf16.mxu0 %v923_v7  ;;  %v947_v24 = vld [vmem:[%s1086_s11 + $0xd4] ss:$8 sps:$4 sm:$0xff]   ;;  %v949_v25 = vld [vmem:[%s1086_s11 + $0xd0] ss:$8 sps:$4 sm:$0xff]   ;;  %v950_v26 = vld [vmem:[%s1086_s11 + $0xc4] ss:$8 sps:$4 sm:$0xff]  }
  0x2a   : > { %v952_v27 = vld [vmem:[%s1086_s11 + $0xc0] ss:$8 sps:$4 sm:$0xff]   ;;  %v953_v28 = vld [vmem:[%s1086_s11 + $0xb4] ss:$8 sps:$4 sm:$0xff]   ;;  %v955_v29 = vld [vmem:[%s1086_s11 + $0xb0] ss:$8 sps:$4 sm:$0xff]  }
  0x2b   : > { %v956_v30 = vld [vmem:[%s1086_s11 + $0xa4] ss:$8 sps:$4 sm:$0xff]   ;;  %v958_v31 = vld [vmem:[%s1086_s11 + $0xa0] ss:$8 sps:$4 sm:$0xff]   ;;  %v959_v32 = vld [vmem:[%s1086_s11 + $0x94] ss:$8 sps:$4 sm:$0xff]  }
  0x2c   : > { %578 = vmatpush1.bf16.msra.mxu0 %v925_v8  ;;  %v961_v33 = vld [vmem:[%s1086_s11 + $0x90] ss:$8 sps:$4 sm:$0xff]   ;;  %v962_v34 = vld [vmem:[%s1086_s11 + $0x84] ss:$8 sps:$4 sm:$0xff]   ;;  %v964_v35 = vld [vmem:[%s1086_s11 + $0x80] ss:$8 sps:$4 sm:$0xff]  }
  0x2d   : > { %579 = vmatprep.subr.bf16.mxu0 %v926_v9  ;;  %v965_v36 = vld [vmem:[%s275_s12] ss:$8 sps:$4 sm:$0xff]   ;;  %p865_p11 = scmp.ne.s32.totalorder %s998_s17, 8 }
  0x2e   : > { %v365_v37 = vld [vmem:[#allocation2 + $0x10] sm:$0xff]  ;;  %v366_v39 = vld [vmem:[#allocation2] sm:$0xff]  ;;  %v367_v42 = vld [vmem:[#allocation2 + $0x18] sm:$0xff] }
  0x2f   : > { %v368_v45 = vld [vmem:[#allocation2 + $0x8] sm:$0xff] }
  0x30   : > { %580 = vmatpush1.bf16.msra.mxu0 %v928_v10 }
  0x31   : > { %581 = vmatprep.subr.bf16.mxu0 %v929_v11 }
  0x34   : > { %582 = vmatpush1.bf16.msra.mxu0 %v931_v12 }
  0x35   : > { %583 = vmatprep.subr.bf16.mxu0 %v932_v13 }
  0x38   : > { %584 = vmatpush1.bf16.msra.mxu0 %v934_v14 }
  0x39   : > { %585 = vmatprep.subr.bf16.mxu0 %v935_v15 }
  0x3c   : > { %586 = vmatpush1.bf16.msra.mxu0 %v937_v17 }
  0x3d   : > { %587 = vmatprep.subr.bf16.mxu0 %v938_v18 }
  0x40   : > { %588 = vmatpush1.bf16.msra.mxu0 %v940_v19 }
  0x41   : > { %589 = vmatprep.subr.bf16.mxu0 %v941_v20 }
  0x44   : > { %590 = vmatpush2.bf16.msra.mxu0 %v943_v21 }
  0x45   : > { %591 = vmatprep.subr.bf16.mxu0 %v944_v22 }
  0x48   : > { %592 = vmatpush2.bf16.msra.mxu0 %v946_v23 }
  0x49   : > { %593 = vmatprep.subr.bf16.mxu0 %v947_v24 }
  0x4c   : > { %594 = vmatpush2.bf16.msra.mxu0 %v949_v25 }
  0x4d   : > { %595 = vmatprep.subr.bf16.mxu0 %v950_v26 }
  0x50   : > { %596 = vmatpush2.bf16.msra.mxu0 %v952_v27 }
  0x51   : > { %597 = vmatprep.subr.bf16.mxu0 %v953_v28 }
  0x54   : > { %598 = vmatpush2.bf16.msra.mxu0 %v955_v29 }
  0x55   : > { %599 = vmatprep.subr.bf16.mxu0 %v956_v30 }
  0x58   : > { %600 = vmatpush2.bf16.msra.mxu0 %v958_v31 }
  0x59   : > { %601 = vmatprep.subr.bf16.mxu0 %v959_v32 }
  0x5c   : > { %602 = vmatpush2.bf16.msra.mxu0 %v961_v33 }
  0x5d   : > { %603 = vmatprep.subr.bf16.mxu0 %v962_v34 }
  0x60   : > { %604 = vmatpush2.bf16.msra.mxu0 %v964_v35 }
  0x63   : > { %606 = vmatmul.mubr.bf16.vlgmr.msra.gmra.mxu0 %v965_v36 }
 0x123   : > { %v607_v38 = vpop.f32.mrf.mxu0 }
 0x124   : > { %v616_v40 = vadd.f32 %v607_v38, %v365_v37 }
 0x125   : > { %v609_v41 = vpop.f32.mrf.mxu0 }
 0x126   : > { %620 = vst [vmem:[#allocation2 + $0x10] sm:$0xff] %v616_v40  ;;  %v617_v43 = vadd.f32 %v609_v41, %v366_v39 }
 0x127   : > { %v611_v44 = vpop.f32.mrf.mxu0 }
 0x128   : > { %621 = vst [vmem:[#allocation2] sm:$0xff] %v617_v43  ;;  %v618_v46 = vadd.f32 %v611_v44, %v367_v42  ;;  %627 = sbr.rel (%p865_p11) target bundleno = 318 (0x13e), region = 82 }
 0x129   : > { %v613_v47 = vpop.f32.mrf.mxu0 }
 0x12a   : > { %622 = vst [vmem:[#allocation2 + $0x18] sm:$0xff] %v618_v46  ;;  %v619_v48 = vadd.f32 %v613_v47, %v368_v45 }
 0x12c   : > { %623 = vst [vmem:[#allocation2 + $0x8] sm:$0xff] %v619_v48 }
 0x12d   : > { %v634_v49 = vlaneseq  ;;  %v632_v51 = vld [vmem:[%s1156_s2] sm:$0x3]  ;;  %v628_v53 = vld [vmem:[#allocation2 + $0x10] sm:$0xff] }
 0x12e   : > { %v648_v52 = vld [vmem:[%s1157_s3] sm:$0x3] }
 0x12f   : > { %v635_v50 = vshrl.u32 %v634_v49, 7  ;;  %v629_v56 = vld [vmem:[#allocation2] sm:$0xff] }
 0x131   : > { %v636_v54 = vsub.s32 0, %v635_v50  ;;  %v640_v55 = vsub.s32 1, %v635_v50  ;;  %v630_v57 = vld [vmem:[#allocation2 + $0x18] sm:$0xff] }
 0x133   : > { %v631_v58 = vld [vmem:[#allocation2 + $0x8] sm:$0xff]  ;;  %v637_v59 = vrot.slane %v632_v51, %v636_v54  ;;  %v641_v60 = vrot.slane %v632_v51, %v640_v55  ;;  %v653_v61 = vrot.slane %v648_v52, %v636_v54  ;;  %v657_v62 = vrot.slane %v648_v52, %v640_v55 }
 0x135   : > { %v644_v63 = vmul.f32 %v637_v59, %v628_v53  ;;  %v645_v0 = vmul.f32 %v641_v60, %v629_v56  ;;  %v646_v1 = vmul.f32 %v637_v59, %v630_v57  ;;  %v647_v2 = vmul.f32 %v641_v60, %v631_v58 }
 0x137   : > { %v660_v3 = vadd.f32 %v653_v61, %v644_v63  ;;  %v661_v4 = vadd.f32 %v657_v62, %v645_v0  ;;  %v662_v5 = vadd.f32 %v653_v61, %v646_v1  ;;  %v663_v6 = vadd.f32 %v657_v62, %v647_v2 }
 0x139   : > { %v664_v7 = vmax.f32 %v660_v3, 0.0  ;;  %v665_v8 = vmax.f32 %v661_v4, 0.0  ;;  %v666_v9 = vmax.f32 %v662_v5, 0.0  ;;  %v667_v10 = vmax.f32 %v663_v6, 0.0 }
 0x13b   : > { %v874_v11 = vpack.c.bf16 %v665_v8, %v664_v7  ;;  %v875_v12 = vpack.c.bf16 %v667_v10, %v666_v9 }
 0x13d   : > { %680 = vst [vmem:[%s1158_s4] sm:$0xff] %v874_v11  ;;  %681 = vst [vmem:[%s1158_s4 + $0x8] sm:$0xff] %v875_v12 }
 0x13e PF: > { %s14_s19 = sadd.s32 1, %s1006_s19   ;;  %s1159_s15 = smov %s994_s16 }
 0x13f   : > { %p11_p12 = scmp.ge.s32.totalorder %s14_s19, 11   ;;  %s1160_s16 = smov %s1069_s23 }
 0x140   : > { %s1161_s17 = smov %s1002_s18  ;;  %s1162_s18 = smov %s1164_s20 }
 0x141   :  { %13 = sbr.rel (!%p11_p12) target bundleno = 3 (0x3), region = 126 }

// kernel: uresnet_forward.38
= control target key start
LH: loop header
LB: loop body
LE: loop exit
PB: predicated region body
PF: predicated region fallthrough
CT: control target
= control target key end

     0   :  { %s1298_s15 = smov 0   ;;  %s1300_s16 = smov 0   ;;  %s1594_s0 = inlined_call_operand.vmem [shape: bf16[16,2304], index: 0, kind: input, shape index: {}]   ;;  %s1595_s1 = inlined_call_operand.vmem [shape: bf16[2304,512], index: 1, kind: input, shape index: {}]   ;;  %s1596_s2 = inlined_call_operand.vmem [shape: f32[1,512], index: 2, kind: input, shape index: {}]   ;;  %s1597_s3 = inlined_call_operand.vmem [shape: f32[1,512], index: 3, kind: input, shape index: {}]   ;;  %s1598_s4 = inlined_call_operand.vmem [shape: bf16[16,512], index: 4, kind: output, shape index: {}]  }
   0x1   :  { %s1302_s17 = smov 0   ;;  %s1304_s18 = smov 0  }
   0x2   :  { %s1306_s19 = smov 0   ;;  %s1308_s20 = smov 0  }
   0x3   :  { %s1310_s21 = smov 0   ;;  %s1312_s22 = smov 0  }
   0x4   :  { %s1314_s23 = smov 0   ;;  %s1316_s24 = smov 0  }
   0x5   :  { %s1318_s25 = smov 0  }
   0x6 LB: > { %1602 = sst [smem:[#allocation6_spill]] %s1250_s20  ;;  %s978_s26 = sadd.s32 4294967295, %s1270_s25   ;;  %s1270_s25 = sphi %s1318_s25, %s14_s25   ;;  %s1266_s24 = sphi %s1316_s24, %s1620_s24   ;;  %s1262_s23 = sphi %s1314_s23, %s1619_s23   ;;  %s1258_s22 = sphi %s1312_s22, %s1618_s22   ;;  %s1254_s21 = sphi %s1310_s21, %s1617_s21   ;;  %s1250_s20 = sphi %s1308_s20, %s1610_s20   ;;  %s1246_s19 = sphi %s1306_s19, %s1609_s19   ;;  %s1242_s18 = sphi %s1304_s18, %s1616_s18   ;;  %s1238_s17 = sphi %s1302_s17, %s1615_s17   ;;  %s1234_s16 = sphi %s1300_s16, %s1614_s16   ;;  %s1230_s15 = sphi %s1298_s15, %s1613_s15  }
   0x7   : > { %s26_s27 = sadd.s32 1, %s1262_s23  ;;  %s29_s28 = sadd.s32 1, %s1266_s24 }
   0x8   : > { %p27_p0 = scmp.ge.s32.totalorder %s26_s27, 9  ;;  %s42_s29 = sadd.s32 1, %s1250_s20 }
   0x9   : > { %p49_p1 = scmp.ne.s32.totalorder %s1250_s20, %s1246_s19  ;;  %p50_p2 = scmp.eq.s32.totalorder %s1270_s25, 0 }
   0xa   : > { %s1622_s27 = smov (%p27_p0, %s26_s27), 0  ;;  %s1624_s28 = smov (!%p27_p0, %s29_s28), %s1266_s24 }
   0xb   : > { %1603 = sst [smem:[#allocation7_spill]] %s1622_s27  ;;  %s38_s30 = ssub.s32 %s1262_s23, %s1622_s27 }
   0xc   : > { %p31_p3 = scmp.ge.s32.totalorder %s1624_s28, 2  ;;  %p40_p4 = scmp.eq.s32.totalorder %s38_s30, 0 }
   0xd   : > { %p1365_p5 = por %p50_p2, %p49_p1  ;;  %s70_s6 = sadd.s32 1, %s1242_s18 }
   0xe   : > { %s1626_s28 = smov (%p31_p3, %s1624_s28), 0  ;;  %p77_p6 = scmp.ne.s32.totalorder %s1242_s18, %s1238_s17 }
   0xf   : > { %1605 = sst [smem:[#allocation8_spill]] %s1626_s28  ;;  %s66_s8 = ssub.s32 %s1266_s24, %s1626_s28 }
  0x10   : > { %s1373_s7 = scalar_select %p40_p4, %s1250_s20, %s42_s29  }
  0x11   : > { %s67_s9 = sor.u32 %s66_s8, %s38_s30  ;;  %p148_p7 = scmp.eq.s32.totalorder %s66_s8, 0 }
  0x12   : > { %1606 = sst [smem:[#allocation9_spill]] %s1373_s7  ;;  %p68_p8 = scmp.eq.s32.totalorder %s67_s9, 0 }
  0x13   : > { %p1379_p9 = por %p77_p6, %p50_p2  ;;  %s150_s11 = sadd.s32 1, %s1234_s16 }
  0x14   : > { %p160_p10 = scmp.ne.s32.totalorder %s1234_s16, %s1230_s15  ;;  %p161_p11 = scmp.eq.s32.totalorder %s978_s26, 17 }
  0x15   : > { %s1387_s12 = scalar_select %p68_p8, %s1242_s18, %s70_s6  }
  0x16   : > { %s1390_s13 = scalar_select %p148_p7, %s1234_s16, %s150_s11  }
  0x17   : > { %p1392_p12 = por %p161_p11, %p160_p10  ;;  %p981_p13 = scmp.ge.s32.totalorder %s1270_s25, 18 }
  0x19   : > { %183 = sbr.rel (%p981_p13) target bundleno = 58 (0x3a), region = 16 }
  0x1e   : > { %186 = sbr.rel (!%p1365_p5) target bundleno = 35 (0x23), region = 20  ;;  %s188_s29 = sand.u32 (%p1365_p5), 1, %s1250_s20  }
  0x1f   : > { %s1039_s30 = sshll.u32 (%p1365_p5), %s1262_s23, 3  ;;  %s982_s8 = sshll.u32 (%p1365_p5), %s188_s29, 4 }
  0x20   : > { %s196_s11 = scalar_lea.vmem (%p1365_p5), %s1594_s0, %s1039_s30  ;;  %s190_s26 = scalar_lea.vmem (%p1365_p5), [#allocation3], %s982_s8 }
  0x21   : > { %v227_v0 = vld [vmem:[%s196_s11] sm:$0xff] (%p1365_p5)  ;;  %v229_v1 = vld [vmem:[%s196_s11 + $0x48] sm:$0xff] (%p1365_p5) }
  0x22   : > { %228 = vst [vmem:[%s190_s26] sm:$0xff] (%p1365_p5), %v227_v0  ;;  %230 = vst [vmem:[%s190_s26 + $0x8] sm:$0xff] (%p1365_p5), %v229_v1 }
  0x23 PF: > { %236 = sbr.rel (!%p1379_p9) target bundleno = 58 (0x3a), region = 58  ;;  %s238_s5 = sand.u32 (%p1379_p9), 1, %s1242_s18  }
  0x24   : > { %s987_s28 = sshll.u32 (%p1379_p9), %s1266_s24, 1  ;;  %s985_s27 = sshll.u32 (%p1379_p9), %s238_s5, 8 }
  0x25   : > { %s1040_s29 = sshll.u32 (%p1379_p9), %s1262_s23, 7  ;;  %s1417_s10 = scalar_lea.vmem (%p1379_p9), [#allocation4], %s985_s27 }
  0x26   : > { %s244_s7 = sadd.s32 (%p1379_p9), %s1040_s29, %s987_s28 }
  0x27   : > { %s989_s20 = sshll.u32 (%p1379_p9), %s244_s7, 2 }
  0x28   : > { %s1412_s9 = scalar_lea.vmem %s1595_s1, %s989_s20 }
  0x29   : > { %v337_v2 = vld [vmem:[%s1412_s9] sm:$0xff]  ;;  %v339_v3 = vld [vmem:[%s1412_s9 + $0x10] sm:$0xff] }
  0x2a   : > { %v341_v4 = vld [vmem:[%s1412_s9 + $0x20] sm:$0xff]  ;;  %338 = vst [vmem:[%s1417_s10] sm:$0xff] %v337_v2  ;;  %340 = vst [vmem:[%s1417_s10 + $0x8] sm:$0xff] %v339_v3  ;;  %v343_v5 = vld [vmem:[%s1412_s9 + $0x30] sm:$0xff] }
  0x2b   : > { %342 = vst [vmem:[%s1417_s10 + $0x10] sm:$0xff] %v341_v4  ;;  %v345_v6 = vld [vmem:[%s1412_s9 + $0x40] sm:$0xff]  ;;  %v347_v7 = vld [vmem:[%s1412_s9 + $0x50] sm:$0xff]  ;;  %344 = vst [vmem:[%s1417_s10 + $0x18] sm:$0xff] %v343_v5 }
  0x2c   : > { %346 = vst [vmem:[%s1417_s10 + $0x20] sm:$0xff] %v345_v6  ;;  %348 = vst [vmem:[%s1417_s10 + $0x28] sm:$0xff] %v347_v7  ;;  %v349_v8 = vld [vmem:[%s1412_s9 + $0x60] sm:$0xff]  ;;  %v351_v9 = vld [vmem:[%s1412_s9 + $0x70] sm:$0xff] }
  0x2d   : > { %v353_v10 = vld [vmem:[%s1412_s9 + $0x80] sm:$0xff]  ;;  %350 = vst [vmem:[%s1417_s10 + $0x30] sm:$0xff] %v349_v8  ;;  %352 = vst [vmem:[%s1417_s10 + $0x38] sm:$0xff] %v351_v9  ;;  %v355_v11 = vld [vmem:[%s1412_s9 + $0x90] sm:$0xff] }
  0x2e   : > { %354 = vst [vmem:[%s1417_s10 + $0x40] sm:$0xff] %v353_v10  ;;  %v357_v12 = vld [vmem:[%s1412_s9 + $0xa0] sm:$0xff]  ;;  %v359_v13 = vld [vmem:[%s1412_s9 + $0xb0] sm:$0xff]  ;;  %356 = vst [vmem:[%s1417_s10 + $0x48] sm:$0xff] %v355_v11 }
  0x2f   : > { %358 = vst [vmem:[%s1417_s10 + $0x50] sm:$0xff] %v357_v12  ;;  %360 = vst [vmem:[%s1417_s10 + $0x58] sm:$0xff] %v359_v13  ;;  %v361_v14 = vld [vmem:[%s1412_s9 + $0xc0] sm:$0xff]  ;;  %v363_v15 = vld [vmem:[%s1412_s9 + $0xd0] sm:$0xff] }
  0x30   : > { %v365_v16 = vld [vmem:[%s1412_s9 + $0xe0] sm:$0xff]  ;;  %362 = vst [vmem:[%s1417_s10 + $0x60] sm:$0xff] %v361_v14  ;;  %364 = vst [vmem:[%s1417_s10 + $0x68] sm:$0xff] %v363_v15  ;;  %v367_v17 = vld [vmem:[%s1412_s9 + $0xf0] sm:$0xff] }
  0x31   : > { %366 = vst [vmem:[%s1417_s10 + $0x70] sm:$0xff] %v365_v16  ;;  %v369_v18 = vld [vmem:[%s1412_s9 + $0x100] sm:$0xff]  ;;  %v371_v19 = vld [vmem:[%s1412_s9 + $0x110] sm:$0xff]  ;;  %368 = vst [vmem:[%s1417_s10 + $0x78] sm:$0xff] %v367_v17 }
  0x32   : > { %370 = vst [vmem:[%s1417_s10 + $0x80] sm:$0xff] %v369_v18  ;;  %372 = vst [vmem:[%s1417_s10 + $0x88] sm:$0xff] %v371_v19  ;;  %v373_v20 = vld [vmem:[%s1412_s9 + $0x120] sm:$0xff]  ;;  %v375_v21 = vld [vmem:[%s1412_s9 + $0x130] sm:$0xff] }
  0x33   : > { %v377_v22 = vld [vmem:[%s1412_s9 + $0x140] sm:$0xff]  ;;  %374 = vst [vmem:[%s1417_s10 + $0x90] sm:$0xff] %v373_v20  ;;  %376 = vst [vmem:[%s1417_s10 + $0x98] sm:$0xff] %v375_v21  ;;  %v379_v23 = vld [vmem:[%s1412_s9 + $0x150] sm:$0xff] }
  0x34   : > { %378 = vst [vmem:[%s1417_s10 + $0xa0] sm:$0xff] %v377_v22  ;;  %v381_v24 = vld [vmem:[%s1412_s9 + $0x160] sm:$0xff]  ;;  %v383_v25 = vld [vmem:[%s1412_s9 + $0x170] sm:$0xff]  ;;  %380 = vst [vmem:[%s1417_s10 + $0xa8] sm:$0xff] %v379_v23 }
  0x35   : > { %382 = vst [vmem:[%s1417_s10 + $0xb0] sm:$0xff] %v381_v24  ;;  %384 = vst [vmem:[%s1417_s10 + $0xb8] sm:$0xff] %v383_v25  ;;  %v385_v26 = vld [vmem:[%s1412_s9 + $0x180] sm:$0xff]  ;;  %v387_v27 = vld [vmem:[%s1412_s9 + $0x190] sm:$0xff] }
  0x36   : > { %v389_v28 = vld [vmem:[%s1412_s9 + $0x1a0] sm:$0xff]  ;;  %386 = vst [vmem:[%s1417_s10 + $0xc0] sm:$0xff] %v385_v26  ;;  %388 = vst [vmem:[%s1417_s10 + $0xc8] sm:$0xff] %v387_v27  ;;  %v391_v29 = vld [vmem:[%s1412_s9 + $0x1b0] sm:$0xff] }
  0x37   : > { %390 = vst [vmem:[%s1417_s10 + $0xd0] sm:$0xff] %v389_v28  ;;  %v393_v30 = vld [vmem:[%s1412_s9 + $0x1c0] sm:$0xff]  ;;  %v395_v31 = vld [vmem:[%s1412_s9 + $0x1d0] sm:$0xff]  ;;  %392 = vst [vmem:[%s1417_s10 + $0xd8] sm:$0xff] %v391_v29 }
  0x38   : > { %394 = vst [vmem:[%s1417_s10 + $0xe0] sm:$0xff] %v393_v30  ;;  %396 = vst [vmem:[%s1417_s10 + $0xe8] sm:$0xff] %v395_v31  ;;  %v397_v32 = vld [vmem:[%s1412_s9 + $0x1e0] sm:$0xff]  ;;  %v399_v33 = vld [vmem:[%s1412_s9 + $0x1f0] sm:$0xff] }
  0x39   : > { %398 = vst [vmem:[%s1417_s10 + $0xf0] sm:$0xff] %v397_v32  ;;  %400 = vst [vmem:[%s1417_s10 + $0xf8] sm:$0xff] %v399_v33 }
  0x3a PF: > { %p990_p0 = scmp.ge.s32.totalorder %s1270_s25, 1  ;;  %p421_p1 = scmp.lt.s32.totalorder %s1270_s25, 19 }
  0x3c   : > { %p422_p2 = pnand %p990_p0, %p421_p1 }
  0x3d   : > { %s428_s20 = sand.u32 (!%p422_p2), 1, %s1246_s19   ;;  %s435_s27 = sand.u32 (!%p422_p2), 1, %s1238_s17  }
  0x3e   : > { %425 = sbr.rel (%p422_p2) target bundleno = 369 (0x171), region = 104  ;;  %s1484_s28 = sshll.u32 (!%p422_p2), %s428_s20, 4 }
  0x3f   : > { %s992_s7 = sshll.u32 (!%p422_p2), %s435_s27, 8  ;;  %s468_s8 = sand.u32 (!%p422_p2), 1, %s1230_s15  }
  0x40   : > { %s994_s11 = sshll.u32 (!%p422_p2), %s1258_s22, 1  ;;  %s993_s26 = sshll.u32 (!%p422_p2), %s468_s8, 4 }
  0x41   : > { %p476_p3 = scmp.lt.s32.totalorder (!%p422_p2), %s994_s11, 3  ;;  %s430_s19 = scalar_lea.vmem (!%p422_p2), [#allocation3], %s1484_s28 }
  0x42   : > { %s1499_s10 = scalar_lea.vmem (!%p422_p2), [#allocation4], %s992_s7  ;;  %s1501_s20 = scalar_lea.vmem (!%p422_p2), [#allocation5], %s993_s26 }
  0x43   : > { %s1628_s11 = smov (!%p476_p3, %s994_s11), 3  ;;  %p996_p4 = scmp.ne.s32.totalorder %s1254_s21, 0 }
  0x44   : > { %s478_s6 = scalar_lea.vmem %s1596_s2, %s1628_s11  ;;  %s483_s17 = scalar_lea.vmem %s1597_s3, %s1628_s11 }
  0x45   : > { %490 = sbr.rel (%p996_p4) target bundleno = 77 (0x4d), region = 116 }
  0x4a   : > { %v1272_v34 = vmov 0.0  }
  0x4b   : > { %491 = vst [vmem:[#allocation2 + $0x10] sm:$0xff] %v1272_v34  ;;  %492 = vst [vmem:[#allocation2] sm:$0xff] %v1272_v34 }
  0x4c   : > { %493 = vst [vmem:[#allocation2 + $0x18] sm:$0xff] %v1272_v34  ;;  %494 = vst [vmem:[#allocation2 + $0x8] sm:$0xff] %v1272_v34 }
  0x4d PF: > { %v1133_v35 = vld [vmem:[%s1499_s10 + $0x74] ss:$8 sps:$4 sm:$0xff]   ;;  %v1135_v36 = vld [vmem:[%s1499_s10 + $0x70] ss:$8 sps:$4 sm:$0xff]   ;;  %v1136_v37 = vld [vmem:[%s1499_s10 + $0x64] ss:$8 sps:$4 sm:$0xff]  }
  0x4e   : > { %703 = vmatprep.subr.bf16.mxu0 %v1133_v35  ;;  %v1138_v38 = vld [vmem:[%s1499_s10 + $0x60] ss:$8 sps:$4 sm:$0xff]   ;;  %v1139_v39 = vld [vmem:[%s1499_s10 + $0x54] ss:$8 sps:$4 sm:$0xff]   ;;  %v1141_v40 = vld [vmem:[%s1499_s10 + $0x50] ss:$8 sps:$4 sm:$0xff]  }
  0x4f   : > { %704 = vmatpush1.bf16.msra.mxu0 %v1135_v36  ;;  %v1142_v41 = vld [vmem:[%s1499_s10 + $0x44] ss:$8 sps:$4 sm:$0xff]   ;;  %v1144_v42 = vld [vmem:[%s1499_s10 + $0x40] ss:$8 sps:$4 sm:$0xff]   ;;  %v1145_v43 = vld [vmem:[%s1499_s10 + $0x34] ss:$8 sps:$4 sm:$0xff]  }
  0x50   : > { %705 = vmatprep.subr.bf16.mxu0 %v1136_v37  ;;  %v1147_v44 = vld [vmem:[%s1499_s10 + $0x30] ss:$8 sps:$4 sm:$0xff]   ;;  %v1148_v45 = vld [vmem:[%s1499_s10 + $0x24] ss:$8 sps:$4 sm:$0xff]   ;;  %v1150_v46 = vld [vmem:[%s1499_s10 + $0x20] ss:$8 sps:$4 sm:$0xff]  }
  0x51   : > { %v1151_v47 = vld [vmem:[%s1499_s10 + $0x14] ss:$8 sps:$4 sm:$0xff]   ;;  %v1153_v49 = vld [vmem:[%s1499_s10 + $0x10] ss:$8 sps:$4 sm:$0xff]   ;;  %v1154_v50 = vld [vmem:[%s1499_s10 + $0x4] ss:$8 sps:$4 sm:$0xff]  }
  0x52   : > { %v1183_v48 = vld [vmem:[%s430_s19 + $0x4] ss:$8 sps:$4 sm:$0xff]   ;;  %v1156_v51 = vld [vmem:[%s1499_s10] ss:$8 sps:$4 sm:$0xff]   ;;  %v1159_v53 = vld [vmem:[%s1499_s10 + $0xf0] ss:$8 sps:$4 sm:$0xff]  }
  0x53   : > { %706 = vmatpush1.bf16.msra.mxu0 %v1138_v38  ;;  %735 = vmatprep.mubr.bf16.mxu0 %v1183_v48  ;;  %v1157_v52 = vld [vmem:[%s1499_s10 + $0xf4] ss:$8 sps:$4 sm:$0xff]   ;;  %v1160_v54 = vld [vmem:[%s1499_s10 + $0xe4] ss:$8 sps:$4 sm:$0xff]   ;;  %v1162_v55 = vld [vmem:[%s1499_s10 + $0xe0] ss:$8 sps:$4 sm:$0xff]  }
  0x54   : > { %707 = vmatprep.subr.bf16.mxu0 %v1139_v39  ;;  %v1163_v56 = vld [vmem:[%s1499_s10 + $0xd4] ss:$8 sps:$4 sm:$0xff]   ;;  %v1165_v57 = vld [vmem:[%s1499_s10 + $0xd0] ss:$8 sps:$4 sm:$0xff]   ;;  %v1166_v58 = vld [vmem:[%s1499_s10 + $0xc4] ss:$8 sps:$4 sm:$0xff]  }
  0x55   : > { %v1168_v59 = vld [vmem:[%s1499_s10 + $0xc0] ss:$8 sps:$4 sm:$0xff]   ;;  %v1169_v60 = vld [vmem:[%s1499_s10 + $0xb4] ss:$8 sps:$4 sm:$0xff]   ;;  %v1171_v61 = vld [vmem:[%s1499_s10 + $0xb0] ss:$8 sps:$4 sm:$0xff]  }
  0x56   : > { %v1172_v62 = vld [vmem:[%s1499_s10 + $0xa4] ss:$8 sps:$4 sm:$0xff]   ;;  %v1174_v63 = vld [vmem:[%s1499_s10 + $0xa0] ss:$8 sps:$4 sm:$0xff]   ;;  %v1175_v0 = vld [vmem:[%s1499_s10 + $0x94] ss:$8 sps:$4 sm:$0xff]  }
  0x57   : > { %708 = vmatpush1.bf16.msra.mxu0 %v1141_v40  ;;  %v1177_v1 = vld [vmem:[%s1499_s10 + $0x90] ss:$8 sps:$4 sm:$0xff]   ;;  %v1178_v2 = vld [vmem:[%s1499_s10 + $0x84] ss:$8 sps:$4 sm:$0xff]   ;;  %v1180_v3 = vld [vmem:[%s1499_s10 + $0x80] ss:$8 sps:$4 sm:$0xff]  }
  0x58   : > { %709 = vmatprep.subr.bf16.mxu0 %v1142_v41  ;;  %v1181_v4 = vld [vmem:[%s430_s19] ss:$8 sps:$4 sm:$0xff]   ;;  %p1031_p5 = scmp.ne.s32.totalorder %s1254_s21, 8 }
  0x59   : > { %v495_v5 = vld [vmem:[#allocation2 + $0x10] sm:$0xff]  ;;  %v496_v7 = vld [vmem:[#allocation2] sm:$0xff]  ;;  %v497_v10 = vld [vmem:[#allocation2 + $0x18] sm:$0xff] }
  0x5a   : > { %v498_v13 = vld [vmem:[#allocation2 + $0x8] sm:$0xff] }
  0x5b   : > { %710 = vmatpush1.bf16.msra.mxu0 %v1144_v42 }
  0x5c   : > { %711 = vmatprep.subr.bf16.mxu0 %v1145_v43 }
  0x5f   : > { %712 = vmatpush1.bf16.msra.mxu0 %v1147_v44 }
  0x60   : > { %713 = vmatprep.subr.bf16.mxu0 %v1148_v45 }
  0x63   : > { %714 = vmatpush1.bf16.msra.mxu0 %v1150_v46 }
  0x64   : > { %715 = vmatprep.subr.bf16.mxu0 %v1151_v47 }
  0x67   : > { %716 = vmatpush1.bf16.msra.mxu0 %v1153_v49 }
  0x68   : > { %717 = vmatprep.subr.bf16.mxu0 %v1154_v50 }
  0x6b   : > { %718 = vmatpush1.bf16.msra.mxu0 %v1156_v51 }
  0x6c   : > { %719 = vmatprep.subr.bf16.mxu0 %v1157_v52 }
  0x6f   : > { %720 = vmatpush2.bf16.msra.mxu0 %v1159_v53 }
  0x70   : > { %721 = vmatprep.subr.bf16.mxu0 %v1160_v54 }
  0x73   : > { %722 = vmatpush2.bf16.msra.mxu0 %v1162_v55 }
  0x74   : > { %723 = vmatprep.subr.bf16.mxu0 %v1163_v56 }
  0x77   : > { %724 = vmatpush2.bf16.msra.mxu0 %v1165_v57 }
  0x78   : > { %725 = vmatprep.subr.bf16.mxu0 %v1166_v58 }
  0x7b   : > { %726 = vmatpush2.bf16.msra.mxu0 %v1168_v59 }
  0x7c   : > { %727 = vmatprep.subr.bf16.mxu0 %v1169_v60 }
  0x7f   : > { %728 = vmatpush2.bf16.msra.mxu0 %v1171_v61 }
  0x80   : > { %729 = vmatprep.subr.bf16.mxu0 %v1172_v62 }
  0x83   : > { %730 = vmatpush2.bf16.msra.mxu0 %v1174_v63 }
  0x84   : > { %731 = vmatprep.subr.bf16.mxu0 %v1175_v0 }
  0x87   : > { %732 = vmatpush2.bf16.msra.mxu0 %v1177_v1 }
  0x88   : > { %733 = vmatprep.subr.bf16.mxu0 %v1178_v2 }
  0x8b   : > { %734 = vmatpush2.bf16.msra.mxu0 %v1180_v3 }
  0x8e   : > { %736 = vmatmul.mubr.bf16.vlgmr.msra.gmra.mxu0 %v1181_v4 }
 0x14e   : > { %v737_v6 = vpop.f32.mrf.mxu0 }
 0x14f   : > { %v746_v8 = vadd.f32 %v737_v6, %v495_v5 }
 0x150   : > { %v739_v9 = vpop.f32.mrf.mxu0 }
 0x151   : > { %750 = vst [vmem:[#allocation2 + $0x10] sm:$0xff] %v746_v8  ;;  %v747_v11 = vadd.f32 %v739_v9, %v496_v7 }
 0x152   : > { %v741_v12 = vpop.f32.mrf.mxu0 }
 0x153   : > { %751 = vst [vmem:[#allocation2] sm:$0xff] %v747_v11  ;;  %v748_v14 = vadd.f32 %v741_v12, %v497_v10  ;;  %757 = sbr.rel (%p1031_p5) target bundleno = 361 (0x169), region = 120 }
 0x154   : > { %v743_v15 = vpop.f32.mrf.mxu0 }
 0x155   : > { %752 = vst [vmem:[#allocation2 + $0x18] sm:$0xff] %v748_v14  ;;  %v749_v16 = vadd.f32 %v743_v15, %v498_v13 }
 0x157   : > { %753 = vst [vmem:[#allocation2 + $0x8] sm:$0xff] %v749_v16 }
 0x158   : > { %v764_v17 = vlaneseq  ;;  %v762_v19 = vld [vmem:[%s478_s6] sm:$0x3]  ;;  %v758_v21 = vld [vmem:[#allocation2 + $0x10] sm:$0xff] }
 0x159   : > { %v778_v20 = vld [vmem:[%s483_s17] sm:$0x3] }
 0x15a   : > { %v765_v18 = vshrl.u32 %v764_v17, 7  ;;  %v759_v24 = vld [vmem:[#allocation2] sm:$0xff] }
 0x15c   : > { %v766_v22 = vsub.s32 0, %v765_v18  ;;  %v770_v23 = vsub.s32 1, %v765_v18  ;;  %v760_v25 = vld [vmem:[#allocation2 + $0x18] sm:$0xff] }
 0x15e   : > { %v761_v26 = vld [vmem:[#allocation2 + $0x8] sm:$0xff]  ;;  %v767_v27 = vrot.slane %v762_v19, %v766_v22  ;;  %v771_v28 = vrot.slane %v762_v19, %v770_v23  ;;  %v783_v29 = vrot.slane %v778_v20, %v766_v22  ;;  %v787_v30 = vrot.slane %v778_v20, %v770_v23 }
 0x160   : > { %v774_v31 = vmul.f32 %v767_v27, %v758_v21  ;;  %v775_v32 = vmul.f32 %v771_v28, %v759_v24  ;;  %v776_v33 = vmul.f32 %v767_v27, %v760_v25  ;;  %v777_v34 = vmul.f32 %v771_v28, %v761_v26 }
 0x162   : > { %v790_v35 = vadd.f32 %v783_v29, %v774_v31  ;;  %v791_v36 = vadd.f32 %v787_v30, %v775_v32  ;;  %v792_v37 = vadd.f32 %v783_v29, %v776_v33  ;;  %v793_v38 = vadd.f32 %v787_v30, %v777_v34 }
 0x164   : > { %v794_v39 = vmax.f32 %v790_v35, 0.0  ;;  %v795_v40 = vmax.f32 %v791_v36, 0.0  ;;  %v796_v41 = vmax.f32 %v792_v37, 0.0  ;;  %v797_v42 = vmax.f32 %v793_v38, 0.0 }
 0x166   : > { %v1041_v43 = vpack.c.bf16 %v795_v40, %v794_v39  ;;  %v1042_v44 = vpack.c.bf16 %v797_v42, %v796_v41 }
 0x168   : > { %810 = vst [vmem:[%s1501_s20] sm:$0xff] %v1041_v43  ;;  %811 = vst [vmem:[%s1501_s20 + $0x8] sm:$0xff] %v1042_v44 }
 0x169 PF: > { %818 = sbr.rel (!%p1392_p12) target bundleno = 369 (0x171), region = 124  ;;  %s1043_s21 = sshll.u32 (%p1392_p12), %s1258_s22, 3 }
 0x16a   : > { %s824_s26 = scalar_lea.vmem (%p1392_p12), %s1598_s4, %s1043_s21 }
 0x16f   : > { %v855_v45 = vld [vmem:[%s1501_s20] sm:$0xff]  ;;  %v857_v46 = vld [vmem:[%s1501_s20 + $0x8] sm:$0xff] }
 0x170   : > { %856 = vst [vmem:[%s824_s26] sm:$0xff] %v855_v45  ;;  %858 = vst [vmem:[%s824_s26 + $0x10] sm:$0xff] %v857_v46 }
 0x171 PF: > { %s14_s25 = sadd.s32 1, %s1270_s25   ;;  %s1609_s19 = sld [smem:[#allocation6_spill]] }
 0x172   : > { %p11_p6 = scmp.ge.s32.totalorder %s14_s25, 20   ;;  %s1610_s20 = sld [smem:[#allocation9_spill]] }
 0x173   : > { %s1611_s14 = sld [smem:[#allocation7_spill]]  ;;  %s1613_s15 = smov %s1234_s16 }
 0x174   : > { %s1612_s5 = sld [smem:[#allocation8_spill]]  ;;  %s1614_s16 = smov %s1390_s13 }
 0x175   : > { %s1615_s17 = smov %s1242_s18  ;;  %s1616_s18 = smov %s1387_s12 }
 0x176   : > { %s1617_s21 = smov %s1262_s23  ;;  %s1618_s22 = smov %s1266_s24 }
 0x177   :  { %13 = sbr.rel (!%p11_p6) target bundleno = 6 (0x6), region = 207 }
 0x179   : > { %s1619_s23 = smov %s1611_s14 }
 0x17a   : > { %s1620_s24 = smov %s1612_s5 }

// kernel: uresnet_forward.39
= control target key start
LH: loop header
LB: loop body
LE: loop exit
PB: predicated region body
PF: predicated region fallthrough
CT: control target
= control target key end

     0   :  { %s1158_s15 = smov 0   ;;  %s1160_s16 = smov 0   ;;  %s1349_s0 = inlined_call_operand.vmem [shape: bf16[16,256], index: 0, kind: input, shape index: {}]   ;;  %s1350_s1 = inlined_call_operand.vmem [shape: bf16[256,512], index: 1, kind: input, shape index: {}]   ;;  %s1351_s2 = inlined_call_operand.vmem [shape: f32[1,512], index: 2, kind: input, shape index: {}]   ;;  %s1352_s3 = inlined_call_operand.vmem [shape: f32[1,512], index: 3, kind: input, shape index: {}]   ;;  %s1353_s4 = inlined_call_operand.vmem [shape: bf16[16,512], index: 4, kind: output, shape index: {}]  }
   0x1   :  { %s1162_s17 = smov 0   ;;  %s1164_s18 = smov 0  }
   0x2   :  { %s1166_s19 = smov 0  }
   0x3 LB: > { %s29_s20 = sadd.s32 1, %s1127_s18  ;;  %s944_s21 = sadd.s32 4294967295, %s1131_s19   ;;  %s1131_s19 = sphi %s1166_s19, %s14_s19   ;;  %s1127_s18 = sphi %s1164_s18, %s1358_s18   ;;  %s1123_s17 = sphi %s1162_s17, %s1357_s17   ;;  %s1119_s16 = sphi %s1160_s16, %s1356_s16   ;;  %s1115_s15 = sphi %s1158_s15, %s1355_s15  }
   0x4   : > { %p31_p0 = scmp.ge.s32.totalorder %s29_s20, 2  ;;  %p77_p1 = scmp.ne.s32.totalorder %s1119_s16, %s1115_s15 }
   0x5   : > { %p78_p2 = scmp.eq.s32.totalorder %s1131_s19, 0  ;;  %p161_p4 = scmp.eq.s32.totalorder %s944_s21, 1 }
   0x6   : > { %s1360_s20 = smov (%p31_p0, %s29_s20), 0  ;;  %s70_s23 = sadd.s32 1, %s1119_s16 }
   0x7   : > { %p79_p3 = por %p78_p2, %p77_p1  ;;  %s66_s22 = ssub.s32 %s1127_s18, %s1360_s20 }
   0x8   : > { %p68_p5 = scmp.eq.s32.totalorder %s66_s22, 0  ;;  %p1193_p6 = por %p161_p4, %p77_p1 }
   0x9   : > { %p948_p7 = scmp.ge.s32.totalorder %s1131_s19, 2 }
   0xa   : > { %s1198_s25 = scalar_select %p68_p5, %s1119_s16, %s70_s23  }
   0xb   : > { %198 = sbr.rel (%p948_p7) target bundleno = 36 (0x24), region = 20 }
  0x10   : > { %201 = sbr.rel (!%p79_p3) target bundleno = 36 (0x24), region = 24  ;;  %s203_s26 = sand.u32 (%p79_p3), 1, %s1119_s16  }
  0x11   : > { %s998_s27 = sshll.u32 (%p79_p3), %s1127_s18, 3  ;;  %s949_s28 = sshll.u32 (%p79_p3), %s203_s26, 8 }
  0x12   : > { %s1206_s5 = scalar_lea.vmem (%p79_p3), %s1350_s1, %s998_s27  ;;  %s1211_s6 = scalar_lea.vmem (%p79_p3), [#allocation3], %s949_s28 }
  0x13   : > { %v302_v0 = vld [vmem:[%s1206_s5] sm:$0xff] (%p79_p3)  ;;  %v304_v1 = vld [vmem:[%s1206_s5 + $0x10] sm:$0xff] (%p79_p3) }
  0x14   : > { %v306_v2 = vld [vmem:[%s1206_s5 + $0x20] sm:$0xff] (%p79_p3)  ;;  %303 = vst [vmem:[%s1211_s6] sm:$0xff] (%p79_p3), %v302_v0  ;;  %305 = vst [vmem:[%s1211_s6 + $0x8] sm:$0xff] (%p79_p3), %v304_v1  ;;  %v308_v3 = vld [vmem:[%s1206_s5 + $0x30] sm:$0xff] (%p79_p3) }
  0x15   : > { %307 = vst [vmem:[%s1211_s6 + $0x10] sm:$0xff] %v306_v2  ;;  %v310_v4 = vld [vmem:[%s1206_s5 + $0x40] sm:$0xff]  ;;  %v312_v5 = vld [vmem:[%s1206_s5 + $0x50] sm:$0xff]  ;;  %309 = vst [vmem:[%s1211_s6 + $0x18] sm:$0xff] %v308_v3 }
  0x16   : > { %311 = vst [vmem:[%s1211_s6 + $0x20] sm:$0xff] %v310_v4  ;;  %313 = vst [vmem:[%s1211_s6 + $0x28] sm:$0xff] %v312_v5  ;;  %v314_v6 = vld [vmem:[%s1206_s5 + $0x60] sm:$0xff]  ;;  %v316_v7 = vld [vmem:[%s1206_s5 + $0x70] sm:$0xff] }
  0x17   : > { %v318_v8 = vld [vmem:[%s1206_s5 + $0x80] sm:$0xff]  ;;  %315 = vst [vmem:[%s1211_s6 + $0x30] sm:$0xff] %v314_v6  ;;  %317 = vst [vmem:[%s1211_s6 + $0x38] sm:$0xff] %v316_v7  ;;  %v320_v9 = vld [vmem:[%s1206_s5 + $0x90] sm:$0xff] }
  0x18   : > { %319 = vst [vmem:[%s1211_s6 + $0x40] sm:$0xff] %v318_v8  ;;  %v322_v10 = vld [vmem:[%s1206_s5 + $0xa0] sm:$0xff]  ;;  %v324_v11 = vld [vmem:[%s1206_s5 + $0xb0] sm:$0xff]  ;;  %321 = vst [vmem:[%s1211_s6 + $0x48] sm:$0xff] %v320_v9 }
  0x19   : > { %323 = vst [vmem:[%s1211_s6 + $0x50] sm:$0xff] %v322_v10  ;;  %325 = vst [vmem:[%s1211_s6 + $0x58] sm:$0xff] %v324_v11  ;;  %v326_v12 = vld [vmem:[%s1206_s5 + $0xc0] sm:$0xff]  ;;  %v328_v13 = vld [vmem:[%s1206_s5 + $0xd0] sm:$0xff] }
  0x1a   : > { %v330_v14 = vld [vmem:[%s1206_s5 + $0xe0] sm:$0xff]  ;;  %327 = vst [vmem:[%s1211_s6 + $0x60] sm:$0xff] %v326_v12  ;;  %329 = vst [vmem:[%s1211_s6 + $0x68] sm:$0xff] %v328_v13  ;;  %v332_v15 = vld [vmem:[%s1206_s5 + $0xf0] sm:$0xff] }
  0x1b   : > { %331 = vst [vmem:[%s1211_s6 + $0x70] sm:$0xff] %v330_v14  ;;  %v334_v16 = vld [vmem:[%s1206_s5 + $0x100] sm:$0xff]  ;;  %v336_v17 = vld [vmem:[%s1206_s5 + $0x110] sm:$0xff]  ;;  %333 = vst [vmem:[%s1211_s6 + $0x78] sm:$0xff] %v332_v15 }
  0x1c   : > { %335 = vst [vmem:[%s1211_s6 + $0x80] sm:$0xff] %v334_v16  ;;  %337 = vst [vmem:[%s1211_s6 + $0x88] sm:$0xff] %v336_v17  ;;  %v338_v18 = vld [vmem:[%s1206_s5 + $0x120] sm:$0xff]  ;;  %v340_v19 = vld [vmem:[%s1206_s5 + $0x130] sm:$0xff] }
  0x1d   : > { %v342_v20 = vld [vmem:[%s1206_s5 + $0x140] sm:$0xff]  ;;  %339 = vst [vmem:[%s1211_s6 + $0x90] sm:$0xff] %v338_v18  ;;  %341 = vst [vmem:[%s1211_s6 + $0x98] sm:$0xff] %v340_v19  ;;  %v344_v21 = vld [vmem:[%s1206_s5 + $0x150] sm:$0xff] }
  0x1e   : > { %343 = vst [vmem:[%s1211_s6 + $0xa0] sm:$0xff] %v342_v20  ;;  %v346_v22 = vld [vmem:[%s1206_s5 + $0x160] sm:$0xff]  ;;  %v348_v23 = vld [vmem:[%s1206_s5 + $0x170] sm:$0xff]  ;;  %345 = vst [vmem:[%s1211_s6 + $0xa8] sm:$0xff] %v344_v21 }
  0x1f   : > { %347 = vst [vmem:[%s1211_s6 + $0xb0] sm:$0xff] %v346_v22  ;;  %349 = vst [vmem:[%s1211_s6 + $0xb8] sm:$0xff] %v348_v23  ;;  %v350_v24 = vld [vmem:[%s1206_s5 + $0x180] sm:$0xff]  ;;  %v352_v25 = vld [vmem:[%s1206_s5 + $0x190] sm:$0xff] }
  0x20   : > { %v354_v26 = vld [vmem:[%s1206_s5 + $0x1a0] sm:$0xff]  ;;  %351 = vst [vmem:[%s1211_s6 + $0xc0] sm:$0xff] %v350_v24  ;;  %353 = vst [vmem:[%s1211_s6 + $0xc8] sm:$0xff] %v352_v25  ;;  %v356_v27 = vld [vmem:[%s1206_s5 + $0x1b0] sm:$0xff] }
  0x21   : > { %355 = vst [vmem:[%s1211_s6 + $0xd0] sm:$0xff] %v354_v26  ;;  %v358_v28 = vld [vmem:[%s1206_s5 + $0x1c0] sm:$0xff]  ;;  %v360_v29 = vld [vmem:[%s1206_s5 + $0x1d0] sm:$0xff]  ;;  %357 = vst [vmem:[%s1211_s6 + $0xd8] sm:$0xff] %v356_v27 }
  0x22   : > { %359 = vst [vmem:[%s1211_s6 + $0xe0] sm:$0xff] %v358_v28  ;;  %361 = vst [vmem:[%s1211_s6 + $0xe8] sm:$0xff] %v360_v29  ;;  %v362_v30 = vld [vmem:[%s1206_s5 + $0x1e0] sm:$0xff]  ;;  %v364_v31 = vld [vmem:[%s1206_s5 + $0x1f0] sm:$0xff] }
  0x23   : > { %363 = vst [vmem:[%s1211_s6 + $0xf0] sm:$0xff] %v362_v30  ;;  %365 = vst [vmem:[%s1211_s6 + $0xf8] sm:$0xff] %v364_v31 }
  0x24 PF: > { %p952_p8 = scmp.ge.s32.totalorder %s1131_s19, 1  ;;  %p386_p9 = scmp.lt.s32.totalorder %s1131_s19, 3 }
  0x26   : > { %p387_p10 = pnand %p952_p8, %p386_p9 }
  0x27   : > { %s393_s7 = sand.u32 (!%p387_p10), 1, %s1115_s15   ;;  %s955_s14 = sshll.u32 (!%p387_p10), %s1123_s17, 1 }
  0x28   : > { %390 = sbr.rel (%p387_p10) target bundleno = 324 (0x144), region = 70  ;;  %s953_s8 = sshll.u32 (!%p387_p10), %s393_s7, 8 }
  0x29   : > { %s1282_s11 = scalar_lea.vmem (!%p387_p10), [#allocation3], %s953_s8  ;;  %p450_p11 = scmp.lt.s32.totalorder (!%p387_p10), %s955_s14, 3 }
  0x2a   : > { %s954_s29 = sshll.u32 (!%p387_p10), %s393_s7, 4 }
  0x2b   : > { %s434_s30 = scalar_lea.vmem (!%p387_p10), [#allocation4], %s954_s29 }
  0x2d   : > { %v1092_v32 = vld [vmem:[%s1349_s0 + $0x4] ss:$8 sps:$4 sm:$0xff]   ;;  %v1042_v33 = vld [vmem:[%s1282_s11 + $0x74] ss:$8 sps:$4 sm:$0xff]   ;;  %v1044_v34 = vld [vmem:[%s1282_s11 + $0x70] ss:$8 sps:$4 sm:$0xff]   ;;  %v737_v2 = vlaneseq }
  0x2e   : > { %709 = vmatprep.mubr.bf16.mxu0 %v1092_v32  ;;  %677 = vmatprep.subr.bf16.mxu0 %v1042_v33  ;;  %v1045_v35 = vld [vmem:[%s1282_s11 + $0x64] ss:$8 sps:$4 sm:$0xff]   ;;  %v1047_v36 = vld [vmem:[%s1282_s11 + $0x60] ss:$8 sps:$4 sm:$0xff]   ;;  %v1048_v37 = vld [vmem:[%s1282_s11 + $0x54] ss:$8 sps:$4 sm:$0xff]  }
  0x2f   : > { %678 = vmatpush1.bf16.msra.mxu0 %v1044_v34  ;;  %v1050_v38 = vld [vmem:[%s1282_s11 + $0x50] ss:$8 sps:$4 sm:$0xff]   ;;  %v1051_v39 = vld [vmem:[%s1282_s11 + $0x44] ss:$8 sps:$4 sm:$0xff]   ;;  %v1053_v40 = vld [vmem:[%s1282_s11 + $0x40] ss:$8 sps:$4 sm:$0xff]  }
  0x30   : > { %679 = vmatprep.subr.bf16.mxu0 %v1045_v35  ;;  %v1054_v41 = vld [vmem:[%s1282_s11 + $0x34] ss:$8 sps:$4 sm:$0xff]   ;;  %v1056_v42 = vld [vmem:[%s1282_s11 + $0x30] ss:$8 sps:$4 sm:$0xff]   ;;  %v1057_v43 = vld [vmem:[%s1282_s11 + $0x24] ss:$8 sps:$4 sm:$0xff]  }
  0x31   : > { %v1059_v44 = vld [vmem:[%s1282_s11 + $0x20] ss:$8 sps:$4 sm:$0xff]   ;;  %v1060_v45 = vld [vmem:[%s1282_s11 + $0x14] ss:$8 sps:$4 sm:$0xff]   ;;  %v1062_v46 = vld [vmem:[%s1282_s11 + $0x10] ss:$8 sps:$4 sm:$0xff]  }
  0x32   : > { %v1063_v47 = vld [vmem:[%s1282_s11 + $0x4] ss:$8 sps:$4 sm:$0xff]   ;;  %v1065_v48 = vld [vmem:[%s1282_s11] ss:$8 sps:$4 sm:$0xff]   ;;  %v1066_v49 = vld [vmem:[%s1282_s11 + $0xf4] ss:$8 sps:$4 sm:$0xff]  }
  0x33   : > { %680 = vmatpush1.bf16.msra.mxu0 %v1047_v36  ;;  %v1068_v50 = vld [vmem:[%s1282_s11 + $0xf0] ss:$8 sps:$4 sm:$0xff]   ;;  %v1069_v51 = vld [vmem:[%s1282_s11 + $0xe4] ss:$8 sps:$4 sm:$0xff]   ;;  %v1071_v52 = vld [vmem:[%s1282_s11 + $0xe0] ss:$8 sps:$4 sm:$0xff]  }
  0x34   : > { %681 = vmatprep.subr.bf16.mxu0 %v1048_v37  ;;  %v1072_v53 = vld [vmem:[%s1282_s11 + $0xd4] ss:$8 sps:$4 sm:$0xff]   ;;  %v1074_v54 = vld [vmem:[%s1282_s11 + $0xd0] ss:$8 sps:$4 sm:$0xff]   ;;  %v1075_v55 = vld [vmem:[%s1282_s11 + $0xc4] ss:$8 sps:$4 sm:$0xff]  }
  0x35   : > { %v1077_v56 = vld [vmem:[%s1282_s11 + $0xc0] ss:$8 sps:$4 sm:$0xff]   ;;  %v1078_v57 = vld [vmem:[%s1282_s11 + $0xb4] ss:$8 sps:$4 sm:$0xff]   ;;  %v1080_v58 = vld [vmem:[%s1282_s11 + $0xb0] ss:$8 sps:$4 sm:$0xff]  }
  0x36   : > { %v1081_v59 = vld [vmem:[%s1282_s11 + $0xa4] ss:$8 sps:$4 sm:$0xff]   ;;  %v1083_v60 = vld [vmem:[%s1282_s11 + $0xa0] ss:$8 sps:$4 sm:$0xff]   ;;  %v1084_v61 = vld [vmem:[%s1282_s11 + $0x94] ss:$8 sps:$4 sm:$0xff]  }
  0x37   : > { %682 = vmatpush1.bf16.msra.mxu0 %v1050_v38  ;;  %v1086_v62 = vld [vmem:[%s1282_s11 + $0x90] ss:$8 sps:$4 sm:$0xff]   ;;  %v1087_v63 = vld [vmem:[%s1282_s11 + $0x84] ss:$8 sps:$4 sm:$0xff]   ;;  %v1089_v0 = vld [vmem:[%s1282_s11 + $0x80] ss:$8 sps:$4 sm:$0xff]  }
  0x38   : > { %683 = vmatprep.subr.bf16.mxu0 %v1051_v39  ;;  %v1090_v1 = vld [vmem:[%s1349_s0] ss:$8 sps:$4 sm:$0xff]   ;;  %s1362_s14 = smov (!%p450_p11, %s955_s14), 3  ;;  %v738_v3 = vshrl.u32 %v737_v2, 7  ;;  %s1001_s15 = sshll.u32 (%p1193_p6), %s1123_s17, 3 }
  0x39   : > { %s452_s23 = scalar_lea.vmem %s1351_s2, %s1362_s14  ;;  %s457_s28 = scalar_lea.vmem %s1352_s3, %s1362_s14 }
  0x3a   : > { %v739_v4 = vsub.s32 0, %v738_v3  ;;  %v735_v5 = vld [vmem:[%s452_s23] sm:$0x3]  ;;  %v743_v6 = vsub.s32 1, %v738_v3  ;;  %s793_s7 = scalar_lea.vmem (%p1193_p6), %s1353_s4, %s1001_s15 }
  0x3b   : > { %684 = vmatpush1.bf16.msra.mxu0 %v1053_v40  ;;  %v751_v8 = vld [vmem:[%s457_s28] sm:$0x3] }
  0x3c   : > { %685 = vmatprep.subr.bf16.mxu0 %v1054_v41  ;;  %v740_v7 = vrot.slane %v735_v5, %v739_v4  ;;  %v744_v9 = vrot.slane %v735_v5, %v743_v6  ;;  %v756_v12 = vrot.slane %v751_v8, %v739_v4  ;;  %v760_v13 = vrot.slane %v751_v8, %v743_v6 }
  0x3f   : > { %686 = vmatpush1.bf16.msra.mxu0 %v1056_v42 }
  0x40   : > { %687 = vmatprep.subr.bf16.mxu0 %v1057_v43 }
  0x43   : > { %688 = vmatpush1.bf16.msra.mxu0 %v1059_v44 }
  0x44   : > { %689 = vmatprep.subr.bf16.mxu0 %v1060_v45 }
  0x47   : > { %690 = vmatpush1.bf16.msra.mxu0 %v1062_v46 }
  0x48   : > { %691 = vmatprep.subr.bf16.mxu0 %v1063_v47 }
  0x4b   : > { %692 = vmatpush1.bf16.msra.mxu0 %v1065_v48 }
  0x4c   : > { %693 = vmatprep.subr.bf16.mxu0 %v1066_v49 }
  0x4f   : > { %694 = vmatpush2.bf16.msra.mxu0 %v1068_v50 }
  0x50   : > { %695 = vmatprep.subr.bf16.mxu0 %v1069_v51 }
  0x53   : > { %696 = vmatpush2.bf16.msra.mxu0 %v1071_v52 }
  0x54   : > { %697 = vmatprep.subr.bf16.mxu0 %v1072_v53 }
  0x57   : > { %698 = vmatpush2.bf16.msra.mxu0 %v1074_v54 }
  0x58   : > { %699 = vmatprep.subr.bf16.mxu0 %v1075_v55 }
  0x5b   : > { %700 = vmatpush2.bf16.msra.mxu0 %v1077_v56 }
  0x5c   : > { %701 = vmatprep.subr.bf16.mxu0 %v1078_v57 }
  0x5f   : > { %702 = vmatpush2.bf16.msra.mxu0 %v1080_v58 }
  0x60   : > { %703 = vmatprep.subr.bf16.mxu0 %v1081_v59 }
  0x63   : > { %704 = vmatpush2.bf16.msra.mxu0 %v1083_v60 }
  0x64   : > { %705 = vmatprep.subr.bf16.mxu0 %v1084_v61 }
  0x67   : > { %706 = vmatpush2.bf16.msra.mxu0 %v1086_v62 }
  0x68   : > { %707 = vmatprep.subr.bf16.mxu0 %v1087_v63 }
  0x6b   : > { %708 = vmatpush2.bf16.msra.mxu0 %v1089_v0 }
  0x6e   : > { %710 = vmatmul.mubr.bf16.vlgmr.msra.gmra.mxu0 %v1090_v1 }
 0x12e   : > { %v711_v10 = vpop.f32.mrf.mxu0 }
 0x12f   : > { %v747_v11 = vmul.f32 %v740_v7, %v711_v10 }
 0x130   : > { %v713_v14 = vpop.f32.mrf.mxu0 }
 0x131   : > { %v748_v15 = vmul.f32 %v744_v9, %v713_v14  ;;  %v763_v17 = vadd.f32 %v756_v12, %v747_v11 }
 0x132   : > { %v715_v16 = vpop.f32.mrf.mxu0 }
 0x133   : > { %v764_v18 = vadd.f32 %v760_v13, %v748_v15  ;;  %v749_v19 = vmul.f32 %v740_v7, %v715_v16 }
 0x134   : > { %v717_v20 = vpop.f32.mrf.mxu0 }
 0x135   : > { %v999_v21 = vpack.c.bf16 %v764_v18, %v763_v17  ;;  %v750_v22 = vmul.f32 %v744_v9, %v717_v20  ;;  %v765_v23 = vadd.f32 %v756_v12, %v749_v19 }
 0x137   : > { %779 = vst [vmem:[%s434_s30] sm:$0xff] %v999_v21  ;;  %v766_v24 = vadd.f32 %v760_v13, %v750_v22  ;;  %787 = sbr.rel (!%p1193_p6) target bundleno = 324 (0x144), region = 86 }
 0x139   : > { %v1000_v25 = vpack.c.bf16 %v766_v24, %v765_v23 }
 0x13b   : > { %780 = vst [vmem:[%s434_s30 + $0x8] sm:$0xff] %v1000_v25 }
 0x13e   : > { %v824_v26 = vld [vmem:[%s434_s30] sm:$0xff] }
 0x13f   : > { %825 = vst [vmem:[%s793_s7] sm:$0xff] %v824_v26 }
 0x142   : > { %v826_v27 = vld [vmem:[%s434_s30 + $0x8] sm:$0xff] }
 0x143   : > { %827 = vst [vmem:[%s793_s7 + $0x10] sm:$0xff] %v826_v27 }
 0x144 PF: > { %s14_s19 = sadd.s32 1, %s1131_s19   ;;  %s1355_s15 = smov %s1119_s16 }
 0x145   : > { %p11_p12 = scmp.ge.s32.totalorder %s14_s19, 4   ;;  %s1356_s16 = smov %s1198_s25 }
 0x146   : > { %s1357_s17 = smov %s1127_s18  ;;  %s1358_s18 = smov %s1360_s20 }
 0x147   :  { %13 = sbr.rel (!%p11_p12) target bundleno = 3 (0x3), region = 164 }

// kernel: uresnet_forward.41
= control target key start
LH: loop header
LB: loop body
LE: loop exit
PB: predicated region body
PF: predicated region fallthrough
CT: control target
= control target key end

     0   :  { %s2135_s0 = inlined_call_operand.vmem [shape: bf16[16,4608], index: 0, kind: input, shape index: {}]   ;;  %s2136_s1 = inlined_call_operand.vmem [shape: bf16[4608,512], index: 1, kind: input, shape index: {}]   ;;  %s2137_s2 = inlined_call_operand.vmem [shape: f32[1,512], index: 2, kind: input, shape index: {}]   ;;  %s2138_s3 = inlined_call_operand.vmem [shape: f32[1,512], index: 3, kind: input, shape index: {}]   ;;  %s2139_s4 = inlined_call_operand.vmem [shape: bf16[16,512], index: 4, kind: output, shape index: {}]  }
   0x1   :  { %2142 = sst [smem:[#allocation8_spill]] %s2135_s0 }
   0x2   :  { %2143 = sst [smem:[#allocation9_spill]] %s2136_s1 }
   0x3   :  { %s1744_s15 = smov 0   ;;  %s1746_s16 = smov 0  }
   0x4   :  { %s1748_s17 = smov 0   ;;  %s1750_s18 = smov 0  }
   0x5   :  { %s1752_s19 = smov 0   ;;  %s1754_s20 = smov 0  }
   0x6   :  { %s1756_s21 = smov 0   ;;  %s1758_s22 = smov 0  }
   0x7   :  { %s1760_s23 = smov 0   ;;  %s1762_s24 = smov 0  }
   0x8   :  { %s1764_s25 = smov 0  }
   0x9 LB: > { %s1339_s26 = sadd.s32 4294967295, %s1716_s25   ;;  %s26_s27 = sadd.s32 1, %s1708_s23  ;;  %s1716_s25 = sphi %s1764_s25, %s14_s25   ;;  %s1712_s24 = sphi %s1762_s24, %s2162_s24   ;;  %s1708_s23 = sphi %s1760_s23, %s2161_s23   ;;  %s1704_s22 = sphi %s1758_s22, %s2160_s22   ;;  %s1700_s21 = sphi %s1756_s21, %s2159_s21   ;;  %s1696_s20 = sphi %s1754_s20, %s2158_s20   ;;  %s1692_s19 = sphi %s1752_s19, %s2157_s19   ;;  %s1688_s18 = sphi %s1750_s18, %s2156_s18   ;;  %s1684_s17 = sphi %s1748_s17, %s2155_s17   ;;  %s1680_s16 = sphi %s1746_s16, %s2154_s16   ;;  %s1676_s15 = sphi %s1744_s15, %s2153_s15  }
   0xa   : > { %p27_p0 = scmp.ge.s32.totalorder %s26_s27, 9  ;;  %s29_s28 = sadd.s32 1, %s1712_s24 }
   0xb   : > { %s42_s29 = sadd.s32 1, %s1696_s20  ;;  %p49_p1 = scmp.ne.s32.totalorder %s1696_s20, %s1692_s19 }
   0xc   : > { %s2164_s27 = smov (%p27_p0, %s26_s27), 0  ;;  %s2166_s28 = smov (!%p27_p0, %s29_s28), %s1712_s24 }
   0xd   : > { %2144 = sst [smem:[#allocation6_spill]] %s2164_s27  ;;  %s38_s30 = ssub.s32 %s1708_s23, %s2164_s27 }
   0xe   : > { %p50_p2 = scmp.eq.s32.totalorder %s1716_s25, 0  ;;  %p31_p3 = scmp.ge.s32.totalorder %s2166_s28, 2 }
   0xf   : > { %p40_p4 = scmp.eq.s32.totalorder %s38_s30, 0  ;;  %s70_s6 = sadd.s32 1, %s1688_s18 }
  0x10   : > { %p1811_p5 = por %p50_p2, %p49_p1  ;;  %s2168_s28 = smov (%p31_p3, %s2166_s28), 0 }
  0x11   : > { %2146 = sst [smem:[#allocation7_spill]] %s2168_s28  ;;  %s66_s8 = ssub.s32 %s1712_s24, %s2168_s28 }
  0x12   : > { %s1819_s7 = scalar_select %p40_p4, %s1696_s20, %s42_s29  }
  0x13   : > { %p77_p6 = scmp.ne.s32.totalorder %s1688_s18, %s1684_s17  ;;  %s67_s9 = sor.u32 %s66_s8, %s38_s30 }
  0x14   : > { %p148_p7 = scmp.eq.s32.totalorder %s66_s8, 0  ;;  %p68_p8 = scmp.eq.s32.totalorder %s67_s9, 0 }
  0x15   : > { %p1825_p9 = por %p77_p6, %p50_p2  ;;  %s150_s11 = sadd.s32 1, %s1680_s16 }
  0x16   : > { %p160_p10 = scmp.ne.s32.totalorder %s1680_s16, %s1676_s15  ;;  %p161_p11 = scmp.eq.s32.totalorder %s1339_s26, 17 }
  0x17   : > { %s1833_s12 = scalar_select %p68_p8, %s1688_s18, %s70_s6  }
  0x18   : > { %s1836_s13 = scalar_select %p148_p7, %s1680_s16, %s150_s11  }
  0x19   : > { %p1838_p12 = por %p161_p11, %p160_p10  ;;  %p1342_p13 = scmp.ge.s32.totalorder %s1716_s25, 18 }
  0x1b   : > { %183 = sbr.rel (%p1342_p13) target bundleno = 86 (0x56), region = 16 }
  0x20   : > { %186 = sbr.rel (!%p1811_p5) target bundleno = 44 (0x2c), region = 20  ;;  %s188_s29 = sand.u32 (%p1811_p5), 1, %s1696_s20  }
  0x21   : > { %s1434_s30 = sshll.u32 (%p1811_p5), %s1708_s23, 4  ;;  %s1343_s8 = sshll.u32 (%p1811_p5), %s188_s29, 5 }
  0x22   : > { %s2149_s0 = sld [smem:[#allocation8_spill]] (%p1811_p5)  ;;  %s190_s26 = scalar_lea.vmem (%p1811_p5), [#allocation3], %s1343_s8 }
  0x28   : > { %s196_s11 = scalar_lea.vmem %s2149_s0, %s1434_s30 }
  0x29   : > { %v209_v0 = vld [vmem:[%s196_s11] sm:$0xff]  ;;  %v211_v1 = vld [vmem:[%s196_s11 + $0x8] sm:$0xff]  ;;  %v213_v2 = vld [vmem:[%s196_s11 + $0x90] sm:$0xff] }
  0x2a   : > { %210 = vst [vmem:[%s190_s26] sm:$0xff] %v209_v0  ;;  %212 = vst [vmem:[%s190_s26 + $0x8] sm:$0xff] %v211_v1  ;;  %v215_v3 = vld [vmem:[%s196_s11 + $0x98] sm:$0xff] }
  0x2b   : > { %214 = vst [vmem:[%s190_s26 + $0x10] sm:$0xff] %v213_v2  ;;  %216 = vst [vmem:[%s190_s26 + $0x18] sm:$0xff] %v215_v3 }
  0x2c PF: > { %222 = sbr.rel (!%p1825_p9) target bundleno = 86 (0x56), region = 43  ;;  %s224_s5 = sand.u32 (%p1825_p9), 1, %s1688_s18  }
  0x2d   : > { %s1348_s29 = sshll.u32 (%p1825_p9), %s1712_s24, 1  ;;  %s1346_s6 = sshll.u32 (%p1825_p9), %s224_s5, 9 }
  0x2e   : > { %s1435_s30 = sshll.u32 (%p1825_p9), %s1708_s23, 8  ;;  %s2150_s1 = sld [smem:[#allocation9_spill]] (%p1825_p9) }
  0x2f   : > { %s230_s9 = sadd.s32 (%p1825_p9), %s1435_s30, %s1348_s29  ;;  %s1863_s10 = scalar_lea.vmem (%p1825_p9), [#allocation4], %s1346_s6 }
  0x30   : > { %s1350_s0 = sshll.u32 (%p1825_p9), %s230_s9, 2 }
  0x34   : > { %s1858_s27 = scalar_lea.vmem %s2150_s1, %s1350_s0 }
  0x35   : > { %v387_v4 = vld [vmem:[%s1858_s27] sm:$0xff]  ;;  %v389_v5 = vld [vmem:[%s1858_s27 + $0x10] sm:$0xff] }
  0x36   : > { %v391_v6 = vld [vmem:[%s1858_s27 + $0x20] sm:$0xff]  ;;  %388 = vst [vmem:[%s1863_s10] sm:$0xff] %v387_v4  ;;  %390 = vst [vmem:[%s1863_s10 + $0x8] sm:$0xff] %v389_v5  ;;  %v393_v7 = vld [vmem:[%s1858_s27 + $0x30] sm:$0xff] }
  0x37   : > { %392 = vst [vmem:[%s1863_s10 + $0x10] sm:$0xff] %v391_v6  ;;  %v395_v8 = vld [vmem:[%s1858_s27 + $0x40] sm:$0xff]  ;;  %v397_v9 = vld [vmem:[%s1858_s27 + $0x50] sm:$0xff]  ;;  %394 = vst [vmem:[%s1863_s10 + $0x18] sm:$0xff] %v393_v7 }
  0x38   : > { %396 = vst [vmem:[%s1863_s10 + $0x20] sm:$0xff] %v395_v8  ;;  %398 = vst [vmem:[%s1863_s10 + $0x28] sm:$0xff] %v397_v9  ;;  %v399_v10 = vld [vmem:[%s1858_s27 + $0x60] sm:$0xff]  ;;  %v401_v11 = vld [vmem:[%s1858_s27 + $0x70] sm:$0xff] }
  0x39   : > { %v403_v12 = vld [vmem:[%s1858_s27 + $0x80] sm:$0xff]  ;;  %400 = vst [vmem:[%s1863_s10 + $0x30] sm:$0xff] %v399_v10  ;;  %402 = vst [vmem:[%s1863_s10 + $0x38] sm:$0xff] %v401_v11  ;;  %v405_v13 = vld [vmem:[%s1858_s27 + $0x90] sm:$0xff] }
  0x3a   : > { %404 = vst [vmem:[%s1863_s10 + $0x40] sm:$0xff] %v403_v12  ;;  %v407_v14 = vld [vmem:[%s1858_s27 + $0xa0] sm:$0xff]  ;;  %v409_v15 = vld [vmem:[%s1858_s27 + $0xb0] sm:$0xff]  ;;  %406 = vst [vmem:[%s1863_s10 + $0x48] sm:$0xff] %v405_v13 }
  0x3b   : > { %408 = vst [vmem:[%s1863_s10 + $0x50] sm:$0xff] %v407_v14  ;;  %410 = vst [vmem:[%s1863_s10 + $0x58] sm:$0xff] %v409_v15  ;;  %v411_v16 = vld [vmem:[%s1858_s27 + $0xc0] sm:$0xff]  ;;  %v413_v17 = vld [vmem:[%s1858_s27 + $0xd0] sm:$0xff] }
  0x3c   : > { %v415_v18 = vld [vmem:[%s1858_s27 + $0xe0] sm:$0xff]  ;;  %412 = vst [vmem:[%s1863_s10 + $0x60] sm:$0xff] %v411_v16  ;;  %414 = vst [vmem:[%s1863_s10 + $0x68] sm:$0xff] %v413_v17  ;;  %v417_v19 = vld [vmem:[%s1858_s27 + $0xf0] sm:$0xff] }
  0x3d   : > { %416 = vst [vmem:[%s1863_s10 + $0x70] sm:$0xff] %v415_v18  ;;  %v419_v20 = vld [vmem:[%s1858_s27 + $0x100] sm:$0xff]  ;;  %v421_v21 = vld [vmem:[%s1858_s27 + $0x110] sm:$0xff]  ;;  %418 = vst [vmem:[%s1863_s10 + $0x78] sm:$0xff] %v417_v19 }
  0x3e   : > { %420 = vst [vmem:[%s1863_s10 + $0x80] sm:$0xff] %v419_v20  ;;  %422 = vst [vmem:[%s1863_s10 + $0x88] sm:$0xff] %v421_v21  ;;  %v423_v22 = vld [vmem:[%s1858_s27 + $0x120] sm:$0xff]  ;;  %v425_v23 = vld [vmem:[%s1858_s27 + $0x130] sm:$0xff] }
  0x3f   : > { %v427_v24 = vld [vmem:[%s1858_s27 + $0x140] sm:$0xff]  ;;  %424 = vst [vmem:[%s1863_s10 + $0x90] sm:$0xff] %v423_v22  ;;  %426 = vst [vmem:[%s1863_s10 + $0x98] sm:$0xff] %v425_v23  ;;  %v429_v25 = vld [vmem:[%s1858_s27 + $0x150] sm:$0xff] }
  0x40   : > { %428 = vst [vmem:[%s1863_s10 + $0xa0] sm:$0xff] %v427_v24  ;;  %v431_v26 = vld [vmem:[%s1858_s27 + $0x160] sm:$0xff]  ;;  %v433_v27 = vld [vmem:[%s1858_s27 + $0x170] sm:$0xff]  ;;  %430 = vst [vmem:[%s1863_s10 + $0xa8] sm:$0xff] %v429_v25 }
  0x41   : > { %432 = vst [vmem:[%s1863_s10 + $0xb0] sm:$0xff] %v431_v26  ;;  %434 = vst [vmem:[%s1863_s10 + $0xb8] sm:$0xff] %v433_v27  ;;  %v435_v28 = vld [vmem:[%s1858_s27 + $0x180] sm:$0xff]  ;;  %v437_v29 = vld [vmem:[%s1858_s27 + $0x190] sm:$0xff] }
  0x42   : > { %v439_v30 = vld [vmem:[%s1858_s27 + $0x1a0] sm:$0xff]  ;;  %436 = vst [vmem:[%s1863_s10 + $0xc0] sm:$0xff] %v435_v28  ;;  %438 = vst [vmem:[%s1863_s10 + $0xc8] sm:$0xff] %v437_v29  ;;  %v441_v31 = vld [vmem:[%s1858_s27 + $0x1b0] sm:$0xff] }
  0x43   : > { %440 = vst [vmem:[%s1863_s10 + $0xd0] sm:$0xff] %v439_v30  ;;  %v443_v32 = vld [vmem:[%s1858_s27 + $0x1c0] sm:$0xff]  ;;  %v445_v33 = vld [vmem:[%s1858_s27 + $0x1d0] sm:$0xff]  ;;  %442 = vst [vmem:[%s1863_s10 + $0xd8] sm:$0xff] %v441_v31 }
  0x44   : > { %444 = vst [vmem:[%s1863_s10 + $0xe0] sm:$0xff] %v443_v32  ;;  %446 = vst [vmem:[%s1863_s10 + $0xe8] sm:$0xff] %v445_v33  ;;  %v447_v34 = vld [vmem:[%s1858_s27 + $0x1e0] sm:$0xff]  ;;  %v449_v35 = vld [vmem:[%s1858_s27 + $0x1f0] sm:$0xff] }
  0x45   : > { %v451_v36 = vld [vmem:[%s1858_s27 + $0x200] sm:$0xff]  ;;  %448 = vst [vmem:[%s1863_s10 + $0xf0] sm:$0xff] %v447_v34  ;;  %450 = vst [vmem:[%s1863_s10 + $0xf8] sm:$0xff] %v449_v35  ;;  %v453_v37 = vld [vmem:[%s1858_s27 + $0x210] sm:$0xff] }
  0x46   : > { %452 = vst [vmem:[%s1863_s10 + $0x100] sm:$0xff] %v451_v36  ;;  %v455_v38 = vld [vmem:[%s1858_s27 + $0x220] sm:$0xff]  ;;  %v457_v39 = vld [vmem:[%s1858_s27 + $0x230] sm:$0xff]  ;;  %454 = vst [vmem:[%s1863_s10 + $0x108] sm:$0xff] %v453_v37 }
  0x47   : > { %456 = vst [vmem:[%s1863_s10 + $0x110] sm:$0xff] %v455_v38  ;;  %458 = vst [vmem:[%s1863_s10 + $0x118] sm:$0xff] %v457_v39  ;;  %v459_v40 = vld [vmem:[%s1858_s27 + $0x240] sm:$0xff]  ;;  %v461_v41 = vld [vmem:[%s1858_s27 + $0x250] sm:$0xff] }
  0x48   : > { %v463_v42 = vld [vmem:[%s1858_s27 + $0x260] sm:$0xff]  ;;  %460 = vst [vmem:[%s1863_s10 + $0x120] sm:$0xff] %v459_v40  ;;  %462 = vst [vmem:[%s1863_s10 + $0x128] sm:$0xff] %v461_v41  ;;  %v465_v43 = vld [vmem:[%s1858_s27 + $0x270] sm:$0xff] }
  0x49   : > { %464 = vst [vmem:[%s1863_s10 + $0x130] sm:$0xff] %v463_v42  ;;  %v467_v44 = vld [vmem:[%s1858_s27 + $0x280] sm:$0xff]  ;;  %v469_v45 = vld [vmem:[%s1858_s27 + $0x290] sm:$0xff]  ;;  %466 = vst [vmem:[%s1863_s10 + $0x138] sm:$0xff] %v465_v43 }
  0x4a   : > { %468 = vst [vmem:[%s1863_s10 + $0x140] sm:$0xff] %v467_v44  ;;  %470 = vst [vmem:[%s1863_s10 + $0x148] sm:$0xff] %v469_v45  ;;  %v471_v46 = vld [vmem:[%s1858_s27 + $0x2a0] sm:$0xff]  ;;  %v473_v47 = vld [vmem:[%s1858_s27 + $0x2b0] sm:$0xff] }
  0x4b   : > { %v475_v48 = vld [vmem:[%s1858_s27 + $0x2c0] sm:$0xff]  ;;  %472 = vst [vmem:[%s1863_s10 + $0x150] sm:$0xff] %v471_v46  ;;  %474 = vst [vmem:[%s1863_s10 + $0x158] sm:$0xff] %v473_v47  ;;  %v477_v49 = vld [vmem:[%s1858_s27 + $0x2d0] sm:$0xff] }
  0x4c   : > { %476 = vst [vmem:[%s1863_s10 + $0x160] sm:$0xff] %v475_v48  ;;  %v479_v50 = vld [vmem:[%s1858_s27 + $0x2e0] sm:$0xff]  ;;  %v481_v51 = vld [vmem:[%s1858_s27 + $0x2f0] sm:$0xff]  ;;  %478 = vst [vmem:[%s1863_s10 + $0x168] sm:$0xff] %v477_v49 }
  0x4d   : > { %480 = vst [vmem:[%s1863_s10 + $0x170] sm:$0xff] %v479_v50  ;;  %482 = vst [vmem:[%s1863_s10 + $0x178] sm:$0xff] %v481_v51  ;;  %v483_v52 = vld [vmem:[%s1858_s27 + $0x300] sm:$0xff]  ;;  %v485_v53 = vld [vmem:[%s1858_s27 + $0x310] sm:$0xff] }
  0x4e   : > { %v487_v54 = vld [vmem:[%s1858_s27 + $0x320] sm:$0xff]  ;;  %484 = vst [vmem:[%s1863_s10 + $0x180] sm:$0xff] %v483_v52  ;;  %486 = vst [vmem:[%s1863_s10 + $0x188] sm:$0xff] %v485_v53  ;;  %v489_v55 = vld [vmem:[%s1858_s27 + $0x330] sm:$0xff] }
  0x4f   : > { %488 = vst [vmem:[%s1863_s10 + $0x190] sm:$0xff] %v487_v54  ;;  %v491_v56 = vld [vmem:[%s1858_s27 + $0x340] sm:$0xff]  ;;  %v493_v57 = vld [vmem:[%s1858_s27 + $0x350] sm:$0xff]  ;;  %490 = vst [vmem:[%s1863_s10 + $0x198] sm:$0xff] %v489_v55 }
  0x50   : > { %492 = vst [vmem:[%s1863_s10 + $0x1a0] sm:$0xff] %v491_v56  ;;  %494 = vst [vmem:[%s1863_s10 + $0x1a8] sm:$0xff] %v493_v57  ;;  %v495_v58 = vld [vmem:[%s1858_s27 + $0x360] sm:$0xff]  ;;  %v497_v59 = vld [vmem:[%s1858_s27 + $0x370] sm:$0xff] }
  0x51   : > { %v499_v60 = vld [vmem:[%s1858_s27 + $0x380] sm:$0xff]  ;;  %496 = vst [vmem:[%s1863_s10 + $0x1b0] sm:$0xff] %v495_v58  ;;  %498 = vst [vmem:[%s1863_s10 + $0x1b8] sm:$0xff] %v497_v59  ;;  %v501_v61 = vld [vmem:[%s1858_s27 + $0x390] sm:$0xff] }
  0x52   : > { %500 = vst [vmem:[%s1863_s10 + $0x1c0] sm:$0xff] %v499_v60  ;;  %v503_v62 = vld [vmem:[%s1858_s27 + $0x3a0] sm:$0xff]  ;;  %v505_v63 = vld [vmem:[%s1858_s27 + $0x3b0] sm:$0xff]  ;;  %502 = vst [vmem:[%s1863_s10 + $0x1c8] sm:$0xff] %v501_v61 }
  0x53   : > { %504 = vst [vmem:[%s1863_s10 + $0x1d0] sm:$0xff] %v503_v62  ;;  %506 = vst [vmem:[%s1863_s10 + $0x1d8] sm:$0xff] %v505_v63  ;;  %v507_v0 = vld [vmem:[%s1858_s27 + $0x3c0] sm:$0xff]  ;;  %v509_v1 = vld [vmem:[%s1858_s27 + $0x3d0] sm:$0xff] }
  0x54   : > { %v511_v2 = vld [vmem:[%s1858_s27 + $0x3e0] sm:$0xff]  ;;  %508 = vst [vmem:[%s1863_s10 + $0x1e0] sm:$0xff] %v507_v0  ;;  %510 = vst [vmem:[%s1863_s10 + $0x1e8] sm:$0xff] %v509_v1  ;;  %v513_v3 = vld [vmem:[%s1858_s27 + $0x3f0] sm:$0xff] }
  0x55   : > { %512 = vst [vmem:[%s1863_s10 + $0x1f0] sm:$0xff] %v511_v2  ;;  %514 = vst [vmem:[%s1863_s10 + $0x1f8] sm:$0xff] %v513_v3 }
  0x56 PF: > { %p1351_p0 = scmp.ge.s32.totalorder %s1716_s25, 1  ;;  %p535_p1 = scmp.lt.s32.totalorder %s1716_s25, 19 }
  0x58   : > { %p536_p2 = pnand %p1351_p0, %p535_p1 }
  0x59   : > { %s542_s0 = sand.u32 (!%p536_p2), 1, %s1692_s19   ;;  %s549_s28 = sand.u32 (!%p536_p2), 1, %s1684_s17  }
  0x5a   : > { %539 = sbr.rel (%p536_p2) target bundleno = 400 (0x190), region = 89  ;;  %s1352_s11 = sshll.u32 (!%p536_p2), %s542_s0, 5 }
  0x5b   : > { %s1353_s26 = sshll.u32 (!%p536_p2), %s549_s28, 9  ;;  %s582_s5 = sand.u32 (!%p536_p2), 1, %s1676_s15  }
  0x5c   : > { %s1355_s29 = sshll.u32 (!%p536_p2), %s1704_s22, 1  ;;  %s1354_s27 = sshll.u32 (!%p536_p2), %s582_s5, 4 }
  0x5d   : > { %p590_p3 = scmp.lt.s32.totalorder (!%p536_p2), %s1355_s29, 3  ;;  %s2006_s19 = scalar_lea.vmem (!%p536_p2), [#allocation3], %s1352_s11 }
  0x5e   : > { %s2008_s17 = scalar_lea.vmem (!%p536_p2), [#allocation4], %s1353_s26  ;;  %s2010_s15 = scalar_lea.vmem (!%p536_p2), [#allocation5], %s1354_s27 }
  0x5f   : > { %s2170_s29 = smov (!%p590_p3, %s1355_s29), 3  ;;  %p1357_p4 = scmp.ne.s32.totalorder %s1700_s21, 0 }
  0x60   : > { %s592_s9 = scalar_lea.vmem %s2137_s2, %s2170_s29  ;;  %s597_s1 = scalar_lea.vmem %s2138_s3, %s2170_s29 }
  0x61   : > { %604 = sbr.rel (%p1357_p4) target bundleno = 105 (0x69), region = 101 }
  0x66   : > { %v1718_v4 = vmov 0.0  }
  0x67   : > { %605 = vst [vmem:[#allocation2 + $0x10] sm:$0xff] %v1718_v4  ;;  %606 = vst [vmem:[#allocation2] sm:$0xff] %v1718_v4 }
  0x68   : > { %607 = vst [vmem:[#allocation2 + $0x18] sm:$0xff] %v1718_v4  ;;  %608 = vst [vmem:[#allocation2 + $0x8] sm:$0xff] %v1718_v4 }
  0x69 PF: > { %v1528_v5 = vld [vmem:[%s2008_s17 + $0x74] ss:$8 sps:$4 sm:$0xff]   ;;  %v1532_v7 = vld [vmem:[%s2008_s17 + $0x70] ss:$8 sps:$4 sm:$0xff]   ;;  %v1534_v9 = vld [vmem:[%s2008_s17 + $0x64] ss:$8 sps:$4 sm:$0xff]  }
  0x6a   : > { %v1530_v6 = vld [vmem:[%s2008_s17 + $0x174] ss:$8 sps:$4 sm:$0xff]   ;;  %1021 = vmatprep.subr.bf16.mxu0 %v1528_v5  ;;  %v1533_v8 = vld [vmem:[%s2008_s17 + $0x170] ss:$8 sps:$4 sm:$0xff]   ;;  %v1536_v10 = vld [vmem:[%s2008_s17 + $0x164] ss:$8 sps:$4 sm:$0xff]  }
  0x6b   : > { %1064 = vmatprep.subr.bf16.mxu1 %v1530_v6  ;;  %1022 = vmatpush1.bf16.msra.mxu0 %v1532_v7  ;;  %v1538_v11 = vld [vmem:[%s2008_s17 + $0x60] ss:$8 sps:$4 sm:$0xff]   ;;  %v1540_v13 = vld [vmem:[%s2008_s17 + $0x54] ss:$8 sps:$4 sm:$0xff]   ;;  %v1544_v15 = vld [vmem:[%s2008_s17 + $0x50] ss:$8 sps:$4 sm:$0xff]  }
  0x6c   : > { %1065 = vmatpush1.bf16.msra.mxu1 %v1533_v8  ;;  %1023 = vmatprep.subr.bf16.mxu0 %v1534_v9  ;;  %v1539_v12 = vld [vmem:[%s2008_s17 + $0x160] ss:$8 sps:$4 sm:$0xff]   ;;  %v1542_v14 = vld [vmem:[%s2008_s17 + $0x154] ss:$8 sps:$4 sm:$0xff]   ;;  %v1545_v16 = vld [vmem:[%s2008_s17 + $0x150] ss:$8 sps:$4 sm:$0xff]  }
  0x6d   : > { %1066 = vmatprep.subr.bf16.mxu1 %v1536_v10  ;;  %v1546_v17 = vld [vmem:[%s2008_s17 + $0x44] ss:$8 sps:$4 sm:$0xff]   ;;  %v1550_v19 = vld [vmem:[%s2008_s17 + $0x40] ss:$8 sps:$4 sm:$0xff]   ;;  %v1552_v21 = vld [vmem:[%s2008_s17 + $0x34] ss:$8 sps:$4 sm:$0xff]  }
  0x6e   : > { %v1548_v18 = vld [vmem:[%s2008_s17 + $0x144] ss:$8 sps:$4 sm:$0xff]   ;;  %v1551_v20 = vld [vmem:[%s2008_s17 + $0x140] ss:$8 sps:$4 sm:$0xff]   ;;  %v1554_v22 = vld [vmem:[%s2008_s17 + $0x134] ss:$8 sps:$4 sm:$0xff]  }
  0x6f   : > { %1024 = vmatpush1.bf16.msra.mxu0 %v1538_v11  ;;  %v1556_v23 = vld [vmem:[%s2008_s17 + $0x30] ss:$8 sps:$4 sm:$0xff]   ;;  %v1558_v25 = vld [vmem:[%s2008_s17 + $0x24] ss:$8 sps:$4 sm:$0xff]   ;;  %v1562_v27 = vld [vmem:[%s2008_s17 + $0x20] ss:$8 sps:$4 sm:$0xff]  }
  0x70   : > { %1067 = vmatpush1.bf16.msra.mxu1 %v1539_v12  ;;  %1025 = vmatprep.subr.bf16.mxu0 %v1540_v13  ;;  %v1557_v24 = vld [vmem:[%s2008_s17 + $0x130] ss:$8 sps:$4 sm:$0xff]   ;;  %v1560_v26 = vld [vmem:[%s2008_s17 + $0x124] ss:$8 sps:$4 sm:$0xff]   ;;  %v1563_v28 = vld [vmem:[%s2008_s17 + $0x120] ss:$8 sps:$4 sm:$0xff]  }
  0x71   : > { %1068 = vmatprep.subr.bf16.mxu1 %v1542_v14  ;;  %v1564_v29 = vld [vmem:[%s2008_s17 + $0x14] ss:$8 sps:$4 sm:$0xff]   ;;  %v1568_v31 = vld [vmem:[%s2008_s17 + $0x10] ss:$8 sps:$4 sm:$0xff]   ;;  %v1570_v33 = vld [vmem:[%s2008_s17 + $0x4] ss:$8 sps:$4 sm:$0xff]  }
  0x72   : > { %v1566_v30 = vld [vmem:[%s2008_s17 + $0x114] ss:$8 sps:$4 sm:$0xff]   ;;  %v1569_v32 = vld [vmem:[%s2008_s17 + $0x110] ss:$8 sps:$4 sm:$0xff]   ;;  %v1572_v34 = vld [vmem:[%s2008_s17 + $0x104] ss:$8 sps:$4 sm:$0xff]  }
  0x73   : > { %1026 = vmatpush1.bf16.msra.mxu0 %v1544_v15  ;;  %v1574_v35 = vld [vmem:[%s2008_s17] ss:$8 sps:$4 sm:$0xff]   ;;  %v1576_v37 = vld [vmem:[%s2008_s17 + $0xf4] ss:$8 sps:$4 sm:$0xff]   ;;  %v1580_v39 = vld [vmem:[%s2008_s17 + $0xf0] ss:$8 sps:$4 sm:$0xff]  }
  0x74   : > { %1069 = vmatpush1.bf16.msra.mxu1 %v1545_v16  ;;  %1027 = vmatprep.subr.bf16.mxu0 %v1546_v17  ;;  %v1575_v36 = vld [vmem:[%s2008_s17 + $0x100] ss:$8 sps:$4 sm:$0xff]   ;;  %v1578_v38 = vld [vmem:[%s2008_s17 + $0x1f4] ss:$8 sps:$4 sm:$0xff]   ;;  %v1581_v40 = vld [vmem:[%s2008_s17 + $0x1f0] ss:$8 sps:$4 sm:$0xff]  }
  0x75   : > { %1070 = vmatprep.subr.bf16.mxu1 %v1548_v18  ;;  %v1582_v41 = vld [vmem:[%s2008_s17 + $0xe4] ss:$8 sps:$4 sm:$0xff]   ;;  %v1586_v43 = vld [vmem:[%s2008_s17 + $0xe0] ss:$8 sps:$4 sm:$0xff]   ;;  %v1588_v45 = vld [vmem:[%s2008_s17 + $0xd4] ss:$8 sps:$4 sm:$0xff]  }
  0x76   : > { %v1584_v42 = vld [vmem:[%s2008_s17 + $0x1e4] ss:$8 sps:$4 sm:$0xff]   ;;  %v1587_v44 = vld [vmem:[%s2008_s17 + $0x1e0] ss:$8 sps:$4 sm:$0xff]   ;;  %v1590_v46 = vld [vmem:[%s2008_s17 + $0x1d4] ss:$8 sps:$4 sm:$0xff]  }
  0x77   : > { %1028 = vmatpush1.bf16.msra.mxu0 %v1550_v19  ;;  %v1592_v47 = vld [vmem:[%s2008_s17 + $0xd0] ss:$8 sps:$4 sm:$0xff]   ;;  %v1594_v49 = vld [vmem:[%s2008_s17 + $0xc4] ss:$8 sps:$4 sm:$0xff]   ;;  %v1598_v51 = vld [vmem:[%s2008_s17 + $0xc0] ss:$8 sps:$4 sm:$0xff]  }
  0x78   : > { %1071 = vmatpush1.bf16.msra.mxu1 %v1551_v20  ;;  %1029 = vmatprep.subr.bf16.mxu0 %v1552_v21  ;;  %v1593_v48 = vld [vmem:[%s2008_s17 + $0x1d0] ss:$8 sps:$4 sm:$0xff]   ;;  %v1596_v50 = vld [vmem:[%s2008_s17 + $0x1c4] ss:$8 sps:$4 sm:$0xff]   ;;  %v1599_v53 = vld [vmem:[%s2008_s17 + $0x1c0] ss:$8 sps:$4 sm:$0xff]  }
  0x79   : > { %1072 = vmatprep.subr.bf16.mxu1 %v1554_v22  ;;  %v1626_v52 = vld [vmem:[%s2006_s19 + $0x4] ss:$16 sps:$4 sm:$0xff]   ;;  %v1629_v56 = vld [vmem:[%s2006_s19 + $0xc] ss:$16 sps:$4 sm:$0xff]   ;;  %v1604_v57 = vld [vmem:[%s2008_s17 + $0xb0] ss:$8 sps:$4 sm:$0xff]  }
  0x7a   : > { %v1600_v54 = vld [vmem:[%s2008_s17 + $0xb4] ss:$8 sps:$4 sm:$0xff]   ;;  %1053 = vmatprep.mubr.bf16.mxu0 %v1626_v52  ;;  %1096 = vmatprep.mubr.bf16.mxu1 %v1629_v56  ;;  %v1605_v58 = vld [vmem:[%s2008_s17 + $0x1b0] ss:$8 sps:$4 sm:$0xff]   ;;  %v1606_v59 = vld [vmem:[%s2008_s17 + $0xa4] ss:$8 sps:$4 sm:$0xff]  }
  0x7b   : > { %1030 = vmatpush1.bf16.msra.mxu0 %v1556_v23  ;;  %v1602_v55 = vld [vmem:[%s2008_s17 + $0x1b4] ss:$8 sps:$4 sm:$0xff]   ;;  %v1608_v60 = vld [vmem:[%s2008_s17 + $0x1a4] ss:$8 sps:$4 sm:$0xff]   ;;  %v1610_v61 = vld [vmem:[%s2008_s17 + $0xa0] ss:$8 sps:$4 sm:$0xff]  }
  0x7c   : > { %1073 = vmatpush1.bf16.msra.mxu1 %v1557_v24  ;;  %1031 = vmatprep.subr.bf16.mxu0 %v1558_v25  ;;  %v1611_v62 = vld [vmem:[%s2008_s17 + $0x1a0] ss:$8 sps:$4 sm:$0xff]   ;;  %v1612_v63 = vld [vmem:[%s2008_s17 + $0x94] ss:$8 sps:$4 sm:$0xff]   ;;  %v1616_v1 = vld [vmem:[%s2008_s17 + $0x90] ss:$8 sps:$4 sm:$0xff]  }
  0x7d   : > { %1074 = vmatprep.subr.bf16.mxu1 %v1560_v26  ;;  %v1614_v0 = vld [vmem:[%s2008_s17 + $0x194] ss:$8 sps:$4 sm:$0xff]   ;;  %v1617_v2 = vld [vmem:[%s2008_s17 + $0x190] ss:$8 sps:$4 sm:$0xff]   ;;  %v1618_v3 = vld [vmem:[%s2008_s17 + $0x84] ss:$8 sps:$4 sm:$0xff]  }
  0x7e   : > { %v1620_v4 = vld [vmem:[%s2008_s17 + $0x184] ss:$8 sps:$4 sm:$0xff]   ;;  %v1622_v5 = vld [vmem:[%s2008_s17 + $0x80] ss:$8 sps:$4 sm:$0xff]   ;;  %v609_v10 = vld [vmem:[#allocation2 + $0x10] sm:$0xff]  ;;  %p1426_p5 = scmp.ne.s32.totalorder %s1700_s21, 8 }
  0x7f   : > { %1032 = vmatpush1.bf16.msra.mxu0 %v1562_v27  ;;  %v1623_v6 = vld [vmem:[%s2008_s17 + $0x180] ss:$8 sps:$4 sm:$0xff]   ;;  %v611_v19 = vld [vmem:[#allocation2 + $0x18] sm:$0xff] }
  0x80   : > { %1075 = vmatpush1.bf16.msra.mxu1 %v1563_v28  ;;  %1033 = vmatprep.subr.bf16.mxu0 %v1564_v29  ;;  %v1624_v7 = vld [vmem:[%s2006_s19] ss:$16 sps:$4 sm:$0xff]   ;;  %v1627_v8 = vld [vmem:[%s2006_s19 + $0x8] ss:$16 sps:$4 sm:$0xff]  }
  0x81   : > { %1076 = vmatprep.subr.bf16.mxu1 %v1566_v30  ;;  %v610_v14 = vld [vmem:[#allocation2] sm:$0xff]  ;;  %v612_v24 = vld [vmem:[#allocation2 + $0x8] sm:$0xff] }
  0x83   : > { %1034 = vmatpush1.bf16.msra.mxu0 %v1568_v31 }
  0x84   : > { %1077 = vmatpush1.bf16.msra.mxu1 %v1569_v32  ;;  %1035 = vmatprep.subr.bf16.mxu0 %v1570_v33 }
  0x85   : > { %1078 = vmatprep.subr.bf16.mxu1 %v1572_v34 }
  0x87   : > { %1036 = vmatpush1.bf16.msra.mxu0 %v1574_v35 }
  0x88   : > { %1079 = vmatpush1.bf16.msra.mxu1 %v1575_v36  ;;  %1037 = vmatprep.subr.bf16.mxu0 %v1576_v37 }
  0x89   : > { %1080 = vmatprep.subr.bf16.mxu1 %v1578_v38 }
  0x8b   : > { %1038 = vmatpush2.bf16.msra.mxu0 %v1580_v39 }
  0x8c   : > { %1081 = vmatpush2.bf16.msra.mxu1 %v1581_v40  ;;  %1039 = vmatprep.subr.bf16.mxu0 %v1582_v41 }
  0x8d   : > { %1082 = vmatprep.subr.bf16.mxu1 %v1584_v42 }
  0x8f   : > { %1040 = vmatpush2.bf16.msra.mxu0 %v1586_v43 }
  0x90   : > { %1083 = vmatpush2.bf16.msra.mxu1 %v1587_v44  ;;  %1041 = vmatprep.subr.bf16.mxu0 %v1588_v45 }
  0x91   : > { %1084 = vmatprep.subr.bf16.mxu1 %v1590_v46 }
  0x93   : > { %1042 = vmatpush2.bf16.msra.mxu0 %v1592_v47 }
  0x94   : > { %1085 = vmatpush2.bf16.msra.mxu1 %v1593_v48  ;;  %1043 = vmatprep.subr.bf16.mxu0 %v1594_v49 }
  0x95   : > { %1086 = vmatprep.subr.bf16.mxu1 %v1596_v50 }
  0x97   : > { %1044 = vmatpush2.bf16.msra.mxu0 %v1598_v51 }
  0x98   : > { %1087 = vmatpush2.bf16.msra.mxu1 %v1599_v53  ;;  %1045 = vmatprep.subr.bf16.mxu0 %v1600_v54 }
  0x99   : > { %1088 = vmatprep.subr.bf16.mxu1 %v1602_v55 }
  0x9b   : > { %1046 = vmatpush2.bf16.msra.mxu0 %v1604_v57 }
  0x9c   : > { %1089 = vmatpush2.bf16.msra.mxu1 %v1605_v58  ;;  %1047 = vmatprep.subr.bf16.mxu0 %v1606_v59 }
  0x9d   : > { %1090 = vmatprep.subr.bf16.mxu1 %v1608_v60 }
  0x9f   : > { %1048 = vmatpush2.bf16.msra.mxu0 %v1610_v61 }
  0xa0   : > { %1091 = vmatpush2.bf16.msra.mxu1 %v1611_v62  ;;  %1049 = vmatprep.subr.bf16.mxu0 %v1612_v63 }
  0xa1   : > { %1092 = vmatprep.subr.bf16.mxu1 %v1614_v0 }
  0xa3   : > { %1050 = vmatpush2.bf16.msra.mxu0 %v1616_v1 }
  0xa4   : > { %1093 = vmatpush2.bf16.msra.mxu1 %v1617_v2  ;;  %1051 = vmatprep.subr.bf16.mxu0 %v1618_v3 }
  0xa5   : > { %1094 = vmatprep.subr.bf16.mxu1 %v1620_v4 }
  0xa7   : > { %1052 = vmatpush2.bf16.msra.mxu0 %v1622_v5 }
  0xa8   : > { %1095 = vmatpush2.bf16.msra.mxu1 %v1623_v6 }
  0xaa   : > { %1054 = vmatmul.mubr.bf16.vlgmr.msra.gmra.mxu0 %v1624_v7 }
  0xab   : > { %1097 = vmatmul.mubr.bf16.vlgmr.msra.gmra.mxu1 %v1627_v8 }
 0x16a   : > { %v1055_v9 = vpop.f32.mrf.mxu0 }
 0x16b   : > { %v1098_v11 = vpop.f32.mrf.mxu1 }
 0x16c   : > { %v1099_v12 = vadd.f32 %v1098_v11, %v1055_v9  ;;  %v1057_v13 = vpop.f32.mrf.mxu0 }
 0x16d   : > { %v1100_v15 = vpop.f32.mrf.mxu1 }
 0x16e   : > { %v1107_v16 = vadd.f32 %v1099_v12, %v609_v10  ;;  %v1101_v17 = vadd.f32 %v1100_v15, %v1057_v13  ;;  %v1059_v18 = vpop.f32.mrf.mxu0 }
 0x16f   : > { %v1102_v20 = vpop.f32.mrf.mxu1 }
 0x170   : > { %1111 = vst [vmem:[#allocation2 + $0x10] sm:$0xff] %v1107_v16  ;;  %v1108_v21 = vadd.f32 %v1101_v17, %v610_v14  ;;  %v1103_v22 = vadd.f32 %v1102_v20, %v1059_v18  ;;  %v1061_v23 = vpop.f32.mrf.mxu0 }
 0x171   : > { %v1104_v25 = vpop.f32.mrf.mxu1 }
 0x172   : > { %1112 = vst [vmem:[#allocation2] sm:$0xff] %v1108_v21  ;;  %v1109_v26 = vadd.f32 %v1103_v22, %v611_v19  ;;  %v1105_v27 = vadd.f32 %v1104_v25, %v1061_v23  ;;  %1118 = sbr.rel (%p1426_p5) target bundleno = 392 (0x188), region = 105 }
 0x174   : > { %1113 = vst [vmem:[#allocation2 + $0x18] sm:$0xff] %v1109_v26  ;;  %v1110_v28 = vadd.f32 %v1105_v27, %v612_v24 }
 0x176   : > { %1114 = vst [vmem:[#allocation2 + $0x8] sm:$0xff] %v1110_v28 }
 0x177   : > { %v1125_v29 = vlaneseq  ;;  %v1123_v31 = vld [vmem:[%s592_s9] sm:$0x3]  ;;  %v1119_v33 = vld [vmem:[#allocation2 + $0x10] sm:$0xff] }
 0x178   : > { %v1139_v32 = vld [vmem:[%s597_s1] sm:$0x3] }
 0x179   : > { %v1126_v30 = vshrl.u32 %v1125_v29, 7  ;;  %v1120_v36 = vld [vmem:[#allocation2] sm:$0xff] }
 0x17b   : > { %v1127_v34 = vsub.s32 0, %v1126_v30  ;;  %v1131_v35 = vsub.s32 1, %v1126_v30  ;;  %v1121_v37 = vld [vmem:[#allocation2 + $0x18] sm:$0xff] }
 0x17d   : > { %v1122_v38 = vld [vmem:[#allocation2 + $0x8] sm:$0xff]  ;;  %v1128_v39 = vrot.slane %v1123_v31, %v1127_v34  ;;  %v1132_v40 = vrot.slane %v1123_v31, %v1131_v35  ;;  %v1144_v41 = vrot.slane %v1139_v32, %v1127_v34  ;;  %v1148_v42 = vrot.slane %v1139_v32, %v1131_v35 }
 0x17f   : > { %v1135_v43 = vmul.f32 %v1128_v39, %v1119_v33  ;;  %v1136_v44 = vmul.f32 %v1132_v40, %v1120_v36  ;;  %v1137_v45 = vmul.f32 %v1128_v39, %v1121_v37  ;;  %v1138_v46 = vmul.f32 %v1132_v40, %v1122_v38 }
 0x181   : > { %v1151_v47 = vadd.f32 %v1144_v41, %v1135_v43  ;;  %v1152_v48 = vadd.f32 %v1148_v42, %v1136_v44  ;;  %v1153_v49 = vadd.f32 %v1144_v41, %v1137_v45  ;;  %v1154_v50 = vadd.f32 %v1148_v42, %v1138_v46 }
 0x183   : > { %v1155_v51 = vmax.f32 %v1151_v47, 0.0  ;;  %v1156_v52 = vmax.f32 %v1152_v48, 0.0  ;;  %v1157_v53 = vmax.f32 %v1153_v49, 0.0  ;;  %v1158_v54 = vmax.f32 %v1154_v50, 0.0 }
 0x185   : > { %v1436_v55 = vpack.c.bf16 %v1156_v52, %v1155_v51  ;;  %v1437_v56 = vpack.c.bf16 %v1158_v54, %v1157_v53 }
 0x187   : > { %1171 = vst [vmem:[%s2010_s15] sm:$0xff] %v1436_v55  ;;  %1172 = vst [vmem:[%s2010_s15 + $0x8] sm:$0xff] %v1437_v56 }
 0x188 PF: > { %1179 = sbr.rel (!%p1838_p12) target bundleno = 400 (0x190), region = 109  ;;  %s1438_s1 = sshll.u32 (%p1838_p12), %s1704_s22, 3 }
 0x189   : > { %s1185_s29 = scalar_lea.vmem (%p1838_p12), %s2139_s4, %s1438_s1 }
 0x18e   : > { %v1216_v57 = vld [vmem:[%s2010_s15] sm:$0xff]  ;;  %v1218_v58 = vld [vmem:[%s2010_s15 + $0x8] sm:$0xff] }
 0x18f   : > { %1217 = vst [vmem:[%s1185_s29] sm:$0xff] %v1216_v57  ;;  %1219 = vst [vmem:[%s1185_s29 + $0x10] sm:$0xff] %v1218_v58 }
 0x190 PF: > { %s14_s25 = sadd.s32 1, %s1716_s25   ;;  %s2151_s14 = sld [smem:[#allocation6_spill]] }
 0x191   : > { %p11_p6 = scmp.ge.s32.totalorder %s14_s25, 20   ;;  %s2152_s27 = sld [smem:[#allocation7_spill]] }
 0x192   : > { %s2153_s15 = smov %s1680_s16  ;;  %s2154_s16 = smov %s1836_s13 }
 0x193   : > { %s2155_s17 = smov %s1688_s18  ;;  %s2156_s18 = smov %s1833_s12 }
 0x194   : > { %s2157_s19 = smov %s1696_s20  ;;  %s2158_s20 = smov %s1819_s7 }
 0x195   : > { %s2159_s21 = smov %s1708_s23  ;;  %s2160_s22 = smov %s1712_s24 }
 0x196   : > { %s2161_s23 = smov %s2151_s14  ;;  %13 = sbr.rel (!%p11_p6) target bundleno = 9 (0x9), region = 192 }
 0x197   : > { %s2162_s24 = smov %s2152_s27 }

// kernel: uresnet_forward.40
= control target key start
LH: loop header
LB: loop body
LE: loop exit
PB: predicated region body
PF: predicated region fallthrough
CT: control target
= control target key end

     0   :  { %s2295_s0 = inlined_call_operand.vmem [shape: bf16[16,4608], index: 0, kind: input, shape index: {}]   ;;  %s2296_s1 = inlined_call_operand.vmem [shape: bf16[4608,512], index: 1, kind: input, shape index: {}]   ;;  %s2297_s2 = inlined_call_operand.vmem [shape: f32[1,512], index: 2, kind: input, shape index: {}]   ;;  %s2298_s3 = inlined_call_operand.vmem [shape: f32[1,512], index: 3, kind: input, shape index: {}]   ;;  %s2299_s4 = inlined_call_operand.vmem [shape: bf16[16,512], index: 4, kind: input, shape index: {}]   ;;  %s2300_s5 = inlined_call_operand.vmem [shape: bf16[16,512], index: 5, kind: output, shape index: {}]  }
   0x1   :  { %2304 = sst [smem:[#allocation11_spill]] %s2295_s0 }
   0x2   :  { %s1879_s18 = smov 0   ;;  %s1881_s19 = smov 0  }
   0x3   :  { %s1883_s20 = smov 0   ;;  %s1885_s21 = smov 0  }
   0x4   :  { %s1887_s22 = smov 0   ;;  %s1889_s23 = smov 0  }
   0x5   :  { %s1891_s24 = smov 0   ;;  %s1893_s25 = smov 0  }
   0x6   :  { %s1895_s26 = smov 0   ;;  %s1897_s27 = smov 0  }
   0x7   :  { %s1899_s28 = smov 0  }
   0x8 LB: > { %2305 = sst [smem:[#allocation7_spill]] %s1826_s23  ;;  %s1464_s29 = sadd.s32 4294967295, %s1846_s28   ;;  %s1846_s28 = sphi %s1899_s28, %s15_s28   ;;  %s1842_s27 = sphi %s1897_s27, %s2325_s27   ;;  %s1838_s26 = sphi %s1895_s26, %s2324_s26   ;;  %s1834_s25 = sphi %s1893_s25, %s2323_s25   ;;  %s1830_s24 = sphi %s1891_s24, %s2322_s24   ;;  %s1826_s23 = sphi %s1889_s23, %s2315_s23   ;;  %s1822_s22 = sphi %s1887_s22, %s2314_s22   ;;  %s1818_s21 = sphi %s1885_s21, %s2321_s21   ;;  %s1814_s20 = sphi %s1883_s20, %s2320_s20   ;;  %s1810_s19 = sphi %s1881_s19, %s2319_s19   ;;  %s1806_s18 = sphi %s1879_s18, %s2318_s18  }
   0x9   : > { %s27_s30 = sadd.s32 1, %s1838_s26  ;;  %s30_s6 = sadd.s32 1, %s1842_s27 }
   0xa   : > { %p28_p0 = scmp.ge.s32.totalorder %s27_s30, 9  ;;  %s43_s7 = sadd.s32 1, %s1826_s23 }
   0xb   : > { %p50_p1 = scmp.ne.s32.totalorder %s1826_s23, %s1822_s22  ;;  %p51_p2 = scmp.eq.s32.totalorder %s1846_s28, 0 }
   0xc   : > { %s2327_s30 = smov (%p28_p0, %s27_s30), 0  ;;  %s2329_s6 = smov (!%p28_p0, %s30_s6), %s1842_s27 }
   0xd   : > { %2306 = sst [smem:[#allocation8_spill]] %s2327_s30  ;;  %s39_s8 = ssub.s32 %s1838_s26, %s2327_s30 }
   0xe   : > { %p32_p3 = scmp.ge.s32.totalorder %s2329_s6, 2  ;;  %p41_p4 = scmp.eq.s32.totalorder %s39_s8, 0 }
   0xf   : > { %p1948_p5 = por %p51_p2, %p50_p1  ;;  %s71_s10 = sadd.s32 1, %s1818_s21 }
  0x10   : > { %s2331_s6 = smov (%p32_p3, %s2329_s6), 0  ;;  %p78_p6 = scmp.ne.s32.totalorder %s1818_s21, %s1814_s20 }
  0x11   : > { %2308 = sst [smem:[#allocation9_spill]] %s2331_s6  ;;  %s67_s12 = ssub.s32 %s1842_s27, %s2331_s6 }
  0x12   : > { %s1956_s11 = scalar_select %p41_p4, %s1826_s23, %s43_s7  }
  0x13   : > { %s68_s13 = sor.u32 %s67_s12, %s39_s8  ;;  %p149_p7 = scmp.eq.s32.totalorder %s67_s12, 0 }
  0x14   : > { %2309 = sst [smem:[#allocation10_spill]] %s1956_s11  ;;  %p69_p8 = scmp.eq.s32.totalorder %s68_s13, 0 }
  0x15   : > { %p1964_p9 = por %p78_p6, %p51_p2  ;;  %s151_s15 = sadd.s32 1, %s1810_s19 }
  0x16   : > { %p158_p10 = scmp.ne.s32.totalorder %s1810_s19, %s1806_s18  ;;  %p190_p12 = scmp.eq.s32.totalorder %s1464_s29, 17 }
  0x17   : > { %s1972_s16 = scalar_select %p69_p8, %s1818_s21, %s71_s10  }
  0x18   : > { %s1975_s17 = scalar_select %p149_p7, %s1810_s19, %s151_s15  }
  0x19   : > { %p1979_p11 = por %p158_p10, %p51_p2  ;;  %p1983_p13 = por %p190_p12, %p158_p10 }
  0x1a   : > { %p1467_p0 = scmp.ge.s32.totalorder %s1846_s28, 18 }
  0x1c   : > { %212 = sbr.rel (%p1467_p0) target bundleno = 89 (0x59), region = 16 }
  0x21   : > { %215 = sbr.rel (!%p1948_p5) target bundleno = 45 (0x2d), region = 20  ;;  %s217_s10 = sand.u32 (%p1948_p5), 1, %s1826_s23  }
  0x22   : > { %s1563_s12 = sshll.u32 (%p1948_p5), %s1838_s26, 4  ;;  %s1468_s13 = sshll.u32 (%p1948_p5), %s217_s10, 5 }
  0x23   : > { %s2313_s0 = sld [smem:[#allocation11_spill]] (%p1948_p5)  ;;  %s219_s29 = scalar_lea.vmem (%p1948_p5), [#allocation3], %s1468_s13 }
  0x29   : > { %s225_s30 = scalar_lea.vmem %s2313_s0, %s1563_s12 }
  0x2a   : > { %v238_v0 = vld [vmem:[%s225_s30] sm:$0xff]  ;;  %v240_v1 = vld [vmem:[%s225_s30 + $0x8] sm:$0xff]  ;;  %v242_v2 = vld [vmem:[%s225_s30 + $0x90] sm:$0xff] }
  0x2b   : > { %239 = vst [vmem:[%s219_s29] sm:$0xff] %v238_v0  ;;  %241 = vst [vmem:[%s219_s29 + $0x8] sm:$0xff] %v240_v1  ;;  %v244_v3 = vld [vmem:[%s225_s30 + $0x98] sm:$0xff] }
  0x2c   : > { %243 = vst [vmem:[%s219_s29 + $0x10] sm:$0xff] %v242_v2  ;;  %245 = vst [vmem:[%s219_s29 + $0x18] sm:$0xff] %v244_v3 }
  0x2d PF: > { %251 = sbr.rel (!%p1964_p9) target bundleno = 84 (0x54), region = 43  ;;  %s253_s9 = sand.u32 (%p1964_p9), 1, %s1818_s21  }
  0x2e   : > { %s1473_s10 = sshll.u32 (%p1964_p9), %s1842_s27, 1  ;;  %s1471_s6 = sshll.u32 (%p1964_p9), %s253_s9, 9 }
  0x2f   : > { %s1564_s12 = sshll.u32 (%p1964_p9), %s1838_s26, 8  ;;  %s2008_s30 = scalar_lea.vmem (%p1964_p9), [#allocation4], %s1471_s6 }
  0x30   : > { %s259_s15 = sadd.s32 (%p1964_p9), %s1564_s12, %s1473_s10 }
  0x31   : > { %s1475_s0 = sshll.u32 (%p1964_p9), %s259_s15, 2 }
  0x32   : > { %s2003_s23 = scalar_lea.vmem %s2296_s1, %s1475_s0 }
  0x33   : > { %v416_v4 = vld [vmem:[%s2003_s23] sm:$0xff]  ;;  %v418_v5 = vld [vmem:[%s2003_s23 + $0x10] sm:$0xff] }
  0x34   : > { %v420_v6 = vld [vmem:[%s2003_s23 + $0x20] sm:$0xff]  ;;  %417 = vst [vmem:[%s2008_s30] sm:$0xff] %v416_v4  ;;  %419 = vst [vmem:[%s2008_s30 + $0x8] sm:$0xff] %v418_v5  ;;  %v422_v7 = vld [vmem:[%s2003_s23 + $0x30] sm:$0xff] }
  0x35   : > { %421 = vst [vmem:[%s2008_s30 + $0x10] sm:$0xff] %v420_v6  ;;  %v424_v8 = vld [vmem:[%s2003_s23 + $0x40] sm:$0xff]  ;;  %v426_v9 = vld [vmem:[%s2003_s23 + $0x50] sm:$0xff]  ;;  %423 = vst [vmem:[%s2008_s30 + $0x18] sm:$0xff] %v422_v7 }
  0x36   : > { %425 = vst [vmem:[%s2008_s30 + $0x20] sm:$0xff] %v424_v8  ;;  %427 = vst [vmem:[%s2008_s30 + $0x28] sm:$0xff] %v426_v9  ;;  %v428_v10 = vld [vmem:[%s2003_s23 + $0x60] sm:$0xff]  ;;  %v430_v11 = vld [vmem:[%s2003_s23 + $0x70] sm:$0xff] }
  0x37   : > { %v432_v12 = vld [vmem:[%s2003_s23 + $0x80] sm:$0xff]  ;;  %429 = vst [vmem:[%s2008_s30 + $0x30] sm:$0xff] %v428_v10  ;;  %431 = vst [vmem:[%s2008_s30 + $0x38] sm:$0xff] %v430_v11  ;;  %v434_v13 = vld [vmem:[%s2003_s23 + $0x90] sm:$0xff] }
  0x38   : > { %433 = vst [vmem:[%s2008_s30 + $0x40] sm:$0xff] %v432_v12  ;;  %v436_v14 = vld [vmem:[%s2003_s23 + $0xa0] sm:$0xff]  ;;  %v438_v15 = vld [vmem:[%s2003_s23 + $0xb0] sm:$0xff]  ;;  %435 = vst [vmem:[%s2008_s30 + $0x48] sm:$0xff] %v434_v13 }
  0x39   : > { %437 = vst [vmem:[%s2008_s30 + $0x50] sm:$0xff] %v436_v14  ;;  %439 = vst [vmem:[%s2008_s30 + $0x58] sm:$0xff] %v438_v15  ;;  %v440_v16 = vld [vmem:[%s2003_s23 + $0xc0] sm:$0xff]  ;;  %v442_v17 = vld [vmem:[%s2003_s23 + $0xd0] sm:$0xff] }
  0x3a   : > { %v444_v18 = vld [vmem:[%s2003_s23 + $0xe0] sm:$0xff]  ;;  %441 = vst [vmem:[%s2008_s30 + $0x60] sm:$0xff] %v440_v16  ;;  %443 = vst [vmem:[%s2008_s30 + $0x68] sm:$0xff] %v442_v17  ;;  %v446_v19 = vld [vmem:[%s2003_s23 + $0xf0] sm:$0xff] }
  0x3b   : > { %445 = vst [vmem:[%s2008_s30 + $0x70] sm:$0xff] %v444_v18  ;;  %v448_v20 = vld [vmem:[%s2003_s23 + $0x100] sm:$0xff]  ;;  %v450_v21 = vld [vmem:[%s2003_s23 + $0x110] sm:$0xff]  ;;  %447 = vst [vmem:[%s2008_s30 + $0x78] sm:$0xff] %v446_v19 }
  0x3c   : > { %449 = vst [vmem:[%s2008_s30 + $0x80] sm:$0xff] %v448_v20  ;;  %451 = vst [vmem:[%s2008_s30 + $0x88] sm:$0xff] %v450_v21  ;;  %v452_v22 = vld [vmem:[%s2003_s23 + $0x120] sm:$0xff]  ;;  %v454_v23 = vld [vmem:[%s2003_s23 + $0x130] sm:$0xff] }
  0x3d   : > { %v456_v24 = vld [vmem:[%s2003_s23 + $0x140] sm:$0xff]  ;;  %453 = vst [vmem:[%s2008_s30 + $0x90] sm:$0xff] %v452_v22  ;;  %455 = vst [vmem:[%s2008_s30 + $0x98] sm:$0xff] %v454_v23  ;;  %v458_v25 = vld [vmem:[%s2003_s23 + $0x150] sm:$0xff] }
  0x3e   : > { %457 = vst [vmem:[%s2008_s30 + $0xa0] sm:$0xff] %v456_v24  ;;  %v460_v26 = vld [vmem:[%s2003_s23 + $0x160] sm:$0xff]  ;;  %v462_v27 = vld [vmem:[%s2003_s23 + $0x170] sm:$0xff]  ;;  %459 = vst [vmem:[%s2008_s30 + $0xa8] sm:$0xff] %v458_v25 }
  0x3f   : > { %461 = vst [vmem:[%s2008_s30 + $0xb0] sm:$0xff] %v460_v26  ;;  %463 = vst [vmem:[%s2008_s30 + $0xb8] sm:$0xff] %v462_v27  ;;  %v464_v28 = vld [vmem:[%s2003_s23 + $0x180] sm:$0xff]  ;;  %v466_v29 = vld [vmem:[%s2003_s23 + $0x190] sm:$0xff] }
  0x40   : > { %v468_v30 = vld [vmem:[%s2003_s23 + $0x1a0] sm:$0xff]  ;;  %465 = vst [vmem:[%s2008_s30 + $0xc0] sm:$0xff] %v464_v28  ;;  %467 = vst [vmem:[%s2008_s30 + $0xc8] sm:$0xff] %v466_v29  ;;  %v470_v31 = vld [vmem:[%s2003_s23 + $0x1b0] sm:$0xff] }
  0x41   : > { %469 = vst [vmem:[%s2008_s30 + $0xd0] sm:$0xff] %v468_v30  ;;  %v472_v32 = vld [vmem:[%s2003_s23 + $0x1c0] sm:$0xff]  ;;  %v474_v33 = vld [vmem:[%s2003_s23 + $0x1d0] sm:$0xff]  ;;  %471 = vst [vmem:[%s2008_s30 + $0xd8] sm:$0xff] %v470_v31 }
  0x42   : > { %473 = vst [vmem:[%s2008_s30 + $0xe0] sm:$0xff] %v472_v32  ;;  %475 = vst [vmem:[%s2008_s30 + $0xe8] sm:$0xff] %v474_v33  ;;  %v476_v34 = vld [vmem:[%s2003_s23 + $0x1e0] sm:$0xff]  ;;  %v478_v35 = vld [vmem:[%s2003_s23 + $0x1f0] sm:$0xff] }
  0x43   : > { %v480_v36 = vld [vmem:[%s2003_s23 + $0x200] sm:$0xff]  ;;  %477 = vst [vmem:[%s2008_s30 + $0xf0] sm:$0xff] %v476_v34  ;;  %479 = vst [vmem:[%s2008_s30 + $0xf8] sm:$0xff] %v478_v35  ;;  %v482_v37 = vld [vmem:[%s2003_s23 + $0x210] sm:$0xff] }
  0x44   : > { %481 = vst [vmem:[%s2008_s30 + $0x100] sm:$0xff] %v480_v36  ;;  %v484_v38 = vld [vmem:[%s2003_s23 + $0x220] sm:$0xff]  ;;  %v486_v39 = vld [vmem:[%s2003_s23 + $0x230] sm:$0xff]  ;;  %483 = vst [vmem:[%s2008_s30 + $0x108] sm:$0xff] %v482_v37 }
  0x45   : > { %485 = vst [vmem:[%s2008_s30 + $0x110] sm:$0xff] %v484_v38  ;;  %487 = vst [vmem:[%s2008_s30 + $0x118] sm:$0xff] %v486_v39  ;;  %v488_v40 = vld [vmem:[%s2003_s23 + $0x240] sm:$0xff]  ;;  %v490_v41 = vld [vmem:[%s2003_s23 + $0x250] sm:$0xff] }
  0x46   : > { %v492_v42 = vld [vmem:[%s2003_s23 + $0x260] sm:$0xff]  ;;  %489 = vst [vmem:[%s2008_s30 + $0x120] sm:$0xff] %v488_v40  ;;  %491 = vst [vmem:[%s2008_s30 + $0x128] sm:$0xff] %v490_v41  ;;  %v494_v43 = vld [vmem:[%s2003_s23 + $0x270] sm:$0xff] }
  0x47   : > { %493 = vst [vmem:[%s2008_s30 + $0x130] sm:$0xff] %v492_v42  ;;  %v496_v44 = vld [vmem:[%s2003_s23 + $0x280] sm:$0xff]  ;;  %v498_v45 = vld [vmem:[%s2003_s23 + $0x290] sm:$0xff]  ;;  %495 = vst [vmem:[%s2008_s30 + $0x138] sm:$0xff] %v494_v43 }
  0x48   : > { %497 = vst [vmem:[%s2008_s30 + $0x140] sm:$0xff] %v496_v44  ;;  %499 = vst [vmem:[%s2008_s30 + $0x148] sm:$0xff] %v498_v45  ;;  %v500_v46 = vld [vmem:[%s2003_s23 + $0x2a0] sm:$0xff]  ;;  %v502_v47 = vld [vmem:[%s2003_s23 + $0x2b0] sm:$0xff] }
  0x49   : > { %v504_v48 = vld [vmem:[%s2003_s23 + $0x2c0] sm:$0xff]  ;;  %501 = vst [vmem:[%s2008_s30 + $0x150] sm:$0xff] %v500_v46  ;;  %503 = vst [vmem:[%s2008_s30 + $0x158] sm:$0xff] %v502_v47  ;;  %v506_v49 = vld [vmem:[%s2003_s23 + $0x2d0] sm:$0xff] }
  0x4a   : > { %505 = vst [vmem:[%s2008_s30 + $0x160] sm:$0xff] %v504_v48  ;;  %v508_v50 = vld [vmem:[%s2003_s23 + $0x2e0] sm:$0xff]  ;;  %v510_v51 = vld [vmem:[%s2003_s23 + $0x2f0] sm:$0xff]  ;;  %507 = vst [vmem:[%s2008_s30 + $0x168] sm:$0xff] %v506_v49 }
  0x4b   : > { %509 = vst [vmem:[%s2008_s30 + $0x170] sm:$0xff] %v508_v50  ;;  %511 = vst [vmem:[%s2008_s30 + $0x178] sm:$0xff] %v510_v51  ;;  %v512_v52 = vld [vmem:[%s2003_s23 + $0x300] sm:$0xff]  ;;  %v514_v53 = vld [vmem:[%s2003_s23 + $0x310] sm:$0xff] }
  0x4c   : > { %v516_v54 = vld [vmem:[%s2003_s23 + $0x320] sm:$0xff]  ;;  %513 = vst [vmem:[%s2008_s30 + $0x180] sm:$0xff] %v512_v52  ;;  %515 = vst [vmem:[%s2008_s30 + $0x188] sm:$0xff] %v514_v53  ;;  %v518_v55 = vld [vmem:[%s2003_s23 + $0x330] sm:$0xff] }
  0x4d   : > { %517 = vst [vmem:[%s2008_s30 + $0x190] sm:$0xff] %v516_v54  ;;  %v520_v56 = vld [vmem:[%s2003_s23 + $0x340] sm:$0xff]  ;;  %v522_v57 = vld [vmem:[%s2003_s23 + $0x350] sm:$0xff]  ;;  %519 = vst [vmem:[%s2008_s30 + $0x198] sm:$0xff] %v518_v55 }
  0x4e   : > { %521 = vst [vmem:[%s2008_s30 + $0x1a0] sm:$0xff] %v520_v56  ;;  %523 = vst [vmem:[%s2008_s30 + $0x1a8] sm:$0xff] %v522_v57  ;;  %v524_v58 = vld [vmem:[%s2003_s23 + $0x360] sm:$0xff]  ;;  %v526_v59 = vld [vmem:[%s2003_s23 + $0x370] sm:$0xff] }
  0x4f   : > { %v528_v60 = vld [vmem:[%s2003_s23 + $0x380] sm:$0xff]  ;;  %525 = vst [vmem:[%s2008_s30 + $0x1b0] sm:$0xff] %v524_v58  ;;  %527 = vst [vmem:[%s2008_s30 + $0x1b8] sm:$0xff] %v526_v59  ;;  %v530_v61 = vld [vmem:[%s2003_s23 + $0x390] sm:$0xff] }
  0x50   : > { %529 = vst [vmem:[%s2008_s30 + $0x1c0] sm:$0xff] %v528_v60  ;;  %v532_v62 = vld [vmem:[%s2003_s23 + $0x3a0] sm:$0xff]  ;;  %v534_v63 = vld [vmem:[%s2003_s23 + $0x3b0] sm:$0xff]  ;;  %531 = vst [vmem:[%s2008_s30 + $0x1c8] sm:$0xff] %v530_v61 }
  0x51   : > { %533 = vst [vmem:[%s2008_s30 + $0x1d0] sm:$0xff] %v532_v62  ;;  %535 = vst [vmem:[%s2008_s30 + $0x1d8] sm:$0xff] %v534_v63  ;;  %v536_v0 = vld [vmem:[%s2003_s23 + $0x3c0] sm:$0xff]  ;;  %v538_v1 = vld [vmem:[%s2003_s23 + $0x3d0] sm:$0xff] }
  0x52   : > { %v540_v2 = vld [vmem:[%s2003_s23 + $0x3e0] sm:$0xff]  ;;  %537 = vst [vmem:[%s2008_s30 + $0x1e0] sm:$0xff] %v536_v0  ;;  %539 = vst [vmem:[%s2008_s30 + $0x1e8] sm:$0xff] %v538_v1  ;;  %v542_v3 = vld [vmem:[%s2003_s23 + $0x3f0] sm:$0xff] }
  0x53   : > { %541 = vst [vmem:[%s2008_s30 + $0x1f0] sm:$0xff] %v540_v2  ;;  %543 = vst [vmem:[%s2008_s30 + $0x1f8] sm:$0xff] %v542_v3 }
  0x54 PF: > { %565 = sbr.rel (!%p1979_p11) target bundleno = 89 (0x59), region = 89  ;;  %s567_s0 = sand.u32 (%p1979_p11), 1, %s1810_s19  }
  0x55   : > { %s1565_s11 = sshll.u32 (%p1979_p11), %s1842_s27, 3  ;;  %s1476_s14 = sshll.u32 (%p1979_p11), %s567_s0, 4 }
  0x56   : > { %s575_s10 = scalar_lea.vmem (%p1979_p11), %s2299_s4, %s1565_s11  ;;  %s569_s6 = scalar_lea.vmem (%p1979_p11), [#allocation5], %s1476_s14 }
  0x57   : > { %v606_v4 = vld [vmem:[%s575_s10] sm:$0xff] (%p1979_p11)  ;;  %v608_v5 = vld [vmem:[%s575_s10 + $0x10] sm:$0xff] (%p1979_p11) }
  0x58   : > { %607 = vst [vmem:[%s569_s6] sm:$0xff] (%p1979_p11), %v606_v4  ;;  %609 = vst [vmem:[%s569_s6 + $0x8] sm:$0xff] (%p1979_p11), %v608_v5 }
  0x59 PF: > { %p1479_p1 = scmp.ge.s32.totalorder %s1846_s28, 1  ;;  %p614_p2 = scmp.lt.s32.totalorder %s1846_s28, 19 }
  0x5b   : > { %p615_p3 = pnand %p1479_p1, %p614_p2 }
  0x5c   : > { %s621_s23 = sand.u32 (!%p615_p3), 1, %s1822_s22   ;;  %s628_s7 = sand.u32 (!%p615_p3), 1, %s1814_s20  }
  0x5d   : > { %618 = sbr.rel (%p615_p3) target bundleno = 407 (0x197), region = 127  ;;  %s1480_s12 = sshll.u32 (!%p615_p3), %s621_s23, 5 }
  0x5e   : > { %s1481_s15 = sshll.u32 (!%p615_p3), %s628_s7, 9  ;;  %s635_s13 = sand.u32 (!%p615_p3), 1, %s1806_s18  }
  0x5f   : > { %s1484_s30 = sshll.u32 (!%p615_p3), %s1834_s25, 1  ;;  %s2148_s0 = sshll.u32 (!%p615_p3), %s635_s13, 4 }
  0x60   : > { %p682_p4 = scmp.lt.s32.totalorder (!%p615_p3), %s1484_s30, 3  ;;  %s2160_s10 = scalar_lea.vmem (!%p615_p3), [#allocation3], %s1480_s12 }
  0x61   : > { %s2162_s18 = scalar_lea.vmem (!%p615_p3), [#allocation4], %s1481_s15  ;;  %s637_s6 = scalar_lea.vmem (!%p615_p3), [#allocation5], %s2148_s0 }
  0x62   : > { %s2333_s30 = smov (!%p682_p4, %s1484_s30), 3  ;;  %s2166_s23 = scalar_lea.vmem [#allocation6], %s2148_s0 }
  0x63   : > { %s684_s29 = scalar_lea.vmem %s2297_s2, %s2333_s30  ;;  %s689_s20 = scalar_lea.vmem %s2298_s3, %s2333_s30 }
  0x64   : > { %p1486_p5 = scmp.ne.s32.totalorder %s1830_s24, 0 }
  0x66   : > { %698 = sbr.rel (%p1486_p5) target bundleno = 110 (0x6e), region = 143 }
  0x6b   : > { %v1848_v6 = vmov 0.0  }
  0x6c   : > { %699 = vst [vmem:[#allocation2 + $0x10] sm:$0xff] %v1848_v6  ;;  %700 = vst [vmem:[#allocation2] sm:$0xff] %v1848_v6 }
  0x6d   : > { %701 = vst [vmem:[#allocation2 + $0x18] sm:$0xff] %v1848_v6  ;;  %702 = vst [vmem:[#allocation2 + $0x8] sm:$0xff] %v1848_v6 }
  0x6e PF: > { %v1658_v7 = vld [vmem:[%s2162_s18 + $0x74] ss:$8 sps:$4 sm:$0xff]   ;;  %v1662_v9 = vld [vmem:[%s2162_s18 + $0x70] ss:$8 sps:$4 sm:$0xff]   ;;  %v1664_v11 = vld [vmem:[%s2162_s18 + $0x64] ss:$8 sps:$4 sm:$0xff]  }
  0x6f   : > { %v1660_v8 = vld [vmem:[%s2162_s18 + $0x174] ss:$8 sps:$4 sm:$0xff]   ;;  %1115 = vmatprep.subr.bf16.mxu0 %v1658_v7  ;;  %v1663_v10 = vld [vmem:[%s2162_s18 + $0x170] ss:$8 sps:$4 sm:$0xff]   ;;  %v1666_v12 = vld [vmem:[%s2162_s18 + $0x164] ss:$8 sps:$4 sm:$0xff]  }
  0x70   : > { %1158 = vmatprep.subr.bf16.mxu1 %v1660_v8  ;;  %1116 = vmatpush1.bf16.msra.mxu0 %v1662_v9  ;;  %v1668_v13 = vld [vmem:[%s2162_s18 + $0x60] ss:$8 sps:$4 sm:$0xff]   ;;  %v1670_v15 = vld [vmem:[%s2162_s18 + $0x54] ss:$8 sps:$4 sm:$0xff]   ;;  %v1674_v17 = vld [vmem:[%s2162_s18 + $0x50] ss:$8 sps:$4 sm:$0xff]  }
  0x71   : > { %1159 = vmatpush1.bf16.msra.mxu1 %v1663_v10  ;;  %1117 = vmatprep.subr.bf16.mxu0 %v1664_v11  ;;  %v1669_v14 = vld [vmem:[%s2162_s18 + $0x160] ss:$8 sps:$4 sm:$0xff]   ;;  %v1672_v16 = vld [vmem:[%s2162_s18 + $0x154] ss:$8 sps:$4 sm:$0xff]   ;;  %v1675_v18 = vld [vmem:[%s2162_s18 + $0x150] ss:$8 sps:$4 sm:$0xff]  }
  0x72   : > { %1160 = vmatprep.subr.bf16.mxu1 %v1666_v12  ;;  %v1676_v19 = vld [vmem:[%s2162_s18 + $0x44] ss:$8 sps:$4 sm:$0xff]   ;;  %v1680_v21 = vld [vmem:[%s2162_s18 + $0x40] ss:$8 sps:$4 sm:$0xff]   ;;  %v1682_v23 = vld [vmem:[%s2162_s18 + $0x34] ss:$8 sps:$4 sm:$0xff]  }
  0x73   : > { %v1678_v20 = vld [vmem:[%s2162_s18 + $0x144] ss:$8 sps:$4 sm:$0xff]   ;;  %v1681_v22 = vld [vmem:[%s2162_s18 + $0x140] ss:$8 sps:$4 sm:$0xff]   ;;  %v1684_v24 = vld [vmem:[%s2162_s18 + $0x134] ss:$8 sps:$4 sm:$0xff]  }
  0x74   : > { %1118 = vmatpush1.bf16.msra.mxu0 %v1668_v13  ;;  %v1686_v25 = vld [vmem:[%s2162_s18 + $0x30] ss:$8 sps:$4 sm:$0xff]   ;;  %v1688_v27 = vld [vmem:[%s2162_s18 + $0x24] ss:$8 sps:$4 sm:$0xff]   ;;  %v1692_v29 = vld [vmem:[%s2162_s18 + $0x20] ss:$8 sps:$4 sm:$0xff]  }
  0x75   : > { %1161 = vmatpush1.bf16.msra.mxu1 %v1669_v14  ;;  %1119 = vmatprep.subr.bf16.mxu0 %v1670_v15  ;;  %v1687_v26 = vld [vmem:[%s2162_s18 + $0x130] ss:$8 sps:$4 sm:$0xff]   ;;  %v1690_v28 = vld [vmem:[%s2162_s18 + $0x124] ss:$8 sps:$4 sm:$0xff]   ;;  %v1693_v30 = vld [vmem:[%s2162_s18 + $0x120] ss:$8 sps:$4 sm:$0xff]  }
  0x76   : > { %1162 = vmatprep.subr.bf16.mxu1 %v1672_v16  ;;  %v1694_v31 = vld [vmem:[%s2162_s18 + $0x14] ss:$8 sps:$4 sm:$0xff]   ;;  %v1698_v33 = vld [vmem:[%s2162_s18 + $0x10] ss:$8 sps:$4 sm:$0xff]   ;;  %v1700_v35 = vld [vmem:[%s2162_s18 + $0x4] ss:$8 sps:$4 sm:$0xff]  }
  0x77   : > { %v1696_v32 = vld [vmem:[%s2162_s18 + $0x114] ss:$8 sps:$4 sm:$0xff]   ;;  %v1699_v34 = vld [vmem:[%s2162_s18 + $0x110] ss:$8 sps:$4 sm:$0xff]   ;;  %v1702_v36 = vld [vmem:[%s2162_s18 + $0x104] ss:$8 sps:$4 sm:$0xff]  }
  0x78   : > { %1120 = vmatpush1.bf16.msra.mxu0 %v1674_v17  ;;  %v1704_v37 = vld [vmem:[%s2162_s18] ss:$8 sps:$4 sm:$0xff]   ;;  %v1706_v39 = vld [vmem:[%s2162_s18 + $0xf4] ss:$8 sps:$4 sm:$0xff]   ;;  %v1710_v41 = vld [vmem:[%s2162_s18 + $0xf0] ss:$8 sps:$4 sm:$0xff]  }
  0x79   : > { %1163 = vmatpush1.bf16.msra.mxu1 %v1675_v18  ;;  %1121 = vmatprep.subr.bf16.mxu0 %v1676_v19  ;;  %v1705_v38 = vld [vmem:[%s2162_s18 + $0x100] ss:$8 sps:$4 sm:$0xff]   ;;  %v1708_v40 = vld [vmem:[%s2162_s18 + $0x1f4] ss:$8 sps:$4 sm:$0xff]   ;;  %v1711_v42 = vld [vmem:[%s2162_s18 + $0x1f0] ss:$8 sps:$4 sm:$0xff]  }
  0x7a   : > { %1164 = vmatprep.subr.bf16.mxu1 %v1678_v20  ;;  %v1712_v43 = vld [vmem:[%s2162_s18 + $0xe4] ss:$8 sps:$4 sm:$0xff]   ;;  %v1716_v45 = vld [vmem:[%s2162_s18 + $0xe0] ss:$8 sps:$4 sm:$0xff]   ;;  %v1718_v47 = vld [vmem:[%s2162_s18 + $0xd4] ss:$8 sps:$4 sm:$0xff]  }
  0x7b   : > { %v1714_v44 = vld [vmem:[%s2162_s18 + $0x1e4] ss:$8 sps:$4 sm:$0xff]   ;;  %v1717_v46 = vld [vmem:[%s2162_s18 + $0x1e0] ss:$8 sps:$4 sm:$0xff]   ;;  %v1720_v48 = vld [vmem:[%s2162_s18 + $0x1d4] ss:$8 sps:$4 sm:$0xff]  }
  0x7c   : > { %1122 = vmatpush1.bf16.msra.mxu0 %v1680_v21  ;;  %v1722_v49 = vld [vmem:[%s2162_s18 + $0xd0] ss:$8 sps:$4 sm:$0xff]   ;;  %v1724_v51 = vld [vmem:[%s2162_s18 + $0xc4] ss:$8 sps:$4 sm:$0xff]   ;;  %v1728_v53 = vld [vmem:[%s2162_s18 + $0xc0] ss:$8 sps:$4 sm:$0xff]  }
  0x7d   : > { %1165 = vmatpush1.bf16.msra.mxu1 %v1681_v22  ;;  %1123 = vmatprep.subr.bf16.mxu0 %v1682_v23  ;;  %v1723_v50 = vld [vmem:[%s2162_s18 + $0x1d0] ss:$8 sps:$4 sm:$0xff]   ;;  %v1726_v52 = vld [vmem:[%s2162_s18 + $0x1c4] ss:$8 sps:$4 sm:$0xff]   ;;  %v1729_v55 = vld [vmem:[%s2162_s18 + $0x1c0] ss:$8 sps:$4 sm:$0xff]  }
  0x7e   : > { %1166 = vmatprep.subr.bf16.mxu1 %v1684_v24  ;;  %v1756_v54 = vld [vmem:[%s2160_s10 + $0x4] ss:$16 sps:$4 sm:$0xff]   ;;  %v1759_v58 = vld [vmem:[%s2160_s10 + $0xc] ss:$16 sps:$4 sm:$0xff]   ;;  %v1734_v59 = vld [vmem:[%s2162_s18 + $0xb0] ss:$8 sps:$4 sm:$0xff]  }
  0x7f   : > { %v1730_v56 = vld [vmem:[%s2162_s18 + $0xb4] ss:$8 sps:$4 sm:$0xff]   ;;  %1147 = vmatprep.mubr.bf16.mxu0 %v1756_v54  ;;  %1190 = vmatprep.mubr.bf16.mxu1 %v1759_v58  ;;  %v1735_v60 = vld [vmem:[%s2162_s18 + $0x1b0] ss:$8 sps:$4 sm:$0xff]   ;;  %v1736_v61 = vld [vmem:[%s2162_s18 + $0xa4] ss:$8 sps:$4 sm:$0xff]  }
  0x80   : > { %1124 = vmatpush1.bf16.msra.mxu0 %v1686_v25  ;;  %v1732_v57 = vld [vmem:[%s2162_s18 + $0x1b4] ss:$8 sps:$4 sm:$0xff]   ;;  %v1738_v62 = vld [vmem:[%s2162_s18 + $0x1a4] ss:$8 sps:$4 sm:$0xff]   ;;  %v1740_v63 = vld [vmem:[%s2162_s18 + $0xa0] ss:$8 sps:$4 sm:$0xff]  }
  0x81   : > { %1167 = vmatpush1.bf16.msra.mxu1 %v1687_v26  ;;  %1125 = vmatprep.subr.bf16.mxu0 %v1688_v27  ;;  %v1741_v0 = vld [vmem:[%s2162_s18 + $0x1a0] ss:$8 sps:$4 sm:$0xff]   ;;  %v1742_v1 = vld [vmem:[%s2162_s18 + $0x94] ss:$8 sps:$4 sm:$0xff]   ;;  %v1746_v3 = vld [vmem:[%s2162_s18 + $0x90] ss:$8 sps:$4 sm:$0xff]  }
  0x82   : > { %1168 = vmatprep.subr.bf16.mxu1 %v1690_v28  ;;  %v1744_v2 = vld [vmem:[%s2162_s18 + $0x194] ss:$8 sps:$4 sm:$0xff]   ;;  %v1747_v4 = vld [vmem:[%s2162_s18 + $0x190] ss:$8 sps:$4 sm:$0xff]   ;;  %v1748_v5 = vld [vmem:[%s2162_s18 + $0x84] ss:$8 sps:$4 sm:$0xff]  }
  0x83   : > { %v1750_v6 = vld [vmem:[%s2162_s18 + $0x184] ss:$8 sps:$4 sm:$0xff]   ;;  %v1752_v7 = vld [vmem:[%s2162_s18 + $0x80] ss:$8 sps:$4 sm:$0xff]   ;;  %v703_v12 = vld [vmem:[#allocation2 + $0x10] sm:$0xff]  ;;  %p1555_p6 = scmp.ne.s32.totalorder %s1830_s24, 8 }
  0x84   : > { %1126 = vmatpush1.bf16.msra.mxu0 %v1692_v29  ;;  %v1753_v8 = vld [vmem:[%s2162_s18 + $0x180] ss:$8 sps:$4 sm:$0xff]   ;;  %v705_v21 = vld [vmem:[#allocation2 + $0x18] sm:$0xff] }
  0x85   : > { %1169 = vmatpush1.bf16.msra.mxu1 %v1693_v30  ;;  %1127 = vmatprep.subr.bf16.mxu0 %v1694_v31  ;;  %v1754_v9 = vld [vmem:[%s2160_s10] ss:$16 sps:$4 sm:$0xff]   ;;  %v1757_v10 = vld [vmem:[%s2160_s10 + $0x8] ss:$16 sps:$4 sm:$0xff]  }
  0x86   : > { %1170 = vmatprep.subr.bf16.mxu1 %v1696_v32  ;;  %v704_v16 = vld [vmem:[#allocation2] sm:$0xff]  ;;  %v706_v26 = vld [vmem:[#allocation2 + $0x8] sm:$0xff] }
  0x88   : > { %1128 = vmatpush1.bf16.msra.mxu0 %v1698_v33 }
  0x89   : > { %1171 = vmatpush1.bf16.msra.mxu1 %v1699_v34  ;;  %1129 = vmatprep.subr.bf16.mxu0 %v1700_v35 }
  0x8a   : > { %1172 = vmatprep.subr.bf16.mxu1 %v1702_v36 }
  0x8c   : > { %1130 = vmatpush1.bf16.msra.mxu0 %v1704_v37 }
  0x8d   : > { %1173 = vmatpush1.bf16.msra.mxu1 %v1705_v38  ;;  %1131 = vmatprep.subr.bf16.mxu0 %v1706_v39 }
  0x8e   : > { %1174 = vmatprep.subr.bf16.mxu1 %v1708_v40 }
  0x90   : > { %1132 = vmatpush2.bf16.msra.mxu0 %v1710_v41 }
  0x91   : > { %1175 = vmatpush2.bf16.msra.mxu1 %v1711_v42  ;;  %1133 = vmatprep.subr.bf16.mxu0 %v1712_v43 }
  0x92   : > { %1176 = vmatprep.subr.bf16.mxu1 %v1714_v44 }
  0x94   : > { %1134 = vmatpush2.bf16.msra.mxu0 %v1716_v45 }
  0x95   : > { %1177 = vmatpush2.bf16.msra.mxu1 %v1717_v46  ;;  %1135 = vmatprep.subr.bf16.mxu0 %v1718_v47 }
  0x96   : > { %1178 = vmatprep.subr.bf16.mxu1 %v1720_v48 }
  0x98   : > { %1136 = vmatpush2.bf16.msra.mxu0 %v1722_v49 }
  0x99   : > { %1179 = vmatpush2.bf16.msra.mxu1 %v1723_v50  ;;  %1137 = vmatprep.subr.bf16.mxu0 %v1724_v51 }
  0x9a   : > { %1180 = vmatprep.subr.bf16.mxu1 %v1726_v52 }
  0x9c   : > { %1138 = vmatpush2.bf16.msra.mxu0 %v1728_v53 }
  0x9d   : > { %1181 = vmatpush2.bf16.msra.mxu1 %v1729_v55  ;;  %1139 = vmatprep.subr.bf16.mxu0 %v1730_v56 }
  0x9e   : > { %1182 = vmatprep.subr.bf16.mxu1 %v1732_v57 }
  0xa0   : > { %1140 = vmatpush2.bf16.msra.mxu0 %v1734_v59 }
  0xa1   : > { %1183 = vmatpush2.bf16.msra.mxu1 %v1735_v60  ;;  %1141 = vmatprep.subr.bf16.mxu0 %v1736_v61 }
  0xa2   : > { %1184 = vmatprep.subr.bf16.mxu1 %v1738_v62 }
  0xa4   : > { %1142 = vmatpush2.bf16.msra.mxu0 %v1740_v63 }
  0xa5   : > { %1185 = vmatpush2.bf16.msra.mxu1 %v1741_v0  ;;  %1143 = vmatprep.subr.bf16.mxu0 %v1742_v1 }
  0xa6   : > { %1186 = vmatprep.subr.bf16.mxu1 %v1744_v2 }
  0xa8   : > { %1144 = vmatpush2.bf16.msra.mxu0 %v1746_v3 }
  0xa9   : > { %1187 = vmatpush2.bf16.msra.mxu1 %v1747_v4  ;;  %1145 = vmatprep.subr.bf16.mxu0 %v1748_v5 }
  0xaa   : > { %1188 = vmatprep.subr.bf16.mxu1 %v1750_v6 }
  0xac   : > { %1146 = vmatpush2.bf16.msra.mxu0 %v1752_v7 }
  0xad   : > { %1189 = vmatpush2.bf16.msra.mxu1 %v1753_v8 }
  0xaf   : > { %1148 = vmatmul.mubr.bf16.vlgmr.msra.gmra.mxu0 %v1754_v9 }
  0xb0   : > { %1191 = vmatmul.mubr.bf16.vlgmr.msra.gmra.mxu1 %v1757_v10 }
 0x16f   : > { %v1149_v11 = vpop.f32.mrf.mxu0 }
 0x170   : > { %v1192_v13 = vpop.f32.mrf.mxu1 }
 0x171   : > { %v1193_v14 = vadd.f32 %v1192_v13, %v1149_v11  ;;  %v1151_v15 = vpop.f32.mrf.mxu0 }
 0x172   : > { %v1194_v17 = vpop.f32.mrf.mxu1 }
 0x173   : > { %v1201_v18 = vadd.f32 %v1193_v14, %v703_v12  ;;  %v1195_v19 = vadd.f32 %v1194_v17, %v1151_v15  ;;  %v1153_v20 = vpop.f32.mrf.mxu0 }
 0x174   : > { %v1196_v22 = vpop.f32.mrf.mxu1 }
 0x175   : > { %1205 = vst [vmem:[#allocation2 + $0x10] sm:$0xff] %v1201_v18  ;;  %v1202_v23 = vadd.f32 %v1195_v19, %v704_v16  ;;  %v1197_v24 = vadd.f32 %v1196_v22, %v1153_v20  ;;  %v1155_v25 = vpop.f32.mrf.mxu0 }
 0x176   : > { %v1198_v27 = vpop.f32.mrf.mxu1 }
 0x177   : > { %1206 = vst [vmem:[#allocation2] sm:$0xff] %v1202_v23  ;;  %v1203_v28 = vadd.f32 %v1197_v24, %v705_v21  ;;  %v1199_v29 = vadd.f32 %v1198_v27, %v1155_v25  ;;  %1212 = sbr.rel (%p1555_p6) target bundleno = 399 (0x18f), region = 147 }
 0x179   : > { %1207 = vst [vmem:[#allocation2 + $0x18] sm:$0xff] %v1203_v28  ;;  %v1204_v30 = vadd.f32 %v1199_v29, %v706_v26 }
 0x17b   : > { %1208 = vst [vmem:[#allocation2 + $0x8] sm:$0xff] %v1204_v30 }
 0x17c   : > { %v1219_v31 = vlaneseq  ;;  %v1217_v33 = vld [vmem:[%s684_s29] sm:$0x3]  ;;  %v1213_v35 = vld [vmem:[#allocation2 + $0x10] sm:$0xff]  ;;  %v1250_v39 = vld [vmem:[%s637_s6 + $0x8] sm:$0xff] }
 0x17d   : > { %v1233_v34 = vld [vmem:[%s689_s20] sm:$0x3]  ;;  %v1253_v49 = vunpack.c.l.bf16 %v1250_v39  ;;  %v1254_v50 = vunpack.c.h.bf16 %v1250_v39 }
 0x17e   : > { %v1220_v32 = vshrl.u32 %v1219_v31, 7  ;;  %v1249_v38 = vld [vmem:[%s637_s6] sm:$0xff] }
 0x17f   : > { %v1214_v40 = vld [vmem:[#allocation2] sm:$0xff]  ;;  %v1251_v47 = vunpack.c.l.bf16 %v1249_v38  ;;  %v1252_v48 = vunpack.c.h.bf16 %v1249_v38 }
 0x180   : > { %v1221_v36 = vsub.s32 0, %v1220_v32  ;;  %v1225_v37 = vsub.s32 1, %v1220_v32  ;;  %v1215_v41 = vld [vmem:[#allocation2 + $0x18] sm:$0xff] }
 0x182   : > { %v1216_v42 = vld [vmem:[#allocation2 + $0x8] sm:$0xff]  ;;  %v1222_v43 = vrot.slane %v1217_v33, %v1221_v36  ;;  %v1226_v44 = vrot.slane %v1217_v33, %v1225_v37  ;;  %v1238_v45 = vrot.slane %v1233_v34, %v1221_v36  ;;  %v1242_v46 = vrot.slane %v1233_v34, %v1225_v37 }
 0x184   : > { %v1229_v51 = vmul.f32 %v1222_v43, %v1213_v35  ;;  %v1230_v52 = vmul.f32 %v1226_v44, %v1214_v40  ;;  %v1231_v53 = vmul.f32 %v1222_v43, %v1215_v41  ;;  %v1232_v54 = vmul.f32 %v1226_v44, %v1216_v42 }
 0x186   : > { %v1245_v55 = vadd.f32 %v1238_v45, %v1229_v51  ;;  %v1246_v56 = vadd.f32 %v1242_v46, %v1230_v52  ;;  %v1247_v57 = vadd.f32 %v1238_v45, %v1231_v53  ;;  %v1248_v58 = vadd.f32 %v1242_v46, %v1232_v54 }
 0x188   : > { %v1255_v59 = vadd.f32 %v1251_v47, %v1245_v55  ;;  %v1256_v60 = vadd.f32 %v1252_v48, %v1246_v56  ;;  %v1257_v61 = vadd.f32 %v1253_v49, %v1247_v57  ;;  %v1258_v62 = vadd.f32 %v1254_v50, %v1248_v58 }
 0x18a   : > { %v1259_v63 = vmax.f32 %v1255_v59, 0.0  ;;  %v1260_v0 = vmax.f32 %v1256_v60, 0.0  ;;  %v1261_v1 = vmax.f32 %v1257_v61, 0.0  ;;  %v1262_v2 = vmax.f32 %v1258_v62, 0.0 }
 0x18c   : > { %v1566_v3 = vpack.c.bf16 %v1260_v0, %v1259_v63  ;;  %v1567_v4 = vpack.c.bf16 %v1262_v2, %v1261_v1 }
 0x18e   : > { %1275 = vst [vmem:[%s2166_s23] sm:$0xff] %v1566_v3  ;;  %1276 = vst [vmem:[%s2166_s23 + $0x8] sm:$0xff] %v1567_v4 }
 0x18f PF: > { %1283 = sbr.rel (!%p1983_p13) target bundleno = 407 (0x197), region = 151  ;;  %s1568_s24 = sshll.u32 (%p1983_p13), %s1834_s25, 3 }
 0x190   : > { %s1289_s11 = scalar_lea.vmem (%p1983_p13), %s2300_s5, %s1568_s24 }
 0x195   : > { %v1320_v5 = vld [vmem:[%s2166_s23] sm:$0xff]  ;;  %v1322_v6 = vld [vmem:[%s2166_s23 + $0x8] sm:$0xff] }
 0x196   : > { %1321 = vst [vmem:[%s1289_s11] sm:$0xff] %v1320_v5  ;;  %1323 = vst [vmem:[%s1289_s11 + $0x10] sm:$0xff] %v1322_v6 }
 0x197 PF: > { %s15_s28 = sadd.s32 1, %s1846_s28   ;;  %s2314_s22 = sld [smem:[#allocation7_spill]] }
 0x198   : > { %p12_p7 = scmp.ge.s32.totalorder %s15_s28, 20   ;;  %s2315_s23 = sld [smem:[#allocation10_spill]] }
 0x199   : > { %s2316_s8 = sld [smem:[#allocation8_spill]]  ;;  %s2318_s18 = smov %s1810_s19 }
 0x19a   : > { %s2317_s14 = sld [smem:[#allocation9_spill]]  ;;  %s2319_s19 = smov %s1975_s17 }
 0x19b   : > { %s2320_s20 = smov %s1818_s21  ;;  %s2321_s21 = smov %s1972_s16 }
 0x19c   : > { %s2322_s24 = smov %s1838_s26  ;;  %s2323_s25 = smov %s1842_s27 }
 0x19d   :  { %14 = sbr.rel (!%p12_p7) target bundleno = 8 (0x8), region = 242 }
 0x19f   : > { %s2324_s26 = smov %s2316_s8 }
 0x1a0   : > { %s2325_s27 = smov %s2317_s14 }

// kernel: uresnet_forward.43
= control target key start
LH: loop header
LB: loop body
LE: loop exit
PB: predicated region body
PF: predicated region fallthrough
CT: control target
= control target key end

     0   :  { %s90_s0 = inlined_call_operand.vmem [shape: bf16[2,1,512], index: 0, kind: input, shape index: {}]   ;;  %s91_s1 = inlined_call_operand.hbm [shape: f32[2,512], index: 1, kind: output, shape index: {}]  }
   0x1   :  { %v47_v0 = vld [vmem:[%s90_s0] sm:$0xff]  }
   0x2   :  { %v48_v1 = vunpack.c.l.bf16 %v47_v0  ;;  %v49_v2 = vunpack.c.h.bf16 %v47_v0 }
   0x3   :  { %6 = vsyncpa [#allocation3], 0  ;;  %vm22_vm0 = vcmask 1041409   ;;  %vm24_vm1 = vcmask 1043459   ;;  %vm26_vm2 = vcmask 1045509   ;;  %s73_s8 = smov [#allocation2]  }
   0x4   :  { %v21_v3 = vrot.slane %v49_v2, 7  ;;  %s38_s9 = sshll.u32 %s73_s8, 4  ;;  %vm28_vm3 = vcmask 1047559   ;;  %s39_s9 = int_to_ptr.vmem [resolvable:$true] %s38_s9 }
   0x5   :  { %s51_s10 = scalar_lea.vmem %s39_s9, 128  ;;  %p56_p1 = scmp.lt.s32.totalorder %s39_s9, %s39_s9 }
   0x6   :  { %v23_v4 = vsel %vm22_vm0, %v21_v3, %v48_v1  ;;  %p52_p0 = scmp.ne.s32.totalorder %s39_s9, %s51_s10  ;;  %p57_p2 = scmp.lt.s32.totalorder %s51_s10, %s51_s10 }
   0x7   :  { %v25_v5 = vsel %vm24_vm1, %v21_v3, %v23_v4 }
   0x8   :  { %v27_v6 = vsel %vm26_vm2, %v21_v3, %v25_v5  ;;  %p58_p3 = por %p57_p2, %p56_p1 }
   0x9   :  { %v29_v7 = vsel %vm28_vm3, %v21_v3, %v27_v6 }
   0xa   :  { %31 = vst [vmem:[#allocation2] sm:$0xff] %v29_v7  ;;  %p59_p4 = pnand %p58_p3, %p52_p0 }
   0xc   :  { %62 = shalt.err (!%p59_p4)
}
   0xd   :  { %41 = dma.vmem_to_hbm [thread:$0]  %s39_s9, 128, %s91_s1, [#allocation3]  }
   0xe   :  { %71 = dma.done.wait [#allocation3], 128  }
   0xf   :  { %72 = vsyncadd [#allocation3], 4294967168 }
  0x10   :  { %45 = vsyncpa [#allocation3], 1 }

</bundles_post_ra>
